<compile_context>
chip_gen: v7x
topology: tpu7x:2x2x1
jax: 0.10.0
libtpu: 0.0.40
codegen_flags: <defaults>
</compile_context>

<pallas_src>
import jax
import jax.numpy as jnp
from jax.experimental import pallas as pl
from jax.experimental.pallas import tpu as pltpu


# ----------------------------------------------------------------------------
# Static per-layer configuration for conv2..conv6 (conv1 uses host im2col).
# ----------------------------------------------------------------------------
def _layer_cfgs(spatial, chans):
    cfgs = []
    g = spatial          # valid output grid size of the previous layer
    pitch = spatial      # row pitch of the previous layer's output inside `tmp`
    kinds = ("pad1", "even", "pad1", "even", "pad1")   # conv2 .. conv6
    for li, kind in enumerate(kinds, start=2):
        c_in, c_out = chans[li - 1], chans[li]
        cpad = ((c_in + 127) // 128) * 128             # lane-align each tap block
        if kind == "pad1":                             # stride-1, pad-1 conv
            wp = g + 2
            g_out = g
        else:                                          # s=2, d=2, p=2 conv ==
            assert g % 2 == 0                          # valid conv on even grid
            wp = g // 2 + 2
            g_out = g // 2
        assert wp >= 3
        m_out = (wp - 2) * wp                          # output rows incl. wrap cols
        f_need = wp * wp + 2                           # rows touched incl. guard
        f_alloc = ((f_need + 7) // 8) * 8
        cfgs.append(dict(kind=kind, c_in=c_in, c_out=c_out, cpad=cpad, wp=wp,
                         m_out=m_out, f_alloc=f_alloc, g_in=g, pitch_in=pitch,
                         g_out=g_out))
        g, pitch = g_out, wp
    return cfgs, g, pitch


# ----------------------------------------------------------------------------
# Fused whole-network kernel (one grid step == one image).
# ----------------------------------------------------------------------------
def _make_kernel(cfgs, spatial, c1, final_g, final_pitch, final_c):
    m1 = spatial * spatial

    def kernel(x1_ref, noise_ref, drop_ref,
               w1_ref, w2_ref, w3_ref, w4_ref, w5_ref, w6_ref, w0_ref, wl_ref,
               o_ref, tmp, b2, b3, b4, b5, b6, t_buf):
        bufs = (b2, b3, b4, b5, b6)
        wrefs = (w2_ref, w3_ref, w4_ref, w5_ref, w6_ref)

        # ---- conv1: host-im2col patches -> single K = 9*C_in matmul + ReLU.
        a1 = jnp.dot(x1_ref[0], w1_ref[...], preferred_element_type=jnp.float32)
        tmp[pl.ds(0, m1), 0:c1] = jnp.maximum(a1, 0.0).astype(jnp.bfloat16)

        # ---- conv2 .. conv6 (activations stay in VMEM the whole time).
        for cfg, buf, wref in zip(cfgs, bufs, wrefs):
            c_in, c_out, cpad = cfg["c_in"], cfg["c_out"], cfg["cpad"]
            wp, m_out, fa = cfg["wp"], cfg["m_out"], cfg["f_alloc"]
            g_in, pitch_in = cfg["g_in"], cfg["pitch_in"]

            # Padding border, guard rows and lane padding must be zero.
            buf[...] = jnp.zeros_like(buf)

            # Scatter the previous layer's valid activations into the padded
            # row-flat grid (lanes 0:c_in).
            if cfg["kind"] == "pad1":
                for y in range(g_in):
                    buf[pl.ds((y + 1) * wp + 1, g_in), 0:c_in] = \
                        tmp[pl.ds(y * pitch_in, g_in), 0:c_in]
            else:  # even-subsampled pad-2 grid of the previous output
                go = cfg["g_out"]
                for ay in range(1, go + 1):
                    for ax in range(1, go + 1):
                        src = 2 * (ay - 1) * pitch_in + 2 * (ax - 1)
                        buf[pl.ds(ay * wp + ax, 1), 0:c_in] = \
                            tmp[pl.ds(src, 1), 0:c_in]

            # Tripled-lane layout: lanes [j*cpad : j*cpad+c_in] of row q hold
            # base row q+j (two lane-aligned bulk shifted copies).
            v = buf[pl.ds(1, fa - 1), 0:c_in]
            buf[pl.ds(0, fa - 1), cpad:cpad + c_in] = v
            v = buf[pl.ds(2, fa - 2), 0:c_in]
            buf[pl.ds(0, fa - 2), 2 * cpad:2 * cpad + c_in] = v

            # Three tap-row matmuls, K = 3*cpad, f32 accumulation, fused ReLU.
            acc = jnp.dot(buf[pl.ds(0, m_out), :], wref[0],
                          preferred_element_type=jnp.float32)
            for i in (1, 2):
                acc = acc + jnp.dot(buf[pl.ds(i * wp, m_out), :], wref[i],
                                    preferred_element_type=jnp.float32)
            tmp[pl.ds(0, m_out), 0:c_out] = \
                jnp.maximum(acc, 0.0).astype(jnp.bfloat16)

        # ---- flatten (h, w, c order) + gaussian noise + dropout scale.
        t_buf[...] = jnp.zeros_like(t_buf)
        for y in range(final_g):
            for x in range(final_g):
                r = y * final_g + x
                lo, hi = r * final_c, (r + 1) * final_c
                mean = tmp[pl.ds(y * final_pitch + x, 1),
                           0:final_c].astype(jnp.float32)
                tv = (mean + noise_ref[0, 0:1, lo:hi]) * drop_ref[0, 0:1, lo:hi]
                t_buf[0:1, lo:hi] = tv.astype(jnp.bfloat16)

        # ---- decode: linear_0 then linear (weights VMEM-resident, M padded
        #      to 8 sublanes; only row 0 of the result is meaningful).
        h = jnp.dot(t_buf[...], w0_ref[...], preferred_element_type=jnp.float32)
        logits = jnp.dot(h.astype(jnp.bfloat16), wl_ref[...],
                         preferred_element_type=jnp.float32)
        o_ref[0] = logits[0:1, :]

    return kernel


def build_fcn_forward_fn(spatial, chans, K, num_classes, batch):
    cfgs, final_g, final_pitch = _layer_cfgs(spatial, chans)
    final_c = chans[6]
    feat = final_g * final_g * final_c
    m1 = spatial * spatial
    c0, c1 = chans[0], chans[1]

    kernel = _make_kernel(cfgs, spatial, c1, final_g, final_pitch, final_c)

    tmp_rows = max([m1] + [c["m_out"] for c in cfgs])
    tmp_cols = max(chans[1:])
    scratch = [pltpu.VMEM((tmp_rows, tmp_cols), jnp.bfloat16)]
    for c in cfgs:
        scratch.append(pltpu.VMEM((c["f_alloc"], 3 * c["cpad"]), jnp.bfloat16))
    scratch.append(pltpu.VMEM((8, feat), jnp.bfloat16))

    in_specs = [
        pl.BlockSpec((1, m1, 9 * c0), lambda n: (n, 0, 0)),          # conv1 patches
        pl.BlockSpec((1, 1, feat), lambda n: (n, 0, 0)),             # noise
        pl.BlockSpec((1, 1, feat), lambda n: (n, 0, 0)),             # dropout scale
        pl.BlockSpec((9 * c0, c1), lambda n: (0, 0)),                # conv1 weight
    ]
    for c in cfgs:                                                   # conv2..conv6
        in_specs.append(
            pl.BlockSpec((3, 3 * c["cpad"], c["c_out"]), lambda n: (0, 0, 0)))
    in_specs.append(pl.BlockSpec((feat, K), lambda n: (0, 0)))       # linear_0
    in_specs.append(pl.BlockSpec((K, num_classes), lambda n: (0, 0)))  # linear

    flops = batch * (
        2 * m1 * 9 * c0 * c1
        + sum(2 * c["m_out"] * 9 * c["cpad"] * c["c_out"] for c in cfgs)
        + 2 * 8 * feat * K + 2 * 8 * K * num_classes)
    bytes_accessed = (
        batch * (m1 * 9 * c0 * 2 + 2 * feat * 4 + num_classes * 4)
        + 9 * c0 * c1 * 2
        + sum(9 * c["cpad"] * c["c_out"] * 2 for c in cfgs)
        + feat * K * 2 + K * num_classes * 2)

    return pl.pallas_call(
        kernel,
        out_shape=jax.ShapeDtypeStruct((batch, 1, num_classes), jnp.float32),
        grid=(batch,),
        in_specs=in_specs,
        out_specs=pl.BlockSpec((1, 1, num_classes), lambda n: (n, 0, 0)),
        scratch_shapes=scratch,
        compiler_params=pltpu.CompilerParams(
            dimension_semantics=("parallel",)),
        cost_estimate=pl.CostEstimate(flops=flops, transcendentals=0,
                                      bytes_accessed=bytes_accessed),
    )


# ----------------------------------------------------------------------------
# Parameter init (weights pre-laid-out once for the kernel).
# ----------------------------------------------------------------------------
def init_fcn_params(key, input_shape, num_classes, K=256, logvar_t=-1.0):
    sf = 2
    c0 = input_shape[0]
    chans = [c0, 32 * sf, 64 * sf, 64 * sf, 128 * sf, 128 * sf, 128 * sf]
    keys = jax.random.split(key, 8)
    params = {}

    # conv1 (torch OIHW, bias=False) -> im2col weight (9*c0, c1),
    # k-index = (i*3 + j)*c0 + c  (matches host patch concat order).
    w = 0.05 * jax.random.normal(keys[0], (chans[1], c0, 3, 3), jnp.float32)
    params["conv1"] = (w.transpose(2, 3, 1, 0).reshape(9 * c0, chans[1])
                       .astype(jnp.bfloat16))

    # conv2..conv6 -> tap-row-major weight (3, 3*cpad, c_out):
    #   [i, j*cpad + c, o] = W_torch[o, c, i, j],  zero-padded for c >= c_in.
    for li in range(2, 7):
        c_in, c_out = chans[li - 1], chans[li]
        cpad = ((c_in + 127) // 128) * 128
        w = 0.05 * jax.random.normal(keys[li - 1], (c_out, c_in, 3, 3),
                                     jnp.float32)
        wt = w.transpose(2, 3, 1, 0)                       # (3, 3, c_in, c_out)
        wt = jnp.pad(wt, ((0, 0), (0, 0), (0, cpad - c_in), (0, 0)))
        params[f"conv{li}"] = wt.reshape(3, 3 * cpad, c_out).astype(jnp.bfloat16)

    # linear_0: torch (K, C*3*3) with in-features in (c, h, w) order; permute
    # rows to the kernel's (h, w, c) flatten order and transpose to (in, out).
    cf = chans[6]
    w0 = 0.05 * jax.random.normal(keys[6], (K, cf * 9), jnp.float32)
    w0 = w0.reshape(K, cf, 3, 3).transpose(2, 3, 1, 0).reshape(9 * cf, K)
    params["linear_0"] = w0.astype(jnp.bfloat16)

    # linear: (classes, K) -> (K, classes)
    w1 = 0.05 * jax.random.normal(keys[7], (num_classes, K), jnp.float32)
    params["linear"] = jnp.transpose(w1, (1, 0)).astype(jnp.bfloat16)

    params["logvar_t"] = jnp.array([logvar_t], jnp.float32)
    return params


# ----------------------------------------------------------------------------
# Forward pass (host side: only conv1 im2col + RNG for noise / dropout mask).
# ----------------------------------------------------------------------------
def fcn_forward(params, x_nchw, rng, *, random_noise=True, dropout_p=0.4,
                training=True):
    N, c0, H, W = x_nchw.shape
    assert H == W
    sf = 2
    chans = [c0, 32 * sf, 64 * sf, 64 * sf, 128 * sf, 128 * sf, 128 * sf]
    K = params["linear_0"].shape[1]
    num_classes = params["linear"].shape[1]
    feat = params["linear_0"].shape[0]
    assert feat == (H // 4) * (H // 4) * chans[6]

    # conv1 im2col on the host (tiny): order (i, j, c) matches params["conv1"].
    x = jnp.transpose(x_nchw, (0, 2, 3, 1)).astype(jnp.bfloat16)
    xp = jnp.pad(x, ((0, 0), (1, 1), (1, 1), (0, 0)))
    x1 = jnp.concatenate(
        [xp[:, i:i + H, j:j + W, :] for i in range(3) for j in range(3)],
        axis=-1).reshape(N, H * W, 9 * c0)

    # Stochastic parts generated with deterministic jax.random; the add and
    # scale themselves are fused inside the kernel.
    k_noise, k_drop = jax.random.split(rng)
    if random_noise:
        noise = (jnp.exp(0.5 * params["logvar_t"][0])
                 * jax.random.normal(k_noise, (N, 1, feat), jnp.float32))
    else:
        noise = jnp.zeros((N, 1, feat), jnp.float32)
    if training and dropout_p > 0.0:
        keep = 1.0 - dropout_p
        drop = (jax.random.bernoulli(k_drop, keep, (N, 1, feat))
                .astype(jnp.float32) / keep)
    else:
        drop = jnp.ones((N, 1, feat), jnp.float32)

    fused = build_fcn_forward_fn(H, chans, K, num_classes, N)
    out = fused(x1, noise, drop,
                params["conv1"], params["conv2"], params["conv3"],
                params["conv4"], params["conv5"], params["conv6"],
                params["linear_0"], params["linear"])
    return out.reshape(N, num_classes)


if __name__ == "__main__":
    # Spatial 12 -> 12 -> 12 -> 6 -> 6 -> 3 -> 3, so the flatten is 256*3*3,
    # matching linear_0's in_features in the reference module.
    batch, channels, spatial, num_classes = 2, 3, 12, 10
    input_shape = (channels, spatial, spatial)

    root = jax.random.PRNGKey(0)
    k_params, k_data, k_fwd = jax.random.split(root, 3)

    params = init_fcn_params(k_params, input_shape, num_classes, K=256)
    x = jax.random.normal(k_data, (batch,) + input_shape, dtype=jnp.float32)

    fwd = jax.jit(lambda p, xx, r: fcn_forward(p, xx, r))
    logits = jax.block_until_ready(fwd(params, x, k_fwd))

    assert logits.shape == (batch, num_classes)
    assert logits.dtype == jnp.float32
    assert bool(jnp.all(jnp.isfinite(logits)))
    print("KERNEL_OK")
</pallas_src>

<mosaic_0001>
module attributes {stable_mosaic.version = 11 : i64} {
  func.func @kernel(%arg0: i32, %arg1: memref<1x144x27xbf16, #tpu.memory_space<vmem>>, %arg2: memref<1x1x2304xf32, #tpu.memory_space<vmem>>, %arg3: memref<1x1x2304xf32, #tpu.memory_space<vmem>>, %arg4: memref<27x64xbf16, #tpu.memory_space<vmem>>, %arg5: memref<3x384x128xbf16, #tpu.memory_space<vmem>>, %arg6: memref<3x384x128xbf16, #tpu.memory_space<vmem>>, %arg7: memref<3x384x256xbf16, #tpu.memory_space<vmem>>, %arg8: memref<3x768x256xbf16, #tpu.memory_space<vmem>>, %arg9: memref<3x768x256xbf16, #tpu.memory_space<vmem>>, %arg10: memref<2304x256xbf16, #tpu.memory_space<vmem>>, %arg11: memref<256x10xbf16, #tpu.memory_space<vmem>>, %arg12: memref<1x1x10xf32, #tpu.memory_space<vmem>>, %arg13: memref<168x256xbf16, #tpu.memory_space<vmem>>, %arg14: memref<200x384xbf16, #tpu.memory_space<vmem>>, %arg15: memref<72x384xbf16, #tpu.memory_space<vmem>>, %arg16: memref<72x384xbf16, #tpu.memory_space<vmem>>, %arg17: memref<32x768xbf16, #tpu.memory_space<vmem>>, %arg18: memref<32x768xbf16, #tpu.memory_space<vmem>>, %arg19: memref<8x2304xbf16, #tpu.memory_space<vmem>>) attributes {dimension_semantics = [#tpu.dimension_semantics<parallel>], iteration_bounds = array<i64: 2>, scalar_prefetch = 0 : i64, scratch_operands = 7 : i64, tpu.core_type = #tpu.core_type<tc>, window_params = [{transform_indices = @transform_0, window_bounds = array<i64: 1, 144, 27>}, {transform_indices = @transform_1, window_bounds = array<i64: 1, 1, 2304>}, {transform_indices = @transform_2, window_bounds = array<i64: 1, 1, 2304>}, {pipeline_mode = #tpu.pipeline_mode<synchronous>, transform_indices = @transform_3, window_bounds = array<i64: 27, 64>}, {pipeline_mode = #tpu.pipeline_mode<synchronous>, transform_indices = @transform_4, window_bounds = array<i64: 3, 384, 128>}, {pipeline_mode = #tpu.pipeline_mode<synchronous>, transform_indices = @transform_5, window_bounds = array<i64: 3, 384, 128>}, {pipeline_mode = #tpu.pipeline_mode<synchronous>, transform_indices = @transform_6, window_bounds = array<i64: 3, 384, 256>}, {pipeline_mode = #tpu.pipeline_mode<synchronous>, transform_indices = @transform_7, window_bounds = array<i64: 3, 768, 256>}, {pipeline_mode = #tpu.pipeline_mode<synchronous>, transform_indices = @transform_8, window_bounds = array<i64: 3, 768, 256>}, {pipeline_mode = #tpu.pipeline_mode<synchronous>, transform_indices = @transform_9, window_bounds = array<i64: 2304, 256>}, {pipeline_mode = #tpu.pipeline_mode<synchronous>, transform_indices = @transform_10, window_bounds = array<i64: 256, 10>}, {transform_indices = @transform_11, window_bounds = array<i64: 1, 1, 10>}]} {
    %c0 = arith.constant 0 : index
    %c0_0 = arith.constant 0 : index
    %c0_1 = arith.constant 0 : index
    %0 = vector.load %arg1[%c0, %c0_0, %c0_1] : memref<1x144x27xbf16, #tpu.memory_space<vmem>>, vector<1x144x27xbf16>
    %1 = vector.shape_cast %0 : vector<1x144x27xbf16> to vector<144x27xbf16>
    %c0_2 = arith.constant 0 : index
    %c0_3 = arith.constant 0 : index
    %2 = vector.load %arg4[%c0_2, %c0_3] : memref<27x64xbf16, #tpu.memory_space<vmem>>, vector<27x64xbf16>
    %cst = arith.constant dense<0.000000e+00> : vector<144x64xf32>
    %3 = tpu.matmul %1, %2, %cst {dimension_numbers = #tpu.dot_dimension_numbers<[1], [0], [0], [1], [0, 0, 1, 1], [], []>} : vector<144x27xbf16>, vector<27x64xbf16>, vector<144x64xf32> -> vector<144x64xf32>
    %cst_4 = arith.constant 0.000000e+00 : f32
    %4 = vector.broadcast %cst_4 : f32 to vector<144x64xf32>
    %5 = arith.maximumf %3, %4 : vector<144x64xf32>
    %6 = arith.truncf %5 : vector<144x64xf32> to vector<144x64xbf16>
    %c0_5 = arith.constant 0 : index
    %c0_6 = arith.constant 0 : index
    %7 = vector.load %arg13[%c0_5, %c0_6] : memref<168x256xbf16, #tpu.memory_space<vmem>>, vector<144x64xbf16>
    tpu.vector_store %arg13[%c0_5, %c0_6], %6 {strides = array<i32>} : memref<168x256xbf16, #tpu.memory_space<vmem>>, vector<144x64xbf16>,
    %cst_7 = arith.constant 0.000000e+00 : bf16
    %8 = vector.broadcast %cst_7 : bf16 to vector<200x384xbf16>
    %c0_8 = arith.constant 0 : index
    %c0_9 = arith.constant 0 : index
    %9 = vector.load %arg14[%c0_8, %c0_9] : memref<200x384xbf16, #tpu.memory_space<vmem>>, vector<200x384xbf16>
    tpu.vector_store %arg14[%c0_8, %c0_9], %8 {strides = array<i32>} : memref<200x384xbf16, #tpu.memory_space<vmem>>, vector<200x384xbf16>,
    %c0_10 = arith.constant 0 : index
    %c0_11 = arith.constant 0 : index
    %10 = vector.load %arg13[%c0_10, %c0_11] : memref<168x256xbf16, #tpu.memory_space<vmem>>, vector<12x64xbf16>
    %c15 = arith.constant 15 : index
    %c0_12 = arith.constant 0 : index
    %11 = vector.load %arg14[%c15, %c0_12] : memref<200x384xbf16, #tpu.memory_space<vmem>>, vector<12x64xbf16>
    tpu.vector_store %arg14[%c15, %c0_12], %10 {strides = array<i32>} : memref<200x384xbf16, #tpu.memory_space<vmem>>, vector<12x64xbf16>,
    %c12 = arith.constant 12 : index
    %c0_13 = arith.constant 0 : index
    %12 = vector.load %arg13[%c12, %c0_13] : memref<168x256xbf16, #tpu.memory_space<vmem>>, vector<12x64xbf16>
    %c29 = arith.constant 29 : index
    %c0_14 = arith.constant 0 : index
    %13 = vector.load %arg14[%c29, %c0_14] : memref<200x384xbf16, #tpu.memory_space<vmem>>, vector<12x64xbf16>
    tpu.vector_store %arg14[%c29, %c0_14], %12 {strides = array<i32>} : memref<200x384xbf16, #tpu.memory_space<vmem>>, vector<12x64xbf16>,
    %c24 = arith.constant 24 : index
    %c0_15 = arith.constant 0 : index
    %14 = vector.load %arg13[%c24, %c0_15] : memref<168x256xbf16, #tpu.memory_space<vmem>>, vector<12x64xbf16>
    %c43 = arith.constant 43 : index
    %c0_16 = arith.constant 0 : index
    %15 = vector.load %arg14[%c43, %c0_16] : memref<200x384xbf16, #tpu.memory_space<vmem>>, vector<12x64xbf16>
    tpu.vector_store %arg14[%c43, %c0_16], %14 {strides = array<i32>} : memref<200x384xbf16, #tpu.memory_space<vmem>>, vector<12x64xbf16>,
    %c36 = arith.constant 36 : index
    %c0_17 = arith.constant 0 : index
    %16 = vector.load %arg13[%c36, %c0_17] : memref<168x256xbf16, #tpu.memory_space<vmem>>, vector<12x64xbf16>
    %c57 = arith.constant 57 : index
    %c0_18 = arith.constant 0 : index
    %17 = vector.load %arg14[%c57, %c0_18] : memref<200x384xbf16, #tpu.memory_space<vmem>>, vector<12x64xbf16>
    tpu.vector_store %arg14[%c57, %c0_18], %16 {strides = array<i32>} : memref<200x384xbf16, #tpu.memory_space<vmem>>, vector<12x64xbf16>,
    %c48 = arith.constant 48 : index
    %c0_19 = arith.constant 0 : index
    %18 = vector.load %arg13[%c48, %c0_19] : memref<168x256xbf16, #tpu.memory_space<vmem>>, vector<12x64xbf16>
    %c71 = arith.constant 71 : index
    %c0_20 = arith.constant 0 : index
    %19 = vector.load %arg14[%c71, %c0_20] : memref<200x384xbf16, #tpu.memory_space<vmem>>, vector<12x64xbf16>
    tpu.vector_store %arg14[%c71, %c0_20], %18 {strides = array<i32>} : memref<200x384xbf16, #tpu.memory_space<vmem>>, vector<12x64xbf16>,
    %c60 = arith.constant 60 : index
    %c0_21 = arith.constant 0 : index
    %20 = vector.load %arg13[%c60, %c0_21] : memref<168x256xbf16, #tpu.memory_space<vmem>>, vector<12x64xbf16>
    %c85 = arith.constant 85 : index
    %c0_22 = arith.constant 0 : index
    %21 = vector.load %arg14[%c85, %c0_22] : memref<200x384xbf16, #tpu.memory_space<vmem>>, vector<12x64xbf16>
    tpu.vector_store %arg14[%c85, %c0_22], %20 {strides = array<i32>} : memref<200x384xbf16, #tpu.memory_space<vmem>>, vector<12x64xbf16>,
    %c72 = arith.constant 72 : index
    %c0_23 = arith.constant 0 : index
    %22 = vector.load %arg13[%c72, %c0_23] : memref<168x256xbf16, #tpu.memory_space<vmem>>, vector<12x64xbf16>
    %c99 = arith.constant 99 : index
    %c0_24 = arith.constant 0 : index
    %23 = vector.load %arg14[%c99, %c0_24] : memref<200x384xbf16, #tpu.memory_space<vmem>>, vector<12x64xbf16>
    tpu.vector_store %arg14[%c99, %c0_24], %22 {strides = array<i32>} : memref<200x384xbf16, #tpu.memory_space<vmem>>, vector<12x64xbf16>,
    %c84 = arith.constant 84 : index
    %c0_25 = arith.constant 0 : index
    %24 = vector.load %arg13[%c84, %c0_25] : memref<168x256xbf16, #tpu.memory_space<vmem>>, vector<12x64xbf16>
    %c113 = arith.constant 113 : index
    %c0_26 = arith.constant 0 : index
    %25 = vector.load %arg14[%c113, %c0_26] : memref<200x384xbf16, #tpu.memory_space<vmem>>, vector<12x64xbf16>
    tpu.vector_store %arg14[%c113, %c0_26], %24 {strides = array<i32>} : memref<200x384xbf16, #tpu.memory_space<vmem>>, vector<12x64xbf16>,
    %c96 = arith.constant 96 : index
    %c0_27 = arith.constant 0 : index
    %26 = vector.load %arg13[%c96, %c0_27] : memref<168x256xbf16, #tpu.memory_space<vmem>>, vector<12x64xbf16>
    %c127 = arith.constant 127 : index
    %c0_28 = arith.constant 0 : index
    %27 = vector.load %arg14[%c127, %c0_28] : memref<200x384xbf16, #tpu.memory_space<vmem>>, vector<12x64xbf16>
    tpu.vector_store %arg14[%c127, %c0_28], %26 {strides = array<i32>} : memref<200x384xbf16, #tpu.memory_space<vmem>>, vector<12x64xbf16>,
    %c108 = arith.constant 108 : index
    %c0_29 = arith.constant 0 : index
    %28 = vector.load %arg13[%c108, %c0_29] : memref<168x256xbf16, #tpu.memory_space<vmem>>, vector<12x64xbf16>
    %c141 = arith.constant 141 : index
    %c0_30 = arith.constant 0 : index
    %29 = vector.load %arg14[%c141, %c0_30] : memref<200x384xbf16, #tpu.memory_space<vmem>>, vector<12x64xbf16>
    tpu.vector_store %arg14[%c141, %c0_30], %28 {strides = array<i32>} : memref<200x384xbf16, #tpu.memory_space<vmem>>, vector<12x64xbf16>,
    %c120 = arith.constant 120 : index
    %c0_31 = arith.constant 0 : index
    %30 = vector.load %arg13[%c120, %c0_31] : memref<168x256xbf16, #tpu.memory_space<vmem>>, vector<12x64xbf16>
    %c155 = arith.constant 155 : index
    %c0_32 = arith.constant 0 : index
    %31 = vector.load %arg14[%c155, %c0_32] : memref<200x384xbf16, #tpu.memory_space<vmem>>, vector<12x64xbf16>
    tpu.vector_store %arg14[%c155, %c0_32], %30 {strides = array<i32>} : memref<200x384xbf16, #tpu.memory_space<vmem>>, vector<12x64xbf16>,
    %c132 = arith.constant 132 : index
    %c0_33 = arith.constant 0 : index
    %32 = vector.load %arg13[%c132, %c0_33] : memref<168x256xbf16, #tpu.memory_space<vmem>>, vector<12x64xbf16>
    %c169 = arith.constant 169 : index
    %c0_34 = arith.constant 0 : index
    %33 = vector.load %arg14[%c169, %c0_34] : memref<200x384xbf16, #tpu.memory_space<vmem>>, vector<12x64xbf16>
    tpu.vector_store %arg14[%c169, %c0_34], %32 {strides = array<i32>} : memref<200x384xbf16, #tpu.memory_space<vmem>>, vector<12x64xbf16>,
    %c1 = arith.constant 1 : index
    %c0_35 = arith.constant 0 : index
    %34 = vector.load %arg14[%c1, %c0_35] : memref<200x384xbf16, #tpu.memory_space<vmem>>, vector<199x64xbf16>
    %c0_36 = arith.constant 0 : index
    %c128 = arith.constant 128 : index
    %35 = vector.load %arg14[%c0_36, %c128] : memref<200x384xbf16, #tpu.memory_space<vmem>>, vector<199x64xbf16>
    tpu.vector_store %arg14[%c0_36, %c128], %34 {strides = array<i32>} : memref<200x384xbf16, #tpu.memory_space<vmem>>, vector<199x64xbf16>,
    %c2 = arith.constant 2 : index
    %c0_37 = arith.constant 0 : index
    %36 = vector.load %arg14[%c2, %c0_37] : memref<200x384xbf16, #tpu.memory_space<vmem>>, vector<198x64xbf16>
    %c0_38 = arith.constant 0 : index
    %c256 = arith.constant 256 : index
    %37 = vector.load %arg14[%c0_38, %c256] : memref<200x384xbf16, #tpu.memory_space<vmem>>, vector<198x64xbf16>
    tpu.vector_store %arg14[%c0_38, %c256], %36 {strides = array<i32>} : memref<200x384xbf16, #tpu.memory_space<vmem>>, vector<198x64xbf16>,
    %c0_39 = arith.constant 0 : index
    %c0_40 = arith.constant 0 : index
    %38 = vector.load %arg14[%c0_39, %c0_40] : memref<200x384xbf16, #tpu.memory_space<vmem>>, vector<168x384xbf16>
    %c0_41 = arith.constant 0 : index
    %c0_42 = arith.constant 0 : index
    %c0_43 = arith.constant 0 : index
    %39 = vector.load %arg5[%c0_41, %c0_42, %c0_43] : memref<3x384x128xbf16, #tpu.memory_space<vmem>>, vector<1x384x128xbf16>
    %40 = vector.shape_cast %39 : vector<1x384x128xbf16> to vector<384x128xbf16>
    %cst_44 = arith.constant dense<0.000000e+00> : vector<168x128xf32>
    %41 = tpu.matmul %38, %40, %cst_44 {dimension_numbers = #tpu.dot_dimension_numbers<[1], [0], [0], [1], [0, 0, 1, 1], [], []>} : vector<168x384xbf16>, vector<384x128xbf16>, vector<168x128xf32> -> vector<168x128xf32>
    %c14 = arith.constant 14 : index
    %c0_45 = arith.constant 0 : index
    %42 = vector.load %arg14[%c14, %c0_45] : memref<200x384xbf16, #tpu.memory_space<vmem>>, vector<168x384xbf16>
    %c1_46 = arith.constant 1 : index
    %c0_47 = arith.constant 0 : index
    %c0_48 = arith.constant 0 : index
    %43 = vector.load %arg5[%c1_46, %c0_47, %c0_48] : memref<3x384x128xbf16, #tpu.memory_space<vmem>>, vector<1x384x128xbf16>
    %44 = vector.shape_cast %43 : vector<1x384x128xbf16> to vector<384x128xbf16>
    %cst_49 = arith.constant dense<0.000000e+00> : vector<168x128xf32>
    %45 = tpu.matmul %42, %44, %cst_49 {dimension_numbers = #tpu.dot_dimension_numbers<[1], [0], [0], [1], [0, 0, 1, 1], [], []>} : vector<168x384xbf16>, vector<384x128xbf16>, vector<168x128xf32> -> vector<168x128xf32>
    %46 = arith.addf %41, %45 : vector<168x128xf32>
    %c28 = arith.constant 28 : index
    %c0_50 = arith.constant 0 : index
    %47 = vector.load %arg14[%c28, %c0_50] : memref<200x384xbf16, #tpu.memory_space<vmem>>, vector<168x384xbf16>
    %c2_51 = arith.constant 2 : index
    %c0_52 = arith.constant 0 : index
    %c0_53 = arith.constant 0 : index
    %48 = vector.load %arg5[%c2_51, %c0_52, %c0_53] : memref<3x384x128xbf16, #tpu.memory_space<vmem>>, vector<1x384x128xbf16>
    %49 = vector.shape_cast %48 : vector<1x384x128xbf16> to vector<384x128xbf16>
    %cst_54 = arith.constant dense<0.000000e+00> : vector<168x128xf32>
    %50 = tpu.matmul %47, %49, %cst_54 {dimension_numbers = #tpu.dot_dimension_numbers<[1], [0], [0], [1], [0, 0, 1, 1], [], []>} : vector<168x384xbf16>, vector<384x128xbf16>, vector<168x128xf32> -> vector<168x128xf32>
    %51 = arith.addf %46, %50 : vector<168x128xf32>
    %cst_55 = arith.constant 0.000000e+00 : f32
    %52 = vector.broadcast %cst_55 : f32 to vector<168x128xf32>
    %53 = arith.maximumf %51, %52 : vector<168x128xf32>
    %54 = arith.truncf %53 : vector<168x128xf32> to vector<168x128xbf16>
    %c0_56 = arith.constant 0 : index
    %c0_57 = arith.constant 0 : index
    %55 = vector.load %arg13[%c0_56, %c0_57] : memref<168x256xbf16, #tpu.memory_space<vmem>>, vector<168x128xbf16>
    tpu.vector_store %arg13[%c0_56, %c0_57], %54 {strides = array<i32>} : memref<168x256xbf16, #tpu.memory_space<vmem>>, vector<168x128xbf16>,
    %cst_58 = arith.constant 0.000000e+00 : bf16
    %56 = vector.broadcast %cst_58 : bf16 to vector<72x384xbf16>
    %c0_59 = arith.constant 0 : index
    %c0_60 = arith.constant 0 : index
    %57 = vector.load %arg15[%c0_59, %c0_60] : memref<72x384xbf16, #tpu.memory_space<vmem>>, vector<72x384xbf16>
    tpu.vector_store %arg15[%c0_59, %c0_60], %56 {strides = array<i32>} : memref<72x384xbf16, #tpu.memory_space<vmem>>, vector<72x384xbf16>,
    %c0_61 = arith.constant 0 : index
    %c0_62 = arith.constant 0 : index
    %58 = vector.load %arg13[%c0_61, %c0_62] : memref<168x256xbf16, #tpu.memory_space<vmem>>, vector<1x128xbf16>
    %c9 = arith.constant 9 : index
    %c0_63 = arith.constant 0 : index
    %59 = vector.load %arg15[%c9, %c0_63] : memref<72x384xbf16, #tpu.memory_space<vmem>>, vector<1x128xbf16>
    tpu.vector_store %arg15[%c9, %c0_63], %58 {strides = array<i32>} : memref<72x384xbf16, #tpu.memory_space<vmem>>, vector<1x128xbf16>,
    %c2_64 = arith.constant 2 : index
    %c0_65 = arith.constant 0 : index
    %60 = vector.load %arg13[%c2_64, %c0_65] : memref<168x256xbf16, #tpu.memory_space<vmem>>, vector<1x128xbf16>
    %c10 = arith.constant 10 : index
    %c0_66 = arith.constant 0 : index
    %61 = vector.load %arg15[%c10, %c0_66] : memref<72x384xbf16, #tpu.memory_space<vmem>>, vector<1x128xbf16>
    tpu.vector_store %arg15[%c10, %c0_66], %60 {strides = array<i32>} : memref<72x384xbf16, #tpu.memory_space<vmem>>, vector<1x128xbf16>,
    %c4 = arith.constant 4 : index
    %c0_67 = arith.constant 0 : index
    %62 = vector.load %arg13[%c4, %c0_67] : memref<168x256xbf16, #tpu.memory_space<vmem>>, vector<1x128xbf16>
    %c11 = arith.constant 11 : index
    %c0_68 = arith.constant 0 : index
    %63 = vector.load %arg15[%c11, %c0_68] : memref<72x384xbf16, #tpu.memory_space<vmem>>, vector<1x128xbf16>
    tpu.vector_store %arg15[%c11, %c0_68], %62 {strides = array<i32>} : memref<72x384xbf16, #tpu.memory_space<vmem>>, vector<1x128xbf16>,
    %c6 = arith.constant 6 : index
    %c0_69 = arith.constant 0 : index
    %64 = vector.load %arg13[%c6, %c0_69] : memref<168x256xbf16, #tpu.memory_space<vmem>>, vector<1x128xbf16>
    %c12_70 = arith.constant 12 : index
    %c0_71 = arith.constant 0 : index
    %65 = vector.load %arg15[%c12_70, %c0_71] : memref<72x384xbf16, #tpu.memory_space<vmem>>, vector<1x128xbf16>
    tpu.vector_store %arg15[%c12_70, %c0_71], %64 {strides = array<i32>} : memref<72x384xbf16, #tpu.memory_space<vmem>>, vector<1x128xbf16>,
    %c8 = arith.constant 8 : index
    %c0_72 = arith.constant 0 : index
    %66 = vector.load %arg13[%c8, %c0_72] : memref<168x256xbf16, #tpu.memory_space<vmem>>, vector<1x128xbf16>
    %c13 = arith.constant 13 : index
    %c0_73 = arith.constant 0 : index
    %67 = vector.load %arg15[%c13, %c0_73] : memref<72x384xbf16, #tpu.memory_space<vmem>>, vector<1x128xbf16>
    tpu.vector_store %arg15[%c13, %c0_73], %66 {strides = array<i32>} : memref<72x384xbf16, #tpu.memory_space<vmem>>, vector<1x128xbf16>,
    %c10_74 = arith.constant 10 : index
    %c0_75 = arith.constant 0 : index
    %68 = vector.load %arg13[%c10_74, %c0_75] : memref<168x256xbf16, #tpu.memory_space<vmem>>, vector<1x128xbf16>
    %c14_76 = arith.constant 14 : index
    %c0_77 = arith.constant 0 : index
    %69 = vector.load %arg15[%c14_76, %c0_77] : memref<72x384xbf16, #tpu.memory_space<vmem>>, vector<1x128xbf16>
    tpu.vector_store %arg15[%c14_76, %c0_77], %68 {strides = array<i32>} : memref<72x384xbf16, #tpu.memory_space<vmem>>, vector<1x128xbf16>,
    %c28_78 = arith.constant 28 : index
    %c0_79 = arith.constant 0 : index
    %70 = vector.load %arg13[%c28_78, %c0_79] : memref<168x256xbf16, #tpu.memory_space<vmem>>, vector<1x128xbf16>
    %c17 = arith.constant 17 : index
    %c0_80 = arith.constant 0 : index
    %71 = vector.load %arg15[%c17, %c0_80] : memref<72x384xbf16, #tpu.memory_space<vmem>>, vector<1x128xbf16>
    tpu.vector_store %arg15[%c17, %c0_80], %70 {strides = array<i32>} : memref<72x384xbf16, #tpu.memory_space<vmem>>, vector<1x128xbf16>,
    %c30 = arith.constant 30 : index
    %c0_81 = arith.constant 0 : index
    %72 = vector.load %arg13[%c30, %c0_81] : memref<168x256xbf16, #tpu.memory_space<vmem>>, vector<1x128xbf16>
    %c18 = arith.constant 18 : index
    %c0_82 = arith.constant 0 : index
    %73 = vector.load %arg15[%c18, %c0_82] : memref<72x384xbf16, #tpu.memory_space<vmem>>, vector<1x128xbf16>
    tpu.vector_store %arg15[%c18, %c0_82], %72 {strides = array<i32>} : memref<72x384xbf16, #tpu.memory_space<vmem>>, vector<1x128xbf16>,
    %c32 = arith.constant 32 : index
    %c0_83 = arith.constant 0 : index
    %74 = vector.load %arg13[%c32, %c0_83] : memref<168x256xbf16, #tpu.memory_space<vmem>>, vector<1x128xbf16>
    %c19 = arith.constant 19 : index
    %c0_84 = arith.constant 0 : index
    %75 = vector.load %arg15[%c19, %c0_84] : memref<72x384xbf16, #tpu.memory_space<vmem>>, vector<1x128xbf16>
    tpu.vector_store %arg15[%c19, %c0_84], %74 {strides = array<i32>} : memref<72x384xbf16, #tpu.memory_space<vmem>>, vector<1x128xbf16>,
    %c34 = arith.constant 34 : index
    %c0_85 = arith.constant 0 : index
    %76 = vector.load %arg13[%c34, %c0_85] : memref<168x256xbf16, #tpu.memory_space<vmem>>, vector<1x128xbf16>
    %c20 = arith.constant 20 : index
    %c0_86 = arith.constant 0 : index
    %77 = vector.load %arg15[%c20, %c0_86] : memref<72x384xbf16, #tpu.memory_space<vmem>>, vector<1x128xbf16>
    tpu.vector_store %arg15[%c20, %c0_86], %76 {strides = array<i32>} : memref<72x384xbf16, #tpu.memory_space<vmem>>, vector<1x128xbf16>,
    %c36_87 = arith.constant 36 : index
    %c0_88 = arith.constant 0 : index
    %78 = vector.load %arg13[%c36_87, %c0_88] : memref<168x256xbf16, #tpu.memory_space<vmem>>, vector<1x128xbf16>
    %c21 = arith.constant 21 : index
    %c0_89 = arith.constant 0 : index
    %79 = vector.load %arg15[%c21, %c0_89] : memref<72x384xbf16, #tpu.memory_space<vmem>>, vector<1x128xbf16>
    tpu.vector_store %arg15[%c21, %c0_89], %78 {strides = array<i32>} : memref<72x384xbf16, #tpu.memory_space<vmem>>, vector<1x128xbf16>,
    %c38 = arith.constant 38 : index
    %c0_90 = arith.constant 0 : index
    %80 = vector.load %arg13[%c38, %c0_90] : memref<168x256xbf16, #tpu.memory_space<vmem>>, vector<1x128xbf16>
    %c22 = arith.constant 22 : index
    %c0_91 = arith.constant 0 : index
    %81 = vector.load %arg15[%c22, %c0_91] : memref<72x384xbf16, #tpu.memory_space<vmem>>, vector<1x128xbf16>
    tpu.vector_store %arg15[%c22, %c0_91], %80 {strides = array<i32>} : memref<72x384xbf16, #tpu.memory_space<vmem>>, vector<1x128xbf16>,
    %c56 = arith.constant 56 : index
    %c0_92 = arith.constant 0 : index
    %82 = vector.load %arg13[%c56, %c0_92] : memref<168x256xbf16, #tpu.memory_space<vmem>>, vector<1x128xbf16>
    %c25 = arith.constant 25 : index
    %c0_93 = arith.constant 0 : index
    %83 = vector.load %arg15[%c25, %c0_93] : memref<72x384xbf16, #tpu.memory_space<vmem>>, vector<1x128xbf16>
    tpu.vector_store %arg15[%c25, %c0_93], %82 {strides = array<i32>} : memref<72x384xbf16, #tpu.memory_space<vmem>>, vector<1x128xbf16>,
    %c58 = arith.constant 58 : index
    %c0_94 = arith.constant 0 : index
    %84 = vector.load %arg13[%c58, %c0_94] : memref<168x256xbf16, #tpu.memory_space<vmem>>, vector<1x128xbf16>
    %c26 = arith.constant 26 : index
    %c0_95 = arith.constant 0 : index
    %85 = vector.load %arg15[%c26, %c0_95] : memref<72x384xbf16, #tpu.memory_space<vmem>>, vector<1x128xbf16>
    tpu.vector_store %arg15[%c26, %c0_95], %84 {strides = array<i32>} : memref<72x384xbf16, #tpu.memory_space<vmem>>, vector<1x128xbf16>,
    %c60_96 = arith.constant 60 : index
    %c0_97 = arith.constant 0 : index
    %86 = vector.load %arg13[%c60_96, %c0_97] : memref<168x256xbf16, #tpu.memory_space<vmem>>, vector<1x128xbf16>
    %c27 = arith.constant 27 : index
    %c0_98 = arith.constant 0 : index
    %87 = vector.load %arg15[%c27, %c0_98] : memref<72x384xbf16, #tpu.memory_space<vmem>>, vector<1x128xbf16>
    tpu.vector_store %arg15[%c27, %c0_98], %86 {strides = array<i32>} : memref<72x384xbf16, #tpu.memory_space<vmem>>, vector<1x128xbf16>,
    %c62 = arith.constant 62 : index
    %c0_99 = arith.constant 0 : index
    %88 = vector.load %arg13[%c62, %c0_99] : memref<168x256xbf16, #tpu.memory_space<vmem>>, vector<1x128xbf16>
    %c28_100 = arith.constant 28 : index
    %c0_101 = arith.constant 0 : index
    %89 = vector.load %arg15[%c28_100, %c0_101] : memref<72x384xbf16, #tpu.memory_space<vmem>>, vector<1x128xbf16>
    tpu.vector_store %arg15[%c28_100, %c0_101], %88 {strides = array<i32>} : memref<72x384xbf16, #tpu.memory_space<vmem>>, vector<1x128xbf16>,
    %c64 = arith.constant 64 : index
    %c0_102 = arith.constant 0 : index
    %90 = vector.load %arg13[%c64, %c0_102] : memref<168x256xbf16, #tpu.memory_space<vmem>>, vector<1x128xbf16>
    %c29_103 = arith.constant 29 : index
    %c0_104 = arith.constant 0 : index
    %91 = vector.load %arg15[%c29_103, %c0_104] : memref<72x384xbf16, #tpu.memory_space<vmem>>, vector<1x128xbf16>
    tpu.vector_store %arg15[%c29_103, %c0_104], %90 {strides = array<i32>} : memref<72x384xbf16, #tpu.memory_space<vmem>>, vector<1x128xbf16>,
    %c66 = arith.constant 66 : index
    %c0_105 = arith.constant 0 : index
    %92 = vector.load %arg13[%c66, %c0_105] : memref<168x256xbf16, #tpu.memory_space<vmem>>, vector<1x128xbf16>
    %c30_106 = arith.constant 30 : index
    %c0_107 = arith.constant 0 : index
    %93 = vector.load %arg15[%c30_106, %c0_107] : memref<72x384xbf16, #tpu.memory_space<vmem>>, vector<1x128xbf16>
    tpu.vector_store %arg15[%c30_106, %c0_107], %92 {strides = array<i32>} : memref<72x384xbf16, #tpu.memory_space<vmem>>, vector<1x128xbf16>,
    %c84_108 = arith.constant 84 : index
    %c0_109 = arith.constant 0 : index
    %94 = vector.load %arg13[%c84_108, %c0_109] : memref<168x256xbf16, #tpu.memory_space<vmem>>, vector<1x128xbf16>
    %c33 = arith.constant 33 : index
    %c0_110 = arith.constant 0 : index
    %95 = vector.load %arg15[%c33, %c0_110] : memref<72x384xbf16, #tpu.memory_space<vmem>>, vector<1x128xbf16>
    tpu.vector_store %arg15[%c33, %c0_110], %94 {strides = array<i32>} : memref<72x384xbf16, #tpu.memory_space<vmem>>, vector<1x128xbf16>,
    %c86 = arith.constant 86 : index
    %c0_111 = arith.constant 0 : index
    %96 = vector.load %arg13[%c86, %c0_111] : memref<168x256xbf16, #tpu.memory_space<vmem>>, vector<1x128xbf16>
    %c34_112 = arith.constant 34 : index
    %c0_113 = arith.constant 0 : index
    %97 = vector.load %arg15[%c34_112, %c0_113] : memref<72x384xbf16, #tpu.memory_space<vmem>>, vector<1x128xbf16>
    tpu.vector_store %arg15[%c34_112, %c0_113], %96 {strides = array<i32>} : memref<72x384xbf16, #tpu.memory_space<vmem>>, vector<1x128xbf16>,
    %c88 = arith.constant 88 : index
    %c0_114 = arith.constant 0 : index
    %98 = vector.load %arg13[%c88, %c0_114] : memref<168x256xbf16, #tpu.memory_space<vmem>>, vector<1x128xbf16>
    %c35 = arith.constant 35 : index
    %c0_115 = arith.constant 0 : index
    %99 = vector.load %arg15[%c35, %c0_115] : memref<72x384xbf16, #tpu.memory_space<vmem>>, vector<1x128xbf16>
    tpu.vector_store %arg15[%c35, %c0_115], %98 {strides = array<i32>} : memref<72x384xbf16, #tpu.memory_space<vmem>>, vector<1x128xbf16>,
    %c90 = arith.constant 90 : index
    %c0_116 = arith.constant 0 : index
    %100 = vector.load %arg13[%c90, %c0_116] : memref<168x256xbf16, #tpu.memory_space<vmem>>, vector<1x128xbf16>
    %c36_117 = arith.constant 36 : index
    %c0_118 = arith.constant 0 : index
    %101 = vector.load %arg15[%c36_117, %c0_118] : memref<72x384xbf16, #tpu.memory_space<vmem>>, vector<1x128xbf16>
    tpu.vector_store %arg15[%c36_117, %c0_118], %100 {strides = array<i32>} : memref<72x384xbf16, #tpu.memory_space<vmem>>, vector<1x128xbf16>,
    %c92 = arith.constant 92 : index
    %c0_119 = arith.constant 0 : index
    %102 = vector.load %arg13[%c92, %c0_119] : memref<168x256xbf16, #tpu.memory_space<vmem>>, vector<1x128xbf16>
    %c37 = arith.constant 37 : index
    %c0_120 = arith.constant 0 : index
    %103 = vector.load %arg15[%c37, %c0_120] : memref<72x384xbf16, #tpu.memory_space<vmem>>, vector<1x128xbf16>
    tpu.vector_store %arg15[%c37, %c0_120], %102 {strides = array<i32>} : memref<72x384xbf16, #tpu.memory_space<vmem>>, vector<1x128xbf16>,
    %c94 = arith.constant 94 : index
    %c0_121 = arith.constant 0 : index
    %104 = vector.load %arg13[%c94, %c0_121] : memref<168x256xbf16, #tpu.memory_space<vmem>>, vector<1x128xbf16>
    %c38_122 = arith.constant 38 : index
    %c0_123 = arith.constant 0 : index
    %105 = vector.load %arg15[%c38_122, %c0_123] : memref<72x384xbf16, #tpu.memory_space<vmem>>, vector<1x128xbf16>
    tpu.vector_store %arg15[%c38_122, %c0_123], %104 {strides = array<i32>} : memref<72x384xbf16, #tpu.memory_space<vmem>>, vector<1x128xbf16>,
    %c112 = arith.constant 112 : index
    %c0_124 = arith.constant 0 : index
    %106 = vector.load %arg13[%c112, %c0_124] : memref<168x256xbf16, #tpu.memory_space<vmem>>, vector<1x128xbf16>
    %c41 = arith.constant 41 : index
    %c0_125 = arith.constant 0 : index
    %107 = vector.load %arg15[%c41, %c0_125] : memref<72x384xbf16, #tpu.memory_space<vmem>>, vector<1x128xbf16>
    tpu.vector_store %arg15[%c41, %c0_125], %106 {strides = array<i32>} : memref<72x384xbf16, #tpu.memory_space<vmem>>, vector<1x128xbf16>,
    %c114 = arith.constant 114 : index
    %c0_126 = arith.constant 0 : index
    %108 = vector.load %arg13[%c114, %c0_126] : memref<168x256xbf16, #tpu.memory_space<vmem>>, vector<1x128xbf16>
    %c42 = arith.constant 42 : index
    %c0_127 = arith.constant 0 : index
    %109 = vector.load %arg15[%c42, %c0_127] : memref<72x384xbf16, #tpu.memory_space<vmem>>, vector<1x128xbf16>
    tpu.vector_store %arg15[%c42, %c0_127], %108 {strides = array<i32>} : memref<72x384xbf16, #tpu.memory_space<vmem>>, vector<1x128xbf16>,
    %c116 = arith.constant 116 : index
    %c0_128 = arith.constant 0 : index
    %110 = vector.load %arg13[%c116, %c0_128] : memref<168x256xbf16, #tpu.memory_space<vmem>>, vector<1x128xbf16>
    %c43_129 = arith.constant 43 : index
    %c0_130 = arith.constant 0 : index
    %111 = vector.load %arg15[%c43_129, %c0_130] : memref<72x384xbf16, #tpu.memory_space<vmem>>, vector<1x128xbf16>
    tpu.vector_store %arg15[%c43_129, %c0_130], %110 {strides = array<i32>} : memref<72x384xbf16, #tpu.memory_space<vmem>>, vector<1x128xbf16>,
    %c118 = arith.constant 118 : index
    %c0_131 = arith.constant 0 : index
    %112 = vector.load %arg13[%c118, %c0_131] : memref<168x256xbf16, #tpu.memory_space<vmem>>, vector<1x128xbf16>
    %c44 = arith.constant 44 : index
    %c0_132 = arith.constant 0 : index
    %113 = vector.load %arg15[%c44, %c0_132] : memref<72x384xbf16, #tpu.memory_space<vmem>>, vector<1x128xbf16>
    tpu.vector_store %arg15[%c44, %c0_132], %112 {strides = array<i32>} : memref<72x384xbf16, #tpu.memory_space<vmem>>, vector<1x128xbf16>,
    %c120_133 = arith.constant 120 : index
    %c0_134 = arith.constant 0 : index
    %114 = vector.load %arg13[%c120_133, %c0_134] : memref<168x256xbf16, #tpu.memory_space<vmem>>, vector<1x128xbf16>
    %c45 = arith.constant 45 : index
    %c0_135 = arith.constant 0 : index
    %115 = vector.load %arg15[%c45, %c0_135] : memref<72x384xbf16, #tpu.memory_space<vmem>>, vector<1x128xbf16>
    tpu.vector_store %arg15[%c45, %c0_135], %114 {strides = array<i32>} : memref<72x384xbf16, #tpu.memory_space<vmem>>, vector<1x128xbf16>,
    %c122 = arith.constant 122 : index
    %c0_136 = arith.constant 0 : index
    %116 = vector.load %arg13[%c122, %c0_136] : memref<168x256xbf16, #tpu.memory_space<vmem>>, vector<1x128xbf16>
    %c46 = arith.constant 46 : index
    %c0_137 = arith.constant 0 : index
    %117 = vector.load %arg15[%c46, %c0_137] : memref<72x384xbf16, #tpu.memory_space<vmem>>, vector<1x128xbf16>
    tpu.vector_store %arg15[%c46, %c0_137], %116 {strides = array<i32>} : memref<72x384xbf16, #tpu.memory_space<vmem>>, vector<1x128xbf16>,
    %c140 = arith.constant 140 : index
    %c0_138 = arith.constant 0 : index
    %118 = vector.load %arg13[%c140, %c0_138] : memref<168x256xbf16, #tpu.memory_space<vmem>>, vector<1x128xbf16>
    %c49 = arith.constant 49 : index
    %c0_139 = arith.constant 0 : index
    %119 = vector.load %arg15[%c49, %c0_139] : memref<72x384xbf16, #tpu.memory_space<vmem>>, vector<1x128xbf16>
    tpu.vector_store %arg15[%c49, %c0_139], %118 {strides = array<i32>} : memref<72x384xbf16, #tpu.memory_space<vmem>>, vector<1x128xbf16>,
    %c142 = arith.constant 142 : index
    %c0_140 = arith.constant 0 : index
    %120 = vector.load %arg13[%c142, %c0_140] : memref<168x256xbf16, #tpu.memory_space<vmem>>, vector<1x128xbf16>
    %c50 = arith.constant 50 : index
    %c0_141 = arith.constant 0 : index
    %121 = vector.load %arg15[%c50, %c0_141] : memref<72x384xbf16, #tpu.memory_space<vmem>>, vector<1x128xbf16>
    tpu.vector_store %arg15[%c50, %c0_141], %120 {strides = array<i32>} : memref<72x384xbf16, #tpu.memory_space<vmem>>, vector<1x128xbf16>,
    %c144 = arith.constant 144 : index
    %c0_142 = arith.constant 0 : index
    %122 = vector.load %arg13[%c144, %c0_142] : memref<168x256xbf16, #tpu.memory_space<vmem>>, vector<1x128xbf16>
    %c51 = arith.constant 51 : index
    %c0_143 = arith.constant 0 : index
    %123 = vector.load %arg15[%c51, %c0_143] : memref<72x384xbf16, #tpu.memory_space<vmem>>, vector<1x128xbf16>
    tpu.vector_store %arg15[%c51, %c0_143], %122 {strides = array<i32>} : memref<72x384xbf16, #tpu.memory_space<vmem>>, vector<1x128xbf16>,
    %c146 = arith.constant 146 : index
    %c0_144 = arith.constant 0 : index
    %124 = vector.load %arg13[%c146, %c0_144] : memref<168x256xbf16, #tpu.memory_space<vmem>>, vector<1x128xbf16>
    %c52 = arith.constant 52 : index
    %c0_145 = arith.constant 0 : index
    %125 = vector.load %arg15[%c52, %c0_145] : memref<72x384xbf16, #tpu.memory_space<vmem>>, vector<1x128xbf16>
    tpu.vector_store %arg15[%c52, %c0_145], %124 {strides = array<i32>} : memref<72x384xbf16, #tpu.memory_space<vmem>>, vector<1x128xbf16>,
    %c148 = arith.constant 148 : index
    %c0_146 = arith.constant 0 : index
    %126 = vector.load %arg13[%c148, %c0_146] : memref<168x256xbf16, #tpu.memory_space<vmem>>, vector<1x128xbf16>
    %c53 = arith.constant 53 : index
    %c0_147 = arith.constant 0 : index
    %127 = vector.load %arg15[%c53, %c0_147] : memref<72x384xbf16, #tpu.memory_space<vmem>>, vector<1x128xbf16>
    tpu.vector_store %arg15[%c53, %c0_147], %126 {strides = array<i32>} : memref<72x384xbf16, #tpu.memory_space<vmem>>, vector<1x128xbf16>,
    %c150 = arith.constant 150 : index
    %c0_148 = arith.constant 0 : index
    %128 = vector.load %arg13[%c150, %c0_148] : memref<168x256xbf16, #tpu.memory_space<vmem>>, vector<1x128xbf16>
    %c54 = arith.constant 54 : index
    %c0_149 = arith.constant 0 : index
    %129 = vector.load %arg15[%c54, %c0_149] : memref<72x384xbf16, #tpu.memory_space<vmem>>, vector<1x128xbf16>
    tpu.vector_store %arg15[%c54, %c0_149], %128 {strides = array<i32>} : memref<72x384xbf16, #tpu.memory_space<vmem>>, vector<1x128xbf16>,
    %c1_150 = arith.constant 1 : index
    %c0_151 = arith.constant 0 : index
    %130 = vector.load %arg15[%c1_150, %c0_151] : memref<72x384xbf16, #tpu.memory_space<vmem>>, vector<71x128xbf16>
    %c0_152 = arith.constant 0 : index
    %c128_153 = arith.constant 128 : index
    %131 = vector.load %arg15[%c0_152, %c128_153] : memref<72x384xbf16, #tpu.memory_space<vmem>>, vector<71x128xbf16>
    tpu.vector_store %arg15[%c0_152, %c128_153], %130 {strides = array<i32>} : memref<72x384xbf16, #tpu.memory_space<vmem>>, vector<71x128xbf16>,
    %c2_154 = arith.constant 2 : index
    %c0_155 = arith.constant 0 : index
    %132 = vector.load %arg15[%c2_154, %c0_155] : memref<72x384xbf16, #tpu.memory_space<vmem>>, vector<70x128xbf16>
    %c0_156 = arith.constant 0 : index
    %c256_157 = arith.constant 256 : index
    %133 = vector.load %arg15[%c0_156, %c256_157] : memref<72x384xbf16, #tpu.memory_space<vmem>>, vector<70x128xbf16>
    tpu.vector_store %arg15[%c0_156, %c256_157], %132 {strides = array<i32>} : memref<72x384xbf16, #tpu.memory_space<vmem>>, vector<70x128xbf16>,
    %c0_158 = arith.constant 0 : index
    %c0_159 = arith.constant 0 : index
    %134 = vector.load %arg15[%c0_158, %c0_159] : memref<72x384xbf16, #tpu.memory_space<vmem>>, vector<48x384xbf16>
    %c0_160 = arith.constant 0 : index
    %c0_161 = arith.constant 0 : index
    %c0_162 = arith.constant 0 : index
    %135 = vector.load %arg6[%c0_160, %c0_161, %c0_162] : memref<3x384x128xbf16, #tpu.memory_space<vmem>>, vector<1x384x128xbf16>
    %136 = vector.shape_cast %135 : vector<1x384x128xbf16> to vector<384x128xbf16>
    %cst_163 = arith.constant dense<0.000000e+00> : vector<48x128xf32>
    %137 = tpu.matmul %134, %136, %cst_163 {dimension_numbers = #tpu.dot_dimension_numbers<[1], [0], [0], [1], [0, 0, 1, 1], [], []>} : vector<48x384xbf16>, vector<384x128xbf16>, vector<48x128xf32> -> vector<48x128xf32>
    %c8_164 = arith.constant 8 : index
    %c0_165 = arith.constant 0 : index
    %138 = vector.load %arg15[%c8_164, %c0_165] : memref<72x384xbf16, #tpu.memory_space<vmem>>, vector<48x384xbf16>
    %c1_166 = arith.constant 1 : index
    %c0_167 = arith.constant 0 : index
    %c0_168 = arith.constant 0 : index
    %139 = vector.load %arg6[%c1_166, %c0_167, %c0_168] : memref<3x384x128xbf16, #tpu.memory_space<vmem>>, vector<1x384x128xbf16>
    %140 = vector.shape_cast %139 : vector<1x384x128xbf16> to vector<384x128xbf16>
    %cst_169 = arith.constant dense<0.000000e+00> : vector<48x128xf32>
    %141 = tpu.matmul %138, %140, %cst_169 {dimension_numbers = #tpu.dot_dimension_numbers<[1], [0], [0], [1], [0, 0, 1, 1], [], []>} : vector<48x384xbf16>, vector<384x128xbf16>, vector<48x128xf32> -> vector<48x128xf32>
    %142 = arith.addf %137, %141 : vector<48x128xf32>
    %c16 = arith.constant 16 : index
    %c0_170 = arith.constant 0 : index
    %143 = vector.load %arg15[%c16, %c0_170] : memref<72x384xbf16, #tpu.memory_space<vmem>>, vector<48x384xbf16>
    %c2_171 = arith.constant 2 : index
    %c0_172 = arith.constant 0 : index
    %c0_173 = arith.constant 0 : index
    %144 = vector.load %arg6[%c2_171, %c0_172, %c0_173] : memref<3x384x128xbf16, #tpu.memory_space<vmem>>, vector<1x384x128xbf16>
    %145 = vector.shape_cast %144 : vector<1x384x128xbf16> to vector<384x128xbf16>
    %cst_174 = arith.constant dense<0.000000e+00> : vector<48x128xf32>
    %146 = tpu.matmul %143, %145, %cst_174 {dimension_numbers = #tpu.dot_dimension_numbers<[1], [0], [0], [1], [0, 0, 1, 1], [], []>} : vector<48x384xbf16>, vector<384x128xbf16>, vector<48x128xf32> -> vector<48x128xf32>
    %147 = arith.addf %142, %146 : vector<48x128xf32>
    %cst_175 = arith.constant 0.000000e+00 : f32
    %148 = vector.broadcast %cst_175 : f32 to vector<48x128xf32>
    %149 = arith.maximumf %147, %148 : vector<48x128xf32>
    %150 = arith.truncf %149 : vector<48x128xf32> to vector<48x128xbf16>
    %c0_176 = arith.constant 0 : index
    %c0_177 = arith.constant 0 : index
    %151 = vector.load %arg13[%c0_176, %c0_177] : memref<168x256xbf16, #tpu.memory_space<vmem>>, vector<48x128xbf16>
    tpu.vector_store %arg13[%c0_176, %c0_177], %150 {strides = array<i32>} : memref<168x256xbf16, #tpu.memory_space<vmem>>, vector<48x128xbf16>,
    %cst_178 = arith.constant 0.000000e+00 : bf16
    %152 = vector.broadcast %cst_178 : bf16 to vector<72x384xbf16>
    %c0_179 = arith.constant 0 : index
    %c0_180 = arith.constant 0 : index
    %153 = vector.load %arg16[%c0_179, %c0_180] : memref<72x384xbf16, #tpu.memory_space<vmem>>, vector<72x384xbf16>
    tpu.vector_store %arg16[%c0_179, %c0_180], %152 {strides = array<i32>} : memref<72x384xbf16, #tpu.memory_space<vmem>>, vector<72x384xbf16>,
    %c0_181 = arith.constant 0 : index
    %c0_182 = arith.constant 0 : index
    %154 = vector.load %arg13[%c0_181, %c0_182] : memref<168x256xbf16, #tpu.memory_space<vmem>>, vector<6x128xbf16>
    %c9_183 = arith.constant 9 : index
    %c0_184 = arith.constant 0 : index
    %155 = vector.load %arg16[%c9_183, %c0_184] : memref<72x384xbf16, #tpu.memory_space<vmem>>, vector<6x128xbf16>
    tpu.vector_store %arg16[%c9_183, %c0_184], %154 {strides = array<i32>} : memref<72x384xbf16, #tpu.memory_space<vmem>>, vector<6x128xbf16>,
    %c8_185 = arith.constant 8 : index
    %c0_186 = arith.constant 0 : index
    %156 = vector.load %arg13[%c8_185, %c0_186] : memref<168x256xbf16, #tpu.memory_space<vmem>>, vector<6x128xbf16>
    %c17_187 = arith.constant 17 : index
    %c0_188 = arith.constant 0 : index
    %157 = vector.load %arg16[%c17_187, %c0_188] : memref<72x384xbf16, #tpu.memory_space<vmem>>, vector<6x128xbf16>
    tpu.vector_store %arg16[%c17_187, %c0_188], %156 {strides = array<i32>} : memref<72x384xbf16, #tpu.memory_space<vmem>>, vector<6x128xbf16>,
    %c16_189 = arith.constant 16 : index
    %c0_190 = arith.constant 0 : index
    %158 = vector.load %arg13[%c16_189, %c0_190] : memref<168x256xbf16, #tpu.memory_space<vmem>>, vector<6x128xbf16>
    %c25_191 = arith.constant 25 : index
    %c0_192 = arith.constant 0 : index
    %159 = vector.load %arg16[%c25_191, %c0_192] : memref<72x384xbf16, #tpu.memory_space<vmem>>, vector<6x128xbf16>
    tpu.vector_store %arg16[%c25_191, %c0_192], %158 {strides = array<i32>} : memref<72x384xbf16, #tpu.memory_space<vmem>>, vector<6x128xbf16>,
    %c24_193 = arith.constant 24 : index
    %c0_194 = arith.constant 0 : index
    %160 = vector.load %arg13[%c24_193, %c0_194] : memref<168x256xbf16, #tpu.memory_space<vmem>>, vector<6x128xbf16>
    %c33_195 = arith.constant 33 : index
    %c0_196 = arith.constant 0 : index
    %161 = vector.load %arg16[%c33_195, %c0_196] : memref<72x384xbf16, #tpu.memory_space<vmem>>, vector<6x128xbf16>
    tpu.vector_store %arg16[%c33_195, %c0_196], %160 {strides = array<i32>} : memref<72x384xbf16, #tpu.memory_space<vmem>>, vector<6x128xbf16>,
    %c32_197 = arith.constant 32 : index
    %c0_198 = arith.constant 0 : index
    %162 = vector.load %arg13[%c32_197, %c0_198] : memref<168x256xbf16, #tpu.memory_space<vmem>>, vector<6x128xbf16>
    %c41_199 = arith.constant 41 : index
    %c0_200 = arith.constant 0 : index
    %163 = vector.load %arg16[%c41_199, %c0_200] : memref<72x384xbf16, #tpu.memory_space<vmem>>, vector<6x128xbf16>
    tpu.vector_store %arg16[%c41_199, %c0_200], %162 {strides = array<i32>} : memref<72x384xbf16, #tpu.memory_space<vmem>>, vector<6x128xbf16>,
    %c40 = arith.constant 40 : index
    %c0_201 = arith.constant 0 : index
    %164 = vector.load %arg13[%c40, %c0_201] : memref<168x256xbf16, #tpu.memory_space<vmem>>, vector<6x128xbf16>
    %c49_202 = arith.constant 49 : index
    %c0_203 = arith.constant 0 : index
    %165 = vector.load %arg16[%c49_202, %c0_203] : memref<72x384xbf16, #tpu.memory_space<vmem>>, vector<6x128xbf16>
    tpu.vector_store %arg16[%c49_202, %c0_203], %164 {strides = array<i32>} : memref<72x384xbf16, #tpu.memory_space<vmem>>, vector<6x128xbf16>,
    %c1_204 = arith.constant 1 : index
    %c0_205 = arith.constant 0 : index
    %166 = vector.load %arg16[%c1_204, %c0_205] : memref<72x384xbf16, #tpu.memory_space<vmem>>, vector<71x128xbf16>
    %c0_206 = arith.constant 0 : index
    %c128_207 = arith.constant 128 : index
    %167 = vector.load %arg16[%c0_206, %c128_207] : memref<72x384xbf16, #tpu.memory_space<vmem>>, vector<71x128xbf16>
    tpu.vector_store %arg16[%c0_206, %c128_207], %166 {strides = array<i32>} : memref<72x384xbf16, #tpu.memory_space<vmem>>, vector<71x128xbf16>,
    %c2_208 = arith.constant 2 : index
    %c0_209 = arith.constant 0 : index
    %168 = vector.load %arg16[%c2_208, %c0_209] : memref<72x384xbf16, #tpu.memory_space<vmem>>, vector<70x128xbf16>
    %c0_210 = arith.constant 0 : index
    %c256_211 = arith.constant 256 : index
    %169 = vector.load %arg16[%c0_210, %c256_211] : memref<72x384xbf16, #tpu.memory_space<vmem>>, vector<70x128xbf16>
    tpu.vector_store %arg16[%c0_210, %c256_211], %168 {strides = array<i32>} : memref<72x384xbf16, #tpu.memory_space<vmem>>, vector<70x128xbf16>,
    %c0_212 = arith.constant 0 : index
    %c0_213 = arith.constant 0 : index
    %170 = vector.load %arg16[%c0_212, %c0_213] : memref<72x384xbf16, #tpu.memory_space<vmem>>, vector<48x384xbf16>
    %c0_214 = arith.constant 0 : index
    %c0_215 = arith.constant 0 : index
    %c0_216 = arith.constant 0 : index
    %171 = vector.load %arg7[%c0_214, %c0_215, %c0_216] : memref<3x384x256xbf16, #tpu.memory_space<vmem>>, vector<1x384x256xbf16>
    %172 = vector.shape_cast %171 : vector<1x384x256xbf16> to vector<384x256xbf16>
    %cst_217 = arith.constant dense<0.000000e+00> : vector<48x256xf32>
    %173 = tpu.matmul %170, %172, %cst_217 {dimension_numbers = #tpu.dot_dimension_numbers<[1], [0], [0], [1], [0, 0, 1, 1], [], []>} : vector<48x384xbf16>, vector<384x256xbf16>, vector<48x256xf32> -> vector<48x256xf32>
    %c8_218 = arith.constant 8 : index
    %c0_219 = arith.constant 0 : index
    %174 = vector.load %arg16[%c8_218, %c0_219] : memref<72x384xbf16, #tpu.memory_space<vmem>>, vector<48x384xbf16>
    %c1_220 = arith.constant 1 : index
    %c0_221 = arith.constant 0 : index
    %c0_222 = arith.constant 0 : index
    %175 = vector.load %arg7[%c1_220, %c0_221, %c0_222] : memref<3x384x256xbf16, #tpu.memory_space<vmem>>, vector<1x384x256xbf16>
    %176 = vector.shape_cast %175 : vector<1x384x256xbf16> to vector<384x256xbf16>
    %cst_223 = arith.constant dense<0.000000e+00> : vector<48x256xf32>
    %177 = tpu.matmul %174, %176, %cst_223 {dimension_numbers = #tpu.dot_dimension_numbers<[1], [0], [0], [1], [0, 0, 1, 1], [], []>} : vector<48x384xbf16>, vector<384x256xbf16>, vector<48x256xf32> -> vector<48x256xf32>
    %178 = arith.addf %173, %177 : vector<48x256xf32>
    %c16_224 = arith.constant 16 : index
    %c0_225 = arith.constant 0 : index
    %179 = vector.load %arg16[%c16_224, %c0_225] : memref<72x384xbf16, #tpu.memory_space<vmem>>, vector<48x384xbf16>
    %c2_226 = arith.constant 2 : index
    %c0_227 = arith.constant 0 : index
    %c0_228 = arith.constant 0 : index
    %180 = vector.load %arg7[%c2_226, %c0_227, %c0_228] : memref<3x384x256xbf16, #tpu.memory_space<vmem>>, vector<1x384x256xbf16>
    %181 = vector.shape_cast %180 : vector<1x384x256xbf16> to vector<384x256xbf16>
    %cst_229 = arith.constant dense<0.000000e+00> : vector<48x256xf32>
    %182 = tpu.matmul %179, %181, %cst_229 {dimension_numbers = #tpu.dot_dimension_numbers<[1], [0], [0], [1], [0, 0, 1, 1], [], []>} : vector<48x384xbf16>, vector<384x256xbf16>, vector<48x256xf32> -> vector<48x256xf32>
    %183 = arith.addf %178, %182 : vector<48x256xf32>
    %cst_230 = arith.constant 0.000000e+00 : f32
    %184 = vector.broadcast %cst_230 : f32 to vector<48x256xf32>
    %185 = arith.maximumf %183, %184 : vector<48x256xf32>
    %186 = arith.truncf %185 : vector<48x256xf32> to vector<48x256xbf16>
    %c0_231 = arith.constant 0 : index
    %c0_232 = arith.constant 0 : index
    %187 = vector.load %arg13[%c0_231, %c0_232] : memref<168x256xbf16, #tpu.memory_space<vmem>>, vector<48x256xbf16>
    tpu.vector_store %arg13[%c0_231, %c0_232], %186 {strides = array<i32>} : memref<168x256xbf16, #tpu.memory_space<vmem>>, vector<48x256xbf16>,
    %cst_233 = arith.constant 0.000000e+00 : bf16
    %188 = vector.broadcast %cst_233 : bf16 to vector<32x768xbf16>
    %c0_234 = arith.constant 0 : index
    %c0_235 = arith.constant 0 : index
    %189 = vector.load %arg17[%c0_234, %c0_235] : memref<32x768xbf16, #tpu.memory_space<vmem>>, vector<32x768xbf16>
    tpu.vector_store %arg17[%c0_234, %c0_235], %188 {strides = array<i32>} : memref<32x768xbf16, #tpu.memory_space<vmem>>, vector<32x768xbf16>,
    %c0_236 = arith.constant 0 : index
    %c0_237 = arith.constant 0 : index
    %190 = vector.load %arg13[%c0_236, %c0_237] : memref<168x256xbf16, #tpu.memory_space<vmem>>, vector<1x256xbf16>
    %c6_238 = arith.constant 6 : index
    %c0_239 = arith.constant 0 : index
    %191 = vector.load %arg17[%c6_238, %c0_239] : memref<32x768xbf16, #tpu.memory_space<vmem>>, vector<1x256xbf16>
    tpu.vector_store %arg17[%c6_238, %c0_239], %190 {strides = array<i32>} : memref<32x768xbf16, #tpu.memory_space<vmem>>, vector<1x256xbf16>,
    %c2_240 = arith.constant 2 : index
    %c0_241 = arith.constant 0 : index
    %192 = vector.load %arg13[%c2_240, %c0_241] : memref<168x256xbf16, #tpu.memory_space<vmem>>, vector<1x256xbf16>
    %c7 = arith.constant 7 : index
    %c0_242 = arith.constant 0 : index
    %193 = vector.load %arg17[%c7, %c0_242] : memref<32x768xbf16, #tpu.memory_space<vmem>>, vector<1x256xbf16>
    tpu.vector_store %arg17[%c7, %c0_242], %192 {strides = array<i32>} : memref<32x768xbf16, #tpu.memory_space<vmem>>, vector<1x256xbf16>,
    %c4_243 = arith.constant 4 : index
    %c0_244 = arith.constant 0 : index
    %194 = vector.load %arg13[%c4_243, %c0_244] : memref<168x256xbf16, #tpu.memory_space<vmem>>, vector<1x256xbf16>
    %c8_245 = arith.constant 8 : index
    %c0_246 = arith.constant 0 : index
    %195 = vector.load %arg17[%c8_245, %c0_246] : memref<32x768xbf16, #tpu.memory_space<vmem>>, vector<1x256xbf16>
    tpu.vector_store %arg17[%c8_245, %c0_246], %194 {strides = array<i32>} : memref<32x768xbf16, #tpu.memory_space<vmem>>, vector<1x256xbf16>,
    %c16_247 = arith.constant 16 : index
    %c0_248 = arith.constant 0 : index
    %196 = vector.load %arg13[%c16_247, %c0_248] : memref<168x256xbf16, #tpu.memory_space<vmem>>, vector<1x256xbf16>
    %c11_249 = arith.constant 11 : index
    %c0_250 = arith.constant 0 : index
    %197 = vector.load %arg17[%c11_249, %c0_250] : memref<32x768xbf16, #tpu.memory_space<vmem>>, vector<1x256xbf16>
    tpu.vector_store %arg17[%c11_249, %c0_250], %196 {strides = array<i32>} : memref<32x768xbf16, #tpu.memory_space<vmem>>, vector<1x256xbf16>,
    %c18_251 = arith.constant 18 : index
    %c0_252 = arith.constant 0 : index
    %198 = vector.load %arg13[%c18_251, %c0_252] : memref<168x256xbf16, #tpu.memory_space<vmem>>, vector<1x256xbf16>
    %c12_253 = arith.constant 12 : index
    %c0_254 = arith.constant 0 : index
    %199 = vector.load %arg17[%c12_253, %c0_254] : memref<32x768xbf16, #tpu.memory_space<vmem>>, vector<1x256xbf16>
    tpu.vector_store %arg17[%c12_253, %c0_254], %198 {strides = array<i32>} : memref<32x768xbf16, #tpu.memory_space<vmem>>, vector<1x256xbf16>,
    %c20_255 = arith.constant 20 : index
    %c0_256 = arith.constant 0 : index
    %200 = vector.load %arg13[%c20_255, %c0_256] : memref<168x256xbf16, #tpu.memory_space<vmem>>, vector<1x256xbf16>
    %c13_257 = arith.constant 13 : index
    %c0_258 = arith.constant 0 : index
    %201 = vector.load %arg17[%c13_257, %c0_258] : memref<32x768xbf16, #tpu.memory_space<vmem>>, vector<1x256xbf16>
    tpu.vector_store %arg17[%c13_257, %c0_258], %200 {strides = array<i32>} : memref<32x768xbf16, #tpu.memory_space<vmem>>, vector<1x256xbf16>,
    %c32_259 = arith.constant 32 : index
    %c0_260 = arith.constant 0 : index
    %202 = vector.load %arg13[%c32_259, %c0_260] : memref<168x256xbf16, #tpu.memory_space<vmem>>, vector<1x256xbf16>
    %c16_261 = arith.constant 16 : index
    %c0_262 = arith.constant 0 : index
    %203 = vector.load %arg17[%c16_261, %c0_262] : memref<32x768xbf16, #tpu.memory_space<vmem>>, vector<1x256xbf16>
    tpu.vector_store %arg17[%c16_261, %c0_262], %202 {strides = array<i32>} : memref<32x768xbf16, #tpu.memory_space<vmem>>, vector<1x256xbf16>,
    %c34_263 = arith.constant 34 : index
    %c0_264 = arith.constant 0 : index
    %204 = vector.load %arg13[%c34_263, %c0_264] : memref<168x256xbf16, #tpu.memory_space<vmem>>, vector<1x256xbf16>
    %c17_265 = arith.constant 17 : index
    %c0_266 = arith.constant 0 : index
    %205 = vector.load %arg17[%c17_265, %c0_266] : memref<32x768xbf16, #tpu.memory_space<vmem>>, vector<1x256xbf16>
    tpu.vector_store %arg17[%c17_265, %c0_266], %204 {strides = array<i32>} : memref<32x768xbf16, #tpu.memory_space<vmem>>, vector<1x256xbf16>,
    %c36_267 = arith.constant 36 : index
    %c0_268 = arith.constant 0 : index
    %206 = vector.load %arg13[%c36_267, %c0_268] : memref<168x256xbf16, #tpu.memory_space<vmem>>, vector<1x256xbf16>
    %c18_269 = arith.constant 18 : index
    %c0_270 = arith.constant 0 : index
    %207 = vector.load %arg17[%c18_269, %c0_270] : memref<32x768xbf16, #tpu.memory_space<vmem>>, vector<1x256xbf16>
    tpu.vector_store %arg17[%c18_269, %c0_270], %206 {strides = array<i32>} : memref<32x768xbf16, #tpu.memory_space<vmem>>, vector<1x256xbf16>,
    %c1_271 = arith.constant 1 : index
    %c0_272 = arith.constant 0 : index
    %208 = vector.load %arg17[%c1_271, %c0_272] : memref<32x768xbf16, #tpu.memory_space<vmem>>, vector<31x256xbf16>
    %c0_273 = arith.constant 0 : index
    %c256_274 = arith.constant 256 : index
    %209 = vector.load %arg17[%c0_273, %c256_274] : memref<32x768xbf16, #tpu.memory_space<vmem>>, vector<31x256xbf16>
    tpu.vector_store %arg17[%c0_273, %c256_274], %208 {strides = array<i32>} : memref<32x768xbf16, #tpu.memory_space<vmem>>, vector<31x256xbf16>,
    %c2_275 = arith.constant 2 : index
    %c0_276 = arith.constant 0 : index
    %210 = vector.load %arg17[%c2_275, %c0_276] : memref<32x768xbf16, #tpu.memory_space<vmem>>, vector<30x256xbf16>
    %c0_277 = arith.constant 0 : index
    %c512 = arith.constant 512 : index
    %211 = vector.load %arg17[%c0_277, %c512] : memref<32x768xbf16, #tpu.memory_space<vmem>>, vector<30x256xbf16>
    tpu.vector_store %arg17[%c0_277, %c512], %210 {strides = array<i32>} : memref<32x768xbf16, #tpu.memory_space<vmem>>, vector<30x256xbf16>,
    %c0_278 = arith.constant 0 : index
    %c0_279 = arith.constant 0 : index
    %212 = vector.load %arg17[%c0_278, %c0_279] : memref<32x768xbf16, #tpu.memory_space<vmem>>, vector<15x768xbf16>
    %c0_280 = arith.constant 0 : index
    %c0_281 = arith.constant 0 : index
    %c0_282 = arith.constant 0 : index
    %213 = vector.load %arg8[%c0_280, %c0_281, %c0_282] : memref<3x768x256xbf16, #tpu.memory_space<vmem>>, vector<1x768x256xbf16>
    %214 = vector.shape_cast %213 : vector<1x768x256xbf16> to vector<768x256xbf16>
    %cst_283 = arith.constant dense<0.000000e+00> : vector<15x256xf32>
    %215 = tpu.matmul %212, %214, %cst_283 {dimension_numbers = #tpu.dot_dimension_numbers<[1], [0], [0], [1], [0, 0, 1, 1], [], []>} : vector<15x768xbf16>, vector<768x256xbf16>, vector<15x256xf32> -> vector<15x256xf32>
    %c5 = arith.constant 5 : index
    %c0_284 = arith.constant 0 : index
    %216 = vector.load %arg17[%c5, %c0_284] : memref<32x768xbf16, #tpu.memory_space<vmem>>, vector<15x768xbf16>
    %c1_285 = arith.constant 1 : index
    %c0_286 = arith.constant 0 : index
    %c0_287 = arith.constant 0 : index
    %217 = vector.load %arg8[%c1_285, %c0_286, %c0_287] : memref<3x768x256xbf16, #tpu.memory_space<vmem>>, vector<1x768x256xbf16>
    %218 = vector.shape_cast %217 : vector<1x768x256xbf16> to vector<768x256xbf16>
    %cst_288 = arith.constant dense<0.000000e+00> : vector<15x256xf32>
    %219 = tpu.matmul %216, %218, %cst_288 {dimension_numbers = #tpu.dot_dimension_numbers<[1], [0], [0], [1], [0, 0, 1, 1], [], []>} : vector<15x768xbf16>, vector<768x256xbf16>, vector<15x256xf32> -> vector<15x256xf32>
    %220 = arith.addf %215, %219 : vector<15x256xf32>
    %c10_289 = arith.constant 10 : index
    %c0_290 = arith.constant 0 : index
    %221 = vector.load %arg17[%c10_289, %c0_290] : memref<32x768xbf16, #tpu.memory_space<vmem>>, vector<15x768xbf16>
    %c2_291 = arith.constant 2 : index
    %c0_292 = arith.constant 0 : index
    %c0_293 = arith.constant 0 : index
    %222 = vector.load %arg8[%c2_291, %c0_292, %c0_293] : memref<3x768x256xbf16, #tpu.memory_space<vmem>>, vector<1x768x256xbf16>
    %223 = vector.shape_cast %222 : vector<1x768x256xbf16> to vector<768x256xbf16>
    %cst_294 = arith.constant dense<0.000000e+00> : vector<15x256xf32>
    %224 = tpu.matmul %221, %223, %cst_294 {dimension_numbers = #tpu.dot_dimension_numbers<[1], [0], [0], [1], [0, 0, 1, 1], [], []>} : vector<15x768xbf16>, vector<768x256xbf16>, vector<15x256xf32> -> vector<15x256xf32>
    %225 = arith.addf %220, %224 : vector<15x256xf32>
    %cst_295 = arith.constant 0.000000e+00 : f32
    %226 = vector.broadcast %cst_295 : f32 to vector<15x256xf32>
    %227 = arith.maximumf %225, %226 : vector<15x256xf32>
    %228 = arith.truncf %227 : vector<15x256xf32> to vector<15x256xbf16>
    %c0_296 = arith.constant 0 : index
    %c0_297 = arith.constant 0 : index
    %229 = vector.load %arg13[%c0_296, %c0_297] : memref<168x256xbf16, #tpu.memory_space<vmem>>, vector<15x256xbf16>
    tpu.vector_store %arg13[%c0_296, %c0_297], %228 {strides = array<i32>} : memref<168x256xbf16, #tpu.memory_space<vmem>>, vector<15x256xbf16>,
    %cst_298 = arith.constant 0.000000e+00 : bf16
    %230 = vector.broadcast %cst_298 : bf16 to vector<32x768xbf16>
    %c0_299 = arith.constant 0 : index
    %c0_300 = arith.constant 0 : index
    %231 = vector.load %arg18[%c0_299, %c0_300] : memref<32x768xbf16, #tpu.memory_space<vmem>>, vector<32x768xbf16>
    tpu.vector_store %arg18[%c0_299, %c0_300], %230 {strides = array<i32>} : memref<32x768xbf16, #tpu.memory_space<vmem>>, vector<32x768xbf16>,
    %c0_301 = arith.constant 0 : index
    %c0_302 = arith.constant 0 : index
    %232 = vector.load %arg13[%c0_301, %c0_302] : memref<168x256xbf16, #tpu.memory_space<vmem>>, vector<3x256xbf16>
    %c6_303 = arith.constant 6 : index
    %c0_304 = arith.constant 0 : index
    %233 = vector.load %arg18[%c6_303, %c0_304] : memref<32x768xbf16, #tpu.memory_space<vmem>>, vector<3x256xbf16>
    tpu.vector_store %arg18[%c6_303, %c0_304], %232 {strides = array<i32>} : memref<32x768xbf16, #tpu.memory_space<vmem>>, vector<3x256xbf16>,
    %c5_305 = arith.constant 5 : index
    %c0_306 = arith.constant 0 : index
    %234 = vector.load %arg13[%c5_305, %c0_306] : memref<168x256xbf16, #tpu.memory_space<vmem>>, vector<3x256xbf16>
    %c11_307 = arith.constant 11 : index
    %c0_308 = arith.constant 0 : index
    %235 = vector.load %arg18[%c11_307, %c0_308] : memref<32x768xbf16, #tpu.memory_space<vmem>>, vector<3x256xbf16>
    tpu.vector_store %arg18[%c11_307, %c0_308], %234 {strides = array<i32>} : memref<32x768xbf16, #tpu.memory_space<vmem>>, vector<3x256xbf16>,
    %c10_309 = arith.constant 10 : index
    %c0_310 = arith.constant 0 : index
    %236 = vector.load %arg13[%c10_309, %c0_310] : memref<168x256xbf16, #tpu.memory_space<vmem>>, vector<3x256xbf16>
    %c16_311 = arith.constant 16 : index
    %c0_312 = arith.constant 0 : index
    %237 = vector.load %arg18[%c16_311, %c0_312] : memref<32x768xbf16, #tpu.memory_space<vmem>>, vector<3x256xbf16>
    tpu.vector_store %arg18[%c16_311, %c0_312], %236 {strides = array<i32>} : memref<32x768xbf16, #tpu.memory_space<vmem>>, vector<3x256xbf16>,
    %c1_313 = arith.constant 1 : index
    %c0_314 = arith.constant 0 : index
    %238 = vector.load %arg18[%c1_313, %c0_314] : memref<32x768xbf16, #tpu.memory_space<vmem>>, vector<31x256xbf16>
    %c0_315 = arith.constant 0 : index
    %c256_316 = arith.constant 256 : index
    %239 = vector.load %arg18[%c0_315, %c256_316] : memref<32x768xbf16, #tpu.memory_space<vmem>>, vector<31x256xbf16>
    tpu.vector_store %arg18[%c0_315, %c256_316], %238 {strides = array<i32>} : memref<32x768xbf16, #tpu.memory_space<vmem>>, vector<31x256xbf16>,
    %c2_317 = arith.constant 2 : index
    %c0_318 = arith.constant 0 : index
    %240 = vector.load %arg18[%c2_317, %c0_318] : memref<32x768xbf16, #tpu.memory_space<vmem>>, vector<30x256xbf16>
    %c0_319 = arith.constant 0 : index
    %c512_320 = arith.constant 512 : index
    %241 = vector.load %arg18[%c0_319, %c512_320] : memref<32x768xbf16, #tpu.memory_space<vmem>>, vector<30x256xbf16>
    tpu.vector_store %arg18[%c0_319, %c512_320], %240 {strides = array<i32>} : memref<32x768xbf16, #tpu.memory_space<vmem>>, vector<30x256xbf16>,
    %c0_321 = arith.constant 0 : index
    %c0_322 = arith.constant 0 : index
    %242 = vector.load %arg18[%c0_321, %c0_322] : memref<32x768xbf16, #tpu.memory_space<vmem>>, vector<15x768xbf16>
    %c0_323 = arith.constant 0 : index
    %c0_324 = arith.constant 0 : index
    %c0_325 = arith.constant 0 : index
    %243 = vector.load %arg9[%c0_323, %c0_324, %c0_325] : memref<3x768x256xbf16, #tpu.memory_space<vmem>>, vector<1x768x256xbf16>
    %244 = vector.shape_cast %243 : vector<1x768x256xbf16> to vector<768x256xbf16>
    %cst_326 = arith.constant dense<0.000000e+00> : vector<15x256xf32>
    %245 = tpu.matmul %242, %244, %cst_326 {dimension_numbers = #tpu.dot_dimension_numbers<[1], [0], [0], [1], [0, 0, 1, 1], [], []>} : vector<15x768xbf16>, vector<768x256xbf16>, vector<15x256xf32> -> vector<15x256xf32>
    %c5_327 = arith.constant 5 : index
    %c0_328 = arith.constant 0 : index
    %246 = vector.load %arg18[%c5_327, %c0_328] : memref<32x768xbf16, #tpu.memory_space<vmem>>, vector<15x768xbf16>
    %c1_329 = arith.constant 1 : index
    %c0_330 = arith.constant 0 : index
    %c0_331 = arith.constant 0 : index
    %247 = vector.load %arg9[%c1_329, %c0_330, %c0_331] : memref<3x768x256xbf16, #tpu.memory_space<vmem>>, vector<1x768x256xbf16>
    %248 = vector.shape_cast %247 : vector<1x768x256xbf16> to vector<768x256xbf16>
    %cst_332 = arith.constant dense<0.000000e+00> : vector<15x256xf32>
    %249 = tpu.matmul %246, %248, %cst_332 {dimension_numbers = #tpu.dot_dimension_numbers<[1], [0], [0], [1], [0, 0, 1, 1], [], []>} : vector<15x768xbf16>, vector<768x256xbf16>, vector<15x256xf32> -> vector<15x256xf32>
    %250 = arith.addf %245, %249 : vector<15x256xf32>
    %c10_333 = arith.constant 10 : index
    %c0_334 = arith.constant 0 : index
    %251 = vector.load %arg18[%c10_333, %c0_334] : memref<32x768xbf16, #tpu.memory_space<vmem>>, vector<15x768xbf16>
    %c2_335 = arith.constant 2 : index
    %c0_336 = arith.constant 0 : index
    %c0_337 = arith.constant 0 : index
    %252 = vector.load %arg9[%c2_335, %c0_336, %c0_337] : memref<3x768x256xbf16, #tpu.memory_space<vmem>>, vector<1x768x256xbf16>
    %253 = vector.shape_cast %252 : vector<1x768x256xbf16> to vector<768x256xbf16>
    %cst_338 = arith.constant dense<0.000000e+00> : vector<15x256xf32>
    %254 = tpu.matmul %251, %253, %cst_338 {dimension_numbers = #tpu.dot_dimension_numbers<[1], [0], [0], [1], [0, 0, 1, 1], [], []>} : vector<15x768xbf16>, vector<768x256xbf16>, vector<15x256xf32> -> vector<15x256xf32>
    %255 = arith.addf %250, %254 : vector<15x256xf32>
    %cst_339 = arith.constant 0.000000e+00 : f32
    %256 = vector.broadcast %cst_339 : f32 to vector<15x256xf32>
    %257 = arith.maximumf %255, %256 : vector<15x256xf32>
    %258 = arith.truncf %257 : vector<15x256xf32> to vector<15x256xbf16>
    %c0_340 = arith.constant 0 : index
    %c0_341 = arith.constant 0 : index
    %259 = vector.load %arg13[%c0_340, %c0_341] : memref<168x256xbf16, #tpu.memory_space<vmem>>, vector<15x256xbf16>
    tpu.vector_store %arg13[%c0_340, %c0_341], %258 {strides = array<i32>} : memref<168x256xbf16, #tpu.memory_space<vmem>>, vector<15x256xbf16>,
    %cst_342 = arith.constant 0.000000e+00 : bf16
    %260 = vector.broadcast %cst_342 : bf16 to vector<8x2304xbf16>
    %c0_343 = arith.constant 0 : index
    %c0_344 = arith.constant 0 : index
    %261 = vector.load %arg19[%c0_343, %c0_344] : memref<8x2304xbf16, #tpu.memory_space<vmem>>, vector<8x2304xbf16>
    tpu.vector_store %arg19[%c0_343, %c0_344], %260 {strides = array<i32>} : memref<8x2304xbf16, #tpu.memory_space<vmem>>, vector<8x2304xbf16>,
    %c0_345 = arith.constant 0 : index
    %c0_346 = arith.constant 0 : index
    %262 = vector.load %arg13[%c0_345, %c0_346] : memref<168x256xbf16, #tpu.memory_space<vmem>>, vector<1x256xbf16>
    %263 = arith.extf %262 : vector<1x256xbf16> to vector<1x256xf32>
    %c0_347 = arith.constant 0 : index
    %c0_348 = arith.constant 0 : index
    %c0_349 = arith.constant 0 : index
    %264 = vector.load %arg2[%c0_347, %c0_348, %c0_349] : memref<1x1x2304xf32, #tpu.memory_space<vmem>>, vector<1x1x256xf32>
    %265 = vector.shape_cast %264 : vector<1x1x256xf32> to vector<1x256xf32>
    %266 = arith.addf %263, %265 : vector<1x256xf32>
    %c0_350 = arith.constant 0 : index
    %c0_351 = arith.constant 0 : index
    %c0_352 = arith.constant 0 : index
    %267 = vector.load %arg3[%c0_350, %c0_351, %c0_352] : memref<1x1x2304xf32, #tpu.memory_space<vmem>>, vector<1x1x256xf32>
    %268 = vector.shape_cast %267 : vector<1x1x256xf32> to vector<1x256xf32>
    %269 = arith.mulf %266, %268 : vector<1x256xf32>
    %270 = arith.truncf %269 : vector<1x256xf32> to vector<1x256xbf16>
    %c0_353 = arith.constant 0 : index
    %c0_354 = arith.constant 0 : index
    %271 = vector.load %arg19[%c0_353, %c0_354] : memref<8x2304xbf16, #tpu.memory_space<vmem>>, vector<1x256xbf16>
    tpu.vector_store %arg19[%c0_353, %c0_354], %270 {strides = array<i32>} : memref<8x2304xbf16, #tpu.memory_space<vmem>>, vector<1x256xbf16>,
    %c1_355 = arith.constant 1 : index
    %c0_356 = arith.constant 0 : index
    %272 = vector.load %arg13[%c1_355, %c0_356] : memref<168x256xbf16, #tpu.memory_space<vmem>>, vector<1x256xbf16>
    %273 = arith.extf %272 : vector<1x256xbf16> to vector<1x256xf32>
    %c0_357 = arith.constant 0 : index
    %c0_358 = arith.constant 0 : index
    %c256_359 = arith.constant 256 : index
    %274 = vector.load %arg2[%c0_357, %c0_358, %c256_359] : memref<1x1x2304xf32, #tpu.memory_space<vmem>>, vector<1x1x256xf32>
    %275 = vector.shape_cast %274 : vector<1x1x256xf32> to vector<1x256xf32>
    %276 = arith.addf %273, %275 : vector<1x256xf32>
    %c0_360 = arith.constant 0 : index
    %c0_361 = arith.constant 0 : index
    %c256_362 = arith.constant 256 : index
    %277 = vector.load %arg3[%c0_360, %c0_361, %c256_362] : memref<1x1x2304xf32, #tpu.memory_space<vmem>>, vector<1x1x256xf32>
    %278 = vector.shape_cast %277 : vector<1x1x256xf32> to vector<1x256xf32>
    %279 = arith.mulf %276, %278 : vector<1x256xf32>
    %280 = arith.truncf %279 : vector<1x256xf32> to vector<1x256xbf16>
    %c0_363 = arith.constant 0 : index
    %c256_364 = arith.constant 256 : index
    %281 = vector.load %arg19[%c0_363, %c256_364] : memref<8x2304xbf16, #tpu.memory_space<vmem>>, vector<1x256xbf16>
    tpu.vector_store %arg19[%c0_363, %c256_364], %280 {strides = array<i32>} : memref<8x2304xbf16, #tpu.memory_space<vmem>>, vector<1x256xbf16>,
    %c2_365 = arith.constant 2 : index
    %c0_366 = arith.constant 0 : index
    %282 = vector.load %arg13[%c2_365, %c0_366] : memref<168x256xbf16, #tpu.memory_space<vmem>>, vector<1x256xbf16>
    %283 = arith.extf %282 : vector<1x256xbf16> to vector<1x256xf32>
    %c0_367 = arith.constant 0 : index
    %c0_368 = arith.constant 0 : index
    %c512_369 = arith.constant 512 : index
    %284 = vector.load %arg2[%c0_367, %c0_368, %c512_369] : memref<1x1x2304xf32, #tpu.memory_space<vmem>>, vector<1x1x256xf32>
    %285 = vector.shape_cast %284 : vector<1x1x256xf32> to vector<1x256xf32>
    %286 = arith.addf %283, %285 : vector<1x256xf32>
    %c0_370 = arith.constant 0 : index
    %c0_371 = arith.constant 0 : index
    %c512_372 = arith.constant 512 : index
    %287 = vector.load %arg3[%c0_370, %c0_371, %c512_372] : memref<1x1x2304xf32, #tpu.memory_space<vmem>>, vector<1x1x256xf32>
    %288 = vector.shape_cast %287 : vector<1x1x256xf32> to vector<1x256xf32>
    %289 = arith.mulf %286, %288 : vector<1x256xf32>
    %290 = arith.truncf %289 : vector<1x256xf32> to vector<1x256xbf16>
    %c0_373 = arith.constant 0 : index
    %c512_374 = arith.constant 512 : index
    %291 = vector.load %arg19[%c0_373, %c512_374] : memref<8x2304xbf16, #tpu.memory_space<vmem>>, vector<1x256xbf16>
    tpu.vector_store %arg19[%c0_373, %c512_374], %290 {strides = array<i32>} : memref<8x2304xbf16, #tpu.memory_space<vmem>>, vector<1x256xbf16>,
    %c5_375 = arith.constant 5 : index
    %c0_376 = arith.constant 0 : index
    %292 = vector.load %arg13[%c5_375, %c0_376] : memref<168x256xbf16, #tpu.memory_space<vmem>>, vector<1x256xbf16>
    %293 = arith.extf %292 : vector<1x256xbf16> to vector<1x256xf32>
    %c0_377 = arith.constant 0 : index
    %c0_378 = arith.constant 0 : index
    %c768 = arith.constant 768 : index
    %294 = vector.load %arg2[%c0_377, %c0_378, %c768] : memref<1x1x2304xf32, #tpu.memory_space<vmem>>, vector<1x1x256xf32>
    %295 = vector.shape_cast %294 : vector<1x1x256xf32> to vector<1x256xf32>
    %296 = arith.addf %293, %295 : vector<1x256xf32>
    %c0_379 = arith.constant 0 : index
    %c0_380 = arith.constant 0 : index
    %c768_381 = arith.constant 768 : index
    %297 = vector.load %arg3[%c0_379, %c0_380, %c768_381] : memref<1x1x2304xf32, #tpu.memory_space<vmem>>, vector<1x1x256xf32>
    %298 = vector.shape_cast %297 : vector<1x1x256xf32> to vector<1x256xf32>
    %299 = arith.mulf %296, %298 : vector<1x256xf32>
    %300 = arith.truncf %299 : vector<1x256xf32> to vector<1x256xbf16>
    %c0_382 = arith.constant 0 : index
    %c768_383 = arith.constant 768 : index
    %301 = vector.load %arg19[%c0_382, %c768_383] : memref<8x2304xbf16, #tpu.memory_space<vmem>>, vector<1x256xbf16>
    tpu.vector_store %arg19[%c0_382, %c768_383], %300 {strides = array<i32>} : memref<8x2304xbf16, #tpu.memory_space<vmem>>, vector<1x256xbf16>,
    %c6_384 = arith.constant 6 : index
    %c0_385 = arith.constant 0 : index
    %302 = vector.load %arg13[%c6_384, %c0_385] : memref<168x256xbf16, #tpu.memory_space<vmem>>, vector<1x256xbf16>
    %303 = arith.extf %302 : vector<1x256xbf16> to vector<1x256xf32>
    %c0_386 = arith.constant 0 : index
    %c0_387 = arith.constant 0 : index
    %c1024 = arith.constant 1024 : index
    %304 = vector.load %arg2[%c0_386, %c0_387, %c1024] : memref<1x1x2304xf32, #tpu.memory_space<vmem>>, vector<1x1x256xf32>
    %305 = vector.shape_cast %304 : vector<1x1x256xf32> to vector<1x256xf32>
    %306 = arith.addf %303, %305 : vector<1x256xf32>
    %c0_388 = arith.constant 0 : index
    %c0_389 = arith.constant 0 : index
    %c1024_390 = arith.constant 1024 : index
    %307 = vector.load %arg3[%c0_388, %c0_389, %c1024_390] : memref<1x1x2304xf32, #tpu.memory_space<vmem>>, vector<1x1x256xf32>
    %308 = vector.shape_cast %307 : vector<1x1x256xf32> to vector<1x256xf32>
    %309 = arith.mulf %306, %308 : vector<1x256xf32>
    %310 = arith.truncf %309 : vector<1x256xf32> to vector<1x256xbf16>
    %c0_391 = arith.constant 0 : index
    %c1024_392 = arith.constant 1024 : index
    %311 = vector.load %arg19[%c0_391, %c1024_392] : memref<8x2304xbf16, #tpu.memory_space<vmem>>, vector<1x256xbf16>
    tpu.vector_store %arg19[%c0_391, %c1024_392], %310 {strides = array<i32>} : memref<8x2304xbf16, #tpu.memory_space<vmem>>, vector<1x256xbf16>,
    %c7_393 = arith.constant 7 : index
    %c0_394 = arith.constant 0 : index
    %312 = vector.load %arg13[%c7_393, %c0_394] : memref<168x256xbf16, #tpu.memory_space<vmem>>, vector<1x256xbf16>
    %313 = arith.extf %312 : vector<1x256xbf16> to vector<1x256xf32>
    %c0_395 = arith.constant 0 : index
    %c0_396 = arith.constant 0 : index
    %c1280 = arith.constant 1280 : index
    %314 = vector.load %arg2[%c0_395, %c0_396, %c1280] : memref<1x1x2304xf32, #tpu.memory_space<vmem>>, vector<1x1x256xf32>
    %315 = vector.shape_cast %314 : vector<1x1x256xf32> to vector<1x256xf32>
    %316 = arith.addf %313, %315 : vector<1x256xf32>
    %c0_397 = arith.constant 0 : index
    %c0_398 = arith.constant 0 : index
    %c1280_399 = arith.constant 1280 : index
    %317 = vector.load %arg3[%c0_397, %c0_398, %c1280_399] : memref<1x1x2304xf32, #tpu.memory_space<vmem>>, vector<1x1x256xf32>
    %318 = vector.shape_cast %317 : vector<1x1x256xf32> to vector<1x256xf32>
    %319 = arith.mulf %316, %318 : vector<1x256xf32>
    %320 = arith.truncf %319 : vector<1x256xf32> to vector<1x256xbf16>
    %c0_400 = arith.constant 0 : index
    %c1280_401 = arith.constant 1280 : index
    %321 = vector.load %arg19[%c0_400, %c1280_401] : memref<8x2304xbf16, #tpu.memory_space<vmem>>, vector<1x256xbf16>
    tpu.vector_store %arg19[%c0_400, %c1280_401], %320 {strides = array<i32>} : memref<8x2304xbf16, #tpu.memory_space<vmem>>, vector<1x256xbf16>,
    %c10_402 = arith.constant 10 : index
    %c0_403 = arith.constant 0 : index
    %322 = vector.load %arg13[%c10_402, %c0_403] : memref<168x256xbf16, #tpu.memory_space<vmem>>, vector<1x256xbf16>
    %323 = arith.extf %322 : vector<1x256xbf16> to vector<1x256xf32>
    %c0_404 = arith.constant 0 : index
    %c0_405 = arith.constant 0 : index
    %c1536 = arith.constant 1536 : index
    %324 = vector.load %arg2[%c0_404, %c0_405, %c1536] : memref<1x1x2304xf32, #tpu.memory_space<vmem>>, vector<1x1x256xf32>
    %325 = vector.shape_cast %324 : vector<1x1x256xf32> to vector<1x256xf32>
    %326 = arith.addf %323, %325 : vector<1x256xf32>
    %c0_406 = arith.constant 0 : index
    %c0_407 = arith.constant 0 : index
    %c1536_408 = arith.constant 1536 : index
    %327 = vector.load %arg3[%c0_406, %c0_407, %c1536_408] : memref<1x1x2304xf32, #tpu.memory_space<vmem>>, vector<1x1x256xf32>
    %328 = vector.shape_cast %327 : vector<1x1x256xf32> to vector<1x256xf32>
    %329 = arith.mulf %326, %328 : vector<1x256xf32>
    %330 = arith.truncf %329 : vector<1x256xf32> to vector<1x256xbf16>
    %c0_409 = arith.constant 0 : index
    %c1536_410 = arith.constant 1536 : index
    %331 = vector.load %arg19[%c0_409, %c1536_410] : memref<8x2304xbf16, #tpu.memory_space<vmem>>, vector<1x256xbf16>
    tpu.vector_store %arg19[%c0_409, %c1536_410], %330 {strides = array<i32>} : memref<8x2304xbf16, #tpu.memory_space<vmem>>, vector<1x256xbf16>,
    %c11_411 = arith.constant 11 : index
    %c0_412 = arith.constant 0 : index
    %332 = vector.load %arg13[%c11_411, %c0_412] : memref<168x256xbf16, #tpu.memory_space<vmem>>, vector<1x256xbf16>
    %333 = arith.extf %332 : vector<1x256xbf16> to vector<1x256xf32>
    %c0_413 = arith.constant 0 : index
    %c0_414 = arith.constant 0 : index
    %c1792 = arith.constant 1792 : index
    %334 = vector.load %arg2[%c0_413, %c0_414, %c1792] : memref<1x1x2304xf32, #tpu.memory_space<vmem>>, vector<1x1x256xf32>
    %335 = vector.shape_cast %334 : vector<1x1x256xf32> to vector<1x256xf32>
    %336 = arith.addf %333, %335 : vector<1x256xf32>
    %c0_415 = arith.constant 0 : index
    %c0_416 = arith.constant 0 : index
    %c1792_417 = arith.constant 1792 : index
    %337 = vector.load %arg3[%c0_415, %c0_416, %c1792_417] : memref<1x1x2304xf32, #tpu.memory_space<vmem>>, vector<1x1x256xf32>
    %338 = vector.shape_cast %337 : vector<1x1x256xf32> to vector<1x256xf32>
    %339 = arith.mulf %336, %338 : vector<1x256xf32>
    %340 = arith.truncf %339 : vector<1x256xf32> to vector<1x256xbf16>
    %c0_418 = arith.constant 0 : index
    %c1792_419 = arith.constant 1792 : index
    %341 = vector.load %arg19[%c0_418, %c1792_419] : memref<8x2304xbf16, #tpu.memory_space<vmem>>, vector<1x256xbf16>
    tpu.vector_store %arg19[%c0_418, %c1792_419], %340 {strides = array<i32>} : memref<8x2304xbf16, #tpu.memory_space<vmem>>, vector<1x256xbf16>,
    %c12_420 = arith.constant 12 : index
    %c0_421 = arith.constant 0 : index
    %342 = vector.load %arg13[%c12_420, %c0_421] : memref<168x256xbf16, #tpu.memory_space<vmem>>, vector<1x256xbf16>
    %343 = arith.extf %342 : vector<1x256xbf16> to vector<1x256xf32>
    %c0_422 = arith.constant 0 : index
    %c0_423 = arith.constant 0 : index
    %c2048 = arith.constant 2048 : index
    %344 = vector.load %arg2[%c0_422, %c0_423, %c2048] : memref<1x1x2304xf32, #tpu.memory_space<vmem>>, vector<1x1x256xf32>
    %345 = vector.shape_cast %344 : vector<1x1x256xf32> to vector<1x256xf32>
    %346 = arith.addf %343, %345 : vector<1x256xf32>
    %c0_424 = arith.constant 0 : index
    %c0_425 = arith.constant 0 : index
    %c2048_426 = arith.constant 2048 : index
    %347 = vector.load %arg3[%c0_424, %c0_425, %c2048_426] : memref<1x1x2304xf32, #tpu.memory_space<vmem>>, vector<1x1x256xf32>
    %348 = vector.shape_cast %347 : vector<1x1x256xf32> to vector<1x256xf32>
    %349 = arith.mulf %346, %348 : vector<1x256xf32>
    %350 = arith.truncf %349 : vector<1x256xf32> to vector<1x256xbf16>
    %c0_427 = arith.constant 0 : index
    %c2048_428 = arith.constant 2048 : index
    %351 = vector.load %arg19[%c0_427, %c2048_428] : memref<8x2304xbf16, #tpu.memory_space<vmem>>, vector<1x256xbf16>
    tpu.vector_store %arg19[%c0_427, %c2048_428], %350 {strides = array<i32>} : memref<8x2304xbf16, #tpu.memory_space<vmem>>, vector<1x256xbf16>,
    %c0_429 = arith.constant 0 : index
    %c0_430 = arith.constant 0 : index
    %352 = vector.load %arg19[%c0_429, %c0_430] : memref<8x2304xbf16, #tpu.memory_space<vmem>>, vector<8x2304xbf16>
    %c0_431 = arith.constant 0 : index
    %c0_432 = arith.constant 0 : index
    %353 = vector.load %arg10[%c0_431, %c0_432] : memref<2304x256xbf16, #tpu.memory_space<vmem>>, vector<2304x256xbf16>
    %cst_433 = arith.constant dense<0.000000e+00> : vector<8x256xf32>
    %354 = tpu.matmul %352, %353, %cst_433 {dimension_numbers = #tpu.dot_dimension_numbers<[1], [0], [0], [1], [0, 0, 1, 1], [], []>} : vector<8x2304xbf16>, vector<2304x256xbf16>, vector<8x256xf32> -> vector<8x256xf32>
    %355 = arith.truncf %354 : vector<8x256xf32> to vector<8x256xbf16>
    %c0_434 = arith.constant 0 : index
    %c0_435 = arith.constant 0 : index
    %356 = vector.load %arg11[%c0_434, %c0_435] : memref<256x10xbf16, #tpu.memory_space<vmem>>, vector<256x10xbf16>
    %cst_436 = arith.constant dense<0.000000e+00> : vector<8x10xf32>
    %357 = tpu.matmul %355, %356, %cst_436 {dimension_numbers = #tpu.dot_dimension_numbers<[1], [0], [0], [1], [0, 0, 1, 1], [], []>} : vector<8x256xbf16>, vector<256x10xbf16>, vector<8x10xf32> -> vector<8x10xf32>
    %358 = vector.extract_strided_slice %357 {offsets = [0, 0], sizes = [1, 10], strides = [1, 1]} : vector<8x10xf32> to vector<1x10xf32>
    %c0_437 = arith.constant 0 : index
    %c0_438 = arith.constant 0 : index
    %c0_439 = arith.constant 0 : index
    %359 = vector.load %arg12[%c0_437, %c0_438, %c0_439] : memref<1x1x10xf32, #tpu.memory_space<vmem>>, vector<1x1x10xf32>
    %360 = vector.shape_cast %359 : vector<1x1x10xf32> to vector<1x10xf32>
    %361 = vector.shape_cast %358 : vector<1x10xf32> to vector<1x1x10xf32>
    tpu.vector_store %arg12[%c0_437, %c0_438, %c0_439], %361 {strides = array<i32>} : memref<1x1x10xf32, #tpu.memory_space<vmem>>, vector<1x1x10xf32>,
    return
  }
  func.func @transform_0(%arg0: i32) -> (i32, i32, i32) {
    %c0_i32 = arith.constant 0 : i32
    %c0_i32_0 = arith.constant 0 : i32
    %c0_i32_1 = arith.constant 0 : i32
    return %arg0, %c0_i32, %c0_i32_0 : i32, i32, i32
  }
  func.func @transform_1(%arg0: i32) -> (i32, i32, i32) {
    %c0_i32 = arith.constant 0 : i32
    %c0_i32_0 = arith.constant 0 : i32
    %c0_i32_1 = arith.constant 0 : i32
    return %arg0, %c0_i32, %c0_i32_0 : i32, i32, i32
  }
  func.func @transform_2(%arg0: i32) -> (i32, i32, i32) {
    %c0_i32 = arith.constant 0 : i32
    %c0_i32_0 = arith.constant 0 : i32
    %c0_i32_1 = arith.constant 0 : i32
    return %arg0, %c0_i32, %c0_i32_0 : i32, i32, i32
  }
  func.func @transform_3(%arg0: i32) -> (i32, i32) {
    %c0_i32 = arith.constant 0 : i32
    %c0_i32_0 = arith.constant 0 : i32
    %c0_i32_1 = arith.constant 0 : i32
    return %c0_i32, %c0_i32_0 : i32, i32
  }
  func.func @transform_4(%arg0: i32) -> (i32, i32, i32) {
    %c0_i32 = arith.constant 0 : i32
    %c0_i32_0 = arith.constant 0 : i32
    %c0_i32_1 = arith.constant 0 : i32
    %c0_i32_2 = arith.constant 0 : i32
    return %c0_i32, %c0_i32_0, %c0_i32_1 : i32, i32, i32
  }
  func.func @transform_5(%arg0: i32) -> (i32, i32, i32) {
    %c0_i32 = arith.constant 0 : i32
    %c0_i32_0 = arith.constant 0 : i32
    %c0_i32_1 = arith.constant 0 : i32
    %c0_i32_2 = arith.constant 0 : i32
    return %c0_i32, %c0_i32_0, %c0_i32_1 : i32, i32, i32
  }
  func.func @transform_6(%arg0: i32) -> (i32, i32, i32) {
    %c0_i32 = arith.constant 0 : i32
    %c0_i32_0 = arith.constant 0 : i32
    %c0_i32_1 = arith.constant 0 : i32
    %c0_i32_2 = arith.constant 0 : i32
    return %c0_i32, %c0_i32_0, %c0_i32_1 : i32, i32, i32
  }
  func.func @transform_7(%arg0: i32) -> (i32, i32, i32) {
    %c0_i32 = arith.constant 0 : i32
    %c0_i32_0 = arith.constant 0 : i32
    %c0_i32_1 = arith.constant 0 : i32
    %c0_i32_2 = arith.constant 0 : i32
    return %c0_i32, %c0_i32_0, %c0_i32_1 : i32, i32, i32
  }
  func.func @transform_8(%arg0: i32) -> (i32, i32, i32) {
    %c0_i32 = arith.constant 0 : i32
    %c0_i32_0 = arith.constant 0 : i32
    %c0_i32_1 = arith.constant 0 : i32
    %c0_i32_2 = arith.constant 0 : i32
    return %c0_i32, %c0_i32_0, %c0_i32_1 : i32, i32, i32
  }
  func.func @transform_9(%arg0: i32) -> (i32, i32) {
    %c0_i32 = arith.constant 0 : i32
    %c0_i32_0 = arith.constant 0 : i32
    %c0_i32_1 = arith.constant 0 : i32
    return %c0_i32, %c0_i32_0 : i32, i32
  }
  func.func @transform_10(%arg0: i32) -> (i32, i32) {
    %c0_i32 = arith.constant 0 : i32
    %c0_i32_0 = arith.constant 0 : i32
    %c0_i32_1 = arith.constant 0 : i32
    return %c0_i32, %c0_i32_0 : i32, i32
  }
  func.func @transform_11(%arg0: i32) -> (i32, i32, i32) {
    %c0_i32 = arith.constant 0 : i32
    %c0_i32_0 = arith.constant 0 : i32
    %c0_i32_1 = arith.constant 0 : i32
    return %arg0, %c0_i32, %c0_i32_0 : i32, i32, i32
  }
}

</mosaic_0001>

<bundles_post_ra>
// kernel: _lambda_.1
= control target key start
LH: loop header
LB: loop body
LE: loop exit
PB: predicated region body
PF: predicated region fallthrough
CT: control target
= control target key end

     0   :  { %s23912_s0 = inlined_call_operand.vmem [shape: bf16[2,144,27], index: 0, kind: input, shape index: {}]   ;;  %s23913_s1 = inlined_call_operand.vmem [shape: f32[2,1,2304], index: 1, kind: input, shape index: {}]   ;;  %s23914_s2 = inlined_call_operand.vmem [shape: f32[2,1,2304], index: 2, kind: input, shape index: {}]   ;;  %s23915_s3 = inlined_call_operand.vmem [shape: bf16[27,64], index: 3, kind: input, shape index: {}]   ;;  %s23916_s4 = inlined_call_operand.hbm [shape: bf16[3,384,128], index: 4, kind: input, shape index: {}]   ;;  %s23917_s5 = inlined_call_operand.hbm [shape: bf16[3,384,128], index: 5, kind: input, shape index: {}]   ;;  %s23918_s6 = inlined_call_operand.vmem [shape: bf16[3,384,256], index: 6, kind: input, shape index: {}]   ;;  %s23919_s7 = inlined_call_operand.vmem [shape: bf16[3,768,256], index: 7, kind: input, shape index: {}]   ;;  %s23920_s8 = inlined_call_operand.hbm [shape: bf16[3,768,256], index: 8, kind: input, shape index: {}]   ;;  %s23921_s9 = inlined_call_operand.hbm [shape: bf16[2304,256], index: 9, kind: input, shape index: {}]   ;;  %s23922_s10 = inlined_call_operand.vmem [shape: bf16[256,10], index: 10, kind: input, shape index: {}]   ;;  %s23923_s11 = inlined_call_operand.hbm [shape: f32[2,1,10], index: 11, kind: output, shape index: {}]  }
   0x1   :  { %23947 = sst [smem:[#allocation28_spill]] %s23923_s11 }
   0x2   :  { %16 = vsyncpa [#allocation10], 0 }
   0x3   :  { %17 = vsyncpa [#allocation13], 0 }
   0x4   :  { %18 = vsyncpa [#allocation16], 0 }
   0x5   :  { %19 = vsyncpa [#allocation11], 0 }
   0x6   :  { %21 = vsyncpa [#allocation11 + $0x1], 0  ;;  %s20228_s17 = smov 0   ;;  %s20230_s18 = smov 0  }
   0x7   :  { %s20232_s19 = smov 0   ;;  %s20234_s20 = smov 0  }
   0x8 LB: > { %23948 = sst [smem:[#allocation22_spill]] %s20141_s17  ;;  %s20249_s21 = sadd.s32 4294967295, %s20153_s20   ;;  %s20153_s20 = sphi %s20234_s20, %s24112_s20   ;;  %s20149_s19 = sphi %s20232_s19, %s24114_s19   ;;  %s20145_s18 = sphi %s20230_s18, %s24116_s18   ;;  %s20141_s17 = sphi %s20228_s17, %s24115_s17  }
   0x9   : > { %23949 = sst [smem:[#allocation23_spill]] %s20149_s19  ;;  %s15076_s22 = sadd.s32 4294967294, %s20153_s20  }
   0xa   : > { %23950 = sst [smem:[#allocation24_spill]] %s20153_s20  ;;  %s20253_s23 = sadd.s32 1, %s20153_s20  }
   0xb   : > { %23951 = sst [smem:[#allocation25_spill]] %s20253_s23  ;;  %s280_s24 = sadd.s32 1, %s20149_s19 }
   0xc   : > { %s277_s25 = ssub.s32 %s20153_s20, %s20253_s23  ;;  %p290_p0 = scmp.ne.s32.totalorder %s20149_s19, %s20145_s18 }
   0xd   : > { %p278_p1 = scmp.eq.s32.totalorder %s277_s25, 0  ;;  %p291_p2 = scmp.eq.s32.totalorder %s20249_s21, 1 }
   0xe   : > { %p296_p3 = scmp.ne.s32.totalorder %s20145_s18, %s20141_s17  ;;  %p297_p4 = scmp.eq.s32.totalorder %s15076_s22, 1 }
   0xf   : > { %s20264_s26 = scalar_select %p278_p1, %s20149_s19, %s280_s24  }
  0x10   : > { %p20266_p5 = por %p291_p2, %p290_p0  ;;  %p20270_p6 = por %p297_p4, %p296_p3 }
  0x11   : > { %23952 = sst [smem:[#allocation26_spill]] %s20264_s26  ;;  %p15077_p7 = scmp.ge.s32.totalorder %s20153_s20, 1 }
  0x12   : > { %s23953_s27 = scalar_select %p20266_p5, 1, 0 }
  0x13   : > { %s23954_s28 = scalar_select %p20270_p6, 1, 0 }
  0x14   : > { %p304_p8 = scmp.lt.s32.totalorder %s20153_s20, 3  ;;  %p23927_p9 = scmp.eq.s32.totalorder %s20249_s21, 0 }
  0x15   : > { %23955 = sst [smem:[#allocation27_spill]] %s23954_s28  ;;  %s20155_s30 = smov [#allocation12]  }
  0x16   : > { %p20277_p10 = pnand %p15077_p7, %p304_p8  ;;  %s332_s12 = sshll.u32 %s20155_s30, 4  ;;  %s20283_s12 = int_to_ptr.vmem [resolvable:$true] %s332_s12 }
  0x17   : > { %s20156_s14 = smov [#allocation9]   ;;  %s20157_s16 = smov [#allocation14]  }
  0x18   : > { %s23956_s29 = scalar_select %p20277_p10, 1, 0 }
  0x19   : > { %p18074_p11 = pneg %p20277_p10  ;;  %s319_s15 = sshll.u32 %s20156_s14, 4  ;;  %s20291_s15 = int_to_ptr.vmem [resolvable:$true] %s319_s15 }
  0x1a   : > { %s20293_s22 = sshll.u32 %s20157_s16, 4  ;;  %s19967_s26 = scalar_lea.hbm %s23917_s5, 9216  ;;  %s352_s22 = int_to_ptr.vmem [resolvable:$true] %s20293_s22 }
  0x1b   : > { %p20287_p12 = pnand %p23927_p9, %p18074_p11  ;;  %p19968_p13 = scmp.ne.s32.totalorder %s23917_s5, %s19967_s26 }
  0x1c   : > { %p19974_p3 = scmp.lt.u32.totalorder %s19967_s26, %s23917_s5 }
  0x1d   : > { %p20303_p0 = pneg %p20287_p12 }
  0x1f   : > { %p19970_p1 = pnand %p20303_p0, %p19968_p13 }
  0x21   : > { %p19971_p2 = pneg %p19970_p1 }
  0x23   : > { %p19976_p4 = pnand %p19974_p3, %p19971_p2 }
  0x25   : > { %19979 = shalt.err (!%p19976_p4)
}
  0x26   : > { %s19980_s19 = scalar_lea.vmem %s20283_s12, 9216  ;;  %p19988_p9 = scmp.lt.s32.totalorder %s20283_s12, %s20283_s12 }
  0x27   : > { %p19981_p7 = scmp.ne.s32.totalorder %s20283_s12, %s19980_s19  ;;  %p19989_p6 = scmp.lt.s32.totalorder %s19980_s19, %s19980_s19 }
  0x29   : > { %p19983_p8 = pnand %p19981_p7, %p20303_p0  ;;  %p19990_p13 = por %p19989_p6, %p19988_p9 }
  0x2b   : > { %p19984_p11 = pneg %p19983_p8 }
  0x2d   : > { %p19991_p1 = pnand %p19990_p13, %p19984_p11 }
  0x2f   : > { %19994 = shalt.err (!%p19991_p1)
}
  0x30   : > { %s20158_s24 = smov 64   ;;  %s20159_s26 = smov 4  }
  0x31   : > { %18080 = dma.hbm_to_vmem [thread:$0]  (!%p20287_p12), %s23917_s5, 9216, %s20283_s12, [#allocation13], %s20158_s24, %s20158_s24, %s20159_s26  }
  0x32   : > { %s19995_s28 = scalar_lea.hbm %s23916_s4, 9216 }
  0x33   : > { %p19996_p6 = scmp.ne.s32.totalorder %s23916_s4, %s19995_s28  ;;  %p20002_p3 = scmp.lt.u32.totalorder %s19995_s28, %s23916_s4 }
  0x35   : > { %p19998_p9 = pnand %p19996_p6, %p20303_p0 }
  0x37   : > { %p19999_p2 = pneg %p19998_p9 }
  0x39   : > { %p20004_p4 = pnand %p20002_p3, %p19999_p2 }
  0x3b   : > { %20007 = shalt.err (!%p20004_p4)
}
  0x3c   : > { %s20008_s12 = scalar_lea.vmem %s20291_s15, 9216  ;;  %p20016_p13 = scmp.lt.s32.totalorder %s20291_s15, %s20291_s15 }
  0x3d   : > { %p20009_p7 = scmp.ne.s32.totalorder %s20291_s15, %s20008_s12  ;;  %p20017_p1 = scmp.lt.s32.totalorder %s20008_s12, %s20008_s12 }
  0x3f   : > { %p20011_p8 = pnand %p20009_p7, %p20303_p0  ;;  %p20018_p6 = por %p20017_p1, %p20016_p13 }
  0x41   : > { %p20012_p11 = pneg %p20011_p8 }
  0x43   : > { %p20019_p9 = pnand %p20018_p6, %p20012_p11 }
  0x45   : > { %20022 = shalt.err (!%p20019_p9)
}
  0x46   : > { %18077 = dma.hbm_to_vmem [thread:$0]  (!%p20287_p12), %s23916_s4, 9216, %s20291_s15, [#allocation10], %s20158_s24, %s20158_s24, %s20159_s26  }
  0x47   : > { %s20023_s25 = scalar_lea.hbm %s23920_s8, 36864 }
  0x48   : > { %p20024_p2 = scmp.ne.s32.totalorder %s23920_s8, %s20023_s25  ;;  %p20030_p7 = scmp.lt.u32.totalorder %s20023_s25, %s23920_s8 }
  0x4a   : > { %p20026_p3 = pnand %p20024_p2, %p20303_p0 }
  0x4c   : > { %p20027_p4 = pneg %p20026_p3 }
  0x4e   : > { %p20032_p8 = pnand %p20030_p7, %p20027_p4 }
  0x50   : > { %20035 = shalt.err (!%p20032_p8)
}
  0x51   : > { %s20036_s12 = scalar_lea.vmem %s352_s22, 36864  ;;  %p20044_p6 = scmp.lt.s32.totalorder %s352_s22, %s352_s22 }
  0x52   : > { %p20037_p11 = scmp.ne.s32.totalorder %s352_s22, %s20036_s12  ;;  %p20045_p9 = scmp.lt.s32.totalorder %s20036_s12, %s20036_s12 }
  0x54   : > { %p20039_p13 = pnand %p20037_p11, %p20303_p0  ;;  %p20046_p5 = por %p20045_p9, %p20044_p6 }
  0x56   : > { %p20040_p1 = pneg %p20039_p13 }
  0x58   : > { %p20047_p10 = pnand %p20046_p5, %p20040_p1 }
  0x5a   : > { %20050 = shalt.err (!%p20047_p10)
}
  0x5b   : > { %s20160_s15 = smov 128   ;;  %s20161_s24 = smov 8  }
  0x5c   : > { %18083 = dma.hbm_to_vmem [thread:$0]  (!%p20287_p12), %s23920_s8, 36864, %s352_s22, [#allocation13], %s20160_s15, %s20160_s15, %s20161_s24  }
  0x5d   : > { %s20162_s17 = smov [#allocation15]   ;;  %s20051_s30 = scalar_lea.hbm %s23921_s9, 36864 }
  0x5e   : > { %s364_s20 = sshll.u32 %s20162_s17, 4  ;;  %p20052_p5 = scmp.ne.s32.totalorder %s23921_s9, %s20051_s30  ;;  %s365_s20 = int_to_ptr.vmem [resolvable:$true] %s364_s20 }
  0x5f   : > { %p20058_p3 = scmp.lt.u32.totalorder %s20051_s30, %s23921_s9 }
  0x60   : > { %p20054_p10 = pnand %p20052_p5, %p20303_p0 }
  0x62   : > { %p20055_p2 = pneg %p20054_p10 }
  0x64   : > { %p20060_p4 = pnand %p20058_p3, %p20055_p2 }
  0x66   : > { %20063 = shalt.err (!%p20060_p4)
}
  0x67   : > { %s20064_s22 = scalar_lea.vmem %s365_s20, 36864  ;;  %p20072_p13 = scmp.lt.s32.totalorder %s365_s20, %s365_s20 }
  0x68   : > { %p20065_p7 = scmp.ne.s32.totalorder %s365_s20, %s20064_s22  ;;  %p20073_p1 = scmp.lt.s32.totalorder %s20064_s22, %s20064_s22 }
  0x6a   : > { %p20067_p8 = pnand %p20065_p7, %p20303_p0  ;;  %p20074_p6 = por %p20073_p1, %p20072_p13 }
  0x6c   : > { %p20068_p11 = pneg %p20067_p8 }
  0x6e   : > { %p20075_p9 = pnand %p20074_p6, %p20068_p11 }
  0x70   : > { %20078 = shalt.err (!%p20075_p9)
}
  0x71   : > { %18086 = dma.hbm_to_vmem [thread:$0]  (!%p20287_p12), %s23921_s9, 36864, %s365_s20, [#allocation16], %s20160_s15, %s20160_s15, %s20161_s24  }
  0x72   : > { %p23959_p5 = scmp.ne.s32.totalorder %s23956_s29, 0 }
  0x73   : > { %p23960_p10 = scmp.eq.s32.totalorder (!%p23959_p5), %s20249_s21, 0 }
  0x74   : > { %405 = sbr.rel (%p23959_p5) target bundleno = 4399 (0x112f), region = 64 }
  0x7b   : > { %20124 = dma.done.wait (%p23960_p10), [#allocation10], 9216   ;;  %p23961_p0 = pmov %p23960_p10 }
  0x7d   : > { %20126 = vsyncadd (%p23961_p0), [#allocation10], 4294958080  ;;  %p23962_p2 = pmov %p23961_p0 }
  0x7e   : > { %p23963_p3 = pmov %p23961_p0 }
  0x7f   : > { %20128 = dma.done.wait (%p23962_p2), [#allocation13], 46080  }
  0x80   : > { %20130 = vsyncadd (%p23963_p3), [#allocation13], 4294921216  ;;  %p23964_p4 = pmov %p23961_p0 }
  0x81   : > { %p23965_p12 = pmov %p23961_p0 }
  0x82   : > { %20132 = dma.done.wait (%p23964_p4), [#allocation16], 36864  }
  0x83   : > { %20134 = vsyncadd (%p23965_p12), [#allocation16], 4294930432  ;;  %v20163_v0 = vmov 0.0   ;;  %vm23939_vm0 = vcmask 1044480   ;;  %p464_p7 = scmp.lt.s32.totalorder %s20249_s21, 1  ;;  %vm23935_vm1 = vmmov 0  }
  0x84   : > { %17385 = vmatprep.subr.bf16.mxu0 %v20163_v0  ;;  %17389 = vmatprep.mubr.msk.bf16.mxu0 %vm23935_vm1, %v20163_v0  ;;  %vm23938_vm2 = vcmask 1045504   ;;  %v20165_v1 = vmov 65535   ;;  %v18144_v3 = vld [vmem:[%s23915_s3] sm:$0xff]   ;;  %v18145_v5 = vld [vmem:[%s23915_s3 + $0x8] sm:$0x3f]   ;;  %vm556_vm3 = vcmask 220160  }
  0x85   : > { %s20403_s23 = scalar_select %p464_p7, %s20249_s21, 1  ;;  %v586_v2 = vsel %vm23939_vm0, 4294967295, %v20165_v1  ;;  %17386 = vmatpush3.bf16.msra.mxu0 %v18144_v3  ;;  %v18155_v9 = vld [vmem:[#allocation9 + $0x100] sm:$0xff]   ;;  %v18157_v11 = vld [vmem:[#allocation9 + $0x108] sm:$0xff]   ;;  %v20166_v20 = vmov 0   ;;  %v18159_v21 = vld [vmem:[#allocation9 + $0x110] sm:$0xff]  }
  0x86   : > { %v587_v4 = vsel %vm23938_vm2, %v586_v2, 0  ;;  %17387 = vmatprep.subr.bf16.mxu0 %v20163_v0  ;;  %v18156_v10 = vld [vmem:[#allocation9 + $0xc0] sm:$0xff]   ;;  %v18158_v12 = vld [vmem:[#allocation9 + $0xc8] sm:$0xff]   ;;  %815 = vst [vmem:[#allocation3 + $0x3c] sm:$0xff] %v20166_v20  ;;  %805 = vst [vmem:[#allocation3] sm:$0xff] %v20166_v20  ;;  %vm23934_vm5 = vcmask 1043459  }
  0x87   : > { %s18054_s29 = smul.u32 72, %s20403_s23  ;;  %v589_v6 = vand.u32 %v18145_v5, %v587_v4  ;;  %806 = vst [vmem:[#allocation3 + $0x8] sm:$0xf] %v20166_v20  ;;  %807 = vst [vmem:[#allocation3 + $0xc] sm:$0xff] %v20166_v20  ;;  %v18160_v22 = vld [vmem:[#allocation9 + $0xd0] sm:$0xff]   ;;  %v18161_v23 = vld [vmem:[#allocation9 + $0x118] sm:$0xff]  }
  0x88   : > { %808 = vst [vmem:[#allocation3 + $0x14] sm:$0xf] %v20166_v20  ;;  %809 = vst [vmem:[#allocation3 + $0x18] sm:$0xff] %v20166_v20  ;;  %v18162_v24 = vld [vmem:[#allocation9 + $0xd8] sm:$0xff]   ;;  %v18163_v25 = vld [vmem:[#allocation9 + $0x120] sm:$0xff]   ;;  %vm786_vm7 = vcmask 519168  }
  0x89   : > { %s20417_s25 = scalar_lea.vmem %s23912_s0, %s18054_s29  ;;  %17388 = vmatpush3.bf16.msra.mxu0 %v589_v6  ;;  %810 = vst [vmem:[#allocation3 + $0x20] sm:$0xf] %v20166_v20  ;;  %811 = vst [vmem:[#allocation3 + $0x24] sm:$0xff] %v20166_v20  ;;  %v18164_v26 = vld [vmem:[#allocation9 + $0xe0] sm:$0xff]   ;;  %vm883_vm4 = vsmask.f32 7950 }
  0x8a   : > { %v18146_v7 = vld [vmem:[%s20417_s25] sm:$0xff]   ;;  %v18147_v8 = vld [vmem:[%s20417_s25 + $0x8] sm:$0xff]   ;;  %16925 = vmatprep.subr.bf16.mxu0 %v18155_v9  ;;  %v18148_v13 = vld [vmem:[%s20417_s25 + $0x10] sm:$0xff]   ;;  %812 = vst [vmem:[#allocation3 + $0x2c] sm:$0xf] %v20166_v20  ;;  %vm882_vm11 = vcmask 519171  }
  0x8b   : > { %v18149_v14 = vld [vmem:[%s20417_s25 + $0x18] sm:$0xff]   ;;  %v18150_v15 = vld [vmem:[%s20417_s25 + $0x20] sm:$0xff]   ;;  %v18151_v16 = vld [vmem:[%s20417_s25 + $0x28] sm:$0xff]   ;;  %813 = vst [vmem:[#allocation3 + $0x30] sm:$0xff] %v20166_v20  ;;  %vm23940_vm8 = vsmask.f32 3328 }
  0x8c   : > { %17390 = vmatmul.mubr.msk.bf16.vlgmr.msra.gmra.mrb[0].mxu0 %vm556_vm3, %v18146_v7  ;;  %v18152_v17 = vld [vmem:[%s20417_s25 + $0x30] sm:$0xff]   ;;  %v18153_v18 = vld [vmem:[%s20417_s25 + $0x38] sm:$0xff]   ;;  %v18154_v19 = vld [vmem:[%s20417_s25 + $0x40] sm:$0xff]   ;;  %814 = vst [vmem:[#allocation3 + $0x38] sm:$0xf] %v20166_v20  ;;  %vm920_vm13 = vcmask 519170  }
  0x8d   : > { %17393 = vmatprep.mubr.msk.bf16.mxu0 %vm23935_vm1, %v20163_v0  ;;  %16926 = vmatpush3.bf16.msra.mxu0 %v18156_v10  ;;  %816 = vst [vmem:[#allocation3 + $0x44] sm:$0xf] %v20166_v20  ;;  %817 = vst [vmem:[#allocation3 + $0x48] sm:$0xff] %v20166_v20  ;;  %v18165_v28 = vld [vmem:[#allocation9 + $0x128] sm:$0xff]   ;;  %v18167_v30 = vld [vmem:[#allocation9 + $0x130] sm:$0xff]   ;;  %s18055_s30 = smul.u32 18, %s20403_s23 }
  0x8e   : > { %16927 = vmatprep.subr.bf16.mxu0 %v18157_v11  ;;  %818 = vst [vmem:[#allocation3 + $0x50] sm:$0xf] %v20166_v20  ;;  %819 = vst [vmem:[#allocation3 + $0x54] sm:$0xff] %v20166_v20  ;;  %v18166_v29 = vld [vmem:[#allocation9 + $0xe8] sm:$0xff]   ;;  %v18168_v31 = vld [vmem:[#allocation9 + $0xf0] sm:$0xff]   ;;  %s462_s22 = sand.u32 1, %s20145_s18  }
  0x8f   : > { %820 = vst [vmem:[#allocation3 + $0x5c] sm:$0xf] %v20166_v20  ;;  %821 = vst [vmem:[#allocation3 + $0x60] sm:$0xff] %v20166_v20  ;;  %v18169_v32 = vld [vmem:[#allocation9 + $0x138] sm:$0xff]   ;;  %v18171_v34 = vld [vmem:[#allocation9 + $0x40] sm:$0xff]   ;;  %s23514_s19 = scalar_lea.vmem %s23913_s1, %s18055_s30  ;;  %s23519_s26 = scalar_lea.vmem %s23914_s2, %s18055_s30 }
  0x90   : > { %822 = vst [vmem:[#allocation3 + $0x68] sm:$0xf] %v20166_v20  ;;  %823 = vst [vmem:[#allocation3 + $0x6c] sm:$0xff] %v20166_v20  ;;  %v18170_v33 = vld [vmem:[#allocation9 + $0xf8] sm:$0xff]   ;;  %17689 = vmatprep.subr.bf16.mxu1 %v18171_v34  ;;  %v18175_v35 = vld [vmem:[#allocation9] sm:$0xff]   ;;  %s463_s23 = scalar_lea.vmem [#allocation17], %s462_s22 }
  0x91   : > { %16928 = vmatpush3.bf16.msra.mxu0 %v18158_v12  ;;  %824 = vst [vmem:[#allocation3 + $0x74] sm:$0xf] %v20166_v20  ;;  %825 = vst [vmem:[#allocation3 + $0x78] sm:$0xff] %v20166_v20  ;;  %17697 = vmatpush3.bf16.msra.mxu1 %v18175_v35  ;;  %v18178_v36 = vld [vmem:[#allocation9 + $0x48] sm:$0xff]   ;;  %v18180_v38 = vld [vmem:[#allocation9 + $0x50] sm:$0xff]   ;;  %s14956_s11 = sshll.u32 %s463_s23, 4  ;;  %s23872_s11 = int_to_ptr.vmem [resolvable:$true] %s14956_s11 }
  0x92   : > { %826 = vst [vmem:[#allocation3 + $0x80] sm:$0xf] %v20166_v20  ;;  %827 = vst [vmem:[#allocation3 + $0x84] sm:$0xff] %v20166_v20  ;;  %16929 = vmatprep.subr.bf16.mxu0 %v18159_v21  ;;  %v18179_v37 = vld [vmem:[#allocation9 + $0x8] sm:$0xff]   ;;  %17690 = vmatprep.subr.bf16.mxu1 %v18178_v36  ;;  %v18181_v39 = vld [vmem:[#allocation9 + $0x10] sm:$0xff]   ;;  %s24106_s15 = sld [smem:[#allocation28_spill]] }
  0x93   : > { %828 = vst [vmem:[#allocation3 + $0x8c] sm:$0xf] %v20166_v20  ;;  %829 = vst [vmem:[#allocation3 + $0x90] sm:$0xff] %v20166_v20  ;;  %v18184_v40 = vld [vmem:[#allocation9 + $0x58] sm:$0xff]   ;;  %v18188_v42 = vld [vmem:[#allocation9 + $0x60] sm:$0xff]   ;;  %s20079_s17 = scalar_lea.vmem %s23872_s11, 16 }
  0x94   : > { %17394 = vmatmul.mubr.msk.bf16.gmra.mrb[4].mxu0 %vm556_vm3, %v18147_v8  ;;  %830 = vst [vmem:[#allocation3 + $0x98] sm:$0xf] %v20166_v20  ;;  %831 = vst [vmem:[#allocation3 + $0x9c] sm:$0xff] %v20166_v20  ;;  %v18185_v41 = vld [vmem:[#allocation9 + $0x18] sm:$0xff]   ;;  %v18189_v43 = vld [vmem:[#allocation9 + $0x20] sm:$0xff]   ;;  %p20080_p8 = scmp.ne.s32.totalorder %s23872_s11, %s20079_s17  ;;  %p24107_p11 = scmp.ne.s32.totalorder %s23953_s27, 0 }
  0x95   : > { %17397 = vmatprep.mubr.msk.bf16.mxu0 %vm23935_vm1, %v20163_v0  ;;  %832 = vst [vmem:[#allocation3 + $0xa4] sm:$0xf] %v20166_v20  ;;  %833 = vst [vmem:[#allocation3 + $0xa8] sm:$0xff] %v20166_v20  ;;  %16930 = vmatpush3.bf16.msra.mxu0 %v18160_v22  ;;  %v18191_v44 = vld [vmem:[#allocation9 + $0x68] sm:$0xff]   ;;  %v18194_v46 = vld [vmem:[#allocation9 + $0x70] sm:$0xff]   ;;  %s20167_s20 = smov [#allocation17]  }
  0x96   : > { %834 = vst [vmem:[#allocation3 + $0xb0] sm:$0xf] %v20166_v20  ;;  %835 = vst [vmem:[#allocation3 + $0xb4] sm:$0xff] %v20166_v20  ;;  %16931 = vmatprep.subr.bf16.mxu0 %v18161_v23  ;;  %17698 = vmatpush3.bf16.msra.mxu1 %v18179_v37  ;;  %v18193_v45 = vld [vmem:[#allocation9 + $0x28] sm:$0xff]   ;;  %v18196_v47 = vld [vmem:[#allocation9 + $0x30] sm:$0xff]   ;;  %p20081_p13 = pnand %p20080_p8, %p24107_p11  ;;  %s20083_s28 = sshll.u32 %s20167_s20, 4  ;;  %s20084_s28 = int_to_ptr.vmem [resolvable:$false] %s20083_s28 }
  0x97   : > { %836 = vst [vmem:[#allocation3 + $0xbc] sm:$0xf] %v20166_v20  ;;  %837 = vst [vmem:[#allocation3 + $0xc0] sm:$0xff] %v20166_v20  ;;  %17691 = vmatprep.subr.bf16.mxu1 %v18180_v38  ;;  %v18198_v48 = vld [vmem:[#allocation9 + $0x78] sm:$0xff]   ;;  %v18202_v50 = vld [vmem:[#allocation9 + $0x1c0] sm:$0xff]   ;;  %s20085_s25 = scalar_lea.vmem %s20084_s28, 32  ;;  %p20086_p6 = scmp.lt.s32.totalorder %s23872_s11, %s20084_s28 }
  0x98   : > { %838 = vst [vmem:[#allocation3 + $0xc8] sm:$0xf] %v20166_v20  ;;  %839 = vst [vmem:[#allocation3 + $0xcc] sm:$0xff] %v20166_v20  ;;  %v18199_v49 = vld [vmem:[#allocation9 + $0x38] sm:$0xff]   ;;  %vm858_vm9 = vsmask.f32 7440  ;;  %p20082_p1 = pneg %p20081_p13  ;;  %p20087_p9 = scmp.lt.s32.totalorder %s20085_s25, %s20079_s17 }
  0x99   : > { %840 = vst [vmem:[#allocation3 + $0xd4] sm:$0xf] %v20166_v20  ;;  %841 = vst [vmem:[#allocation3 + $0xd8] sm:$0xff] %v20166_v20  ;;  %16932 = vmatpush3.bf16.msra.mxu0 %v18162_v24  ;;  %vm23941_vm10 = vsmask.f32 256 }
  0x9a   : > { %842 = vst [vmem:[#allocation3 + $0xe0] sm:$0xf] %v20166_v20  ;;  %843 = vst [vmem:[#allocation3 + $0xe4] sm:$0xff] %v20166_v20  ;;  %16933 = vmatprep.subr.bf16.mxu0 %v18163_v25  ;;  %17699 = vmatpush3.bf16.msra.mxu1 %v18181_v39  ;;  %vm23937_vm12 = vsmask.f32 7946  ;;  %p20088_p5 = por %p20087_p9, %p20086_p6 }
  0x9b   : > { %844 = vst [vmem:[#allocation3 + $0xec] sm:$0xf] %v20166_v20  ;;  %845 = vst [vmem:[#allocation3 + $0xf0] sm:$0xff] %v20166_v20  ;;  %17692 = vmatprep.subr.bf16.mxu1 %v18184_v40  ;;  %vm23944_vm14 = vsmask.f32 1280 }
  0x9c   : > { %17398 = vmatmul.mubr.msk.bf16.gmra.mrb[8].mxu0 %vm556_vm3, %v18148_v13  ;;  %846 = vst [vmem:[#allocation3 + $0xf8] sm:$0xf] %v20166_v20  ;;  %847 = vst [vmem:[#allocation3 + $0xfc] sm:$0xff] %v20166_v20  ;;  %v923_v24 = vld [vmem:[#allocation3 + $0x24] sm:$0xc]  ;;  %p20089_p10 = pnand %p20088_p5, %p20082_p1 }
  0x9d   : > { %17401 = vmatprep.mubr.msk.bf16.mxu0 %vm23935_vm1, %v20163_v0  ;;  %848 = vst [vmem:[#allocation3 + $0x104] sm:$0xf] %v20166_v20  ;;  %849 = vst [vmem:[#allocation3 + $0x108] sm:$0xff] %v20166_v20  ;;  %16934 = vmatpush3.bf16.msra.mxu0 %v18164_v26  ;;  %v892_v36 = vld [vmem:[#allocation3 + $0x24] sm:$0x3] }
  0x9e   : > { %850 = vst [vmem:[#allocation3 + $0x110] sm:$0xf] %v20166_v20  ;;  %851 = vst [vmem:[#allocation3 + $0x114] sm:$0xff] %v20166_v20  ;;  %16935 = vmatprep.subr.bf16.mxu0 %v18165_v28  ;;  %17700 = vmatpush3.bf16.msra.mxu1 %v18185_v41  ;;  %vm934_vm2 = vsmask.f32 5392 }
  0x9f   : > { %852 = vst [vmem:[#allocation3 + $0x11c] sm:$0xf] %v20166_v20  ;;  %853 = vst [vmem:[#allocation3 + $0x120] sm:$0xff] %v20166_v20  ;;  %17693 = vmatprep.subr.bf16.mxu1 %v18188_v42  ;;  %vm23945_vm0 = vsmask.f32 2304 }
  0xa0   : > { %854 = vst [vmem:[#allocation3 + $0x128] sm:$0xf] %v20166_v20  ;;  %3835 = vst [vmem:[#allocation4] sm:$0xff] %v20166_v20 }
  0xa1   : > { %3836 = vst [vmem:[#allocation4 + $0x8] sm:$0xf] %v20166_v20  ;;  %3837 = vst [vmem:[#allocation4 + $0xc] sm:$0xff] %v20166_v20  ;;  %16936 = vmatpush3.bf16.msra.mxu0 %v18166_v29 }
  0xa2   : > { %3838 = vst [vmem:[#allocation4 + $0x14] sm:$0xf] %v20166_v20  ;;  %3839 = vst [vmem:[#allocation4 + $0x18] sm:$0xff] %v20166_v20  ;;  %16937 = vmatprep.subr.bf16.mxu0 %v18167_v30  ;;  %17701 = vmatpush3.bf16.msra.mxu1 %v18189_v43 }
  0xa3   : > { %3840 = vst [vmem:[#allocation4 + $0x20] sm:$0xf] %v20166_v20  ;;  %3841 = vst [vmem:[#allocation4 + $0x24] sm:$0xff] %v20166_v20  ;;  %17694 = vmatprep.subr.bf16.mxu1 %v18191_v44  ;;  %v929_v44 = vld [vmem:[#allocation3 + $0x3c] sm:$0x1] }
  0xa4   : > { %17402 = vmatmul.mubr.msk.bf16.gmra.mrb[12].mxu0 %vm556_vm3, %v18149_v14  ;;  %3842 = vst [vmem:[#allocation4 + $0x2c] sm:$0xf] %v20166_v20  ;;  %3843 = vst [vmem:[#allocation4 + $0x30] sm:$0xff] %v20166_v20  ;;  %v885_v14 = vld [vmem:[#allocation3 + $0xc] sm:$0x8] }
  0xa5   : > { %17405 = vmatprep.mubr.msk.bf16.mxu0 %vm23935_vm1, %v20163_v0  ;;  %3844 = vst [vmem:[#allocation4 + $0x38] sm:$0xf] %v20166_v20  ;;  %3845 = vst [vmem:[#allocation4 + $0x3c] sm:$0xff] %v20166_v20  ;;  %16938 = vmatpush3.bf16.msra.mxu0 %v18168_v31 }
  0xa6   : > { %3846 = vst [vmem:[#allocation4 + $0x44] sm:$0xf] %v20166_v20  ;;  %3847 = vst [vmem:[#allocation4 + $0x48] sm:$0xff] %v20166_v20  ;;  %16939 = vmatprep.subr.bf16.mxu0 %v18169_v32  ;;  %17702 = vmatpush3.bf16.msra.mxu1 %v18193_v45 }
  0xa7   : > { %3848 = vst [vmem:[#allocation4 + $0x50] sm:$0xf] %v20166_v20  ;;  %3849 = vst [vmem:[#allocation4 + $0x54] sm:$0xff] %v20166_v20  ;;  %17695 = vmatprep.subr.bf16.mxu1 %v18194_v46 }
  0xa8   : > { %3850 = vst [vmem:[#allocation4 + $0x5c] sm:$0xf] %v20166_v20  ;;  %3851 = vst [vmem:[#allocation4 + $0x60] sm:$0xff] %v20166_v20 }
  0xa9   : > { %5428 = vst [vmem:[#allocation5] sm:$0xff] %v20166_v20  ;;  %5429 = vst [vmem:[#allocation5 + $0x8] sm:$0xf] %v20166_v20  ;;  %16940 = vmatpush3.bf16.msra.mxu0 %v18170_v33 }
  0xaa   : > { %5430 = vst [vmem:[#allocation5 + $0xc] sm:$0xff] %v20166_v20  ;;  %5431 = vst [vmem:[#allocation5 + $0x14] sm:$0xf] %v20166_v20  ;;  %17425 = vmatprep.subr.bf16.mxu0 %v20163_v0  ;;  %17703 = vmatpush3.bf16.msra.mxu1 %v18196_v47 }
  0xab   : > { %5432 = vst [vmem:[#allocation5 + $0x18] sm:$0xff] %v20166_v20  ;;  %5433 = vst [vmem:[#allocation5 + $0x20] sm:$0xf] %v20166_v20  ;;  %17696 = vmatprep.subr.bf16.mxu1 %v18198_v48 }
  0xac   : > { %17406 = vmatmul.mubr.msk.bf16.gmra.mrb[16].mxu0 %vm556_vm3, %v18150_v15  ;;  %5434 = vst [vmem:[#allocation5 + $0x24] sm:$0xff] %v20166_v20  ;;  %5435 = vst [vmem:[#allocation5 + $0x2c] sm:$0xf] %v20166_v20 }
  0xad   : > { %17409 = vmatprep.mubr.msk.bf16.mxu0 %vm23935_vm1, %v20163_v0  ;;  %5436 = vst [vmem:[#allocation5 + $0x30] sm:$0xff] %v20166_v20  ;;  %5437 = vst [vmem:[#allocation5 + $0x38] sm:$0xf] %v20166_v20 }
  0xae   : > { %5438 = vst [vmem:[#allocation5 + $0x3c] sm:$0xff] %v20166_v20  ;;  %5439 = vst [vmem:[#allocation5 + $0x44] sm:$0xf] %v20166_v20  ;;  %17704 = vmatpush3.bf16.msra.mxu1 %v18199_v49 }
  0xaf   : > { %5440 = vst [vmem:[#allocation5 + $0x48] sm:$0xff] %v20166_v20  ;;  %5441 = vst [vmem:[#allocation5 + $0x50] sm:$0xf] %v20166_v20  ;;  %17127 = vmatprep.subr.bf16.mxu1 %v18202_v50 }
  0xb0   : > { %5442 = vst [vmem:[#allocation5 + $0x54] sm:$0xff] %v20166_v20  ;;  %5443 = vst [vmem:[#allocation5 + $0x5c] sm:$0xf] %v20166_v20 }
  0xb1   : > { %5444 = vst [vmem:[#allocation5 + $0x60] sm:$0xff] %v20166_v20  ;;  %7155 = vst [vmem:[#allocation6] sm:$0xff] %v20166_v20 }
  0xb2   : > { %7156 = vst [vmem:[#allocation6 + $0x8] sm:$0xff] %v20166_v20  ;;  %7161 = vst [vmem:[#allocation6 + $0x30] sm:$0xff] %v20166_v20 }
  0xb3   : > { %7162 = vst [vmem:[#allocation6 + $0x38] sm:$0xff] %v20166_v20  ;;  %7165 = vst [vmem:[#allocation6 + $0x50] sm:$0xff] %v20166_v20 }
  0xb4   : > { %17410 = vmatmul.mubr.msk.bf16.gmra.mrb[20].mxu0 %vm556_vm3, %v18151_v16  ;;  %7166 = vst [vmem:[#allocation6 + $0x58] sm:$0xff] %v20166_v20  ;;  %9737 = vst [vmem:[#allocation7] sm:$0xff] %v20166_v20 }
  0xb5   : > { %17413 = vmatprep.mubr.msk.bf16.mxu0 %vm23935_vm1, %v20163_v0  ;;  %9738 = vst [vmem:[#allocation7 + $0x8] sm:$0xff] %v20166_v20  ;;  %9743 = vst [vmem:[#allocation7 + $0x30] sm:$0xff] %v20166_v20 }
  0xb6   : > { %9744 = vst [vmem:[#allocation7 + $0x38] sm:$0xff] %v20166_v20  ;;  %9747 = vst [vmem:[#allocation7 + $0x50] sm:$0xff] %v20166_v20 }
  0xb7   : > { %9748 = vst [vmem:[#allocation7 + $0x58] sm:$0xff] %v20166_v20  ;;  %12186 = vst [vmem:[#allocation8] sm:$0xff] %v20166_v20 }
  0xb8   : > { %12187 = vst [vmem:[#allocation8 + $0x8] sm:$0xff] %v20166_v20  ;;  %12188 = vst [vmem:[#allocation8 + $0x10] sm:$0xff] %v20166_v20 }
  0xb9   : > { %12189 = vst [vmem:[#allocation8 + $0x18] sm:$0xff] %v20166_v20  ;;  %12190 = vst [vmem:[#allocation8 + $0x20] sm:$0xff] %v20166_v20 }
  0xba   : > { %12191 = vst [vmem:[#allocation8 + $0x28] sm:$0xff] %v20166_v20  ;;  %12192 = vst [vmem:[#allocation8 + $0x30] sm:$0xff] %v20166_v20 }
  0xbb   : > { %12193 = vst [vmem:[#allocation8 + $0x38] sm:$0xff] %v20166_v20  ;;  %12194 = vst [vmem:[#allocation8 + $0x40] sm:$0xff] %v20166_v20 }
  0xbc   : > { %17414 = vmatmul.mubr.msk.bf16.gmra.mrb[24].mxu0 %vm556_vm3, %v18152_v17  ;;  %vm20561_vm6 = vmand %vm23934_vm5, %vm883_vm4 }
  0xbd   : > { %17417 = vmatprep.mubr.msk.bf16.mxu0 %vm23935_vm1, %v20163_v0  ;;  %vm20572_vm15 = vmand %vm882_vm11, %vm883_vm4  ;;  %vm898_vm11 = vsmask.f32 4368 }
  0xbe   : > { %vm20578_vm5 = vmor %vm23940_vm8, %vm858_vm9  ;;  %vm970_vm8 = vsmask.f32 6416 }
  0xbf   : > { %vm20584_vm4 = vmand %vm920_vm13, %vm23937_vm12  ;;  %vm956_vm13 = vcmask 519169  }
  0xc4   : > { %17418 = vmatmul.mubr.msk.bf16.gmra.mrb[28].mxu0 %vm556_vm3, %v18153_v18 }
  0xc5   : > { %17421 = vmatprep.mubr.msk.bf16.mxu0 %vm23935_vm1, %v20163_v0  ;;  %vm889_vm1 = vcmask 517120  }
  0xc6   : > { %vm20592_vm9 = vmand %vm889_vm1, %vm23944_vm14  ;;  %vm23942_vm1 = vsmask.f32 7942 }
  0xcc   : > { %17422 = vmatmul.mubr.msk.bf16.gmra.mrb[32].mxu0 %vm556_vm3, %v18154_v19  ;;  %vm927_vm3 = vcmask 516096  }
  0xcd   : > { %vm20599_vm12 = vmand %vm927_vm3, %vm23941_vm10 }
  0xce   : > { %vm20610_vm3 = vmor %vm23941_vm10, %vm898_vm11  ;;  %vm23943_vm10 = vsmask.f32 7938 }
  0xcf   : > { %vm20619_vm11 = vmand %vm956_vm13, %vm23942_vm1 }
  0xd0   : > { %vm20642_vm13 = vmor %vm23944_vm14, %vm934_vm2 }
  0xd1   : > { %vm20651_vm1 = vmor %vm23945_vm0, %vm970_vm8  ;;  %vm23988_vm8 = vsmask.f32 3328 }
  0xd2   : > { %vm20658_vm2 = vmand %vm786_vm7, %vm23943_vm10 }
  0xd3   : > { %vm20704_vm10 = vmand %vm786_vm7, %vm23988_vm8  ;;  %vm998_vm8 = vcmask 518144  }
  0xd4   : > { %vm20749_vm14 = vmand %vm998_vm8, %vm23945_vm0 }
 0x15f   : > { %v625_v51 = vpop.f32.mrb[0].mxu0 }
 0x160   : > { %v696_v52 = vmax.f32 %v625_v51, 0.0  ;;  %v17391_v53 = vpop.f32.mrb[1].mxu0  ;;  %v1173_v51 = vld [vmem:[#allocation3 + $0xcc] sm:$0xc] }
 0x161   : > { %v628_v54 = vpop.f32.mrb[2].mxu0  ;;  %v959_v53 = vld [vmem:[#allocation3 + $0x3c] sm:$0xe] }
 0x162   : > { %v16850_v55 = vpack.c.bf16 %v696_v52, %v696_v52  ;;  %v697_v56 = vmax.f32 %v628_v54, 0.0  ;;  %v17392_v57 = vpop.f32.mrb[3].mxu0 }
 0x164   : > { %787 = vst.msk [vmem:[#allocation2] sm:$0xf] %vm786_vm7, %v16850_v55  ;;  %v16851_v58 = vpack.c.bf16 %v697_v56, %v697_v56 }
 0x166   : > { %788 = vst.msk [vmem:[#allocation2 + $0x8] sm:$0xf] %vm786_vm7, %v16851_v58 }
 0x167   : > { %v633_v59 = vpop.f32.mrb[4].mxu0 }
 0x168   : > { %v698_v60 = vmax.f32 %v633_v59, 0.0  ;;  %v17395_v61 = vpop.f32.mrb[5].mxu0 }
 0x169   : > { %v636_v62 = vpop.f32.mrb[6].mxu0 }
 0x16a   : > { %v16852_v63 = vpack.c.bf16 %v698_v60, %v698_v60  ;;  %v699_v1 = vmax.f32 %v636_v62, 0.0  ;;  %v17396_v2 = vpop.f32.mrb[7].mxu0 }
 0x16b   : > { %v855_v3 = vld [vmem:[#allocation2] sm:$0xf] }
 0x16c   : > { %v861_v4 = vshll.u32 %v855_v3, 16  ;;  %v864_v5 = vshrl.u32 %v855_v3, 16  ;;  %789 = vst.msk [vmem:[#allocation2 + $0x10] sm:$0xf] %vm786_vm7, %v16852_v63  ;;  %v16853_v6 = vpack.c.bf16 %v699_v1, %v699_v1 }
 0x16d   : > { %v856_v7 = vld [vmem:[#allocation2 + $0x8] sm:$0x3]  ;;  %v895_v8 = vld [vmem:[#allocation2 + $0x8] sm:$0xc] }
 0x16e   : > { %v863_v9 = vrot.slane %v861_v4, 5  ;;  %v866_v10 = vrot.slane %v864_v5, 4  ;;  %v870_v11 = vshll.u32 %v856_v7, 16  ;;  %v874_v12 = vshrl.u32 %v856_v7, 16  ;;  %790 = vst.msk [vmem:[#allocation2 + $0x18] sm:$0xf] %vm786_vm7, %v16853_v6 }
 0x16f   : > { %v901_v15 = vshrl.u32 %v895_v8, 16  ;;  %v641_v16 = vpop.f32.mrb[8].mxu0  ;;  %v904_v26 = vshll.u32 %v895_v8, 16 }
 0x170   : > { %v867_v18 = vor.u32 %v866_v10, %v863_v9  ;;  %v872_v19 = vrot.slane %v870_v11, 5  ;;  %v876_v20 = vrot.slane %v874_v12, 4  ;;  %v700_v21 = vmax.f32 %v641_v16, 0.0  ;;  %v17399_v22 = vpop.f32.mrb[9].mxu0 }
 0x171   : > { %v903_v25 = vrot.slane %v901_v15, 7  ;;  %v644_v28 = vpop.f32.mrb[10].mxu0  ;;  %v886_v29 = vsel %vm20572_vm15, %v863_v9, %v885_v14 }
 0x172   : > { %v868_v30 = vrot.slane %v867_v18, 4  ;;  %v877_v31 = vor.u32 %v876_v20, %v872_v19  ;;  %v16854_v32 = vpack.c.bf16 %v700_v21, %v700_v21  ;;  %v701_v33 = vmax.f32 %v644_v28, 0.0  ;;  %v17400_v34 = vpop.f32.mrb[11].mxu0  ;;  %887 = vst [vmem:[#allocation3 + $0xc] sm:$0x8] %v886_v29 }
 0x173   : > { %v896_v37 = vld [vmem:[#allocation2 + $0x10] sm:$0xf]  ;;  %v906_v38 = vor.u32 %v904_v26, %v903_v25  ;;  %v907_v55 = vrot.slane %v903_v25, 4 }
 0x174   : > { %v878_v39 = vrot.slane %v877_v31, 4  ;;  %v909_v40 = vshrl.u32 %v896_v37, 16  ;;  %791 = vst.msk [vmem:[#allocation2 + $0x20] sm:$0xf] %vm786_vm7, %v16854_v32  ;;  %v16855_v41 = vpack.c.bf16 %v701_v33, %v701_v33  ;;  %v912_v42 = vshll.u32 %v896_v37, 16 }
 0x175   : > { %v932_v45 = vld [vmem:[#allocation2 + $0x18] sm:$0xf]  ;;  %v873_v46 = vsel %vm20578_vm5, %v868_v30, %v872_v19  ;;  %v924_v47 = vsel %vm20584_vm4, %v906_v38, %v923_v24 }
 0x176   : > { %v911_v48 = vrot.slane %v909_v40, 7  ;;  %v937_v49 = vshrl.u32 %v932_v45, 16  ;;  %v940_v50 = vshll.u32 %v932_v45, 16  ;;  %792 = vst.msk [vmem:[#allocation2 + $0x28] sm:$0xf] %vm786_vm7, %v16855_v41  ;;  %v893_v52 = vsel %vm20592_vm9, %v878_v39, %v892_v36 }
 0x177   : > { %888 = vst.msk [vmem:[#allocation3 + $0x18] sm:$0xf] %vm786_vm7, %v873_v46  ;;  %925 = vst [vmem:[#allocation3 + $0x24] sm:$0xc] %v924_v47  ;;  %v649_v54 = vpop.f32.mrb[12].mxu0 }
 0x178   : > { %894 = vst [vmem:[#allocation3 + $0x24] sm:$0x3] %v893_v52  ;;  %v914_v56 = vor.u32 %v912_v42, %v911_v48  ;;  %v916_v57 = vrot.slane %v911_v48, 4  ;;  %v939_v58 = vrot.slane %v937_v49, 6  ;;  %v942_v59 = vrot.slane %v940_v50, 7  ;;  %v17403_v60 = vpop.f32.mrb[13].mxu0 }
 0x179   : > { %v702_v62 = vmax.f32 %v649_v54, 0.0  ;;  %v652_v63 = vpop.f32.mrb[14].mxu0  ;;  %v1238_v1 = vld [vmem:[#allocation3 + $0xc] sm:$0xf]  ;;  %v995_v54 = vld [vmem:[#allocation3 + $0x54] sm:$0xf] }
 0x17a   : > { %v930_v2 = vsel %vm20599_vm12, %v916_v57, %v929_v44  ;;  %v20625_v3 = vor.u32 %v942_v59, %v939_v58  ;;  %v703_v4 = vmax.f32 %v652_v63, 0.0  ;;  %v17404_v5 = vpop.f32.mrb[15].mxu0  ;;  %v915_v6 = vsel %vm20610_vm3, %v907_v55, %v914_v56 }
 0x17b   : > { %931 = vst [vmem:[#allocation3 + $0x3c] sm:$0x1] %v930_v2  ;;  %v933_v7 = vld [vmem:[#allocation2 + $0x20] sm:$0x3]  ;;  %v967_v8 = vld [vmem:[#allocation2 + $0x20] sm:$0xc]  ;;  %v16856_v9 = vpack.c.bf16 %v702_v62, %v702_v62 }
 0x17c   : > { %926 = vst.msk [vmem:[#allocation3 + $0x30] sm:$0xf] %vm786_vm7, %v915_v6  ;;  %v1272_v10 = vshll.u32 %v1238_v1, 16  ;;  %v1276_v11 = vshrl.u32 %v1238_v1, 16  ;;  %v944_v12 = vrot.slane %v20625_v3, 4  ;;  %v960_v14 = vsel %vm20619_vm11, %v20625_v3, %v959_v53 }
 0x17d   : > { %v946_v15 = vshrl.u32 %v933_v7, 16  ;;  %v949_v16 = vshll.u32 %v933_v7, 16  ;;  %961 = vst [vmem:[#allocation3 + $0x3c] sm:$0xe] %v960_v14  ;;  %v973_v18 = vshrl.u32 %v967_v8, 16  ;;  %v976_v19 = vshll.u32 %v967_v8, 16 }
 0x17e   : > { %v968_v20 = vld [vmem:[#allocation2 + $0x28] sm:$0xf]  ;;  %793 = vst.msk [vmem:[#allocation2 + $0x30] sm:$0xf] %vm786_vm7, %v16856_v9  ;;  %v16857_v21 = vpack.c.bf16 %v703_v4, %v703_v4  ;;  %v1239_v22 = vld [vmem:[#allocation3 + $0x18] sm:$0xf] }
 0x17f   : > { %v948_v24 = vrot.slane %v946_v15, 6  ;;  %v951_v25 = vrot.slane %v949_v16, 7  ;;  %v982_v26 = vshrl.u32 %v968_v20, 16  ;;  %v985_v28 = vshll.u32 %v968_v20, 16  ;;  %v20635_v29 = vld [vmem:[#allocation3 + $0x24] sm:$0xf] }
 0x180   : > { %v975_v30 = vrot.slane %v973_v18, 5  ;;  %v978_v31 = vrot.slane %v976_v19, 6  ;;  %794 = vst.msk [vmem:[#allocation2 + $0x38] sm:$0xf] %vm786_vm7, %v16857_v21  ;;  %v657_v32 = vpop.f32.mrb[16].mxu0  ;;  %v20638_v33 = vrot.slane %v1272_v10, 5 }
 0x181   : > { %v1278_v34 = vrot.slane %v1276_v11, 4  ;;  %v952_v36 = vor.u32 %v951_v25, %v948_v24  ;;  %v984_v37 = vrot.slane %v982_v26, 5  ;;  %v987_v38 = vrot.slane %v985_v28, 6  ;;  %v17407_v40 = vpop.f32.mrb[17].mxu0  ;;  %v1027_v7 = vld [vmem:[#allocation3 + $0x60] sm:$0x8] }
 0x182   : > { %v704_v39 = vmax.f32 %v657_v32, 0.0  ;;  %v979_v41 = vor.u32 %v978_v31, %v975_v30  ;;  %v660_v42 = vpop.f32.mrb[18].mxu0  ;;  %v1282_v46 = vshll.u32 %v1239_v22, 16  ;;  %v1286_v47 = vshrl.u32 %v1239_v22, 16 }
 0x183   : > { %v1279_v45 = vor.u32 %v1278_v34, %v20638_v33  ;;  %v20647_v48 = vor.u32 %v987_v38, %v984_v37  ;;  %v705_v50 = vmax.f32 %v660_v42, 0.0  ;;  %v17408_v52 = vpop.f32.mrb[19].mxu0  ;;  %v1292_v55 = vshll.u32 %v20635_v29, 16  ;;  %v20662_v58 = vld [vmem:[#allocation3 + $0x30] sm:$0xf] }
 0x184   : > { %v16858_v49 = vpack.c.bf16 %v704_v39, %v704_v39  ;;  %v980_v56 = vrot.slane %v979_v41, 4  ;;  %v1284_v60 = vrot.slane %v1282_v46, 5  ;;  %v1288_v62 = vrot.slane %v1286_v47, 4  ;;  %v20685_v42 = vld [vmem:[#allocation3 + $0x3c] sm:$0xf] }
 0x185   : > { %v1280_v59 = vrot.slane %v1279_v45, 4  ;;  %v990_v63 = vrot.slane %v20647_v48, 4  ;;  %v1003_v1 = vld [vmem:[#allocation2 + $0x30] sm:$0xf]  ;;  %v16859_v2 = vpack.c.bf16 %v705_v50, %v705_v50  ;;  %v20666_v3 = vrot.slane %v1292_v55, 5 }
 0x186   : > { %795 = vst.msk [vmem:[#allocation2 + $0x40] sm:$0xf] %vm786_vm7, %v16858_v49  ;;  %v20670_v4 = vsel %vm20642_vm13, %v944_v12, %v952_v36  ;;  %v1006_v5 = vshll.u32 %v1003_v1, 16  ;;  %v1009_v6 = vshrl.u32 %v1003_v1, 16  ;;  %v989_v8 = vsel %vm20651_vm1, %v980_v56, %v20647_v48  ;;  %v1056_v36 = vld [vmem:[#allocation3 + $0x78] sm:$0xc] }
 0x187   : > { %v1285_v9 = vsel %vm20578_vm5, %v1280_v59, %v1284_v60  ;;  %v1004_v10 = vld [vmem:[#allocation2 + $0x38] sm:$0x3]  ;;  %v1034_v11 = vld [vmem:[#allocation2 + $0x38] sm:$0xc]  ;;  %796 = vst.msk [vmem:[#allocation2 + $0x48] sm:$0xf] %vm786_vm7, %v16859_v2  ;;  %v996_v14 = vsel %vm20658_vm2, %v989_v8, %v995_v54  ;;  %v1289_v15 = vor.u32 %v1288_v62, %v1284_v60 }
 0x188   : > { %v1296_v12 = vshrl.u32 %v20635_v29, 16  ;;  %v1302_v16 = vshll.u32 %v20662_v58, 16  ;;  %1537 = vst.msk [vmem:[#allocation3 + $0x10] sm:$0xf] %vm786_vm7, %v1285_v9  ;;  %v1008_v18 = vrot.slane %v1006_v5, 5  ;;  %v1011_v19 = vrot.slane %v1009_v6, 4 }
 0x189   : > { %v1015_v20 = vshll.u32 %v1004_v10, 16  ;;  %v1019_v21 = vshrl.u32 %v1004_v10, 16  ;;  %v665_v22 = vpop.f32.mrb[20].mxu0  ;;  %997 = vst [vmem:[#allocation3 + $0x54] sm:$0xf] %v996_v14  ;;  %v1037_v24 = vshrl.u32 %v1034_v11, 16 }
 0x18a   : > { %v1040_v25 = vshll.u32 %v1034_v11, 16  ;;  %v706_v26 = vmax.f32 %v665_v22, 0.0  ;;  %v17411_v28 = vpop.f32.mrb[21].mxu0  ;;  %v1290_v30 = vrot.slane %v1289_v15, 4  ;;  %v1012_v31 = vor.u32 %v1011_v19, %v1008_v18  ;;  %v964_v10 = vld [vmem:[#allocation3 + $0x48] sm:$0xf] }
 0x18b   : > { %v1028_v32 = vsel %vm20572_vm15, %v1008_v18, %v1027_v7  ;;  %v1017_v29 = vrot.slane %v1015_v20, 5  ;;  %v1021_v34 = vrot.slane %v1019_v21, 4  ;;  %v668_v37 = vpop.f32.mrb[22].mxu0  ;;  %v1039_v38 = vrot.slane %v1037_v24, 7 }
 0x18c   : > { %1029 = vst [vmem:[#allocation3 + $0x60] sm:$0x8] %v1028_v32  ;;  %v16860_v39 = vpack.c.bf16 %v706_v26, %v706_v26  ;;  %v707_v40 = vmax.f32 %v668_v37, 0.0  ;;  %v17412_v41 = vpop.f32.mrb[23].mxu0  ;;  %v1295_v45 = vsel %vm20578_vm5, %v1290_v30, %v20666_v3  ;;  %v1013_v46 = vrot.slane %v1012_v31, 4 }
 0x18d   : > { %v1022_v47 = vor.u32 %v1021_v34, %v1017_v29  ;;  %v1035_v49 = vld [vmem:[#allocation2 + $0x40] sm:$0xf]  ;;  %v1298_v50 = vrot.slane %v1296_v12, 4  ;;  %v1304_v52 = vrot.slane %v1302_v16, 5  ;;  %1538 = vst.msk [vmem:[#allocation3 + $0x1c] sm:$0xf] %vm786_vm7, %v1295_v45  ;;  %v1042_v54 = vor.u32 %v1040_v25, %v1039_v38 }
 0x18e   : > { %v1043_v55 = vrot.slane %v1039_v38, 4  ;;  %v1045_v56 = vshrl.u32 %v1035_v49, 16  ;;  %v1048_v59 = vshll.u32 %v1035_v49, 16  ;;  %797 = vst.msk [vmem:[#allocation2 + $0x50] sm:$0xf] %vm786_vm7, %v16860_v39  ;;  %v1018_v60 = vsel %vm20578_vm5, %v1013_v46, %v1017_v29 }
 0x18f   : > { %v20694_v62 = vrot.slane %v1022_v47, 4  ;;  %v1063_v1 = vld [vmem:[#allocation2 + $0x48] sm:$0xf]  ;;  %v16861_v2 = vpack.c.bf16 %v707_v40, %v707_v40  ;;  %v1299_v5 = vor.u32 %v1298_v50, %v20666_v3  ;;  %1030 = vst.msk [vmem:[#allocation3 + $0x6c] sm:$0xf] %vm786_vm7, %v1018_v60  ;;  %v1057_v6 = vsel %vm20584_vm4, %v1042_v54, %v1056_v36  ;;  %v673_v3 = vpop.f32.mrb[24].mxu0 }
 0x190   : > { %v20700_v7 = vrot.slane %v1045_v56, 7  ;;  %v1066_v8 = vshrl.u32 %v1063_v1, 16  ;;  %v1069_v9 = vshll.u32 %v1063_v1, 16  ;;  %1058 = vst [vmem:[#allocation3 + $0x78] sm:$0xc] %v1057_v6  ;;  %v1306_v15 = vshrl.u32 %v20662_v58, 16 }
 0x191   : > { %798 = vst.msk [vmem:[#allocation2 + $0x58] sm:$0xf] %vm786_vm7, %v16861_v2  ;;  %v1300_v14 = vrot.slane %v1299_v5, 4  ;;  %v1312_v12 = vshll.u32 %v20685_v42, 16  ;;  %v1316_v16 = vshrl.u32 %v20685_v42, 16  ;;  %v17415_v22 = vpop.f32.mrb[25].mxu0  ;;  %v965_v37 = vsel %vm20704_vm10, %v20670_v4, %v964_v10 }
 0x192   : > { %v1050_v18 = vor.u32 %v1048_v59, %v20700_v7  ;;  %v1052_v19 = vrot.slane %v20700_v7, 4  ;;  %v1068_v20 = vrot.slane %v1066_v8, 6  ;;  %v1071_v21 = vrot.slane %v1069_v9, 7  ;;  %v1831_v24 = vld [vmem:[#allocation3 + $0xc] sm:$0x88]  ;;  %v676_v26 = vpop.f32.mrb[26].mxu0 }
 0x193   : > { %v708_v25 = vmax.f32 %v673_v3, 0.0  ;;  %v1305_v28 = vsel %vm20578_vm5, %v1300_v14, %v1304_v52  ;;  %v1308_v30 = vrot.slane %v1306_v15, 4  ;;  %v20716_v58 = vrot.slane %v1312_v12, 5  ;;  %v17416_v34 = vpop.f32.mrb[27].mxu0  ;;  %966 = vst [vmem:[#allocation3 + $0x48] sm:$0xf] %v965_v37 }
 0x194   : > { %v1051_v31 = vsel %vm20610_vm3, %v1043_v55, %v1050_v18  ;;  %v20720_v32 = vor.u32 %v1071_v21, %v1068_v20  ;;  %v709_v29 = vmax.f32 %v676_v26, 0.0  ;;  %1539 = vst.msk [vmem:[#allocation3 + $0x28] sm:$0xf] %vm786_vm7, %v1305_v28  ;;  %v1745_v36 = vld [vmem:[#allocation3 + $0x18] sm:$0xff]  ;;  %v20731_v59 = vld [vmem:[#allocation3 + $0x54] sm:$0xf] }
 0x195   : > { %1059 = vst.msk [vmem:[#allocation3 + $0x84] sm:$0xf] %vm786_vm7, %v1051_v31  ;;  %v1064_v38 = vld [vmem:[#allocation2 + $0x50] sm:$0x3]  ;;  %v1091_v39 = vld [vmem:[#allocation2 + $0x50] sm:$0xc]  ;;  %v16862_v40 = vpack.c.bf16 %v708_v25, %v708_v25  ;;  %v1309_v41 = vor.u32 %v1308_v30, %v1304_v52  ;;  %v15128_v42 = vcombine.low %v1831_v24, %v1745_v36  ;;  %v15129_v45 = vcombine.high %v1831_v24, %v1745_v36 }
 0x196   : > { %v1073_v46 = vrot.slane %v20720_v32, 4  ;;  %v1075_v47 = vshrl.u32 %v1064_v38, 16  ;;  %v1078_v49 = vshll.u32 %v1064_v38, 16  ;;  %v1094_v50 = vshrl.u32 %v1091_v39, 16  ;;  %v1088_v6 = vld [vmem:[#allocation3 + $0x9c] sm:$0xf] }
 0x197   : > { %v1097_v54 = vshll.u32 %v1091_v39, 16  ;;  %799 = vst.msk [vmem:[#allocation2 + $0x60] sm:$0xf] %vm786_vm7, %v16862_v40  ;;  %v16863_v55 = vpack.c.bf16 %v709_v29, %v709_v29  ;;  %v1310_v56 = vrot.slane %v1309_v41, 4  ;;  %v20729_v4 = vrot.slane %v15128_v42, 3  ;;  %v681_v3 = vpop.f32.mrb[28].mxu0 }
 0x198   : > { %v1077_v60 = vrot.slane %v1075_v47, 6  ;;  %v1080_v1 = vrot.slane %v1078_v49, 7  ;;  %v1096_v52 = vrot.slane %v1094_v50, 5  ;;  %v1092_v2 = vld [vmem:[#allocation2 + $0x58] sm:$0xf]  ;;  %v20733_v5 = vrot.slane %v15129_v45, 3 }
 0x199   : > { %v1099_v8 = vrot.slane %v1097_v54, 6  ;;  %v1103_v9 = vshrl.u32 %v1092_v2, 16  ;;  %v1106_v10 = vshll.u32 %v1092_v2, 16  ;;  %800 = vst.msk [vmem:[#allocation2 + $0x68] sm:$0xf] %vm786_vm7, %v16863_v55  ;;  %v1315_v14 = vsel %vm20578_vm5, %v1310_v56, %v20716_v58  ;;  %v17419_v18 = vpop.f32.mrb[29].mxu0 }
 0x19a   : > { %v1081_v15 = vor.u32 %v1080_v1, %v1077_v60  ;;  %v710_v12 = vmax.f32 %v681_v3, 0.0  ;;  %1540 = vst.msk [vmem:[#allocation3 + $0x34] sm:$0xf] %vm786_vm7, %v1315_v14  ;;  %v1318_v20 = vrot.slane %v1316_v16, 4  ;;  %v1332_v21 = vshll.u32 %v20731_v59, 16  ;;  %v684_v26 = vpop.f32.mrb[30].mxu0 }
 0x19b   : > { %v1100_v22 = vor.u32 %v1099_v8, %v1096_v52  ;;  %v1105_v24 = vrot.slane %v1103_v9, 5  ;;  %v1108_v25 = vrot.slane %v1106_v10, 6  ;;  %v1336_v28 = vshrl.u32 %v20731_v59, 16  ;;  %v17420_v34 = vpop.f32.mrb[31].mxu0  ;;  %v1243_v36 = vld [vmem:[#allocation3 + $0x48] sm:$0xf] }
 0x19c   : > { %v1082_v30 = vsel %vm20642_vm13, %v1073_v46, %v1081_v15  ;;  %v16864_v31 = vpack.c.bf16 %v710_v12, %v710_v12  ;;  %v711_v29 = vmax.f32 %v684_v26, 0.0  ;;  %v1319_v37 = vor.u32 %v1318_v20, %v20716_v58  ;;  %v1000_v38 = vld [vmem:[#allocation3 + $0x60] sm:$0x7]  ;;  %v1114_v42 = vld [vmem:[#allocation3 + $0xa8] sm:$0xf] }
 0x19d   : > { %v1089_v16 = vsel %vm20704_vm10, %v1082_v30, %v1088_v6  ;;  %v1101_v39 = vrot.slane %v1100_v22, 4  ;;  %v1109_v41 = vor.u32 %v1108_v25, %v1105_v24  ;;  %v1117_v45 = vld [vmem:[#allocation3 + $0xb4] sm:$0x7]  ;;  %v1322_v46 = vshll.u32 %v1243_v36, 16  ;;  %v1144_v49 = vld [vmem:[#allocation3 + $0xb4] sm:$0x8] }
 0x19e   : > { %1090 = vst [vmem:[#allocation3 + $0x9c] sm:$0xf] %v1089_v16  ;;  %v1120_v47 = vld [vmem:[#allocation2 + $0x60] sm:$0xf]  ;;  %801 = vst.msk [vmem:[#allocation2 + $0x70] sm:$0xf] %vm786_vm7, %v16864_v31  ;;  %v16865_v58 = vpack.c.bf16 %v711_v29, %v711_v29  ;;  %v1001_v14 = vsel %vm20749_vm14, %v990_v63, %v1000_v38 }
 0x19f   : > { %v1320_v50 = vrot.slane %v1319_v37, 4  ;;  %v1326_v54 = vshrl.u32 %v1243_v36, 16  ;;  %v20754_v55 = vrot.slane %v1332_v21, 5  ;;  %v1110_v56 = vsel %vm20651_vm1, %v1101_v39, %v1109_v41  ;;  %v1747_v2 = vld [vmem:[#allocation3 + $0x24] sm:$0xff]  ;;  %v689_v22 = vpop.f32.mrb[32].mxu0 }
 0x1a0   : > { %v1111_v60 = vrot.slane %v1109_v41, 4  ;;  %v1123_v1 = vshll.u32 %v1120_v47, 16  ;;  %v1126_v52 = vshrl.u32 %v1120_v47, 16  ;;  %v1115_v6 = vsel %vm20658_vm2, %v1110_v56, %v1114_v42  ;;  %v1121_v8 = vld [vmem:[#allocation2 + $0x68] sm:$0x3]  ;;  %v17423_v31 = vpop.f32.mrb[33].mxu0 }
 0x1a1   : > { %v1151_v9 = vld [vmem:[#allocation2 + $0x68] sm:$0xc]  ;;  %802 = vst.msk [vmem:[#allocation2 + $0x78] sm:$0xf] %vm786_vm7, %v16865_v58  ;;  %v20761_v10 = vrot.slane %v1322_v46, 5  ;;  %v20763_v3 = vrot.slane %v1326_v54, 4 }
 0x1a2   : > { %1116 = vst [vmem:[#allocation3 + $0xa8] sm:$0xf] %v1115_v6  ;;  %v1118_v15 = vsel %vm20749_vm14, %v1111_v60, %v1117_v45  ;;  %v1125_v12 = vrot.slane %v1123_v1, 5  ;;  %v1128_v18 = vrot.slane %v1126_v52, 4  ;;  %v1132_v20 = vshll.u32 %v1121_v8, 16  ;;  %v1749_v21 = vld [vmem:[#allocation3 + $0x30] sm:$0xff] }
 0x1a3   : > { %1002 = vst [vmem:[#allocation3 + $0x60] sm:$0x7] %v1001_v14  ;;  %1119 = vst [vmem:[#allocation3 + $0xb4] sm:$0x7] %v1118_v15  ;;  %v1136_v24 = vshrl.u32 %v1121_v8, 16  ;;  %v1154_v25 = vshrl.u32 %v1151_v9, 16  ;;  %v15132_v30 = vcombine.high %v1747_v2, %v1749_v21  ;;  %v15131_v34 = vcombine.low %v1747_v2, %v1749_v21 }
 0x1a4   : > { %v1157_v26 = vshll.u32 %v1151_v9, 16  ;;  %v1129_v48 = vor.u32 %v1128_v18, %v1125_v12  ;;  %v1145_v63 = vsel %vm20572_vm15, %v1125_v12, %v1144_v49  ;;  %v1134_v29 = vrot.slane %v1132_v20, 5  ;;  %v692_v36 = vpop.f32.mrb[34].mxu0  ;;  %v18177_v60 = vld [vmem:[#allocation9 + $0x140] sm:$0xff]   ;;  %v18186_v31 = vld [vmem:[#allocation9 + $0x148] sm:$0xff]  }
 0x1a5   : > { %1146 = vst [vmem:[#allocation3 + $0xb4] sm:$0x8] %v1145_v63  ;;  %v1138_v37 = vrot.slane %v1136_v24, 4  ;;  %v1156_v38 = vrot.slane %v1154_v25, 7  ;;  %v20773_v16 = vrot.slane %v15132_v30, 3  ;;  %v712_v39 = vmax.f32 %v689_v22, 0.0 }
 0x1a6   : > { %v17424_v41 = vpop.f32.mrb[35].mxu0  ;;  %v1130_v42 = vrot.slane %v1129_v48, 4  ;;  %v1152_v45 = vld [vmem:[#allocation2 + $0x70] sm:$0xf]  ;;  %v20775_v46 = vrot.slane %v15131_v34, 3  ;;  %v713_v47 = vmax.f32 %v692_v36, 0.0  ;;  %v1325_v13 = vsel %vm20578_vm5, %v1320_v50, %v20761_v10 }
 0x1a7   : > { %v1139_v49 = vor.u32 %v1138_v37, %v1134_v29  ;;  %v20780_v58 = vor.u32 %v1157_v26, %v1156_v38  ;;  %v1160_v54 = vrot.slane %v1156_v38, 4  ;;  %v1162_v56 = vshrl.u32 %v1152_v45, 16  ;;  %1541 = vst.msk [vmem:[#allocation3 + $0x40] sm:$0xf] %vm786_vm7, %v1325_v13  ;;  %v1246_v21 = vld [vmem:[#allocation3 + $0x6c] sm:$0xf] }
 0x1a8   : > { %v1135_v1 = vsel %vm20578_vm5, %v1130_v42, %v1134_v29  ;;  %v1165_v52 = vshll.u32 %v1152_v45, 16  ;;  %v1180_v2 = vld [vmem:[#allocation2 + $0x78] sm:$0xf]  ;;  %vm23993_vm15 = vcmask 1044480   ;;  %v16866_v18 = vpack.c.bf16 %v712_v39, %v712_v39  ;;  %v1031_v22 = vld [vmem:[#allocation3 + $0x78] sm:$0x3] }
 0x1a9   : > { %v2035_v6 = vsel %vm23993_vm15, %v20733_v5, %v20773_v16  ;;  %vm23994_vm0 = vmmov %vm23993_vm15  ;;  %v20791_v8 = vrot.slane %v1139_v49, 4  ;;  %1147 = vst.msk [vmem:[#allocation3 + $0xc0] sm:$0xf] %vm786_vm7, %v1135_v1  ;;  %v20794_v9 = vrot.slane %v1162_v56, 7  ;;  %v1183_v14 = vshrl.u32 %v1180_v2, 16  ;;  %v18195_v13 = vld [vmem:[#allocation9 + $0x150] sm:$0xff]  }
 0x1aa   : > { %v2032_v50 = vsel %vm23994_vm0, %v20729_v4, %v20775_v46  ;;  %v1186_v15 = vshll.u32 %v1180_v2, 16  ;;  %2302 = vmatprep.mubr.bf16.mxu0 %v2035_v6  ;;  %v1245_v12 = vld [vmem:[#allocation3 + $0x60] sm:$0xf]  ;;  %v16867_v20 = vpack.c.bf16 %v713_v47, %v713_v47  ;;  %v1329_v5 = vor.u32 %v20763_v3, %v20761_v10  ;;  %803 = vst.msk [vmem:[#allocation2 + $0x80] sm:$0xf] %vm786_vm7, %v16866_v18  ;;  %v18201_v18 = vld [vmem:[#allocation9 + $0x158] sm:$0xff]  }
 0x1ab   : > { %2303 = vmatmul.mubr.bf16.vlgmr.msra.gmra.mrb[36].mxu0 %v2032_v50  ;;  %v1338_v4 = vrot.slane %v1336_v28, 4  ;;  %v1167_v24 = vor.u32 %v1165_v52, %v20794_v9  ;;  %v1169_v25 = vrot.slane %v20794_v9, 4  ;;  %v1185_v26 = vrot.slane %v1183_v14, 6  ;;  %v1060_v3 = vld [vmem:[#allocation3 + $0x90] sm:$0x1] }
 0x1ac   : > { %v1188_v30 = vrot.slane %v1186_v15, 7  ;;  %17426 = vmatpush3.bf16.msra.mxu0 %v18177_v60  ;;  %804 = vst.msk [vmem:[#allocation2 + $0x88] sm:$0xf] %vm786_vm7, %v16867_v20  ;;  %v1330_v48 = vrot.slane %v1329_v5, 4  ;;  %v1342_v59 = vshll.u32 %v1245_v12, 16  ;;  %v1346_v28 = vshrl.u32 %v1245_v12, 16 }
 0x1ad   : > { %17427 = vmatprep.subr.bf16.mxu0 %v20163_v0  ;;  %v1339_v10 = vor.u32 %v1338_v4, %v20754_v55  ;;  %v1085_v63 = vld [vmem:[#allocation3 + $0x90] sm:$0xe]  ;;  %v1168_v29 = vsel %vm20610_vm3, %v1160_v54, %v1167_v24  ;;  %v1352_v36 = vshll.u32 %v1246_v21, 16  ;;  %v1356_v37 = vshrl.u32 %v1246_v21, 16  ;;  %v1248_v38 = vld [vmem:[#allocation3 + $0x84] sm:$0xf]  ;;  %vm23999_vm3 = vmmov %vm23994_vm0 }
 0x1ae   : > { %v20808_v34 = vor.u32 %v1188_v30, %v1185_v26  ;;  %v20810_v39 = vld [vmem:[#allocation3 + $0x9c] sm:$0xf]  ;;  %1176 = vst.msk [vmem:[#allocation3 + $0xd8] sm:$0xf] %vm786_vm7, %v1168_v29  ;;  %v1335_v41 = vsel %vm20578_vm5, %v1330_v48, %v20754_v55  ;;  %v1344_v45 = vrot.slane %v1342_v59, 5  ;;  %v1348_v47 = vrot.slane %v1346_v28, 4 }
 0x1af   : > { %v1340_v42 = vrot.slane %v1339_v10, 4  ;;  %v1148_v49 = vld [vmem:[#allocation3 + $0xcc] sm:$0x3]  ;;  %1542 = vst.msk [vmem:[#allocation3 + $0x4c] sm:$0xf] %vm786_vm7, %v1335_v41  ;;  %v1354_v56 = vrot.slane %v1352_v36, 5  ;;  %v1032_v60 = vsel %vm20592_vm9, %v20694_v62, %v1031_v22  ;;  %v1061_v62 = vsel %vm20599_vm12, %v1052_v19, %v1060_v3 }
 0x1b0   : > { %v1190_v54 = vrot.slane %v20808_v34, 4  ;;  %17428 = vmatpush3.bf16.msra.mxu0 %v18186_v31  ;;  %v1358_v1 = vrot.slane %v1356_v37, 4  ;;  %v1349_v52 = vor.u32 %v1348_v47, %v1344_v45  ;;  %1033 = vst [vmem:[#allocation3 + $0x78] sm:$0x3] %v1032_v60  ;;  %v1372_v2 = vshll.u32 %v1248_v38, 16 }
 0x1b1   : > { %v1345_v55 = vsel %vm20578_vm5, %v1340_v42, %v1344_v45  ;;  %v1376_v6 = vshrl.u32 %v1248_v38, 16  ;;  %17429 = vmatprep.subr.bf16.mxu0 %v20163_v0  ;;  %v1177_v50 = vld [vmem:[#allocation3 + $0xe4] sm:$0x1]  ;;  %v1202_v9 = vld [vmem:[#allocation3 + $0xe4] sm:$0xe]  ;;  %v1086_v15 = vsel %vm20619_vm11, %v20720_v32, %v1085_v63  ;;  %v1392_v12 = vshll.u32 %v20810_v39, 16 }
 0x1b2   : > { %1543 = vst.msk [vmem:[#allocation3 + $0x58] sm:$0xf] %vm786_vm7, %v1345_v55  ;;  %v1359_v14 = vor.u32 %v1358_v1, %v1354_v56  ;;  %v1350_v20 = vrot.slane %v1349_v52, 4  ;;  %v20833_v5 = vrot.slane %v1372_v2, 5  ;;  %1062 = vst [vmem:[#allocation3 + $0x90] sm:$0x1] %v1061_v62  ;;  %v1149_v19 = vsel %vm20592_vm9, %v20791_v8, %v1148_v49 }
 0x1b3   : > { %1087 = vst [vmem:[#allocation3 + $0x90] sm:$0xe] %v1086_v15  ;;  %v20835_v21 = vrot.slane %v1376_v6, 4  ;;  %v1396_v4 = vshrl.u32 %v20810_v39, 16  ;;  %v1181_v7 = vld [vmem:[#allocation2 + $0x80] sm:$0x3]  ;;  %v1174_v32 = vsel %vm20584_vm4, %v20780_v58, %v1173_v51  ;;  %v1178_v26 = vsel %vm20599_vm12, %v1169_v25, %v1177_v50  ;;  %vm23995_vm12 = vmmov %vm23994_vm0 }
 0x1b4   : > { %v1208_v22 = vld [vmem:[#allocation2 + $0x80] sm:$0xc]  ;;  %v1209_v24 = vld [vmem:[#allocation2 + $0x88] sm:$0xf]  ;;  %17430 = vmatpush3.bf16.msra.mxu0 %v18195_v13  ;;  %v1203_v30 = vsel %vm20619_vm11, %v20808_v34, %v1202_v9  ;;  %v1192_v31 = vshrl.u32 %v1181_v7, 16  ;;  %v1195_v48 = vshll.u32 %v1181_v7, 16  ;;  %v1355_v43 = vsel %vm20578_vm5, %v1350_v20, %v1354_v56  ;;  %vm23996_vm4 = vmmov %vm23994_vm0 }
 0x1b5   : > { %v1211_v10 = vshrl.u32 %v1208_v22, 16  ;;  %v1214_v59 = vshll.u32 %v1208_v22, 16  ;;  %17431 = vmatprep.subr.bf16.mxu0 %v20163_v0  ;;  %1150 = vst [vmem:[#allocation3 + $0xcc] sm:$0x3] %v1149_v19  ;;  %1175 = vst [vmem:[#allocation3 + $0xcc] sm:$0xc] %v1174_v32  ;;  %v1379_v2 = vor.u32 %v20835_v21, %v20833_v5 }
 0x1b6   : > { %1179 = vst [vmem:[#allocation3 + $0xe4] sm:$0x1] %v1178_v26  ;;  %1204 = vst [vmem:[#allocation3 + $0xe4] sm:$0xe] %v1203_v30  ;;  %v1220_v35 = vshrl.u32 %v1209_v24, 16  ;;  %v1223_v23 = vshll.u32 %v1209_v24, 16 }
 0x1b7   : > { %v1751_v58 = vld [vmem:[#allocation3 + $0x3c] sm:$0xff]  ;;  %v1360_v8 = vrot.slane %v1359_v14, 4  ;;  %v1194_v25 = vrot.slane %v1192_v31, 6  ;;  %v1197_v61 = vrot.slane %v1195_v48, 7  ;;  %v1213_v28 = vrot.slane %v1211_v10, 5  ;;  %v1753_v63 = vld [vmem:[#allocation3 + $0x48] sm:$0xff]  ;;  %vm23997_vm9 = vmmov %vm23994_vm0 }
 0x1b8   : > { %v1216_v3 = vrot.slane %v1214_v59, 6  ;;  %1544 = vst.msk [vmem:[#allocation3 + $0x64] sm:$0xf] %vm786_vm7, %v1355_v43  ;;  %v1222_v29 = vrot.slane %v1220_v35, 5  ;;  %v1225_v36 = vrot.slane %v1223_v23, 6  ;;  %v20853_v37 = vcombine.high %v1751_v58, %v1753_v63  ;;  %17432 = vmatpush3.bf16.msra.mxu0 %v18201_v18  ;;  %v18207_v42 = vld [vmem:[#allocation9 + $0x160] sm:$0xff]   ;;  %vm24000_vm11 = vmmov %vm23994_vm0 }
 0x1b9   : > { %v20855_v38 = vcombine.low %v1751_v58, %v1753_v63  ;;  %v1247_v41 = vld [vmem:[#allocation3 + $0x78] sm:$0xf]  ;;  %v1198_v45 = vor.u32 %v1197_v61, %v1194_v25  ;;  %v1205_v47 = vld [vmem:[#allocation3 + $0xf0] sm:$0xf]  ;;  %17433 = vmatprep.subr.bf16.mxu0 %v20163_v0  ;;  %v1231_v60 = vld [vmem:[#allocation3 + $0xfc] sm:$0xf] }
 0x1ba   : > { %v1217_v13 = vor.u32 %v1216_v3, %v1213_v28  ;;  %v1362_v49 = vshll.u32 %v1247_v41, 16  ;;  %v1366_v51 = vshrl.u32 %v1247_v41, 16  ;;  %v20858_v56 = vor.u32 %v1225_v36, %v1222_v29  ;;  %v1249_v52 = vld [vmem:[#allocation3 + $0x90] sm:$0xf]  ;;  %v18218_v20 = vld [vmem:[#allocation9 + $0x168] sm:$0xff]   ;;  %v18226_v26 = vld [vmem:[#allocation9 + $0x170] sm:$0xff]  }
 0x1bb   : > { %v2041_v1 = vrot.slane %v20853_v37, 3  ;;  %v2039_v55 = vrot.slane %v20855_v38, 3  ;;  %v1199_v6 = vsel %vm20642_vm13, %v1190_v54, %v1198_v45  ;;  %v1755_v34 = vld [vmem:[#allocation3 + $0x54] sm:$0xff]  ;;  %v1380_v7 = vrot.slane %v1379_v2, 4  ;;  %v1251_v22 = vld [vmem:[#allocation3 + $0xa8] sm:$0xf]  ;;  %vm24001_vm13 = vmmov %vm23994_vm0 }
 0x1bc   : > { %v1218_v50 = vrot.slane %v1217_v13, 4  ;;  %v1364_v9 = vrot.slane %v1362_v49, 5  ;;  %v1368_v14 = vrot.slane %v1366_v51, 4  ;;  %v1206_v62 = vsel %vm20704_vm10, %v1199_v6, %v1205_v47  ;;  %17434 = vmatpush3.bf16.msra.mxu0 %v18207_v42  ;;  %v1252_v32 = vld [vmem:[#allocation3 + $0xb4] sm:$0xf]  ;;  %v18229_v63 = vld [vmem:[#allocation9 + $0x178] sm:$0xff]  }
 0x1bd   : > { %v2042_v15 = vsel %vm23994_vm0, %v20773_v16, %v2041_v1  ;;  %v2040_v18 = vsel %vm23995_vm12, %v20775_v46, %v2039_v55  ;;  %1207 = vst [vmem:[#allocation3 + $0xf0] sm:$0xf] %v1206_v62  ;;  %17435 = vmatprep.subr.bf16.mxu0 %v20163_v0  ;;  %v1382_v24 = vshll.u32 %v1249_v52, 16  ;;  %v1386_v53 = vshrl.u32 %v1249_v52, 16  ;;  %v1253_v10 = vld [vmem:[#allocation3 + $0xc0] sm:$0xf]  ;;  %vm24003_vm12 = vmmov %vm23994_vm0 }
 0x1be   : > { %v1227_v44 = vsel %vm20651_vm1, %v1218_v50, %v20858_v56  ;;  %2310 = vmatprep.mubr.bf16.mxu0 %v2042_v15  ;;  %v1365_v54 = vsel %vm20578_vm5, %v1360_v8, %v1364_v9  ;;  %v1369_v21 = vor.u32 %v1368_v14, %v1364_v9  ;;  %v1394_v19 = vrot.slane %v1392_v12, 5  ;;  %v1254_v43 = vld [vmem:[#allocation3 + $0xcc] sm:$0xf]  ;;  %v1255_v49 = vld [vmem:[#allocation3 + $0xd8] sm:$0xf]  ;;  %vm23998_vm1 = vmmov %vm23994_vm0 }
 0x1bf   : > { %v1232_v16 = vsel %vm20658_vm2, %v1227_v44, %v1231_v60  ;;  %2311 = vmatmul.mubr.bf16.gmra.mrb[40].mxu0 %v2040_v18  ;;  %v1757_v46 = vld [vmem:[#allocation3 + $0x60] sm:$0xff]  ;;  %1545 = vst.msk [vmem:[#allocation3 + $0x70] sm:$0xf] %vm786_vm7, %v1365_v54  ;;  %v1398_v57 = vrot.slane %v1396_v4, 4  ;;  %v1384_v59 = vrot.slane %v1382_v24, 5  ;;  %v1388_v35 = vrot.slane %v1386_v53, 4  ;;  %vm24002_vm2 = vmmov %vm23994_vm0 }
 0x1c0   : > { %1233 = vst [vmem:[#allocation3 + $0xfc] sm:$0xf] %v1232_v16  ;;  %v20885_v30 = vcombine.high %v1755_v34, %v1757_v46  ;;  %v20887_v31 = vcombine.low %v1755_v34, %v1757_v46  ;;  %v1370_v48 = vrot.slane %v1369_v21, 4  ;;  %v1402_v23 = vshll.u32 %v1251_v22, 16  ;;  %17436 = vmatpush3.bf16.msra.mxu0 %v18218_v20  ;;  %v1256_v2 = vld [vmem:[#allocation3 + $0xe4] sm:$0xf] }
 0x1c1   : > { %v1406_v58 = vshrl.u32 %v1251_v22, 16  ;;  %v1399_v61 = vor.u32 %v1398_v57, %v1394_v19  ;;  %17437 = vmatprep.subr.bf16.mxu0 %v20163_v0  ;;  %v1385_v39 = vsel %vm20578_vm5, %v1380_v7, %v1384_v59  ;;  %v1389_v4 = vor.u32 %v1388_v35, %v1384_v59  ;;  %v19936_v53 = vld [vmem:[#allocation9 + $0x40] sm:$0xff]  }
 0x1c2   : > { %v2047_v12 = vrot.slane %v20885_v30, 3  ;;  %v2045_v8 = vrot.slane %v20887_v31, 3  ;;  %v1375_v25 = vsel %vm20578_vm5, %v1370_v48, %v20833_v5  ;;  %v1404_v28 = vrot.slane %v1402_v23, 5  ;;  %1547 = vst.msk [vmem:[#allocation3 + $0x88] sm:$0xf] %vm786_vm7, %v1385_v39 }
 0x1c3   : > { %1546 = vst.msk [vmem:[#allocation3 + $0x7c] sm:$0xf] %vm786_vm7, %v1375_v25  ;;  %v1408_v3 = vrot.slane %v1406_v58, 4  ;;  %v1400_v36 = vrot.slane %v1399_v61, 4  ;;  %v1412_v41 = vshll.u32 %v1252_v32, 16  ;;  %v1390_v42 = vrot.slane %v1389_v4, 4 }
 0x1c4   : > { %v2048_v29 = vsel %vm23996_vm4, %v2041_v1, %v2047_v12  ;;  %v2046_v5 = vsel %vm23997_vm9, %v2039_v55, %v2045_v8  ;;  %v1416_v47 = vshrl.u32 %v1252_v32, 16  ;;  %v1422_v13 = vshll.u32 %v1253_v10, 16  ;;  %17438 = vmatpush3.bf16.msra.mxu0 %v18226_v26  ;;  %v1257_v48 = vld [vmem:[#allocation3 + $0xf0] sm:$0xf]  ;;  %v20981_v40 = vld [vmem:[#allocation3 + $0xc] sm:$0xf]  ;;  %vm24006_vm9 = vmmov %vm23994_vm0 }
 0x1c5   : > { %2318 = vmatprep.mubr.bf16.mxu0 %v2048_v29  ;;  %v1409_v45 = vor.u32 %v1408_v3, %v1404_v28  ;;  %v1405_v51 = vsel %vm20578_vm5, %v1400_v36, %v1404_v28  ;;  %v1414_v60 = vrot.slane %v1412_v41, 5  ;;  %v1426_v1 = vshrl.u32 %v1253_v10, 16  ;;  %17439 = vmatprep.subr.bf16.mxu0 %v20163_v0  ;;  %v18203_v28 = vld [vmem:[#allocation9 + $0x180] sm:$0xff]  }
 0x1c6   : > { %v1432_v52 = vshll.u32 %v1254_v43, 16  ;;  %v1395_v55 = vsel %vm20578_vm5, %v1390_v42, %v1394_v19  ;;  %1549 = vst.msk [vmem:[#allocation3 + $0xa0] sm:$0xf] %vm786_vm7, %v1405_v51  ;;  %v1418_v50 = vrot.slane %v1416_v47, 4  ;;  %v1424_v9 = vrot.slane %v1422_v13, 5  ;;  %v1759_v14 = vld [vmem:[#allocation3 + $0x6c] sm:$0xff] }
 0x1c7   : > { %2319 = vmatmul.mubr.bf16.gmra.mrb[44].mxu0 %v2046_v5  ;;  %v1410_v6 = vrot.slane %v1409_v45, 4  ;;  %1548 = vst.msk [vmem:[#allocation3 + $0x94] sm:$0xf] %vm786_vm7, %v1395_v55  ;;  %v1428_v62 = vrot.slane %v1426_v1, 4  ;;  %v1436_v18 = vshrl.u32 %v1254_v43, 16  ;;  %v1442_v20 = vshll.u32 %v1255_v49, 16 }
 0x1c8   : > { %v1434_v15 = vrot.slane %v1432_v52, 5  ;;  %v1419_v34 = vor.u32 %v1418_v50, %v1414_v60  ;;  %v1446_v54 = vshrl.u32 %v1255_v49, 16  ;;  %v1452_v21 = vshll.u32 %v1256_v2, 16  ;;  %17440 = vmatpush3.bf16.msra.mxu0 %v18229_v63  ;;  %v1258_v36 = vld [vmem:[#allocation3 + $0xfc] sm:$0xf] }
 0x1c9   : > { %v1415_v44 = vsel %vm20578_vm5, %v1410_v6, %v1414_v60  ;;  %v1429_v22 = vor.u32 %v1428_v62, %v1424_v9  ;;  %v1438_v16 = vrot.slane %v1436_v18, 4  ;;  %v1444_v46 = vrot.slane %v1442_v20, 5  ;;  %17026 = vmatprep.subr.bf16.mxu0 %v19936_v53  ;;  %v20927_v25 = vld [vmem:[#allocation3 + $0x84] sm:$0xff]  ;;  %v18209_v62 = vld [vmem:[#allocation9 + $0x1d0] sm:$0xff]  }
 0x1ca   : > { %v20916_v7 = vld [vmem:[#allocation3 + $0x78] sm:$0xff]  ;;  %1550 = vst.msk [vmem:[#allocation3 + $0xac] sm:$0xf] %vm786_vm7, %v1415_v44  ;;  %v1456_v24 = vshrl.u32 %v1256_v2, 16  ;;  %v1420_v26 = vrot.slane %v1419_v34, 4  ;;  %v1448_v57 = vrot.slane %v1446_v54, 4 }
 0x1cb   : > { %v20920_v19 = vcombine.high %v1759_v14, %v20916_v7  ;;  %v20923_v32 = vcombine.low %v1759_v14, %v20916_v7  ;;  %v1430_v10 = vrot.slane %v1429_v22, 4  ;;  %v1439_v59 = vor.u32 %v1438_v16, %v1434_v15  ;;  %v18206_v14 = vld [vmem:[#allocation9 + $0x188] sm:$0xff]   ;;  %v1234_v44 = vld [vmem:[#allocation3 + $0x108] sm:$0x7] }
 0x1cc   : > { %v1454_v35 = vrot.slane %v1452_v21, 5  ;;  %v1458_v23 = vrot.slane %v1456_v24, 4  ;;  %v1425_v61 = vsel %vm20578_vm5, %v1420_v26, %v1424_v9  ;;  %v1449_v39 = vor.u32 %v1448_v57, %v1444_v46 }
 0x1cd   : > { %v2053_v58 = vrot.slane %v20920_v19, 3  ;;  %v2051_v43 = vrot.slane %v20923_v32, 3  ;;  %v1767_v4 = vld [vmem:[#allocation3 + $0x9c] sm:$0xff]  ;;  %1551 = vst.msk [vmem:[#allocation3 + $0xb8] sm:$0xf] %vm786_vm7, %v1425_v61  ;;  %v1435_v3 = vsel %vm20578_vm5, %v1430_v10, %v1434_v15  ;;  %v1440_v63 = vrot.slane %v1439_v59, 4 }
 0x1ce   : > { %v1459_v29 = vor.u32 %v1458_v23, %v1454_v35  ;;  %v1462_v5 = vshll.u32 %v1257_v48, 16  ;;  %v1765_v45 = vld [vmem:[#allocation3 + $0x90] sm:$0xff]  ;;  %1552 = vst.msk [vmem:[#allocation3 + $0xc4] sm:$0xf] %vm786_vm7, %v1435_v3  ;;  %v1450_v47 = vrot.slane %v1449_v39, 4  ;;  %v1466_v13 = vshrl.u32 %v1257_v48, 16 }
 0x1cf   : > { %v2054_v41 = vsel %vm23998_vm1, %v2047_v12, %v2053_v58  ;;  %v2052_v42 = vsel %vm23999_vm3, %v2045_v8, %v2051_v43  ;;  %v20942_v49 = vcombine.high %v20927_v25, %v1765_v45  ;;  %v15204_v51 = vcombine.high %v1765_v45, %v1767_v4  ;;  %v18205_v8 = vld [vmem:[#allocation9 + $0x1c8] sm:$0xff]   ;;  %vm24007_vm1 = vmmov %vm23994_vm0 }
 0x1d0   : > { %2326 = vmatprep.mubr.bf16.mxu0 %v2054_v41  ;;  %v15203_v60 = vcombine.low %v1765_v45, %v1767_v4  ;;  %v20945_v1 = vcombine.low %v20927_v25, %v1765_v45  ;;  %v1445_v52 = vsel %vm20578_vm5, %v1440_v63, %v1444_v46  ;;  %v1455_v2 = vsel %vm20578_vm5, %v1450_v47, %v1454_v35  ;;  %v18213_v63 = vld [vmem:[#allocation9 + $0x198] sm:$0xff]   ;;  %v1565_v45 = vld [vmem:[#allocation3 + $0x18] sm:$0xf]  ;;  %vm24008_vm3 = vmmov %vm23994_vm0 }
 0x1d1   : > { %2327 = vmatmul.mubr.bf16.gmra.mrb[48].mxu0 %v2052_v42  ;;  %v1769_v12 = vld [vmem:[#allocation3 + $0xa8] sm:$0xff]  ;;  %v1460_v55 = vrot.slane %v1459_v29, 4  ;;  %v1464_v6 = vrot.slane %v1462_v5, 5  ;;  %v2059_v50 = vrot.slane %v20942_v49, 3  ;;  %2810 = vmatprep.mubr.bf16.mxu1 %v15204_v51  ;;  %1553 = vst.msk [vmem:[#allocation3 + $0xd0] sm:$0xf] %vm786_vm7, %v1445_v52 }
 0x1d2   : > { %v20952_v9 = vcombine.high %v1767_v4, %v1769_v12  ;;  %1554 = vst.msk [vmem:[#allocation3 + $0xdc] sm:$0xf] %vm786_vm7, %v1455_v2  ;;  %2811 = vmatmul.mubr.bf16.vlgmr.msra.gmra.mrb[0].mxu1 %v15203_v60  ;;  %v1468_v18 = vrot.slane %v1466_v13, 4  ;;  %v1472_v20 = vshll.u32 %v1258_v36, 16  ;;  %v1228_v34 = vrot.slane %v20858_v56, 4  ;;  %v18210_v56 = vld [vmem:[#allocation9 + $0x190] sm:$0xff]  }
 0x1d3   : > { %v1465_v15 = vsel %vm20578_vm5, %v1460_v55, %v1464_v6  ;;  %v2060_v54 = vsel %vm24000_vm11, %v2053_v58, %v2059_v50  ;;  %v2057_v21 = vrot.slane %v20945_v1, 3  ;;  %17128 = vmatpush3.bf16.msra.mxu1 %v18203_v28  ;;  %v1476_v24 = vshrl.u32 %v1258_v36, 16  ;;  %v18215_v42 = vld [vmem:[#allocation9 + $0x1e0] sm:$0xff]   ;;  %v1566_v47 = vld [vmem:[#allocation3 + $0x24] sm:$0xf]  ;;  %vm24009_vm11 = vmmov %vm23994_vm0 }
 0x1d4   : > { %v2065_v22 = vrot.slane %v20952_v9, 3  ;;  %1555 = vst.msk [vmem:[#allocation3 + $0xe8] sm:$0xf] %vm786_vm7, %v1465_v15  ;;  %2334 = vmatprep.mubr.bf16.mxu0 %v2060_v54  ;;  %v1771_v16 = vld [vmem:[#allocation3 + $0xb4] sm:$0xff]  ;;  %17129 = vmatprep.subr.bf16.mxu1 %v18205_v8  ;;  %v1469_v46 = vor.u32 %v1468_v18, %v1464_v6  ;;  %v20965_v48 = vcombine.low %v1767_v4, %v1769_v12  ;;  %v1474_v35 = vrot.slane %v1472_v20, 5  ;;  %v18212_v4 = vld [vmem:[#allocation9 + $0x1d8] sm:$0xff]  }
 0x1d5   : > { %v15207_v53 = vcombine.high %v1769_v12, %v1771_v16  ;;  %v20963_v26 = vld [vmem:[#allocation3 + $0xc0] sm:$0xff]  ;;  %v2058_v23 = vsel %vm24002_vm2, %v2051_v43, %v2057_v21  ;;  %v1235_v58 = vsel %vm20749_vm14, %v1228_v34, %v1234_v44  ;;  %v15206_v61 = vcombine.low %v1769_v12, %v1771_v16  ;;  %v20989_v13 = vld [vmem:[#allocation3 + $0x114] sm:$0xf]  ;;  %v18217_v52 = vld [vmem:[#allocation9 + $0x1a0] sm:$0xff]  }
 0x1d6   : > { %v2066_v57 = vsel %vm24001_vm13, %v2059_v50, %v2065_v22  ;;  %v20969_v10 = vcombine.high %v1771_v16, %v20963_v26  ;;  %v1470_v59 = vrot.slane %v1469_v46, 4  ;;  %1236 = vst [vmem:[#allocation3 + $0x108] sm:$0x7] %v1235_v58  ;;  %v1478_v3 = vrot.slane %v1476_v24, 4  ;;  %v20991_v60 = vld [vmem:[#allocation3] sm:$0xf]  ;;  %vm24011_vm2 = vmmov %vm23994_vm0 }
 0x1d7   : > { %2818 = vmatprep.mubr.bf16.mxu1 %v15207_v53  ;;  %17130 = vmatpush3.bf16.msra.mxu1 %v18206_v14  ;;  %v2063_v29 = vrot.slane %v20965_v48, 3  ;;  %v20994_v12 = vcombine.low %v1771_v16, %v20963_v26  ;;  %vm1613_vm14 = vcmask 1042432   ;;  %vm1614_vm15 = vcmask 1046532   ;;  %v18219_v6 = vld [vmem:[#allocation9 + $0x1e8] sm:$0xff]   ;;  %v1567_v50 = vld [vmem:[#allocation3 + $0x30] sm:$0xf] }
 0x1d8   : > { %v20974_v39 = vld [vmem:[#allocation3 + $0xcc] sm:$0xff]  ;;  %17131 = vmatprep.subr.bf16.mxu1 %v18209_v62  ;;  %v1475_v28 = vsel %vm20578_vm5, %v1470_v59, %v1474_v35  ;;  %v2071_v5 = vrot.slane %v20969_v10, 3  ;;  %v1479_v51 = vor.u32 %v1478_v3, %v1474_v35  ;;  %v1618_v14 = vrot.slane %v20981_v40, 5  ;;  %v1568_v20 = vld [vmem:[#allocation3 + $0x3c] sm:$0xf]  ;;  %vm21013_vm4 = vmor %vm1613_vm14, %vm1614_vm15 }
 0x1d9   : > { %2335 = vmatmul.mubr.bf16.gmra.mrb[52].mxu0 %v2058_v23  ;;  %v15210_v43 = vcombine.high %v20963_v26, %v20974_v39  ;;  %1556 = vst.msk [vmem:[#allocation3 + $0xf4] sm:$0xf] %vm786_vm7, %v1475_v28  ;;  %v20985_v36 = vld [vmem:[#allocation3 + $0xd8] sm:$0xff]  ;;  %v2064_v8 = vsel %vm23994_vm0, %v2057_v21, %v2063_v29  ;;  %v15209_v55 = vcombine.low %v20963_v26, %v20974_v39  ;;  %v1621_v44 = vrot.slane %v1565_v45, 5  ;;  %vm24012_vm15 = vmmov %vm23994_vm0 }
 0x1da   : > { %2342 = vmatprep.mubr.bf16.mxu0 %v2066_v57  ;;  %2819 = vmatmul.mubr.bf16.gmra.mrb[4].mxu1 %v15206_v61  ;;  %v2072_v2 = vsel %vm24003_vm12, %v2065_v22, %v2071_v5  ;;  %v21009_v15 = vcombine.high %v20974_v39, %v20985_v36  ;;  %v1624_v34 = vrot.slane %v1566_v47, 5  ;;  %v1480_v54 = vrot.slane %v1479_v51, 4  ;;  %v18220_v53 = vld [vmem:[#allocation9 + $0x1a8] sm:$0xff]   ;;  %v18222_v57 = vld [vmem:[#allocation9 + $0x1f0] sm:$0xff]   ;;  %v1569_v61 = vld [vmem:[#allocation3 + $0x48] sm:$0xf] }
 0x1db   : > { %v20987_v41 = vld [vmem:[#allocation3 + $0xe4] sm:$0xff]  ;;  %2826 = vmatprep.mubr.bf16.mxu1 %v15210_v43  ;;  %17132 = vmatpush3.bf16.msra.mxu1 %v18210_v56  ;;  %v1620_v46 = vrot.slane %v1618_v14, 4  ;;  %v2069_v24 = vrot.slane %v20994_v12, 3  ;;  %v1492_v26 = vshll.u32 %v20989_v13, 16  ;;  %v1263_v56 = vshrl.u32 %v20991_v60, 16 }
 0x1dc   : > { %17133 = vmatprep.subr.bf16.mxu1 %v18212_v4  ;;  %v15213_v62 = vcombine.high %v20985_v36, %v20987_v41  ;;  %v1623_v58 = vrot.slane %v1621_v44, 4  ;;  %v1570_v4 = vld [vmem:[#allocation3 + $0x54] sm:$0xf]  ;;  %v2077_v28 = vrot.slane %v21009_v15, 3  ;;  %v1626_v43 = vrot.slane %v1624_v34, 4 }
 0x1dd   : > { %v1259_v18 = vld [vmem:[#allocation3 + $0x108] sm:$0xf]  ;;  %v1622_v23 = vsel %vm21013_vm4, %v1620_v46, %v1621_v44  ;;  %v1630_v51 = vrot.slane %v1568_v20, 5  ;;  %v21048_v20 = vcombine.low %v20974_v39, %v20985_v36  ;;  %v1633_v46 = vrot.slane %v1569_v61, 5  ;;  %v21075_v61 = vld [vmem:[#allocation3 + $0x30] sm:$0xff] }
 0x1de   : > { %v1482_v21 = vshll.u32 %v1259_v18, 16  ;;  %v1486_v22 = vshrl.u32 %v1259_v18, 16  ;;  %1716 = vst.msk [vmem:[#allocation3 + $0x14] sm:$0xf] %vm786_vm7, %v1622_v23  ;;  %v1625_v47 = vsel %vm21013_vm4, %v1623_v58, %v1624_v34  ;;  %v15212_v18 = vcombine.low %v20985_v36, %v20987_v41  ;;  %v18225_v34 = vld [vmem:[#allocation9 + $0x1f8] sm:$0xff]  }
 0x1df   : > { %17134 = vmatpush3.bf16.msra.mxu1 %v18213_v63  ;;  %v1627_v63 = vrot.slane %v1567_v50, 5  ;;  %1717 = vst.msk [vmem:[#allocation3 + $0x20] sm:$0xf] %vm786_vm7, %v1625_v47  ;;  %v1266_v50 = vshll.u32 %v20991_v60, 16  ;;  %v21051_v60 = vld [vmem:[#allocation3 + $0x24] sm:$0xcc]  ;;  %v2078_v39 = vsel %vm24007_vm1, %v2071_v5, %v2077_v28 }
 0x1e0   : > { %17135 = vmatprep.subr.bf16.mxu1 %v18215_v42  ;;  %v1484_v59 = vrot.slane %v1482_v21, 5  ;;  %v1488_v35 = vrot.slane %v1486_v22, 4  ;;  %v21025_v3 = vld [vmem:[#allocation3 + $0xf0] sm:$0xff]  ;;  %v1574_v21 = vld [vmem:[#allocation3 + $0x84] sm:$0xf]  ;;  %v1635_v58 = vrot.slane %v1633_v46, 4 }
 0x1e1   : > { %2343 = vmatmul.mubr.bf16.gmra.mrb[56].mxu0 %v2064_v8  ;;  %v18223_v8 = vld [vmem:[#allocation9 + $0x1b0] sm:$0xff]   ;;  %v21062_v36 = vcombine.high %v20987_v41, %v21025_v3  ;;  %v15216_v23 = vcombine.high %v21025_v3, %v21025_v3  ;;  %vm24010_vm13 = vcmask 1045504  }
 0x1e2   : > { %2350 = vmatprep.mubr.bf16.mxu0 %v2072_v2  ;;  %2827 = vmatmul.mubr.bf16.gmra.mrb[8].mxu1 %v15209_v55  ;;  %v1485_v42 = vsel %vm20578_vm5, %v1480_v54, %v1484_v59  ;;  %v1489_v45 = vor.u32 %v1488_v35, %v1484_v59  ;;  %v21032_v2 = vrot.slane %v1492_v26, 5  ;;  %v1629_v55 = vrot.slane %v1627_v63, 4  ;;  %v1571_v54 = vld [vmem:[#allocation3 + $0x60] sm:$0xf]  ;;  %v1573_v59 = vld [vmem:[#allocation3 + $0x78] sm:$0xf]  ;;  %vm24013_vm0 = vmmov %vm24010_vm13 }
 0x1e3   : > { %2834 = vmatprep.mubr.bf16.mxu1 %v15213_v62  ;;  %17136 = vmatpush3.bf16.msra.mxu1 %v18217_v52  ;;  %1557 = vst.msk [vmem:[#allocation3 + $0x100] sm:$0xf] %vm786_vm7, %v1485_v42  ;;  %v1628_v52 = vsel %vm21013_vm4, %v1626_v43, %v1627_v63  ;;  %v2070_v62 = vsel %vm24006_vm9, %v2063_v29, %v2069_v24  ;;  %v1632_v29 = vrot.slane %v1630_v51, 4  ;;  %v1636_v26 = vrot.slane %v1570_v4, 5  ;;  %v18227_v43 = vld [vmem:[#allocation9 + $0x1b8] sm:$0xff]   ;;  %vm24014_vm12 = vmmov %vm24013_vm0 }
 0x1e4   : > { %17137 = vmatprep.subr.bf16.mxu1 %v18219_v6  ;;  %v1572_v6 = vld [vmem:[#allocation3 + $0x6c] sm:$0xf]  ;;  %v1490_v44 = vrot.slane %v1489_v45, 4  ;;  %1718 = vst.msk [vmem:[#allocation3 + $0x2c] sm:$0xf] %vm786_vm7, %v1628_v52  ;;  %v1631_v22 = vsel %vm21013_vm4, %v1629_v55, %v1630_v51  ;;  %v21068_v35 = vrot.slane %v1263_v56, 4  ;;  %v15243_v4 = vcombine.high %v21051_v60, %v21075_v61  ;;  %vm24015_vm9 = vmmov %vm24007_vm1 }
 0x1e5   : > { %1719 = vst.msk [vmem:[#allocation3 + $0x38] sm:$0xf] %vm786_vm7, %v1631_v22  ;;  %v1634_v5 = vsel %vm21013_vm4, %v1632_v29, %v1633_v46  ;;  %v1639_v56 = vrot.slane %v1571_v54, 5  ;;  %v1642_v63 = vrot.slane %v1572_v6, 5  ;;  %v21080_v42 = vrot.slane %v1266_v50, 5  ;;  %vm24016_vm1 = vmmov %vm24013_vm0 }
 0x1e6   : > { %1720 = vst.msk [vmem:[#allocation3 + $0x44] sm:$0xf] %vm786_vm7, %v1634_v5  ;;  %v2075_v45 = vrot.slane %v21048_v20, 3  ;;  %v1637_v47 = vsel %vm21013_vm4, %v1635_v58, %v1636_v26  ;;  %v1645_v51 = vrot.slane %v1573_v59, 5  ;;  %v1648_v52 = vrot.slane %v1574_v21, 5 }
 0x1e7   : > { %17138 = vmatpush3.bf16.msra.mxu1 %v18220_v53  ;;  %v1495_v53 = vsel %vm20578_vm5, %v1490_v44, %v21032_v2  ;;  %v2083_v55 = vrot.slane %v21062_v36, 3  ;;  %1721 = vst.msk [vmem:[#allocation3 + $0x50] sm:$0xf] %vm786_vm7, %v1637_v47  ;;  %v1641_v6 = vrot.slane %v1639_v56, 4  ;;  %v1644_v50 = vrot.slane %v1642_v63, 4 }
 0x1e8   : > { %17139 = vmatprep.subr.bf16.mxu1 %v18222_v57  ;;  %1558 = vst.msk [vmem:[#allocation3 + $0x10c] sm:$0xf] %vm786_vm7, %v1495_v53  ;;  %v1638_v57 = vrot.slane %v1636_v26, 4  ;;  %v1576_v54 = vld [vmem:[#allocation3 + $0x9c] sm:$0xf]  ;;  %v3211_v22 = vrot.slane %v20853_v37, 2  ;;  %v2076_v46 = vsel %vm24008_vm3, %v2069_v24, %v2075_v45  ;;  %v21104_v26 = vcombine.low %v20987_v41, %v21025_v3  ;;  %vm24018_vm3 = vmmov %vm24013_vm0 }
 0x1e9   : > { %2351 = vmatmul.mubr.bf16.gmra.mrb[60].mxu0 %v2070_v62  ;;  %v1643_v21 = vsel %vm21013_vm4, %v1641_v6, %v1642_v63  ;;  %v1650_v29 = vrot.slane %v1648_v52, 4  ;;  %v1577_v53 = vld [vmem:[#allocation3 + $0xa8] sm:$0xf]  ;;  %v2084_v24 = vsel %vm24009_vm11, %v2077_v28, %v2083_v55  ;;  %v15215_v41 = vcombine.low %v21025_v3, %v21025_v3 }
 0x1ea   : > { %2358 = vmatprep.mubr.bf16.mxu0 %v2078_v39  ;;  %2835 = vmatmul.mubr.bf16.gmra.mrb[12].mxu1 %v15212_v18  ;;  %v1640_v62 = vsel %vm21013_vm4, %v1638_v57, %v1639_v56  ;;  %v1575_v18 = vld [vmem:[#allocation3 + $0x90] sm:$0xf]  ;;  %v21089_v44 = vld [vmem:[#allocation3 + $0xfc] sm:$0xff]  ;;  %1723 = vst.msk [vmem:[#allocation3 + $0x68] sm:$0xf] %vm786_vm7, %v1643_v21  ;;  %v3210_v59 = vrot.slane %v15243_v4, 2  ;;  %v15242_v28 = vcombine.low %v21051_v60, %v21075_v61 }
 0x1eb   : > { %2842 = vmatprep.mubr.bf16.mxu1 %v15216_v23  ;;  %17140 = vmatpush3.bf16.msra.mxu1 %v18223_v8  ;;  %1722 = vst.msk [vmem:[#allocation3 + $0x5c] sm:$0xf] %vm786_vm7, %v1640_v62  ;;  %v1647_v8 = vrot.slane %v1645_v51, 4  ;;  %v1651_v39 = vrot.slane %v1575_v18, 5  ;;  %v1654_v5 = vrot.slane %v1576_v54, 5  ;;  %v1496_v3 = vshrl.u32 %v20989_v13, 16 }
 0x1ec   : > { %17141 = vmatprep.subr.bf16.mxu1 %v18225_v34  ;;  %v1646_v34 = vsel %vm21013_vm4, %v1644_v50, %v1645_v51  ;;  %v1578_v56 = vld [vmem:[#allocation3 + $0xb4] sm:$0xf]  ;;  %v3212_v63 = vsel %vm24010_vm13, %v3210_v59, %v3211_v22  ;;  %v2081_v47 = vrot.slane %v21104_v26, 3  ;;  %v1261_v62 = vld [vmem:[#allocation3 + $0x120] sm:$0xf]  ;;  %v3208_v6 = vrot.slane %v20855_v38, 2  ;;  %vm24020_vm13 = vmmov %vm24013_vm0 }
 0x1ed   : > { %v1649_v37 = vsel %vm21013_vm4, %v1647_v8, %v1648_v52  ;;  %1724 = vst.msk [vmem:[#allocation3 + $0x74] sm:$0xf] %vm786_vm7, %v1646_v34  ;;  %v1652_v57 = vsel %vm21013_vm4, %v1650_v29, %v1651_v39  ;;  %v1656_v4 = vrot.slane %v1654_v5, 4  ;;  %v1657_v52 = vrot.slane %v1577_v53, 5  ;;  %v1579_v29 = vld [vmem:[#allocation3 + $0xc0] sm:$0xf] }
 0x1ee   : > { %1725 = vst.msk [vmem:[#allocation3 + $0x80] sm:$0xf] %vm786_vm7, %v1649_v37  ;;  %1726 = vst.msk [vmem:[#allocation3 + $0x8c] sm:$0xf] %vm786_vm7, %v1652_v57  ;;  %v1660_v60 = vrot.slane %v1578_v56, 5  ;;  %v1269_v13 = vor.u32 %v21080_v42, %v21068_v35  ;;  %v3218_v61 = vrot.slane %v20885_v30, 2 }
 0x1ef   : > { %17142 = vmatpush3.bf16.msra.mxu1 %v18227_v43  ;;  %v1835_v23 = vld [vmem:[#allocation3 + $0x108] sm:$0x77]  ;;  %v1653_v43 = vrot.slane %v1651_v39, 4  ;;  %v1658_v18 = vsel %vm21013_vm4, %v1656_v4, %v1657_v52  ;;  %v1659_v8 = vrot.slane %v1657_v52, 4  ;;  %v3207_v54 = vrot.slane %v15242_v28, 2 }
 0x1f0   : > { %v15159_v58 = vcombine.high %v21089_v44, %v1835_v23  ;;  %v15158_v21 = vcombine.low %v21089_v44, %v1835_v23  ;;  %1728 = vst.msk [vmem:[#allocation3 + $0xa4] sm:$0xf] %vm786_vm7, %v1658_v18  ;;  %v1498_v34 = vrot.slane %v1496_v3, 4  ;;  %v1502_v42 = vshll.u32 %v1261_v62, 16  ;;  %v1581_v39 = vld [vmem:[#allocation3 + $0xd8] sm:$0xf] }
 0x1f1   : > { %2359 = vmatmul.mubr.bf16.gmra.mrb[64].mxu0 %v2076_v46  ;;  %v1655_v51 = vsel %vm21013_vm4, %v1653_v43, %v1654_v5  ;;  %v2082_v46 = vsel %vm24011_vm2, %v2075_v45, %v2081_v47  ;;  %v1661_v35 = vsel %vm21013_vm4, %v1659_v8, %v1660_v60  ;;  %v1506_v37 = vshrl.u32 %v1261_v62, 16  ;;  %v1582_v57 = vld [vmem:[#allocation3 + $0xe4] sm:$0xf]  ;;  %v1583_v43 = vld [vmem:[#allocation3 + $0xf0] sm:$0xf] }
 0x1f2   : > { %2366 = vmatprep.mubr.bf16.mxu0 %v2084_v24  ;;  %2843 = vmatmul.mubr.bf16.gmra.mrb[16].mxu1 %v15215_v41  ;;  %v21130_v50 = vrot.slane %v15159_v58, 3  ;;  %1727 = vst.msk [vmem:[#allocation3 + $0x98] sm:$0xf] %vm786_vm7, %v1655_v51  ;;  %v3209_v24 = vsel %vm24013_vm0, %v3207_v54, %v3208_v6  ;;  %1729 = vst.msk [vmem:[#allocation3 + $0xb0] sm:$0xf] %vm786_vm7, %v1661_v35  ;;  %v1499_v45 = vor.u32 %v1498_v34, %v21032_v2  ;;  %vm24019_vm11 = vmmov 0  }
 0x1f3   : > { %3479 = vmatprep.mubr.bf16.mxu1 %v3212_v63  ;;  %v1580_v41 = vld [vmem:[#allocation3 + $0xcc] sm:$0xf]  ;;  %v21154_v59 = vrot.slane %v1269_v13, 4  ;;  %v3219_v23 = vsel %vm24014_vm12, %v3211_v22, %v3218_v61  ;;  %v3216_v5 = vrot.slane %v20887_v31, 2  ;;  %v1504_v58 = vrot.slane %v1502_v42, 5  ;;  %vm24022_vm12 = vmmov %vm24011_vm2 }
 0x1f4   : > { %v2090_v53 = vsel %vm24012_vm15, %v2083_v55, %v21130_v50  ;;  %v1508_v55 = vrot.slane %v1506_v37, 4  ;;  %v21160_v56 = vrot.slane %v15158_v21, 3  ;;  %v1500_v28 = vrot.slane %v1499_v45, 4  ;;  %v1560_v63 = vld [vmem:[#allocation3 + $0x124] sm:$0xf]  ;;  %vm24021_vm15 = vmmov %vm24013_vm0 }
 0x1f5   : > { %v1662_v2 = vrot.slane %v1660_v60, 4  ;;  %v1663_v3 = vrot.slane %v1579_v29, 5  ;;  %v3224_v4 = vrot.slane %v20920_v19, 2  ;;  %v1666_v52 = vrot.slane %v1580_v41, 5  ;;  %v1584_v22 = vld [vmem:[#allocation3 + $0xfc] sm:$0xf] }
 0x1f6   : > { %v1509_v51 = vor.u32 %v1508_v55, %v1504_v58  ;;  %v1669_v62 = vrot.slane %v1581_v39, 5  ;;  %v1505_v13 = vsel %vm20578_vm5, %v1500_v28, %v1504_v58  ;;  %v1585_v8 = vld [vmem:[#allocation3 + $0x108] sm:$0xf]  ;;  %v21169_v29 = vld [vmem:[#allocation3 + $0x114] sm:$0xf]  ;;  %v1672_v35 = vrot.slane %v1582_v57, 5 }
 0x1f7   : > { %v1664_v18 = vsel %vm21013_vm4, %v1662_v2, %v1663_v3  ;;  %1559 = vst.msk [vmem:[#allocation3 + $0x118] sm:$0xf] %vm786_vm7, %v1505_v13  ;;  %v1665_v21 = vrot.slane %v1663_v3, 4  ;;  %v1668_v60 = vrot.slane %v1666_v52, 4  ;;  %v1675_v42 = vrot.slane %v1583_v43, 5 }
 0x1f8   : > { %v1510_v54 = vrot.slane %v1509_v51, 4  ;;  %1730 = vst.msk [vmem:[#allocation3 + $0xbc] sm:$0xf] %vm786_vm7, %v1664_v18  ;;  %v1671_v34 = vrot.slane %v1669_v62, 4  ;;  %v1678_v37 = vrot.slane %v1584_v22, 5  ;;  %v1681_v45 = vrot.slane %v1585_v8, 5 }
 0x1f9   : > { %2367 = vmatmul.mubr.bf16.gmra.mrb[68].mxu0 %v2082_v46  ;;  %v2088_v46 = vsel %vm24015_vm9, %v2081_v47, %v21160_v56  ;;  %v3217_v47 = vsel %vm24016_vm1, %v3208_v6, %v3216_v5  ;;  %v21184_v41 = vld [vmem:[#allocation3 + $0x38] sm:$0xf]  ;;  %v21191_v58 = vld [vmem:[#allocation3 + $0x2c] sm:$0xf]  ;;  %v21193_v55 = vld [vmem:[#allocation3 + $0x44] sm:$0xf] }
 0x1fa   : > { %2374 = vmatprep.mubr.bf16.mxu0 %v2090_v53  ;;  %3480 = vmatmul.mubr.bf16.vlgmr.msra.gmra.mrb[20].mxu1 %v3209_v24  ;;  %v1561_v39 = vsel %vm20704_vm10, %v1510_v54, %v1560_v63  ;;  %v1667_v53 = vsel %vm21013_vm4, %v1665_v21, %v1666_v52  ;;  %v1670_v24 = vsel %vm21013_vm4, %v1668_v60, %v1669_v62  ;;  %v1677_v38 = vrot.slane %v1675_v42, 4  ;;  %v1563_v28 = vld [vmem:[#allocation3] sm:$0xe]  ;;  %vm24017_vm10 = vmmov %vm24013_vm0  ;;  %v21204_v2 = vld [vmem:[#allocation3 + $0x74] sm:$0xf] }
 0x1fb   : > { %3487 = vmatprep.mubr.bf16.mxu1 %v3219_v23  ;;  %1562 = vst [vmem:[#allocation3 + $0x124] sm:$0xf] %v1561_v39  ;;  %1731 = vst.msk [vmem:[#allocation3 + $0xc8] sm:$0xf] %vm786_vm7, %v1667_v53  ;;  %v1673_v11 = vsel %vm21013_vm4, %v1671_v34, %v1672_v35  ;;  %v1674_v23 = vrot.slane %v1672_v35, 4  ;;  %v1680_v6 = vrot.slane %v1678_v37, 4  ;;  %v3225_v63 = vsel %vm24017_vm10, %v3218_v61, %v3224_v4 }
 0x1fc   : > { %1732 = vst.msk [vmem:[#allocation3 + $0xd4] sm:$0xf] %vm786_vm7, %v1670_v24  ;;  %1733 = vst.msk [vmem:[#allocation3 + $0xe0] sm:$0xf] %vm786_vm7, %v1673_v11  ;;  %v1683_v57 = vrot.slane %v1681_v45, 4  ;;  %v1684_v43 = vrot.slane %v21169_v29, 5  ;;  %v1275_v52 = vsel %vm20578_vm5, %v21154_v59, %v20638_v33  ;;  %v1679_v30 = vsel %vm21013_vm4, %v1677_v38, %v1678_v37 }
 0x1fd   : > { %v21206_v3 = vld [vmem:[#allocation3 + $0x8c] sm:$0xf]  ;;  %v1676_v51 = vsel %vm21013_vm4, %v1674_v23, %v1675_v42  ;;  %v21214_v62 = vld [vmem:[#allocation3 + $0x20] sm:$0xf]  ;;  %v1682_v61 = vsel %vm21013_vm4, %v1680_v6, %v1681_v45  ;;  %1536 = vst.msk [vmem:[#allocation3 + $0x4] sm:$0xf] %vm786_vm7, %v1275_v52  ;;  %v15133_v34 = vcombine.low %v21191_v58, %v21184_v41  ;;  %v15200_v35 = vcombine.low %v20916_v7, %v20927_v25  ;;  %vm24023_vm9 = vmmov %vm24013_vm0 }
 0x1fe   : > { %1734 = vst.msk [vmem:[#allocation3 + $0xec] sm:$0xf] %vm786_vm7, %v1676_v51  ;;  %v1685_v22 = vsel %vm21013_vm4, %v1683_v57, %v1684_v43  ;;  %v21226_v13 = vld [vmem:[#allocation3 + $0x50] sm:$0xf]  ;;  %v21228_v33 = vld [vmem:[#allocation3 + $0x68] sm:$0xf]  ;;  %v15190_v37 = vcombine.low %v21214_v62, %v21191_v58  ;;  %v15193_v39 = vcombine.low %v21184_v41, %v21193_v55  ;;  %vm24024_vm1 = vmmov %vm24013_vm0 }
 0x1ff   : > { %v21230_v59 = vld [vmem:[#allocation3 + $0x80] sm:$0xf]  ;;  %v21232_v18 = vld [vmem:[#allocation3 + $0x98] sm:$0xf]  ;;  %v21234_v8 = vld [vmem:[#allocation3 + $0xa4] sm:$0xf]  ;;  %v15136_v19 = vcombine.low %v21193_v55, %v21226_v13 }
 0x200   : > { %v21236_v54 = vld [vmem:[#allocation3 + $0xbc] sm:$0xf]  ;;  %1735 = vst.msk [vmem:[#allocation3 + $0xf8] sm:$0xf] %vm786_vm7, %v1679_v30  ;;  %1736 = vst.msk [vmem:[#allocation3 + $0x104] sm:$0xf] %vm786_vm7, %v1682_v61  ;;  %v15202_v24 = vcombine.low %v21230_v59, %v21206_v3  ;;  %v15205_v45 = vcombine.low %v21232_v18, %v21234_v8 }
 0x201   : > { %2375 = vmatmul.mubr.bf16.gmra.mrb[72].mxu0 %v2088_v46  ;;  %1737 = vst.msk [vmem:[#allocation3 + $0x110] sm:$0xf] %vm786_vm7, %v1685_v22  ;;  %v3222_v21 = vrot.slane %v20923_v32, 2  ;;  %v3230_v60 = vrot.slane %v20942_v49, 2  ;;  %v15201_v46 = vcombine.high %v20916_v7, %v20927_v25  ;;  %v15127_v42 = vrot.slane %v1563_v28, 9  ;;  %v19938_v22 = vld [vmem:[#allocation9] sm:$0xff]   ;;  %vm24027_vm10 = vmmov %vm24013_vm0 }
 0x202   : > { %2382 = vmatprep.mubr.bf16.mxu0 %v21130_v50  ;;  %3488 = vmatmul.mubr.bf16.gmra.mrb[24].mxu1 %v3217_v47  ;;  %v21202_v50 = vld [vmem:[#allocation3 + $0x5c] sm:$0xf]  ;;  %v21253_v53 = vld [vmem:[#allocation3 + $0xb0] sm:$0xf]  ;;  %v15199_v49 = vcombine.low %v21228_v33, %v21204_v2  ;;  %v1832_v47 = vld [vmem:[#allocation3 + $0x14] sm:$0x8] }
 0x203   : > { %3495 = vmatprep.mubr.bf16.mxu1 %v3225_v63  ;;  %v15196_v32 = vcombine.low %v21226_v13, %v21202_v50  ;;  %v21264_v11 = vld [vmem:[#allocation3 + $0xc8] sm:$0xf]  ;;  %v21266_v23 = vld [vmem:[#allocation3 + $0xd4] sm:$0xf]  ;;  %v1619_v38 = vsel %vm21013_vm4, %v15127_v42, %v1618_v14  ;;  %v15208_v6 = vcombine.low %v21253_v53, %v21236_v54  ;;  %v3223_v57 = vsel %vm24018_vm3, %v3216_v5, %v3222_v21  ;;  %v21286_v28 = vld [vmem:[#allocation3 + $0xe0] sm:$0xf] }
 0x204   : > { %1715 = vst.msk [vmem:[#allocation3 + $0x8] sm:$0xf] %vm786_vm7, %v1619_v38  ;;  %v15211_v40 = vcombine.low %v21264_v11, %v21266_v23  ;;  %v3231_v14 = vsel %vm24020_vm13, %v3224_v4, %v3230_v60  ;;  %v2037_v5 = vrot.slane %v15133_v34, 3  ;;  %v3228_v52 = vrot.slane %v20945_v1, 2  ;;  %v1587_v4 = vld [vmem:[#allocation3 + $0x120] sm:$0xf]  ;;  %vm24028_vm3 = vmmov %vm24011_vm2 }
 0x205   : > { %v21288_v31 = vld [vmem:[#allocation3 + $0xec] sm:$0xf]  ;;  %v3236_v30 = vrot.slane %v20952_v9, 2  ;;  %v1686_v34 = vrot.slane %v1684_v43, 4  ;;  %v19939_v9 = vld [vmem:[#allocation9 + $0x48] sm:$0xff]   ;;  %v1687_v38 = vrot.slane %v1587_v4, 5  ;;  %vm24029_vm13 = vmmov %vm24013_vm0 }
 0x206   : > { %v15214_v63 = vcombine.low %v21286_v28, %v21288_v31  ;;  %v3229_v42 = vsel %vm24021_vm15, %v3222_v21, %v3228_v52  ;;  %v19941_v29 = vld [vmem:[#allocation9 + $0x50] sm:$0xff]   ;;  %v3240_v4 = vrot.slane %v20994_v12, 2  ;;  %vm24031_vm15 = vmmov %vm24028_vm3 }
 0x207   : > { %v3237_v1 = vsel %vm24013_vm0, %v3230_v60, %v3236_v30  ;;  %v1688_v21 = vsel %vm21013_vm4, %v1686_v34, %v1687_v38  ;;  %v15139_v60 = vcombine.low %v21202_v50, %v21228_v33  ;;  %v19945_v34 = vld [vmem:[#allocation9 + $0x60] sm:$0xff]  }
 0x208   : > { %1738 = vst.msk [vmem:[#allocation3 + $0x11c] sm:$0xf] %vm786_vm7, %v1688_v21  ;;  %vm24025_vm7 = vmmov %vm24011_vm2  ;;  %v19948_v21 = vld [vmem:[#allocation9 + $0x28] sm:$0xff]  }
 0x209   : > { %2383 = vmatmul.mubr.bf16.gmra.mrb[76].mxu0 %v21160_v56  ;;  %v15130_v56 = vcombine.low %v1832_v47, %v21214_v62  ;;  %v2043_v47 = vrot.slane %v15136_v19, 3  ;;  %v19943_v19 = vld [vmem:[#allocation9 + $0x58] sm:$0xff]  }
 0x20a   : > { %17441 = vmatprep.mubr.msk.bf16.mxu0 %vm24019_vm11, %v20163_v0  ;;  %3496 = vmatmul.mubr.bf16.gmra.mrb[28].mxu1 %v3223_v57  ;;  %v19940_v57 = vld [vmem:[#allocation9 + $0x8] sm:$0xff]  }
 0x20b   : > { %3503 = vmatprep.mubr.bf16.mxu1 %v3231_v14  ;;  %v2036_v51 = vrot.slane %v15130_v56, 3  ;;  %v3234_v56 = vrot.slane %v20965_v48, 2  ;;  %v1689_v14 = vrot.slane %v1687_v38, 4  ;;  %v2044_v43 = vsel %vm24022_vm12, %v2037_v5, %v2043_v47  ;;  %v19947_v38 = vld [vmem:[#allocation9 + $0x68] sm:$0xff]   ;;  %vm24032_vm12 = vmmov %vm24013_vm0 }
 0x20d   : > { %v2038_v61 = vsel %vm24011_vm2, %v2036_v51, %v2037_v5  ;;  %v3242_v51 = vrot.slane %v20969_v10, 2  ;;  %1740 = vst.msk [vmem:[#allocation3 + $0x128] sm:$0x7] %vm998_vm8, %v1689_v14  ;;  %v3235_v48 = vsel %vm24023_vm9, %v3228_v52, %v3234_v56  ;;  %v2049_v5 = vrot.slane %v15139_v60, 3  ;;  %vm24026_vm8 = vmmov %vm24013_vm0  ;;  %v19950_v60 = vld [vmem:[#allocation9 + $0x30] sm:$0xff]  }
 0x20e   : > { %v3254_v14 = vrot.slane %v21062_v36, 2  ;;  %vm24030_vm2 = vmmov %vm24013_vm0 }
 0x20f   : > { %v3243_v10 = vsel %vm24024_vm1, %v3236_v30, %v3242_v51  ;;  %v2050_v52 = vsel %vm24025_vm7, %v2043_v47, %v2049_v5  ;;  %v3241_v30 = vsel %vm24026_vm8, %v3234_v56, %v3240_v4  ;;  %v3246_v47 = vrot.slane %v21048_v20, 2  ;;  %v19949_v56 = vld [vmem:[#allocation9 + $0x70] sm:$0xff]   ;;  %vm24033_vm9 = vmmov %vm24028_vm3 }
 0x210   : > { %vm24034_vm1 = vmmov %vm24013_vm0 }
 0x211   : > { %17442 = vmatmul.mubr.bf16.vlgmr.msra.gmra.mrb[80].mxu0 %v2038_v61  ;;  %v19942_v61 = vld [vmem:[#allocation9 + $0x10] sm:$0xff]   ;;  %vm24035_vm7 = vmmov %vm24013_vm0 }
 0x212   : > { %17027 = vmatpush3.bf16.msra.mxu0 %v19938_v22  ;;  %17445 = vmatprep.mubr.msk.bf16.mxu0 %vm24019_vm11, %v20163_v0  ;;  %v19944_v22 = vld [vmem:[#allocation9 + $0x18] sm:$0xff]   ;;  %vm24036_vm8 = vmmov %vm24028_vm3 }
 0x213   : > { %3504 = vmatmul.mubr.bf16.gmra.mrb[32].mxu1 %v3229_v42  ;;  %17028 = vmatprep.subr.bf16.mxu0 %v19939_v9  ;;  %v3248_v42 = vrot.slane %v21009_v15, 2  ;;  %v19946_v9 = vld [vmem:[#allocation9 + $0x20] sm:$0xff]  }
 0x214   : > { %3511 = vmatprep.mubr.bf16.mxu1 %v3237_v1  ;;  %v15142_v1 = vcombine.low %v21204_v2, %v21230_v59 }
 0x215   : > { %v3249_v12 = vsel %vm24027_vm10, %v3242_v51, %v3248_v42  ;;  %v3247_v51 = vsel %vm24029_vm13, %v3240_v4, %v3246_v47  ;;  %v3255_v20 = vsel %vm24030_vm2, %v3248_v42, %v3254_v14  ;;  %v18237_v42 = vld [vmem:[#allocation3 + $0x118] ss:$12 sps:$4 sm:$0x3f]   ;;  %vm24037_vm10 = vmmov %vm24013_vm0 }
 0x216   : > { %17029 = vmatpush3.bf16.msra.mxu0 %v19940_v57  ;;  %v2055_v15 = vrot.slane %v15142_v1, 3  ;;  %v3008_v57 = vld [vmem:[#allocation3 + $0x108] sm:$0xff]  ;;  %vm24038_vm13 = vmmov %vm24028_vm3 }
 0x217   : > { %17030 = vmatprep.subr.bf16.mxu0 %v19941_v29  ;;  %v15270_v36 = vcombine.high %v21089_v44, %v3008_v57  ;;  %vm24039_vm2 = vmmov %vm24028_vm3 }
 0x218   : > { %v2056_v29 = vsel %vm24028_vm3, %v2049_v5, %v2055_v15 }
 0x219   : > { %17446 = vmatmul.mubr.bf16.gmra.mrb[84].mxu0 %v2044_v43  ;;  %v15145_v43 = vcombine.low %v21206_v3, %v21232_v18  ;;  %v3260_v5 = vrot.slane %v15270_v36, 2 }
 0x21a   : > { %17449 = vmatprep.mubr.msk.bf16.mxu0 %vm24019_vm11, %v20163_v0  ;;  %17031 = vmatpush3.bf16.msra.mxu0 %v19942_v61 }
 0x21b   : > { %3512 = vmatmul.mubr.bf16.gmra.mrb[36].mxu1 %v3235_v48  ;;  %17032 = vmatprep.subr.bf16.mxu0 %v19943_v19  ;;  %v19951_v48 = vld [vmem:[#allocation9 + $0x78] sm:$0xff]   ;;  %v2061_v61 = vrot.slane %v15145_v43, 3  ;;  %v15154_v43 = vcombine.low %v21266_v23, %v21286_v28  ;;  %v18263_v28 = vld [vmem:[#allocation3 + $0x2c] ss:$12 sps:$4 sm:$0xfc]  }
 0x21c   : > { %3519 = vmatprep.mubr.bf16.mxu1 %v3243_v10  ;;  %v3252_v10 = vrot.slane %v21104_v26, 2  ;;  %v19952_v19 = vld [vmem:[#allocation9 + $0x38] sm:$0xff]   ;;  %v3261_v26 = vsel %vm24032_vm12, %v3254_v14, %v3260_v5  ;;  %vm24041_vm12 = vmmov %vm24013_vm0 }
 0x21d   : > { %v2062_v4 = vsel %vm24031_vm15, %v2055_v15, %v2061_v61  ;;  %vm24040_vm15 = vmmov %vm24013_vm0 }
 0x21e   : > { %17033 = vmatpush3.bf16.msra.mxu0 %v19944_v22  ;;  %v15148_v22 = vcombine.low %v21234_v8, %v21253_v53 }
 0x21f   : > { %17034 = vmatprep.subr.bf16.mxu0 %v19945_v34  ;;  %v3253_v34 = vsel %vm24013_vm0, %v3246_v47, %v3252_v10 }
 0x220   : > { %v2067_v1 = vrot.slane %v15148_v22, 3  ;;  %v18245_v22 = vld [vmem:[#allocation3 + $0x4] ss:$12 sps:$4 sm:$0xff]  }
 0x221   : > { %17450 = vmatmul.mubr.bf16.gmra.mrb[88].mxu0 %v2050_v52  ;;  %v15269_v52 = vcombine.low %v21089_v44, %v3008_v57 }
 0x222   : > { %17453 = vmatprep.mubr.msk.bf16.mxu0 %vm24019_vm11, %v20163_v0  ;;  %17035 = vmatpush3.bf16.msra.mxu0 %v19946_v9  ;;  %v3012_v9 = vld [vmem:[#allocation3 + $0x120] sm:$0x33]  ;;  %v2068_v15 = vsel %vm24033_vm9, %v2061_v61, %v2067_v1  ;;  %vm24042_vm9 = vmmov %vm24013_vm0 }
 0x223   : > { %3520 = vmatmul.mubr.bf16.gmra.mrb[40].mxu1 %v3241_v30  ;;  %17036 = vmatprep.subr.bf16.mxu0 %v19947_v38  ;;  %v3010_v30 = vld [vmem:[#allocation3 + $0x114] sm:$0xff]  ;;  %v3266_v38 = vrot.slane %v18237_v42, 2  ;;  %v18246_v42 = vld [vmem:[#allocation9 + $0x80] sm:$0xff]  }
 0x224   : > { %3527 = vmatprep.mubr.bf16.mxu1 %v3249_v12  ;;  %v3258_v12 = vrot.slane %v15269_v52, 2  ;;  %v15272_v44 = vcombine.low %v3010_v30, %v3012_v9  ;;  %v19953_v52 = vld [vmem:[#allocation3 + $0x18] sm:$0xff] }
 0x225   : > { %v3267_v57 = vsel %vm24035_vm7, %v3260_v5, %v3266_v38  ;;  %v18247_v30 = vld [vmem:[#allocation9 + $0x88] sm:$0xff]   ;;  %v18248_v9 = vld [vmem:[#allocation9 + $0x90] sm:$0xff]   ;;  %vm24044_vm7 = vmmov %vm24013_vm0 }
 0x226   : > { %17037 = vmatpush3.bf16.msra.mxu0 %v19948_v21  ;;  %v15151_v21 = vcombine.low %v21236_v54, %v21264_v11  ;;  %v3259_v47 = vsel %vm24034_vm1, %v3252_v10, %v3258_v12  ;;  %v18242_v10 = vld [vmem:[#allocation3 + $0x104] ss:$12 sps:$4 sm:$0x7f]   ;;  %vm24043_vm1 = vmmov %vm24013_vm0 }
 0x227   : > { %17038 = vmatprep.subr.bf16.mxu0 %v19949_v56  ;;  %v3264_v56 = vrot.slane %v15272_v44, 2  ;;  %v2091_v5 = vrot.slane %v18242_v10, 3  ;;  %v18250_v44 = vld [vmem:[#allocation9 + $0xa0] sm:$0xff]  }
 0x228   : > { %v2073_v14 = vrot.slane %v15151_v21, 3 }
 0x229   : > { %17454 = vmatmul.mubr.bf16.gmra.mrb[92].mxu0 %v2056_v29 }
 0x22a   : > { %17457 = vmatprep.mubr.msk.bf16.mxu0 %vm24019_vm11, %v20163_v0  ;;  %17039 = vmatpush3.bf16.msra.mxu0 %v19950_v60  ;;  %v2074_v29 = vsel %vm24036_vm8, %v2067_v1, %v2073_v14  ;;  %v1782_v60 = vld [vmem:[#allocation3 + $0xf8] sm:$0xf]  ;;  %vm24045_vm8 = vmmov %vm24013_vm0 }
 0x22b   : > { %3528 = vmatmul.mubr.bf16.gmra.mrb[44].mxu1 %v3247_v51  ;;  %17040 = vmatprep.subr.bf16.mxu0 %v19951_v48  ;;  %v3265_v51 = vsel %vm24037_vm10, %v3258_v12, %v3264_v56  ;;  %v15157_v48 = vcombine.low %v21288_v31, %v1782_v60  ;;  %vm24046_vm10 = vmmov %vm24013_vm0 }
 0x22c   : > { %3535 = vmatprep.mubr.bf16.mxu1 %v3255_v20  ;;  %v2079_v20 = vrot.slane %v15154_v43, 3  ;;  %v18251_v43 = vld [vmem:[#allocation9 + $0xa8] sm:$0xff]  }
 0x22d   : > { %v2085_v61 = vrot.slane %v15157_v48, 3  ;;  %v19960_v48 = vld [vmem:[#allocation3 + $0x6c] sm:$0xff] }
 0x22e   : > { %17041 = vmatpush3.bf16.msra.mxu0 %v19952_v19  ;;  %v2080_v36 = vsel %vm24028_vm3, %v2073_v14, %v2079_v20  ;;  %v19957_v14 = vld [vmem:[#allocation3 + $0x48] sm:$0xff]  ;;  %vm24047_vm3 = vmmov %vm24013_vm0 }
 0x22f   : > { %17485 = vmatprep.subr.bf16.mxu0 %v20163_v0  ;;  %v2086_v19 = vsel %vm24038_vm13, %v2079_v20, %v2085_v61  ;;  %vm24048_vm13 = vmmov %vm24013_vm0 }
 0x231   : > { %17458 = vmatmul.mubr.bf16.gmra.mrb[96].mxu0 %v2062_v4  ;;  %v2092_v4 = vsel %vm24039_vm2, %v2085_v61, %v2091_v5  ;;  %vm3864_vm2 = vcmask 1041409  }
 0x232   : > { %17461 = vmatprep.mubr.msk.bf16.mxu0 %vm24019_vm11, %v20163_v0 }
 0x233   : > { %3536 = vmatmul.mubr.bf16.gmra.mrb[48].mxu1 %v3253_v34  ;;  %v18243_v34 = vld [vmem:[#allocation3] ss:$12 sps:$4 sm:$0xff]  }
 0x234   : > { %3543 = vmatprep.mubr.bf16.mxu1 %v3261_v26  ;;  %v19954_v26 = vld [vmem:[#allocation3 + $0x24] sm:$0xff] }
 0x235   : > { %v15189_v1 = vcombine.high %v19953_v52, %v19954_v26  ;;  %v15188_v12 = vcombine.low %v19953_v52, %v19954_v26 }
 0x239   : > { %17462 = vmatmul.mubr.bf16.gmra.mrb[100].mxu0 %v2068_v15  ;;  %v19956_v15 = vld [vmem:[#allocation3 + $0x3c] sm:$0xff] }
 0x23a   : > { %17465 = vmatprep.mubr.msk.bf16.mxu0 %vm24019_vm11, %v20163_v0 }
 0x23b   : > { %3544 = vmatmul.mubr.bf16.gmra.mrb[52].mxu1 %v3259_v47  ;;  %v18249_v47 = vld [vmem:[#allocation9 + $0x98] sm:$0xff]  }
 0x23c   : > { %3551 = vmatprep.mubr.bf16.mxu1 %v3267_v57 }
 0x241   : > { %17466 = vmatmul.mubr.bf16.gmra.mrb[104].mxu0 %v2074_v29 }
 0x242   : > { %17469 = vmatprep.mubr.msk.bf16.mxu0 %vm24019_vm11, %v20163_v0 }
 0x243   : > { %3552 = vmatmul.mubr.bf16.gmra.mrb[56].mxu1 %v3265_v51  ;;  %v18252_v51 = vld [vmem:[#allocation9 + $0xb0] sm:$0xff]  }
 0x244   : > { %3559 = vmatprep.mubr.bf16.mxu1 %v3266_v38  ;;  %v19955_v38 = vld [vmem:[#allocation3 + $0x30] sm:$0xff] }
 0x245   : > { %v15192_v21 = vcombine.high %v19955_v38, %v19956_v15  ;;  %v15191_v57 = vcombine.low %v19955_v38, %v19956_v15  ;;  %v18254_v38 = vld [vmem:[#allocation3 + $0x8] ss:$12 sps:$4 sm:$0xff]  }
 0x249   : > { %17470 = vmatmul.mubr.bf16.gmra.mrb[108].mxu0 %v2080_v36  ;;  %v19959_v36 = vld [vmem:[#allocation3 + $0x60] sm:$0xff] }
 0x24a   : > { %17473 = vmatprep.mubr.msk.bf16.mxu0 %vm24019_vm11, %v20163_v0  ;;  %v15198_v61 = vcombine.high %v19959_v36, %v19960_v48 }
 0x24b   : > { %3560 = vmatmul.mubr.bf16.gmra.mrb[60].mxu1 %v3264_v56  ;;  %v19958_v56 = vld [vmem:[#allocation3 + $0x54] sm:$0xff] }
 0x24c   : > { %v15195_v29 = vcombine.high %v19957_v14, %v19958_v56  ;;  %v15194_v60 = vcombine.low %v19957_v14, %v19958_v56  ;;  %v18258_v14 = vld [vmem:[#allocation9 + $0x218] sm:$0xff]  }
 0x251   : > { %17474 = vmatmul.mubr.bf16.gmra.mrb[112].mxu0 %v2086_v19  ;;  %v18253_v19 = vld [vmem:[#allocation9 + $0xb8] sm:$0xff]  }
 0x252   : > { %17477 = vmatprep.mubr.msk.bf16.mxu0 %vm24019_vm11, %v20163_v0 }
 0x259   : > { %17478 = vmatmul.mubr.bf16.gmra.mrb[116].mxu0 %v2092_v4 }
 0x25a   : > { %17481 = vmatprep.mubr.msk.bf16.mxu0 %vm24019_vm11, %v20163_v0 }
 0x261   : > { %17482 = vmatmul.mubr.bf16.gmra.mrb[120].mxu0 %v2091_v5 }
 0x262   : > { %2762 = vmatprep.mubr.bf16.mxu0 %v18245_v22 }
 0x269   : > { %2763 = vmatmul.mubr.bf16.vlgmr.msra.gmra.mrb[124].mxu0 %v18243_v34  ;;  %v15197_v34 = vcombine.low %v19959_v36, %v19960_v48 }
 0x26a   : > { %17486 = vmatpush3.bf16.msra.mxu0 %v18246_v42  ;;  %2770 = vmatprep.mubr.bf16.mxu0 %v15189_v1 }
 0x26b   : > { %17487 = vmatprep.subr.bf16.mxu0 %v20163_v0 }
 0x26e   : > { %17488 = vmatpush3.bf16.msra.mxu0 %v18247_v30 }
 0x26f   : > { %17489 = vmatprep.subr.bf16.mxu0 %v20163_v0 }
 0x271   : > { %2771 = vmatmul.mubr.bf16.gmra.mrb[128].mxu0 %v15188_v12 }
 0x272   : > { %2778 = vmatprep.mubr.bf16.mxu0 %v15192_v21  ;;  %17490 = vmatpush3.bf16.msra.mxu0 %v18248_v9  ;;  %v18255_v9 = vld [vmem:[#allocation9 + $0x200] sm:$0xff]   ;;  %v18256_v21 = vld [vmem:[#allocation9 + $0x208] sm:$0xff]  }
 0x273   : > { %17491 = vmatprep.subr.bf16.mxu0 %v20163_v0 }
 0x276   : > { %17492 = vmatpush3.bf16.msra.mxu0 %v18249_v47  ;;  %v18257_v47 = vld [vmem:[#allocation9 + $0x210] sm:$0xff]  }
 0x277   : > { %17493 = vmatprep.subr.bf16.mxu0 %v20163_v0 }
 0x279   : > { %2779 = vmatmul.mubr.bf16.gmra.mrb[132].mxu0 %v15191_v57 }
 0x27a   : > { %2786 = vmatprep.mubr.bf16.mxu0 %v15195_v29  ;;  %17494 = vmatpush3.bf16.msra.mxu0 %v18250_v44  ;;  %v18259_v29 = vld [vmem:[#allocation9 + $0x220] sm:$0xff]  }
 0x27b   : > { %17495 = vmatprep.subr.bf16.mxu0 %v20163_v0 }
 0x27e   : > { %17496 = vmatpush3.bf16.msra.mxu0 %v18251_v43  ;;  %v16941_v20 = vpop.f32.mrb[36].mxu0 }
 0x27f   : > { %17497 = vmatprep.subr.bf16.mxu0 %v20163_v0  ;;  %v16942_v10 = vpop.f32.mrb[37].mxu0 }
 0x280   : > { %v21374_v5 = vadd.f32 %v16942_v10, %v16941_v20  ;;  %v16944_v4 = vpop.f32.mrb[38].mxu0 }
 0x281   : > { %2787 = vmatmul.mubr.bf16.gmra.mrb[136].mxu0 %v15194_v60  ;;  %v16945_v22 = vpop.f32.mrb[39].mxu0 }
 0x282   : > { %2794 = vmatprep.mubr.bf16.mxu0 %v15198_v61  ;;  %17498 = vmatpush3.bf16.msra.mxu0 %v18252_v51  ;;  %v21376_v42 = vadd.f32 %v16945_v22, %v16944_v4  ;;  %v18260_v61 = vld [vmem:[#allocation9 + $0x228] sm:$0xff]   ;;  %v18261_v22 = vld [vmem:[#allocation9 + $0x230] sm:$0xff]  }
 0x283   : > { %17499 = vmatprep.subr.bf16.mxu0 %v20163_v0 }
 0x286   : > { %17500 = vmatpush3.bf16.msra.mxu0 %v18253_v19 }
 0x287   : > { %17545 = vmatprep.subr.bf16.mxu0 %v20163_v0 }
 0x289   : > { %2795 = vmatmul.mubr.bf16.gmra.mrb[140].mxu0 %v15197_v34 }
 0x28a   : > { %2802 = vmatprep.mubr.bf16.mxu0 %v15201_v46 }
 0x291   : > { %2803 = vmatmul.mubr.bf16.gmra.mrb[144].mxu0 %v15200_v35 }
 0x292   : > { %v16947_v52 = vpop.f32.mrb[40].mxu0  ;;  %17501 = vmatprep.mubr.msk.bf16.mxu0 %vm24019_vm11, %v20163_v0 }
 0x293   : > { %v16948_v26 = vpop.f32.mrb[41].mxu0 }
 0x294   : > { %v21388_v1 = vadd.f32 %v16948_v26, %v16947_v52  ;;  %v16950_v30 = vpop.f32.mrb[42].mxu0 }
 0x295   : > { %v16951_v12 = vpop.f32.mrb[43].mxu0 }
 0x296   : > { %v21390_v15 = vadd.f32 %v16951_v12, %v16950_v30 }
 0x299   : > { %17502 = vmatmul.mubr.bf16.vlgmr.msra.gmra.mrb[80].mxu0 %v18254_v38  ;;  %v18262_v38 = vld [vmem:[#allocation9 + $0x238] sm:$0xff]  }
 0x29a   : > { %17546 = vmatpush3.bf16.msra.mxu0 %v18255_v9  ;;  %v16953_v46 = vpop.f32.mrb[44].mxu0  ;;  %17505 = vmatprep.mubr.msk.bf16.mxu0 %vm24019_vm11, %v20163_v0 }
 0x29b   : > { %v16954_v7 = vpop.f32.mrb[45].mxu0  ;;  %17547 = vmatprep.subr.bf16.mxu0 %v20163_v0 }
 0x29c   : > { %v21395_v25 = vadd.f32 %v16954_v7, %v16953_v46  ;;  %v16956_v35 = vpop.f32.mrb[46].mxu0 }
 0x29d   : > { %v16957_v44 = vpop.f32.mrb[47].mxu0 }
 0x29e   : > { %v21397_v57 = vadd.f32 %v16957_v44, %v16956_v35  ;;  %17548 = vmatpush3.bf16.msra.mxu0 %v18256_v21 }
 0x29f   : > { %17549 = vmatprep.subr.bf16.mxu0 %v20163_v0 }
 0x2a1   : > { %17506 = vmatmul.mubr.bf16.gmra.mrb[84].mxu0 %v15190_v37 }
 0x2a2   : > { %17509 = vmatprep.mubr.msk.bf16.mxu0 %vm24019_vm11, %v20163_v0  ;;  %17550 = vmatpush3.bf16.msra.mxu0 %v18257_v47 }
 0x2a3   : > { %17551 = vmatprep.subr.bf16.mxu0 %v20163_v0 }
 0x2a4   : > { %v16959_v56 = vpop.f32.mrb[48].mxu0 }
 0x2a5   : > { %v16960_v43 = vpop.f32.mrb[49].mxu0  ;;  %v17078_v20 = vpop.f32.mrb[0].mxu1 }
 0x2a6   : > { %v21406_v51 = vadd.f32 %v16960_v43, %v16959_v56  ;;  %v16962_v60 = vpop.f32.mrb[50].mxu0  ;;  %17552 = vmatpush3.bf16.msra.mxu0 %v18258_v14  ;;  %v17079_v48 = vpop.f32.mrb[1].mxu1 }
 0x2a7   : > { %v16963_v36 = vpop.f32.mrb[51].mxu0  ;;  %17553 = vmatprep.subr.bf16.mxu0 %v20163_v0  ;;  %v17080_v62 = vadd.f32 %v17079_v48, %v17078_v20  ;;  %v17081_v37 = vpop.f32.mrb[2].mxu1 }
 0x2a8   : > { %v21409_v58 = vadd.f32 %v16963_v36, %v16962_v60  ;;  %v17082_v10 = vpop.f32.mrb[3].mxu1 }
 0x2a9   : > { %17510 = vmatmul.mubr.bf16.gmra.mrb[88].mxu0 %v15193_v39  ;;  %v17083_v19 = vadd.f32 %v17082_v10, %v17081_v37 }
 0x2aa   : > { %17513 = vmatprep.mubr.msk.bf16.mxu0 %vm24019_vm11, %v20163_v0  ;;  %17554 = vmatpush3.bf16.msra.mxu0 %v18259_v29 }
 0x2ab   : > { %17555 = vmatprep.subr.bf16.mxu0 %v20163_v0 }
 0x2ac   : > { %v16965_v4 = vpop.f32.mrb[52].mxu0 }
 0x2ad   : > { %v16966_v34 = vpop.f32.mrb[53].mxu0  ;;  %v17084_v30 = vpop.f32.mrb[4].mxu1 }
 0x2ae   : > { %v21417_v52 = vadd.f32 %v16966_v34, %v16965_v4  ;;  %v16968_v26 = vpop.f32.mrb[54].mxu0  ;;  %17556 = vmatpush3.bf16.msra.mxu0 %v18260_v61  ;;  %v17085_v12 = vpop.f32.mrb[5].mxu1 }
 0x2af   : > { %v16969_v9 = vpop.f32.mrb[55].mxu0  ;;  %17557 = vmatprep.subr.bf16.mxu0 %v20163_v0  ;;  %v17086_v55 = vadd.f32 %v17085_v12, %v17084_v30  ;;  %v17087_v39 = vpop.f32.mrb[6].mxu1 }
 0x2b0   : > { %v21420_v41 = vadd.f32 %v16969_v9, %v16968_v26  ;;  %v17088_v21 = vpop.f32.mrb[7].mxu1 }
 0x2b1   : > { %17514 = vmatmul.mubr.bf16.gmra.mrb[92].mxu0 %v15196_v32  ;;  %v17089_v46 = vadd.f32 %v17088_v21, %v17087_v39 }
 0x2b2   : > { %17517 = vmatprep.mubr.msk.bf16.mxu0 %vm24019_vm11, %v20163_v0  ;;  %17558 = vmatpush3.bf16.msra.mxu0 %v18261_v22 }
 0x2b3   : > { %17559 = vmatprep.subr.bf16.mxu0 %v20163_v0 }
 0x2b4   : > { %v16971_v7 = vpop.f32.mrb[56].mxu0 }
 0x2b5   : > { %v16972_v35 = vpop.f32.mrb[57].mxu0  ;;  %v17090_v14 = vpop.f32.mrb[8].mxu1 }
 0x2b6   : > { %v21428_v47 = vadd.f32 %v16972_v35, %v16971_v7  ;;  %v16974_v44 = vpop.f32.mrb[58].mxu0  ;;  %17560 = vmatpush3.bf16.msra.mxu0 %v18262_v38  ;;  %v17091_v29 = vpop.f32.mrb[9].mxu1 }
 0x2b7   : > { %v16975_v56 = vpop.f32.mrb[59].mxu0  ;;  %v17092_v50 = vadd.f32 %v17091_v29, %v17090_v14  ;;  %v17093_v13 = vpop.f32.mrb[10].mxu1 }
 0x2b8   : > { %v21430_v43 = vadd.f32 %v16975_v56, %v16974_v44  ;;  %v17094_v32 = vpop.f32.mrb[11].mxu1 }
 0x2b9   : > { %17518 = vmatmul.mubr.bf16.gmra.mrb[96].mxu0 %v15199_v49  ;;  %v17095_v60 = vadd.f32 %v17094_v32, %v17093_v13 }
 0x2ba   : > { %17521 = vmatprep.mubr.msk.bf16.mxu0 %vm24019_vm11, %v20163_v0 }
 0x2bc   : > { %v16977_v20 = vpop.f32.mrb[60].mxu0 }
 0x2bd   : > { %v16978_v36 = vpop.f32.mrb[61].mxu0  ;;  %v17096_v61 = vpop.f32.mrb[12].mxu1 }
 0x2be   : > { %v16979_v48 = vadd.f32 %v16978_v36, %v16977_v20  ;;  %v16980_v37 = vpop.f32.mrb[62].mxu0  ;;  %v17097_v4 = vpop.f32.mrb[13].mxu1 }
 0x2bf   : > { %v16981_v10 = vpop.f32.mrb[63].mxu0  ;;  %v17098_v26 = vadd.f32 %v17097_v4, %v17096_v61  ;;  %v17099_v30 = vpop.f32.mrb[14].mxu1 }
 0x2c0   : > { %v21437_v22 = vadd.f32 %v17080_v62, %v16979_v48  ;;  %v16982_v34 = vadd.f32 %v16981_v10, %v16980_v37  ;;  %v17100_v2 = vpop.f32.mrb[15].mxu1 }
 0x2c1   : > { %17522 = vmatmul.mubr.bf16.gmra.mrb[100].mxu0 %v15202_v24 }
 0x2c2   : > { %v21442_v33 = vadd.f32 %v17083_v19, %v16982_v34  ;;  %17525 = vmatprep.mubr.msk.bf16.mxu0 %vm24019_vm11, %v20163_v0 }
 0x2c4   : > { %v16983_v49 = vpop.f32.mrb[64].mxu0 }
 0x2c5   : > { %v16984_v9 = vpop.f32.mrb[65].mxu0  ;;  %v17102_v38 = vpop.f32.mrb[16].mxu1 }
 0x2c6   : > { %v16985_v12 = vadd.f32 %v16984_v9, %v16983_v49  ;;  %v16986_v39 = vpop.f32.mrb[66].mxu0  ;;  %v17103_v21 = vpop.f32.mrb[17].mxu1 }
 0x2c7   : > { %v16987_v62 = vpop.f32.mrb[67].mxu0  ;;  %v17105_v44 = vpop.f32.mrb[18].mxu1  ;;  %v19961_v21 = vld [vmem:[#allocation3 + $0xf8] sm:$0xf] }
 0x2c8   : > { %v21446_v7 = vadd.f32 %v17086_v55, %v16985_v12  ;;  %v16988_v35 = vadd.f32 %v16987_v62, %v16986_v39  ;;  %v17106_v3 = vpop.f32.mrb[19].mxu1 }
 0x2c9   : > { %17526 = vmatmul.mubr.bf16.gmra.mrb[104].mxu0 %v15205_v45 }
 0x2ca   : > { %v21451_v59 = vadd.f32 %v17089_v46, %v16988_v35  ;;  %17529 = vmatprep.mubr.msk.bf16.mxu0 %vm24019_vm11, %v20163_v0  ;;  %v15217_v35 = vcombine.low %v19961_v21, %v19961_v21 }
 0x2cc   : > { %v16989_v24 = vpop.f32.mrb[68].mxu0 }
 0x2cd   : > { %v16990_v19 = vpop.f32.mrb[69].mxu0  ;;  %v17143_v29 = vpop.f32.mrb[20].mxu1 }
 0x2ce   : > { %v16991_v14 = vadd.f32 %v16990_v19, %v16989_v24  ;;  %v16992_v56 = vpop.f32.mrb[70].mxu0  ;;  %v17144_v55 = vpop.f32.mrb[21].mxu1  ;;  %v18264_v19 = vld [vmem:[#allocation3 + $0x44] ss:$12 sps:$4 sm:$0xff]  }
 0x2cf   : > { %v16993_v13 = vpop.f32.mrb[71].mxu0  ;;  %v21457_v36 = vadd.f32 %v17144_v55, %v17143_v29  ;;  %v17146_v18 = vpop.f32.mrb[22].mxu1  ;;  %v3214_v31 = vrot.slane %v18264_v19, 2  ;;  %v3213_v29 = vrot.slane %v18263_v28, 2 }
 0x2d0   : > { %v21455_v32 = vadd.f32 %v17092_v50, %v16991_v14  ;;  %v16994_v20 = vadd.f32 %v16993_v13, %v16992_v56  ;;  %v17147_v8 = vpop.f32.mrb[23].mxu1 }
 0x2d1   : > { %17530 = vmatmul.mubr.bf16.gmra.mrb[108].mxu0 %v15208_v6  ;;  %v21464_v46 = vadd.f32 %v17147_v8, %v17146_v18  ;;  %v3215_v55 = vsel %vm24040_vm15, %v3213_v29, %v3214_v31  ;;  %v18265_v8 = vld [vmem:[#allocation3 + $0x5c] ss:$12 sps:$4 sm:$0xff]   ;;  %vm3858_vm15 = vcmask 1040384  }
 0x2d2   : > { %v21462_v45 = vadd.f32 %v17095_v60, %v16994_v20  ;;  %17533 = vmatprep.mubr.msk.bf16.mxu0 %vm24019_vm11, %v20163_v0 }
 0x2d4   : > { %v16995_v48 = vpop.f32.mrb[72].mxu0 }
 0x2d5   : > { %v16996_v37 = vpop.f32.mrb[73].mxu0  ;;  %v17149_v10 = vpop.f32.mrb[24].mxu1 }
 0x2d6   : > { %v16997_v50 = vadd.f32 %v16996_v37, %v16995_v48  ;;  %v16998_v61 = vpop.f32.mrb[74].mxu0  ;;  %v17150_v34 = vpop.f32.mrb[25].mxu1 }
 0x2d7   : > { %v16999_v4 = vpop.f32.mrb[75].mxu0  ;;  %v21470_v2 = vadd.f32 %v17150_v34, %v17149_v10  ;;  %v17152_v54 = vpop.f32.mrb[26].mxu1 }
 0x2d8   : > { %v21468_v30 = vadd.f32 %v17098_v26, %v16997_v50  ;;  %v17153_v53 = vpop.f32.mrb[27].mxu1  ;;  %v3220_v50 = vrot.slane %v18265_v8, 2 }
 0x2d9   : > { %17534 = vmatmul.mubr.bf16.gmra.mrb[112].mxu0 %v15211_v40  ;;  %v21475_v6 = vadd.f32 %v17153_v53, %v17152_v54  ;;  %v18266_v53 = vld [vmem:[#allocation3 + $0x74] ss:$12 sps:$4 sm:$0xff]  }
 0x2da   : > { %17537 = vmatprep.mubr.msk.bf16.mxu0 %vm24019_vm11, %v20163_v0  ;;  %v3221_v4 = vsel %vm24013_vm0, %v3214_v31, %v3220_v50  ;;  %vm3885_vm0 = vcmask 1042434  }
 0x2dc   : > { %v17001_v60 = vpop.f32.mrb[76].mxu0 }
 0x2dd   : > { %v17002_v49 = vpop.f32.mrb[77].mxu0  ;;  %v17155_v12 = vpop.f32.mrb[28].mxu1 }
 0x2de   : > { %v17004_v9 = vpop.f32.mrb[78].mxu0  ;;  %v17156_v26 = vpop.f32.mrb[29].mxu1 }
 0x2df   : > { %v17005_v39 = vpop.f32.mrb[79].mxu0  ;;  %v21479_v38 = vadd.f32 %v17156_v26, %v17155_v12  ;;  %v17158_v62 = vpop.f32.mrb[30].mxu1  ;;  %v3226_v9 = vrot.slane %v18266_v53, 2 }
 0x2e0   : > { %v17159_v11 = vpop.f32.mrb[31].mxu1 }
 0x2e1   : > { %17538 = vmatmul.mubr.bf16.gmra.mrb[116].mxu0 %v15214_v63  ;;  %v21484_v23 = vadd.f32 %v17159_v11, %v17158_v62  ;;  %v3227_v26 = vsel %vm24041_vm12, %v3220_v50, %v3226_v9  ;;  %vm24049_vm12 = vsmask.f32 1280 }
 0x2e2   : > { %17541 = vmatprep.mubr.msk.bf16.mxu0 %vm24019_vm11, %v20163_v0 }
 0x2e6   : > { %v17161_v40 = vpop.f32.mrb[32].mxu1 }
 0x2e7   : > { %v17162_v44 = vpop.f32.mrb[33].mxu1 }
 0x2e8   : > { %v21488_v3 = vadd.f32 %v17162_v44, %v17161_v40  ;;  %v17164_v24 = vpop.f32.mrb[34].mxu1  ;;  %v18267_v40 = vld [vmem:[#allocation3 + $0x8c] ss:$12 sps:$4 sm:$0xff]  }
 0x2e9   : > { %17542 = vmatmul.mubr.bf16.gmra.mrb[120].mxu0 %v15217_v35  ;;  %v17165_v14 = vpop.f32.mrb[35].mxu1 }
 0x2ea   : > { %v21490_v56 = vadd.f32 %v17165_v14, %v17164_v24  ;;  %17561 = vmatprep.mubr.msk.bf16.mxu0 %vm24019_vm11, %v20163_v0  ;;  %v3232_v24 = vrot.slane %v18267_v40, 2  ;;  %v18270_v40 = vld [vmem:[#allocation3 + $0xd4] ss:$12 sps:$4 sm:$0xff]  }
 0x2ec   : > { %v3233_v31 = vsel %vm24042_vm9, %v3226_v9, %v3232_v24  ;;  %vm21610_vm9 = vmand %vm3864_vm2, %vm24049_vm12 }
 0x2ee   : > { %v17167_v63 = vpop.f32.mrb[36].mxu1 }
 0x2ef   : > { %v17168_v13 = vpop.f32.mrb[37].mxu1 }
 0x2f0   : > { %v21495_v20 = vadd.f32 %v17168_v13, %v17167_v63  ;;  %v17170_v18 = vpop.f32.mrb[38].mxu1  ;;  %v18268_v13 = vld [vmem:[#allocation3 + $0xa4] ss:$12 sps:$4 sm:$0xff]  }
 0x2f1   : > { %17562 = vmatmul.mubr.bf16.vlgmr.msra.gmra.mrb[80].mxu0 %v3215_v55  ;;  %v17171_v48 = vpop.f32.mrb[39].mxu1  ;;  %v3238_v8 = vrot.slane %v18268_v13, 2 }
 0x2f2   : > { %v21497_v37 = vadd.f32 %v17171_v48, %v17170_v18  ;;  %17565 = vmatprep.mubr.msk.bf16.mxu0 %vm24019_vm11, %v20163_v0 }
 0x2f6   : > { %v17173_v61 = vpop.f32.mrb[40].mxu1 }
 0x2f7   : > { %v17174_v10 = vpop.f32.mrb[41].mxu1 }
 0x2f8   : > { %v21502_v34 = vadd.f32 %v17174_v10, %v17173_v61  ;;  %v17176_v54 = vpop.f32.mrb[42].mxu1  ;;  %v3239_v61 = vsel %vm24043_vm1, %v3232_v24, %v3238_v8  ;;  %vm24052_vm1 = vsmask.f32 7938 }
 0x2f9   : > { %17566 = vmatmul.mubr.bf16.gmra.mrb[84].mxu0 %v3221_v4  ;;  %v17177_v60 = vpop.f32.mrb[43].mxu1 }
 0x2fa   : > { %v21504_v49 = vadd.f32 %v17177_v60, %v17176_v54  ;;  %17569 = vmatprep.mubr.msk.bf16.mxu0 %vm24019_vm11, %v20163_v0  ;;  %v18269_v54 = vld [vmem:[#allocation3 + $0xbc] ss:$12 sps:$4 sm:$0xff]  }
 0x2fb   : > { %v3244_v9 = vrot.slane %v18269_v54, 2 }
 0x2fe   : > { %v17179_v12 = vpop.f32.mrb[44].mxu1 }
 0x2ff   : > { %v17180_v39 = vpop.f32.mrb[45].mxu1 }
 0x300   : > { %v17181_v62 = vadd.f32 %v17180_v39, %v17179_v12  ;;  %v17182_v11 = vpop.f32.mrb[46].mxu1 }
 0x301   : > { %17570 = vmatmul.mubr.bf16.gmra.mrb[88].mxu0 %v3227_v26  ;;  %v17183_v21 = vpop.f32.mrb[47].mxu1  ;;  %v3245_v26 = vsel %vm24044_vm7, %v3238_v8, %v3244_v9  ;;  %v18273_v8 = vld [vmem:[#allocation3 + $0x11c] ss:$12 sps:$4 sm:$0x3f]   ;;  %vm21616_vm7 = vmand %vm3858_vm15, %vm24052_vm1  ;;  %vm24062_vm1 = vsmask.f32 7942 }
 0x302   : > { %v17184_v35 = vadd.f32 %v17183_v21, %v17182_v11  ;;  %17573 = vmatprep.mubr.msk.bf16.mxu0 %vm24019_vm11, %v20163_v0  ;;  %v21512_v44 = vadd.f32 %v21437_v22, %v17181_v62 }
 0x304   : > { %v21515_v19 = vadd.f32 %v21442_v33, %v17184_v35 }
 0x306   : > { %v17185_v14 = vpop.f32.mrb[48].mxu1 }
 0x307   : > { %v17186_v28 = vpop.f32.mrb[49].mxu1 }
 0x308   : > { %v17187_v63 = vadd.f32 %v17186_v28, %v17185_v14  ;;  %v17188_v29 = vpop.f32.mrb[50].mxu1  ;;  %v18271_v28 = vld [vmem:[#allocation3 + $0xec] ss:$12 sps:$4 sm:$0xff]  }
 0x309   : > { %17574 = vmatmul.mubr.bf16.gmra.mrb[92].mxu0 %v3233_v31  ;;  %v17189_v55 = vpop.f32.mrb[51].mxu1 }
 0x30a   : > { %v17190_v18 = vadd.f32 %v17189_v55, %v17188_v29  ;;  %17577 = vmatprep.mubr.msk.bf16.mxu0 %vm24019_vm11, %v20163_v0  ;;  %v21521_v22 = vadd.f32 %v21446_v7, %v17187_v63  ;;  %v3256_v29 = vrot.slane %v18271_v28, 2  ;;  %v18272_v55 = vld [vmem:[#allocation3 + $0x104] ss:$12 sps:$4 sm:$0xff]  }
 0x30c   : > { %v21524_v33 = vadd.f32 %v21451_v59, %v17190_v18 }
 0x30e   : > { %v17191_v48 = vpop.f32.mrb[52].mxu1 }
 0x30f   : > { %v17192_v50 = vpop.f32.mrb[53].mxu1 }
 0x310   : > { %v17193_v10 = vadd.f32 %v17192_v50, %v17191_v48  ;;  %v17194_v4 = vpop.f32.mrb[54].mxu1  ;;  %v3268_v48 = vrot.slane %v18273_v8, 2 }
 0x311   : > { %17578 = vmatmul.mubr.bf16.gmra.mrb[96].mxu0 %v3239_v61  ;;  %v17195_v53 = vpop.f32.mrb[55].mxu1 }
 0x312   : > { %v17196_v60 = vadd.f32 %v17195_v53, %v17194_v4  ;;  %17581 = vmatprep.mubr.msk.bf16.mxu0 %vm24019_vm11, %v20163_v0  ;;  %v21530_v7 = vadd.f32 %v21455_v32, %v17193_v10  ;;  %v3250_v32 = vrot.slane %v18270_v40, 2 }
 0x314   : > { %v21533_v59 = vadd.f32 %v21462_v45, %v17196_v60  ;;  %v3251_v45 = vsel %vm24045_vm8, %v3244_v9, %v3250_v32  ;;  %v3257_v13 = vsel %vm24046_vm10, %v3250_v32, %v3256_v29  ;;  %vm24055_vm8 = vsmask.f32 2304 }
 0x315   : > { %vm21623_vm10 = vmand %vm3885_vm0, %vm24055_vm8 }
 0x316   : > { %v17197_v12 = vpop.f32.mrb[56].mxu1  ;;  %vm21650_vm8 = vmand %vm3864_vm2, %vm24062_vm1  ;;  %vm24065_vm2 = vsmask.f32 7946  ;;  %vm7241_vm1 = vcmask 1045509  }
 0x317   : > { %v17198_v39 = vpop.f32.mrb[57].mxu1 }
 0x318   : > { %v17199_v62 = vadd.f32 %v17198_v39, %v17197_v12  ;;  %v17200_v11 = vpop.f32.mrb[58].mxu1 }
 0x319   : > { %17582 = vmatmul.mubr.bf16.gmra.mrb[100].mxu0 %v3245_v26  ;;  %v17201_v21 = vpop.f32.mrb[59].mxu1 }
 0x31a   : > { %17585 = vmatprep.mubr.msk.bf16.mxu0 %vm24019_vm11, %v20163_v0  ;;  %v21539_v35 = vadd.f32 %v21468_v30, %v17199_v62  ;;  %v3262_v30 = vrot.slane %v18272_v55, 2 }
 0x31c   : > { %v3263_v18 = vsel %vm24047_vm3, %v3256_v29, %v3262_v30  ;;  %v3269_v50 = vsel %vm24048_vm13, %v3262_v30, %v3268_v48  ;;  %vm24058_vm3 = vsmask.f32 3328  ;;  %vm24059_vm13 = vcmask 1043459  }
 0x31d   : > { %vm21631_vm12 = vmand %vm24059_vm13, %vm24058_vm3 }
 0x31e   : > { %v17203_v24 = vpop.f32.mrb[60].mxu1  ;;  %vm21658_vm3 = vmand %vm3885_vm0, %vm24065_vm2  ;;  %vm5455_vm0 = vsmask.f32 3330  ;;  %vm7260_vm2 = vcmask 1046534  }
 0x31f   : > { %v17204_v14 = vpop.f32.mrb[61].mxu1 }
 0x320   : > { %v17206_v31 = vpop.f32.mrb[62].mxu1 }
 0x321   : > { %17586 = vmatmul.mubr.bf16.gmra.mrb[104].mxu0 %v3251_v45  ;;  %v17207_v63 = vpop.f32.mrb[63].mxu1 }
 0x322   : > { %17589 = vmatprep.mubr.msk.bf16.mxu0 %vm24019_vm11, %v20163_v0 }
 0x329   : > { %17590 = vmatmul.mubr.bf16.gmra.mrb[108].mxu0 %v3257_v13 }
 0x32a   : > { %17593 = vmatprep.mubr.msk.bf16.mxu0 %vm24019_vm11, %v20163_v0 }
 0x331   : > { %17594 = vmatmul.mubr.bf16.gmra.mrb[112].mxu0 %v3263_v18 }
 0x332   : > { %17597 = vmatprep.mubr.msk.bf16.mxu0 %vm24019_vm11, %v20163_v0 }
 0x339   : > { %17598 = vmatmul.mubr.bf16.gmra.mrb[116].mxu0 %v3269_v50 }
 0x33a   : > { %17601 = vmatprep.mubr.msk.bf16.mxu0 %vm24019_vm11, %v20163_v0 }
 0x33c   : > { %v17042_v61 = vpop.f32.mrb[124].mxu0 }
 0x33d   : > { %v17043_v10 = vpop.f32.mrb[125].mxu0 }
 0x33e   : > { %v17044_v4 = vadd.f32 %v17043_v10, %v17042_v61  ;;  %v17045_v54 = vpop.f32.mrb[126].mxu0 }
 0x33f   : > { %v17046_v53 = vpop.f32.mrb[127].mxu0 }
 0x340   : > { %v17705_v60 = vadd.f32 %v17044_v4, %v21374_v5  ;;  %v17047_v9 = vadd.f32 %v17046_v53, %v17045_v54 }
 0x341   : > { %17602 = vmatmul.mubr.bf16.gmra.mrb[120].mxu0 %v3268_v48 }
 0x342   : > { %v17708_v12 = vadd.f32 %v17047_v9, %v21376_v42  ;;  %v21556_v39 = vadd.f32 %v17705_v60, %v21457_v36 }
 0x344   : > { %v17048_v26 = vpop.f32.mrb[128].mxu0  ;;  %v21559_v62 = vadd.f32 %v17708_v12, %v21464_v46  ;;  %v18275_v12 = vld [vmem:[#allocation12 + $0xc0] sm:$0xff]  }
 0x345   : > { %v17049_v11 = vpop.f32.mrb[129].mxu0 }
 0x346   : > { %v17050_v40 = vadd.f32 %v17049_v11, %v17048_v26  ;;  %v17051_v21 = vpop.f32.mrb[130].mxu0 }
 0x347   : > { %v17052_v32 = vpop.f32.mrb[131].mxu0 }
 0x348   : > { %v17711_v24 = vadd.f32 %v17050_v40, %v21388_v1  ;;  %v17053_v14 = vadd.f32 %v17052_v32, %v17051_v21 }
 0x34a   : > { %v17714_v5 = vadd.f32 %v17053_v14, %v21390_v15  ;;  %v21564_v45 = vadd.f32 %v17711_v24, %v21470_v2  ;;  %v18276_v14 = vld [vmem:[#allocation12 + $0x108] sm:$0xff]  }
 0x34c   : > { %v17054_v42 = vpop.f32.mrb[132].mxu0  ;;  %v21567_v36 = vadd.f32 %v17714_v5, %v21475_v6  ;;  %v18278_v5 = vld [vmem:[#allocation12 + $0x40] sm:$0xff]  }
 0x34d   : > { %v17055_v28 = vpop.f32.mrb[133].mxu0  ;;  %17273 = vmatprep.subr.bf16.mxu0 %v18278_v5 }
 0x34e   : > { %v17056_v31 = vadd.f32 %v17055_v28, %v17054_v42  ;;  %v17057_v46 = vpop.f32.mrb[134].mxu0  ;;  %v18279_v42 = vld [vmem:[#allocation12 + $0x110] sm:$0xff]   ;;  %v18280_v28 = vld [vmem:[#allocation12] sm:$0xff]  }
 0x34f   : > { %v17058_v63 = vpop.f32.mrb[135].mxu0  ;;  %17274 = vmatpush3.bf16.msra.mxu0 %v18280_v28 }
 0x350   : > { %v17717_v29 = vadd.f32 %v17056_v31, %v21395_v25  ;;  %v17059_v13 = vadd.f32 %v17058_v63, %v17057_v46  ;;  %v18281_v31 = vld [vmem:[#allocation12 + $0xd0] sm:$0xff]   ;;  %v18282_v46 = vld [vmem:[#allocation12 + $0x48] sm:$0xff]   ;;  %v18287_v63 = vld [vmem:[#allocation12 + $0x58] sm:$0xff]  }
 0x351   : > { %17275 = vmatprep.subr.bf16.mxu0 %v18282_v46 }
 0x352   : > { %v17720_v55 = vadd.f32 %v17059_v13, %v21397_v57  ;;  %v21572_v1 = vadd.f32 %v17717_v29, %v21479_v38  ;;  %v18288_v29 = vld [vmem:[#allocation12 + $0xd8] sm:$0xff]  }
 0x353   : > { %v18289_v13 = vld [vmem:[#allocation12 + $0x18] sm:$0xff]  }
 0x354   : > { %v17060_v15 = vpop.f32.mrb[136].mxu0  ;;  %v21575_v2 = vadd.f32 %v17720_v55, %v21484_v23  ;;  %v18290_v55 = vld [vmem:[#allocation12 + $0x60] sm:$0xff]  }
 0x355   : > { %v17061_v30 = vpop.f32.mrb[137].mxu0 }
 0x356   : > { %v17062_v18 = vadd.f32 %v17061_v30, %v17060_v15  ;;  %v17063_v6 = vpop.f32.mrb[138].mxu0  ;;  %v18291_v15 = vld [vmem:[#allocation12 + $0x20] sm:$0xff]   ;;  %v18292_v30 = vld [vmem:[#allocation12 + $0x68] sm:$0xff]  }
 0x357   : > { %v17064_v8 = vpop.f32.mrb[139].mxu0 }
 0x358   : > { %v17723_v48 = vadd.f32 %v17062_v18, %v21406_v51  ;;  %v17065_v50 = vadd.f32 %v17064_v8, %v17063_v6  ;;  %v18274_v51 = vld [vmem:[#allocation12 + $0x100] sm:$0xff]   ;;  %v18293_v18 = vld [vmem:[#allocation12 + $0x28] sm:$0xff]  }
 0x359   : > { %17228 = vmatprep.subr.bf16.mxu1 %v18274_v51  ;;  %v18294_v6 = vld [vmem:[#allocation12 + $0x120] sm:$0xff]  }
 0x35a   : > { %v17726_v61 = vadd.f32 %v17065_v50, %v21409_v58  ;;  %v21580_v25 = vadd.f32 %v17723_v48, %v21488_v3  ;;  %17229 = vmatpush3.bf16.msra.mxu1 %v18275_v12  ;;  %v18295_v8 = vld [vmem:[#allocation12 + $0xe0] sm:$0xff]   ;;  %v18296_v48 = vld [vmem:[#allocation12 + $0x70] sm:$0xff]  }
 0x35b   : > { %17230 = vmatprep.subr.bf16.mxu1 %v18276_v14  ;;  %v18297_v50 = vld [vmem:[#allocation12 + $0x30] sm:$0xff]  }
 0x35c   : > { %v17066_v57 = vpop.f32.mrb[140].mxu0  ;;  %v21583_v38 = vadd.f32 %v17726_v61, %v21490_v56  ;;  %v18298_v61 = vld [vmem:[#allocation12 + $0x78] sm:$0xff]  }
 0x35d   : > { %v17067_v10 = vpop.f32.mrb[141].mxu0 }
 0x35e   : > { %v17068_v4 = vadd.f32 %v17067_v10, %v17066_v57  ;;  %v17069_v23 = vpop.f32.mrb[142].mxu0  ;;  %v18300_v57 = vld [vmem:[#allocation12 + $0x128] sm:$0xff]  }
 0x35f   : > { %v17070_v54 = vpop.f32.mrb[143].mxu0  ;;  %v18301_v10 = vld [vmem:[#allocation12 + $0xe8] sm:$0xff]  }
 0x360   : > { %v17729_v53 = vadd.f32 %v17068_v4, %v21417_v52  ;;  %v17071_v60 = vadd.f32 %v17070_v54, %v17069_v23  ;;  %v18299_v4 = vld [vmem:[#allocation12 + $0x38] sm:$0xff]   ;;  %v18304_v23 = vld [vmem:[#allocation12 + $0x130] sm:$0xff]  }
 0x361   : > { %v18305_v54 = vld [vmem:[#allocation12 + $0xf0] sm:$0xff]  }
 0x362   : > { %v17732_v9 = vadd.f32 %v17071_v60, %v21420_v41  ;;  %v21588_v58 = vadd.f32 %v17729_v53, %v21495_v20  ;;  %v18306_v53 = vld [vmem:[#allocation12 + $0x138] sm:$0xff]  }
 0x363   : > { %v18307_v60 = vld [vmem:[#allocation12 + $0xf8] sm:$0xff]  }
 0x364   : > { %v17072_v3 = vpop.f32.mrb[144].mxu0  ;;  %v21591_v26 = vadd.f32 %v17732_v9, %v21497_v37  ;;  %v18277_v37 = vld [vmem:[#allocation12 + $0xc8] sm:$0xff]   ;;  %v18308_v9 = vld [vmem:[#allocation12 + $0x1c0] sm:$0xff]  }
 0x365   : > { %v17073_v56 = vpop.f32.mrb[145].mxu0  ;;  %17231 = vmatpush3.bf16.msra.mxu1 %v18277_v37 }
 0x366   : > { %v17074_v11 = vadd.f32 %v17073_v56, %v17072_v3  ;;  %v17075_v40 = vpop.f32.mrb[146].mxu0  ;;  %17232 = vmatprep.subr.bf16.mxu1 %v18279_v42 }
 0x367   : > { %v17076_v21 = vpop.f32.mrb[147].mxu0 }
 0x368   : > { %v17735_v52 = vadd.f32 %v17074_v11, %v21428_v47  ;;  %v17077_v32 = vadd.f32 %v17076_v21, %v17075_v40  ;;  %v18283_v47 = vld [vmem:[#allocation12 + $0x8] sm:$0xff]  }
 0x369   : > { %17233 = vmatpush3.bf16.msra.mxu1 %v18281_v31  ;;  %17276 = vmatpush3.bf16.msra.mxu0 %v18283_v47 }
 0x36a   : > { %v17738_v41 = vadd.f32 %v17077_v32, %v21430_v43  ;;  %v21596_v24 = vadd.f32 %v17735_v52, %v21502_v34  ;;  %v18284_v43 = vld [vmem:[#allocation12 + $0x50] sm:$0xff]  }
 0x36b   : > { %v18285_v34 = vld [vmem:[#allocation12 + $0x10] sm:$0xff]   ;;  %17277 = vmatprep.subr.bf16.mxu0 %v18284_v43 }
 0x36c   : > { %v21599_v20 = vadd.f32 %v17738_v41, %v21504_v49  ;;  %v18286_v49 = vld [vmem:[#allocation12 + $0x118] sm:$0xff]   ;;  %v4146_v52 = vld [vmem:[#allocation4 + $0x54] sm:$0xf] }
 0x36d   : > { %17278 = vmatpush3.bf16.msra.mxu0 %v18285_v34  ;;  %17234 = vmatprep.subr.bf16.mxu1 %v18286_v49  ;;  %v4218_v14 = vshll.u32 %v4146_v52, 16  ;;  %v4222_v42 = vshrl.u32 %v4146_v52, 16  ;;  %v3866_v49 = vld [vmem:[#allocation4 + $0xc] sm:$0x2] }
 0x36e   : > { %17279 = vmatprep.subr.bf16.mxu0 %v18287_v63  ;;  %17235 = vmatpush3.bf16.msra.mxu1 %v18288_v29  ;;  %v4147_v63 = vld [vmem:[#allocation4 + $0x60] sm:$0xf] }
 0x36f   : > { %17236 = vmatprep.subr.bf16.mxu1 %v18294_v6  ;;  %v21605_v46 = vrot.slane %v4218_v14, 5  ;;  %v4224_v29 = vrot.slane %v4222_v42, 4 }
 0x371   : > { %17280 = vmatpush3.bf16.msra.mxu0 %v18289_v13 }
 0x372   : > { %17281 = vmatprep.subr.bf16.mxu0 %v18290_v55  ;;  %17237 = vmatpush3.bf16.msra.mxu1 %v18295_v8  ;;  %v4225_v8 = vor.u32 %v4224_v29, %v21605_v46 }
 0x373   : > { %17238 = vmatprep.subr.bf16.mxu1 %v18300_v57 }
 0x374   : > { %v4226_v52 = vrot.slane %v4225_v8, 4 }
 0x375   : > { %17282 = vmatpush3.bf16.msra.mxu0 %v18291_v15  ;;  %v4228_v15 = vshll.u32 %v4147_v63, 16 }
 0x376   : > { %17283 = vmatprep.subr.bf16.mxu0 %v18292_v30  ;;  %17239 = vmatpush3.bf16.msra.mxu1 %v18301_v10 }
 0x377   : > { %17240 = vmatprep.subr.bf16.mxu1 %v18304_v23 }
 0x379   : > { %17284 = vmatpush3.bf16.msra.mxu0 %v18293_v18 }
 0x37a   : > { %17285 = vmatprep.subr.bf16.mxu0 %v18296_v48  ;;  %17241 = vmatpush3.bf16.msra.mxu1 %v18305_v54 }
 0x37b   : > { %17242 = vmatprep.subr.bf16.mxu1 %v18306_v53 }
 0x37d   : > { %17286 = vmatpush3.bf16.msra.mxu0 %v18297_v50 }
 0x37e   : > { %17287 = vmatprep.subr.bf16.mxu0 %v18298_v61  ;;  %17243 = vmatpush3.bf16.msra.mxu1 %v18307_v60 }
 0x37f   : > { %17605 = vmatprep.subr.bf16.mxu1 %v20163_v0 }
 0x381   : > { %17288 = vmatpush3.bf16.msra.mxu0 %v18299_v4  ;;  %v3887_v4 = vld [vmem:[#allocation4 + $0xc] sm:$0x4] }
 0x382   : > { %17318 = vmatprep.subr.bf16.mxu0 %v18308_v9 }
 0x3c4   : > { %v3601_v51 = vpop.f32.mrb[80].mxu0 }
 0x3c5   : > { %v17707_v12 = vadd.f32 %v21556_v39, %v3601_v51  ;;  %v17563_v3 = vpop.f32.mrb[81].mxu0 }
 0x3c6   : > { %v3604_v56 = vpop.f32.mrb[82].mxu0 }
 0x3c7   : > { %v3708_v11 = vmax.f32 %v17707_v12, 0.0  ;;  %v17710_v40 = vadd.f32 %v21559_v62, %v3604_v56  ;;  %v17564_v21 = vpop.f32.mrb[83].mxu0  ;;  %v3906_v56 = vld [vmem:[#allocation4 + $0xc] sm:$0x8] }
 0x3c9   : > { %v16868_v32 = vpack.c.bf16 %v3708_v11, %v3708_v11  ;;  %v3709_v41 = vmax.f32 %v17710_v40, 0.0 }
 0x3cb   : > { %3814 = vst [vmem:[#allocation2] sm:$0xf] %v16868_v32  ;;  %v16869_v37 = vpack.c.bf16 %v3709_v41, %v3709_v41  ;;  %v21640_v32 = vrot.slane %v4228_v15, 5 }
 0x3cc   : > { %v3609_v5 = vpop.f32.mrb[84].mxu0 }
 0x3cd   : > { %3815 = vst [vmem:[#allocation2 + $0x8] sm:$0xf] %v16869_v37  ;;  %v17713_v28 = vadd.f32 %v21564_v45, %v3609_v5  ;;  %v17567_v31 = vpop.f32.mrb[85].mxu0  ;;  %v4231_v42 = vsel %vm20578_vm5, %v4226_v52, %v21640_v32 }
 0x3ce   : > { %v3612_v39 = vpop.f32.mrb[86].mxu0  ;;  %4253 = vst [vmem:[#allocation4 + $0x58] sm:$0xf] %v4231_v42 }
 0x3cf   : > { %v3710_v47 = vmax.f32 %v17713_v28, 0.0  ;;  %v17716_v62 = vadd.f32 %v21567_v36, %v3612_v39  ;;  %v17568_v43 = vpop.f32.mrb[87].mxu0  ;;  %v3860_v36 = vld [vmem:[#allocation4 + $0xc] sm:$0x1] }
 0x3d0   : > { %v3924_v43 = vld [vmem:[#allocation4 + $0x18] sm:$0x2] }
 0x3d1   : > { %v16870_v13 = vpack.c.bf16 %v3710_v47, %v3710_v47  ;;  %v3711_v55 = vmax.f32 %v17716_v62, 0.0  ;;  %v4139_v47 = vld [vmem:[#allocation4] sm:$0xf] }
 0x3d2   : > { %v3853_v30 = vld [vmem:[#allocation2] sm:$0x1]  ;;  %v3863_v18 = vld [vmem:[#allocation2] sm:$0x2]  ;;  %v3869_v6 = vld [vmem:[#allocation2] sm:$0x4] }
 0x3d3   : > { %v3855_v50 = vshll.u32 %v3853_v30, 16  ;;  %v3880_v61 = vld [vmem:[#allocation2] sm:$0x8]  ;;  %3816 = vst [vmem:[#allocation2 + $0x10] sm:$0xf] %v16870_v13  ;;  %v16871_v57 = vpack.c.bf16 %v3711_v55, %v3711_v55  ;;  %v3867_v10 = vsel %vm21610_vm9, %v3863_v18, %v3866_v49  ;;  %v3871_v9 = vshll.u32 %v3869_v6, 16 }
 0x3d4   : > { %v15321_v23 = vrot.slane %v3880_v61, 9  ;;  %v3900_v54 = vld [vmem:[#allocation2 + $0x8] sm:$0x2]  ;;  %v3617_v53 = vpop.f32.mrb[88].mxu0  ;;  %3868 = vst [vmem:[#allocation4 + $0xc] sm:$0x2] %v3867_v10 }
 0x3d5   : > { %3817 = vst [vmem:[#allocation2 + $0x18] sm:$0xf] %v16871_v57  ;;  %v17719_v51 = vadd.f32 %v21572_v1, %v3617_v53  ;;  %v17571_v12 = vpop.f32.mrb[89].mxu0  ;;  %v3861_v3 = vsel %vm21616_vm7, %v3855_v50, %v3860_v36  ;;  %v3902_v21 = vrot.slane %v3900_v54, 6  ;;  %v3890_v41 = vld [vmem:[#allocation2 + $0x8] sm:$0x1] }
 0x3d6   : > { %v3620_v11 = vpop.f32.mrb[90].mxu0  ;;  %3862 = vst [vmem:[#allocation4 + $0xc] sm:$0x1] %v3861_v3  ;;  %v3888_v40 = vsel %vm21623_vm10, %v15321_v23, %v3887_v4  ;;  %v3892_v62 = vshll.u32 %v3890_v41, 16  ;;  %v4149_v15 = vshrl.u32 %v4139_v47, 16  ;;  %v4152_v61 = vshll.u32 %v4139_v47, 16 }
 0x3d7   : > { %v3712_v14 = vmax.f32 %v17719_v51, 0.0  ;;  %v17722_v37 = vadd.f32 %v21575_v2, %v3620_v11  ;;  %v17572_v5 = vpop.f32.mrb[91].mxu0  ;;  %3889 = vst [vmem:[#allocation4 + $0xc] sm:$0x4] %v3888_v40  ;;  %v3907_v1 = vsel %vm21631_vm12, %v3902_v21, %v3906_v56  ;;  %v15320_v2 = vrot.slane %v3871_v9, 9 }
 0x3d8   : > { %3908 = vst [vmem:[#allocation4 + $0xc] sm:$0x8] %v3907_v1  ;;  %v3894_v57 = vrot.slane %v3892_v62, 6  ;;  %v3916_v10 = vld [vmem:[#allocation4 + $0x18] sm:$0x1]  ;;  %v4154_v52 = vrot.slane %v4152_v61, 5 }
 0x3d9   : > { %v16872_v31 = vpack.c.bf16 %v3712_v14, %v3712_v14  ;;  %v3713_v39 = vmax.f32 %v17722_v37, 0.0  ;;  %v3952_v11 = vld [vmem:[#allocation4 + $0x18] sm:$0x8]  ;;  %v3940_v37 = vld [vmem:[#allocation4 + $0x18] sm:$0x4] }
 0x3da   : > { %v4259_v47 = vld [vmem:[#allocation4] sm:$0xe] }
 0x3db   : > { %3818 = vst [vmem:[#allocation2 + $0x20] sm:$0xf] %v16872_v31  ;;  %v16873_v49 = vpack.c.bf16 %v3713_v39, %v3713_v39  ;;  %v3877_v63 = vld [vmem:[#allocation4 + $0xc] sm:$0x2] }
 0x3dc   : > { %v3909_v29 = vld [vmem:[#allocation2 + $0x18] sm:$0x4]  ;;  %v3919_v13 = vld [vmem:[#allocation2 + $0x18] sm:$0x8]  ;;  %v3625_v55 = vpop.f32.mrb[92].mxu0  ;;  %v3878_v36 = vsel %vm21650_vm8, %v15320_v2, %v3877_v63 }
 0x3dd   : > { %v3911_v18 = vshll.u32 %v3909_v29, 16  ;;  %v15323_v6 = vrot.slane %v3919_v13, 10  ;;  %3819 = vst [vmem:[#allocation2 + $0x28] sm:$0xf] %v16873_v49  ;;  %v17725_v8 = vadd.f32 %v21580_v25, %v3625_v55  ;;  %v17575_v50 = vpop.f32.mrb[93].mxu0  ;;  %v4151_v25 = vrot.slane %v4149_v15, 4 }
 0x3de   : > { %3879 = vst [vmem:[#allocation4 + $0xc] sm:$0x2] %v3878_v36  ;;  %v3628_v4 = vpop.f32.mrb[94].mxu0  ;;  %v3897_v23 = vld [vmem:[#allocation4 + $0xc] sm:$0x4] }
 0x3df   : > { %v15322_v54 = vrot.slane %v3911_v18, 10  ;;  %v3925_v53 = vsel %vm21610_vm9, %v15323_v6, %v3924_v43  ;;  %v3714_v9 = vmax.f32 %v17725_v8, 0.0  ;;  %v17728_v51 = vadd.f32 %v21583_v38, %v3628_v4  ;;  %v17576_v12 = vpop.f32.mrb[95].mxu0 }
 0x3e0   : > { %3926 = vst [vmem:[#allocation4 + $0x18] sm:$0x2] %v3925_v53  ;;  %v3898_v3 = vsel %vm21658_vm3, %v3894_v57, %v3897_v23  ;;  %v4155_v63 = vor.u32 %v4154_v52, %v4151_v25  ;;  %v15332_v18 = vrot.slane %v4259_v47, 9  ;;  %v3960_v23 = vld [vmem:[#allocation4 + $0x24] sm:$0x1] }
 0x3e1   : > { %v3917_v56 = vsel %vm21616_vm7, %v15322_v54, %v3916_v10  ;;  %v16874_v40 = vpack.c.bf16 %v3714_v9, %v3714_v9  ;;  %v3715_v21 = vmax.f32 %v17728_v51, 0.0  ;;  %3899 = vst [vmem:[#allocation4 + $0xc] sm:$0x4] %v3898_v3  ;;  %v3964_v54 = vld [vmem:[#allocation4 + $0x24] sm:$0x2] }
 0x3e2   : > { %3918 = vst [vmem:[#allocation4 + $0x18] sm:$0x1] %v3917_v56  ;;  %v3927_v41 = vld [vmem:[#allocation2 + $0x20] sm:$0x1]  ;;  %v3936_v14 = vld [vmem:[#allocation2 + $0x20] sm:$0x2] }
 0x3e3   : > { %v3929_v5 = vshll.u32 %v3927_v41, 16  ;;  %v3938_v38 = vrot.slane %v3936_v14, 7  ;;  %v3951_v1 = vld [vmem:[#allocation2 + $0x20] sm:$0x8]  ;;  %3820 = vst [vmem:[#allocation2 + $0x30] sm:$0xf] %v16874_v40  ;;  %v16875_v42 = vpack.c.bf16 %v3715_v21, %v3715_v21 }
 0x3e4   : > { %v3953_v31 = vsel %vm21631_vm12, %v3951_v1, %v3952_v11  ;;  %v3633_v39 = vpop.f32.mrb[96].mxu0  ;;  %v3943_v8 = vld [vmem:[#allocation2 + $0x20] sm:$0x4]  ;;  %v4156_v10 = vrot.slane %v4155_v63, 4 }
 0x3e5   : > { %v3931_v2 = vrot.slane %v3929_v5, 7  ;;  %v3941_v62 = vsel %vm21623_vm10, %v3938_v38, %v3940_v37  ;;  %3954 = vst [vmem:[#allocation4 + $0x18] sm:$0x8] %v3953_v31  ;;  %3821 = vst [vmem:[#allocation2 + $0x38] sm:$0xf] %v16875_v42  ;;  %v17731_v43 = vadd.f32 %v21588_v58, %v3633_v39  ;;  %v17579_v49 = vpop.f32.mrb[97].mxu0 }
 0x3e6   : > { %3942 = vst [vmem:[#allocation4 + $0x18] sm:$0x4] %v3941_v62  ;;  %v3636_v29 = vpop.f32.mrb[98].mxu0  ;;  %v3945_v9 = vshll.u32 %v3943_v8, 16 }
 0x3e7   : > { %v3933_v13 = vld [vmem:[#allocation4 + $0x18] sm:$0x2]  ;;  %v3716_v55 = vmax.f32 %v17731_v43, 0.0  ;;  %v17734_v36 = vadd.f32 %v21591_v26, %v3636_v29  ;;  %v17580_v15 = vpop.f32.mrb[99].mxu0  ;;  %v3982_v26 = vld [vmem:[#allocation4 + $0x24] sm:$0x4] }
 0x3e8   : > { %v3934_v6 = vsel %vm21650_vm8, %v3931_v2, %v3933_v13  ;;  %v4140_v50 = vld [vmem:[#allocation4 + $0xc] sm:$0xf] }
 0x3e9   : > { %v21678_v61 = vld [vmem:[#allocation4 + $0xc] sm:$0xf]  ;;  %3935 = vst [vmem:[#allocation4 + $0x18] sm:$0x2] %v3934_v6  ;;  %v16876_v57 = vpack.c.bf16 %v3716_v55, %v3716_v55  ;;  %v3717_v58 = vmax.f32 %v17734_v36, 0.0  ;;  %v4158_v4 = vshll.u32 %v4140_v50, 16 }
 0x3ea   : > { %v4279_v53 = vrot.slane %v21678_v61, 5  ;;  %v4162_v3 = vshrl.u32 %v4140_v50, 16  ;;  %v3998_v36 = vld [vmem:[#allocation4 + $0x24] sm:$0x8] }
 0x3eb   : > { %3822 = vst [vmem:[#allocation2 + $0x40] sm:$0xf] %v16876_v57  ;;  %v16877_v51 = vpack.c.bf16 %v3717_v58, %v3717_v58  ;;  %v4160_v12 = vrot.slane %v4158_v4, 5 }
 0x3ec   : > { %v3955_v25 = vld [vmem:[#allocation2 + $0x38] sm:$0x1]  ;;  %v3963_v56 = vld [vmem:[#allocation2 + $0x38] sm:$0x2]  ;;  %v3967_v11 = vld [vmem:[#allocation2 + $0x38] sm:$0x4]  ;;  %v4280_v40 = vsel %vm21013_vm4, %v15332_v18, %v4279_v53 }
 0x3ed   : > { %v3948_v21 = vld [vmem:[#allocation4 + $0x18] sm:$0x4]  ;;  %v3957_v52 = vshll.u32 %v3955_v25, 16  ;;  %v3965_v41 = vsel %vm21610_vm9, %v3963_v56, %v3964_v54  ;;  %v3977_v14 = vld [vmem:[#allocation2 + $0x38] sm:$0x8]  ;;  %v4161_v37 = vsel %vm20578_vm5, %v4156_v10, %v4160_v12  ;;  %v3641_v1 = vpop.f32.mrb[100].mxu0 }
 0x3ee   : > { %3823 = vst [vmem:[#allocation2 + $0x48] sm:$0xf] %v16877_v51  ;;  %4312 = vst [vmem:[#allocation4 + $0x8] sm:$0xf] %v4280_v40  ;;  %v3949_v5 = vsel %vm21658_vm3, %v3945_v9, %v3948_v21  ;;  %v15325_v38 = vrot.slane %v3977_v14, 9  ;;  %v17737_v31 = vadd.f32 %v21596_v24, %v3641_v1  ;;  %v17583_v39 = vpop.f32.mrb[101].mxu0 }
 0x3ef   : > { %3966 = vst [vmem:[#allocation4 + $0x24] sm:$0x2] %v3965_v41  ;;  %4246 = vst [vmem:[#allocation4 + $0x4] sm:$0xf] %v4161_v37  ;;  %v3961_v42 = vsel %vm21616_vm7, %v3957_v52, %v3960_v23  ;;  %v3969_v47 = vshll.u32 %v3967_v11, 16  ;;  %v3644_v62 = vpop.f32.mrb[102].mxu0 }
 0x3f0   : > { %3950 = vst [vmem:[#allocation4 + $0x18] sm:$0x4] %v3949_v5  ;;  %3962 = vst [vmem:[#allocation4 + $0x24] sm:$0x1] %v3961_v42  ;;  %v3983_v2 = vsel %vm21623_vm10, %v15325_v38, %v3982_v26  ;;  %v4164_v43 = vrot.slane %v4162_v3, 4  ;;  %v3718_v49 = vmax.f32 %v17737_v31, 0.0  ;;  %v17740_v63 = vadd.f32 %v21599_v20, %v3644_v62 }
 0x3f1   : > { %3984 = vst [vmem:[#allocation4 + $0x24] sm:$0x4] %v3983_v2  ;;  %v17584_v29 = vpop.f32.mrb[103].mxu0  ;;  %v15324_v8 = vrot.slane %v3969_v47, 9  ;;  %v4016_v1 = vld [vmem:[#allocation4 + $0x30] sm:$0x2] }
 0x3f2   : > { %v3985_v13 = vld [vmem:[#allocation2 + $0x40] sm:$0x1]  ;;  %v3994_v55 = vld [vmem:[#allocation2 + $0x40] sm:$0x2]  ;;  %v16878_v6 = vpack.c.bf16 %v3718_v49, %v3718_v49  ;;  %v3719_v24 = vmax.f32 %v17740_v63, 0.0  ;;  %v4165_v57 = vor.u32 %v4164_v43, %v4160_v12 }
 0x3f3   : > { %v3987_v15 = vshll.u32 %v3985_v13, 16  ;;  %v3996_v18 = vrot.slane %v3994_v55, 6  ;;  %v4008_v39 = vld [vmem:[#allocation4 + $0x30] sm:$0x1]  ;;  %v4044_v49 = vld [vmem:[#allocation4 + $0x30] sm:$0x8] }
 0x3f4   : > { %v3649_v50 = vpop.f32.mrb[104].mxu0  ;;  %3824 = vst [vmem:[#allocation2 + $0x50] sm:$0xf] %v16878_v6  ;;  %v16879_v23 = vpack.c.bf16 %v3719_v24, %v3719_v24  ;;  %v4166_v52 = vrot.slane %v4165_v57, 4 }
 0x3f5   : > { %v3989_v10 = vrot.slane %v3987_v15, 6  ;;  %v3999_v4 = vsel %vm21631_vm12, %v3996_v18, %v3998_v36  ;;  %v17743_v20 = vadd.f32 %v21512_v44, %v3649_v50  ;;  %v17587_v54 = vpop.f32.mrb[105].mxu0  ;;  %v4281_v44 = vrot.slane %v4279_v53, 4  ;;  %v4032_v36 = vld [vmem:[#allocation4 + $0x30] sm:$0x4] }
 0x3f6   : > { %v3974_v58 = vld [vmem:[#allocation4 + $0x24] sm:$0x2]  ;;  %4000 = vst [vmem:[#allocation4 + $0x24] sm:$0x8] %v3999_v4  ;;  %v3652_v26 = vpop.f32.mrb[106].mxu0 }
 0x3f7   : > { %v3975_v9 = vsel %vm21650_vm8, %v15324_v8, %v3974_v58  ;;  %v4141_v51 = vld [vmem:[#allocation4 + $0x18] sm:$0xf]  ;;  %3825 = vst [vmem:[#allocation2 + $0x58] sm:$0xf] %v16879_v23  ;;  %v3720_v12 = vmax.f32 %v17743_v20, 0.0  ;;  %v17746_v25 = vadd.f32 %v21515_v19, %v3652_v26  ;;  %v17588_v56 = vpop.f32.mrb[107].mxu0 }
 0x3f8   : > { %v21702_v3 = vld [vmem:[#allocation4 + $0x18] sm:$0xf]  ;;  %3976 = vst [vmem:[#allocation4 + $0x24] sm:$0x2] %v3975_v9  ;;  %v4168_v11 = vshll.u32 %v4141_v51, 16  ;;  %v4172_v40 = vshrl.u32 %v4141_v51, 16 }
 0x3f9   : > { %v3991_v21 = vld [vmem:[#allocation4 + $0x24] sm:$0x4]  ;;  %v4282_v41 = vrot.slane %v21702_v3, 5  ;;  %v16880_v37 = vpack.c.bf16 %v3720_v12, %v3720_v12  ;;  %v3721_v5 = vmax.f32 %v17746_v25, 0.0 }
 0x3fa   : > { %v3992_v14 = vsel %vm21658_vm3, %v3989_v10, %v3991_v21  ;;  %v4170_v38 = vrot.slane %v4168_v11, 5  ;;  %v4174_v61 = vrot.slane %v4172_v40, 4  ;;  %v4321_v12 = vld [vmem:[#allocation4] sm:$0xff] }
 0x3fb   : > { %3993 = vst [vmem:[#allocation4 + $0x24] sm:$0x4] %v3992_v14  ;;  %v4283_v19 = vsel %vm21013_vm4, %v4281_v44, %v4282_v41  ;;  %3826 = vst [vmem:[#allocation2 + $0x60] sm:$0xf] %v16880_v37  ;;  %v16881_v42 = vpack.c.bf16 %v3721_v5, %v3721_v5  ;;  %v4001_v53 = vld [vmem:[#allocation2 + $0x50] sm:$0x4] }
 0x3fc   : > { %v4171_v31 = vsel %vm20578_vm5, %v4166_v52, %v4170_v38  ;;  %4313 = vst [vmem:[#allocation4 + $0x14] sm:$0xf] %v4283_v19  ;;  %v4011_v47 = vld [vmem:[#allocation2 + $0x50] sm:$0x8]  ;;  %v3657_v2 = vpop.f32.mrb[108].mxu0  ;;  %v4003_v62 = vshll.u32 %v4001_v53, 16  ;;  %v4175_v50 = vor.u32 %v4174_v61, %v4170_v38 }
 0x3fd   : > { %4247 = vst [vmem:[#allocation4 + $0x10] sm:$0xf] %v4171_v31  ;;  %v15327_v43 = vrot.slane %v4011_v47, 10  ;;  %3827 = vst [vmem:[#allocation2 + $0x68] sm:$0xf] %v16881_v42  ;;  %v17749_v63 = vadd.f32 %v21521_v22, %v3657_v2  ;;  %v17591_v29 = vpop.f32.mrb[109].mxu0 }
 0x3fe   : > { %v4019_v13 = vld [vmem:[#allocation2 + $0x58] sm:$0x1]  ;;  %v4028_v55 = vld [vmem:[#allocation2 + $0x58] sm:$0x2]  ;;  %v15326_v15 = vrot.slane %v4003_v62, 10  ;;  %v3660_v8 = vpop.f32.mrb[110].mxu0 }
 0x3ff   : > { %v4017_v18 = vsel %vm21610_vm9, %v15327_v43, %v4016_v1  ;;  %v4030_v6 = vrot.slane %v4028_v55, 7  ;;  %v4043_v24 = vld [vmem:[#allocation2 + $0x58] sm:$0x8]  ;;  %v3722_v58 = vmax.f32 %v17749_v63, 0.0  ;;  %v17752_v10 = vadd.f32 %v21524_v33, %v3660_v8  ;;  %v17592_v22 = vpop.f32.mrb[111].mxu0  ;;  %v18311_v1 = vld [vmem:[#allocation12 + $0x1c8] sm:$0xff]  }
 0x400   : > { %4018 = vst [vmem:[#allocation4 + $0x30] sm:$0x2] %v4017_v18  ;;  %v4045_v57 = vsel %vm21631_vm12, %v4043_v24, %v4044_v49  ;;  %v4009_v4 = vsel %vm21616_vm7, %v15326_v15, %v4008_v39  ;;  %v4021_v9 = vshll.u32 %v4019_v13, 16  ;;  %v4176_v33 = vrot.slane %v4175_v50, 4  ;;  %v18309_v37 = vld [vmem:[#allocation12 + $0x180] sm:$0xff]   ;;  %v18312_v49 = vld [vmem:[#allocation12 + $0x188] sm:$0xff]  }
 0x401   : > { %v4033_v23 = vsel %vm21623_vm10, %v4030_v6, %v4032_v36  ;;  %4046 = vst [vmem:[#allocation4 + $0x30] sm:$0x8] %v4045_v57  ;;  %4010 = vst [vmem:[#allocation4 + $0x30] sm:$0x1] %v4009_v4  ;;  %v16882_v26 = vpack.c.bf16 %v3722_v58, %v3722_v58  ;;  %v3723_v51 = vmax.f32 %v17752_v10, 0.0  ;;  %v4284_v56 = vrot.slane %v4282_v41, 4 }
 0x402   : > { %v4142_v20 = vld [vmem:[#allocation4 + $0x24] sm:$0xf]  ;;  %4034 = vst [vmem:[#allocation4 + $0x30] sm:$0x4] %v4033_v23  ;;  %v4023_v42 = vrot.slane %v4021_v9, 7  ;;  %v18314_v36 = vld [vmem:[#allocation12 + $0x1d0] sm:$0xff]  }
 0x403   : > { %v21724_v54 = vld [vmem:[#allocation4 + $0x24] sm:$0xf]  ;;  %v4178_v3 = vshll.u32 %v4142_v20, 16  ;;  %3828 = vst [vmem:[#allocation2 + $0x70] sm:$0xf] %v16882_v26  ;;  %v16883_v40 = vpack.c.bf16 %v3723_v51, %v3723_v51  ;;  %v4182_v53 = vshrl.u32 %v4142_v20, 16 }
 0x404   : > { %v21726_v25 = vld [vmem:[#allocation4 + $0xc] sm:$0xff]  ;;  %v4285_v11 = vrot.slane %v21724_v54, 5  ;;  %v3665_v21 = vpop.f32.mrb[112].mxu0  ;;  %v4035_v5 = vld [vmem:[#allocation2 + $0x58] sm:$0x4] }
 0x405   : > { %v15366_v52 = vcombine.low %v4321_v12, %v21726_v25  ;;  %v15367_v44 = vcombine.high %v4321_v12, %v21726_v25  ;;  %v21731_v14 = vrot.slane %v4178_v3, 5  ;;  %v17755_v38 = vadd.f32 %v21530_v7, %v3665_v21  ;;  %v17595_v19 = vpop.f32.mrb[113].mxu0  ;;  %3829 = vst [vmem:[#allocation2 + $0x78] sm:$0xf] %v16883_v40  ;;  %v4056_v29 = vld [vmem:[#allocation4 + $0x3c] sm:$0x2] }
 0x406   : > { %v4286_v41 = vsel %vm21013_vm4, %v4284_v56, %v4285_v11  ;;  %v3668_v31 = vpop.f32.mrb[114].mxu0  ;;  %v4037_v43 = vshll.u32 %v4035_v5, 16  ;;  %v4074_v18 = vld [vmem:[#allocation4 + $0x3c] sm:$0x4]  ;;  %v4184_v6 = vrot.slane %v4182_v53, 4  ;;  %v18315_v20 = vld [vmem:[#allocation12 + $0x190] sm:$0xff]  }
 0x407   : > { %4937 = vmatprep.mubr.bf16.mxu0 %v15367_v44  ;;  %v4181_v61 = vsel %vm20578_vm5, %v4176_v33, %v21731_v14  ;;  %4314 = vst [vmem:[#allocation4 + $0x20] sm:$0xf] %v4286_v41  ;;  %v4025_v39 = vld [vmem:[#allocation4 + $0x30] sm:$0x2]  ;;  %v3724_v47 = vmax.f32 %v17755_v38, 0.0  ;;  %v17758_v7 = vadd.f32 %v21533_v59, %v3668_v31  ;;  %v17596_v2 = vpop.f32.mrb[115].mxu0 }
 0x408   : > { %4938 = vmatmul.mubr.bf16.vlgmr.msra.gmra.mrb[148].mxu0 %v15366_v52  ;;  %4248 = vst [vmem:[#allocation4 + $0x1c] sm:$0xf] %v4181_v61  ;;  %v4026_v62 = vsel %vm21650_vm8, %v4023_v42, %v4025_v39  ;;  %v4052_v59 = vld [vmem:[#allocation4 + $0x3c] sm:$0x1]  ;;  %v4090_v57 = vld [vmem:[#allocation4 + $0x3c] sm:$0x8] }
 0x409   : > { %17319 = vmatpush3.bf16.msra.mxu0 %v18309_v37  ;;  %4027 = vst [vmem:[#allocation4 + $0x30] sm:$0x2] %v4026_v62  ;;  %v4040_v63 = vld [vmem:[#allocation4 + $0x30] sm:$0x4]  ;;  %v16884_v13 = vpack.c.bf16 %v3724_v47, %v3724_v47  ;;  %v3725_v55 = vmax.f32 %v17758_v7, 0.0  ;;  %v18310_v12 = vld [vmem:[#allocation12 + $0x140] sm:$0xff]   ;;  %v4185_v37 = vor.u32 %v4184_v6, %v21731_v14 }
 0x40a   : > { %17320 = vmatprep.subr.bf16.mxu0 %v18311_v1  ;;  %v4041_v15 = vsel %vm21658_vm3, %v4037_v43, %v4040_v63  ;;  %v4047_v24 = vld [vmem:[#allocation2 + $0x70] sm:$0x1]  ;;  %v4055_v8 = vld [vmem:[#allocation2 + $0x70] sm:$0x2]  ;;  %v4059_v50 = vld [vmem:[#allocation2 + $0x70] sm:$0x4] }
 0x40b   : > { %4042 = vst [vmem:[#allocation4 + $0x30] sm:$0x4] %v4041_v15  ;;  %3830 = vst [vmem:[#allocation2 + $0x80] sm:$0xf] %v16884_v13  ;;  %v16885_v58 = vpack.c.bf16 %v3725_v55, %v3725_v55  ;;  %v4049_v10 = vshll.u32 %v4047_v24, 16  ;;  %v4057_v22 = vsel %vm21610_vm9, %v4055_v8, %v4056_v29  ;;  %v18317_v33 = vld [vmem:[#allocation12 + $0x1d8] sm:$0xff]  }
 0x40c   : > { %v4069_v4 = vld [vmem:[#allocation2 + $0x70] sm:$0x8]  ;;  %v3673_v23 = vpop.f32.mrb[116].mxu0  ;;  %4058 = vst [vmem:[#allocation4 + $0x3c] sm:$0x2] %v4057_v22  ;;  %v4061_v40 = vshll.u32 %v4059_v50, 16 }
 0x40d   : > { %17321 = vmatpush3.bf16.msra.mxu0 %v18312_v49  ;;  %v15329_v9 = vrot.slane %v4069_v4, 9  ;;  %v4086_v26 = vld [vmem:[#allocation2 + $0x78] sm:$0x2]  ;;  %3831 = vst [vmem:[#allocation2 + $0x88] sm:$0xf] %v16885_v58  ;;  %v17761_v51 = vadd.f32 %v21539_v35, %v3673_v23  ;;  %v17599_v3 = vpop.f32.mrb[117].mxu0  ;;  %v4053_v56 = vsel %vm21616_vm7, %v4049_v10, %v4052_v59 }
 0x40e   : > { %17322 = vmatprep.subr.bf16.mxu0 %v18314_v36  ;;  %v4088_v21 = vrot.slane %v4086_v26, 6  ;;  %v3676_v52 = vpop.f32.mrb[118].mxu0  ;;  %v21754_v5 = vld [vmem:[#allocation4 + $0x54] sm:$0xf]  ;;  %4054 = vst [vmem:[#allocation4 + $0x3c] sm:$0x1] %v4053_v56 }
 0x40f   : > { %v21751_v44 = vld [vmem:[#allocation4 + $0x18] sm:$0xff]  ;;  %v4075_v35 = vsel %vm21623_vm10, %v15329_v9, %v4074_v18  ;;  %v4077_v38 = vld [vmem:[#allocation2 + $0x78] sm:$0x1]  ;;  %v3726_v19 = vmax.f32 %v17761_v51, 0.0  ;;  %v17600_v1 = vpop.f32.mrb[119].mxu0  ;;  %v4287_v39 = vrot.slane %v4285_v11, 4 }
 0x410   : > { %v15334_v41 = vcombine.high %v21726_v25, %v21751_v44  ;;  %4076 = vst [vmem:[#allocation4 + $0x3c] sm:$0x4] %v4075_v35  ;;  %v4091_v42 = vsel %vm21631_vm12, %v4088_v21, %v4090_v57  ;;  %v15333_v31 = vcombine.low %v21726_v25, %v21751_v44  ;;  %v18318_v14 = vld [vmem:[#allocation12 + $0x198] sm:$0xff]   ;;  %v18320_v53 = vld [vmem:[#allocation12 + $0x1e0] sm:$0xff]   ;;  %v4297_v47 = vrot.slane %v21754_v5, 5  ;;  %v18313_v29 = vld [vmem:[#allocation12 + $0x148] sm:$0xff]  }
 0x411   : > { %17323 = vmatpush3.bf16.msra.mxu0 %v18315_v20  ;;  %4092 = vst [vmem:[#allocation4 + $0x3c] sm:$0x8] %v4091_v42  ;;  %v16886_v61 = vpack.c.bf16 %v3726_v19, %v3726_v19  ;;  %v4079_v7 = vshll.u32 %v4077_v38, 16  ;;  %v4108_v2 = vld [vmem:[#allocation4 + $0x48] sm:$0x2]  ;;  %v4186_v43 = vrot.slane %v4185_v37, 4 }
 0x412   : > { %4656 = vmatprep.mubr.bf16.mxu1 %v15334_v41  ;;  %17324 = vmatprep.subr.bf16.mxu0 %v18317_v33  ;;  %v4143_v62 = vld [vmem:[#allocation4 + $0x30] sm:$0xf]  ;;  %v15328_v25 = vrot.slane %v4061_v40, 9  ;;  %v18321_v13 = vld [vmem:[#allocation12 + $0x1a0] sm:$0xff]   ;;  %v18323_v55 = vld [vmem:[#allocation12 + $0x1e8] sm:$0xff]  }
 0x413   : > { %4657 = vmatmul.mubr.bf16.vlgmr.msra.gmra.mrb[64].mxu1 %v15333_v31  ;;  %v21767_v49 = vld [vmem:[#allocation4 + $0x30] sm:$0xf]  ;;  %3832 = vst [vmem:[#allocation2 + $0x90] sm:$0xf] %v16886_v61  ;;  %v4188_v63 = vshll.u32 %v4143_v62, 16  ;;  %v4081_v57 = vrot.slane %v4079_v7, 6 }
 0x414   : > { %17606 = vmatpush3.bf16.msra.mxu1 %v18310_v12  ;;  %v4288_v36 = vrot.slane %v21767_v49, 5  ;;  %v4066_v54 = vld [vmem:[#allocation4 + $0x3c] sm:$0x2]  ;;  %v4093_v11 = vld [vmem:[#allocation2 + $0x88] sm:$0x4]  ;;  %v3681_v24 = vpop.f32.mrb[120].mxu0 }
 0x415   : > { %v4103_v15 = vld [vmem:[#allocation2 + $0x88] sm:$0x8]  ;;  %17607 = vmatprep.subr.bf16.mxu1 %v20163_v0  ;;  %17325 = vmatpush3.bf16.msra.mxu0 %v18318_v14  ;;  %v4067_v59 = vsel %vm21650_vm8, %v15328_v25, %v4066_v54  ;;  %v4095_v18 = vshll.u32 %v4093_v11, 16  ;;  %v21773_v8 = vrot.slane %v4188_v63, 5  ;;  %v4267_v50 = vld [vmem:[#allocation4 + $0x60] sm:$0xf] }
 0x416   : > { %v15331_v6 = vrot.slane %v4103_v15, 10  ;;  %17326 = vmatprep.subr.bf16.mxu0 %v18320_v53  ;;  %4068 = vst [vmem:[#allocation4 + $0x3c] sm:$0x2] %v4067_v59  ;;  %v4100_v58 = vld [vmem:[#allocation4 + $0x48] sm:$0x1]  ;;  %v17603_v10 = vpop.f32.mrb[121].mxu0  ;;  %v4289_v4 = vsel %vm21013_vm4, %v4287_v39, %v4288_v36 }
 0x417   : > { %v4192_v22 = vshrl.u32 %v4143_v62, 16  ;;  %v4083_v23 = vld [vmem:[#allocation4 + $0x3c] sm:$0x4]  ;;  %v15330_v20 = vrot.slane %v4095_v18, 10  ;;  %v3684_v26 = vpop.f32.mrb[122].mxu0  ;;  %v4191_v51 = vsel %vm20578_vm5, %v4186_v43, %v21773_v8  ;;  %v18316_v3 = vld [vmem:[#allocation12 + $0x150] sm:$0xff]  }
 0x418   : > { %v4109_v9 = vsel %vm21610_vm9, %v15331_v6, %v4108_v2  ;;  %17608 = vmatpush3.bf16.msra.mxu1 %v18313_v29  ;;  %4315 = vst [vmem:[#allocation4 + $0x2c] sm:$0xf] %v4289_v4  ;;  %v4299_v12 = vrot.slane %v4297_v47, 4  ;;  %v4084_v33 = vsel %vm21658_vm3, %v4081_v57, %v4083_v23  ;;  %v17604_v56 = vpop.f32.mrb[123].mxu0  ;;  %4249 = vst [vmem:[#allocation4 + $0x28] sm:$0xf] %v4191_v51 }
 0x419   : > { %4110 = vst [vmem:[#allocation4 + $0x48] sm:$0x2] %v4109_v9  ;;  %17609 = vmatprep.subr.bf16.mxu1 %v20163_v0  ;;  %17327 = vmatpush3.bf16.msra.mxu0 %v18321_v13  ;;  %v18324_v40 = vld [vmem:[#allocation12 + $0x1a8] sm:$0xff]   ;;  %v4300_v21 = vrot.slane %v4267_v50, 5  ;;  %4085 = vst [vmem:[#allocation4 + $0x3c] sm:$0x4] %v4084_v33  ;;  %v4101_v52 = vsel %vm21616_vm7, %v15330_v20, %v4100_v58 }
 0x41a   : > { %v4136_v37 = vld [vmem:[#allocation4 + $0x48] sm:$0x8]  ;;  %17328 = vmatprep.subr.bf16.mxu0 %v18323_v55  ;;  %v18326_v35 = vld [vmem:[#allocation12 + $0x1f0] sm:$0xff]   ;;  %4102 = vst [vmem:[#allocation4 + $0x48] sm:$0x1] %v4101_v52  ;;  %v4194_v61 = vrot.slane %v4192_v22, 4 }
 0x41b   : > { %v4111_v38 = vld [vmem:[#allocation2 + $0x90] sm:$0x1]  ;;  %v4120_v19 = vld [vmem:[#allocation2 + $0x90] sm:$0x2]  ;;  %v4124_v1 = vld [vmem:[#allocation4 + $0x48] sm:$0x4]  ;;  %v4301_v41 = vsel %vm21013_vm4, %v4299_v12, %v4300_v21 }
 0x41c   : > { %v4113_v42 = vshll.u32 %v4111_v38, 16  ;;  %v4122_v31 = vrot.slane %v4120_v19, 7  ;;  %v4135_v14 = vld [vmem:[#allocation2 + $0x90] sm:$0x8]  ;;  %17610 = vmatpush3.bf16.msra.mxu1 %v18316_v3  ;;  %4319 = vst [vmem:[#allocation4 + $0x5c] sm:$0xf] %v4301_v41  ;;  %v4195_v29 = vor.u32 %v4194_v61, %v21773_v8 }
 0x41d   : > { %v18319_v53 = vld [vmem:[#allocation12 + $0x158] sm:$0xff]   ;;  %v4137_v39 = vsel %vm21631_vm12, %v4135_v14, %v4136_v37  ;;  %17611 = vmatprep.subr.bf16.mxu1 %v20163_v0  ;;  %17329 = vmatpush3.bf16.msra.mxu0 %v18324_v40  ;;  %v18327_v7 = vld [vmem:[#allocation12 + $0x1b0] sm:$0xff]   ;;  %v18322_v13 = vld [vmem:[#allocation12 + $0x160] sm:$0xff]   ;;  %v4290_v28 = vrot.slane %v4288_v36, 4 }
 0x41e   : > { %v4115_v2 = vrot.slane %v4113_v42, 7  ;;  %v4125_v62 = vsel %vm21623_vm10, %v4122_v31, %v4124_v1  ;;  %4138 = vst [vmem:[#allocation4 + $0x48] sm:$0x8] %v4137_v39  ;;  %17330 = vmatprep.subr.bf16.mxu0 %v18326_v35  ;;  %v18329_v43 = vld [vmem:[#allocation12 + $0x1f8] sm:$0xff]   ;;  %v18325_v50 = vld [vmem:[#allocation12 + $0x168] sm:$0xff]   ;;  %v18328_v4 = vld [vmem:[#allocation12 + $0x170] sm:$0xff]  }
 0x41f   : > { %4126 = vst [vmem:[#allocation4 + $0x48] sm:$0x4] %v4125_v62  ;;  %v4327_v63 = vld [vmem:[#allocation4 + $0x24] sm:$0xff]  ;;  %v18330_v15 = vld [vmem:[#allocation12 + $0x1b8] sm:$0xff]  }
 0x420   : > { %v4117_v25 = vld [vmem:[#allocation4 + $0x48] sm:$0x2]  ;;  %17612 = vmatpush3.bf16.msra.mxu1 %v18319_v53  ;;  %v21802_v54 = vcombine.high %v21751_v44, %v4327_v63  ;;  %v21805_v11 = vcombine.low %v21751_v44, %v4327_v63  ;;  %v4144_v48 = vld [vmem:[#allocation4 + $0x3c] sm:$0xf]  ;;  %v4196_v44 = vrot.slane %v4195_v29, 4  ;;  %v18333_v62 = vld [vmem:[#allocation12 + $0x80] sm:$0xff]  }
 0x421   : > { %v4118_v55 = vsel %vm21650_vm8, %v4115_v2, %v4117_v25  ;;  %17613 = vmatprep.subr.bf16.mxu1 %v20163_v0  ;;  %17331 = vmatpush3.bf16.msra.mxu0 %v18327_v7  ;;  %v4264_v59 = vld [vmem:[#allocation4 + $0x3c] sm:$0xf]  ;;  %v4198_v6 = vshll.u32 %v4144_v48, 16  ;;  %v4202_v10 = vshrl.u32 %v4144_v48, 16  ;;  %v5029_v25 = vld [vmem:[#allocation4 + $0x54] sm:$0xff] }
 0x422   : > { %4119 = vst [vmem:[#allocation4 + $0x48] sm:$0x2] %v4118_v55  ;;  %v4127_v18 = vld [vmem:[#allocation2 + $0x90] sm:$0x4]  ;;  %17332 = vmatprep.subr.bf16.mxu0 %v18329_v43  ;;  %v4291_v24 = vrot.slane %v4264_v59, 5  ;;  %4945 = vmatprep.mubr.bf16.mxu0 %v21802_v54 }
 0x423   : > { %4946 = vmatmul.mubr.bf16.gmra.mrb[152].mxu0 %v21805_v11  ;;  %v4200_v8 = vrot.slane %v4198_v6, 5  ;;  %v4129_v58 = vshll.u32 %v4127_v18, 16  ;;  %v4204_v23 = vrot.slane %v4202_v10, 4  ;;  %v18331_v20 = vld [vmem:[#allocation12 + $0x178] sm:$0xff]   ;;  %v4328_v55 = vld [vmem:[#allocation4 + $0x2c] sm:$0xf] }
 0x424   : > { %17614 = vmatpush3.bf16.msra.mxu1 %v18322_v13  ;;  %v4292_v57 = vsel %vm21013_vm4, %v4290_v28, %v4291_v24  ;;  %v4293_v40 = vrot.slane %v4291_v24, 4  ;;  %v18337_v48 = vld [vmem:[#allocation12 + $0x98] sm:$0xff]   ;;  %v18339_v6 = vld [vmem:[#allocation12 + $0xa0] sm:$0xff]   ;;  %v18340_v24 = vld [vmem:[#allocation12 + $0xa8] sm:$0xff]   ;;  %vm7242_vm8 = vsmask.f32 7958 }
 0x425   : > { %17615 = vmatprep.subr.bf16.mxu1 %v20163_v0  ;;  %17333 = vmatpush3.bf16.msra.mxu0 %v18330_v15  ;;  %4316 = vst [vmem:[#allocation4 + $0x38] sm:$0xf] %v4292_v57  ;;  %v4201_v36 = vsel %vm20578_vm5, %v4196_v44, %v4200_v8  ;;  %v4205_v9 = vor.u32 %v4204_v23, %v4200_v8  ;;  %v18341_v44 = vld [vmem:[#allocation12 + $0xb0] sm:$0xff]   ;;  %v18342_v8 = vld [vmem:[#allocation12 + $0xb8] sm:$0xff]   ;;  %v18343_v57 = vld [vmem:[#allocation12 + $0x200] sm:$0xff]  }
 0x426   : > { %v4132_v49 = vld [vmem:[#allocation4 + $0x48] sm:$0x4]  ;;  %4250 = vst [vmem:[#allocation4 + $0x34] sm:$0xf] %v4201_v36 }
 0x427   : > { %v4133_v22 = vsel %vm21658_vm3, %v4129_v58, %v4132_v49  ;;  %v4206_v52 = vrot.slane %v4205_v9, 4  ;;  %v18344_v10 = vld [vmem:[#allocation12 + $0x208] sm:$0xff]   ;;  %v18345_v49 = vld [vmem:[#allocation12 + $0x210] sm:$0xff]   ;;  %vm7261_vm3 = vsmask.f32 6400 }
 0x428   : > { %4134 = vst [vmem:[#allocation4 + $0x48] sm:$0x4] %v4133_v22  ;;  %17616 = vmatpush3.bf16.msra.mxu1 %v18325_v50  ;;  %v4322_v50 = vld [vmem:[#allocation4 + $0x8] sm:$0xf]  ;;  %v18346_v22 = vld [vmem:[#allocation12 + $0x218] sm:$0xff]   ;;  %v18349_v9 = vld [vmem:[#allocation12 + $0x230] sm:$0xff]  }
 0x429   : > { %17617 = vmatprep.subr.bf16.mxu1 %v20163_v0 }
 0x42c   : > { %17618 = vmatpush3.bf16.msra.mxu1 %v18328_v4  ;;  %v4330_v13 = vld [vmem:[#allocation4 + $0x38] sm:$0xf]  ;;  %v18347_v4 = vld [vmem:[#allocation12 + $0x220] sm:$0xff]  }
 0x42d   : > { %17619 = vmatprep.subr.bf16.mxu1 %v20163_v0  ;;  %v4329_v26 = vld [vmem:[#allocation4 + $0x30] sm:$0xff] }
 0x42e   : > { %v15337_v51 = vcombine.high %v4327_v63, %v4329_v26  ;;  %v15336_v3 = vcombine.low %v4327_v63, %v4329_v26  ;;  %v18334_v63 = vld [vmem:[#allocation12 + $0x88] sm:$0xff]  }
 0x42f   : > { %v4145_v12 = vld [vmem:[#allocation4 + $0x48] sm:$0xf] }
 0x430   : > { %v4265_v33 = vld [vmem:[#allocation4 + $0x48] sm:$0xf]  ;;  %v4208_v56 = vshll.u32 %v4145_v12, 16  ;;  %v4212_v30 = vshrl.u32 %v4145_v12, 16  ;;  %17620 = vmatpush3.bf16.msra.mxu1 %v18331_v20  ;;  %4664 = vmatprep.mubr.bf16.mxu1 %v15337_v51  ;;  %v18351_v51 = vld [vmem:[#allocation4 + $0x20] ss:$12 sps:$4 sm:$0xff]  }
 0x431   : > { %v4294_v21 = vrot.slane %v4265_v33, 5  ;;  %17633 = vmatprep.subr.bf16.mxu1 %v20163_v0  ;;  %4665 = vmatmul.mubr.bf16.gmra.mrb[68].mxu1 %v15336_v3  ;;  %v18348_v20 = vld [vmem:[#allocation12 + $0x228] sm:$0xff]  }
 0x432   : > { %v4210_v37 = vrot.slane %v4208_v56, 5  ;;  %v4214_v35 = vrot.slane %v4212_v30, 4  ;;  %v18354_v33 = vld [vmem:[%s23918_s6 + $0x180] ss:$8 sps:$4 sm:$0xff]   ;;  %v18356_v56 = vld [vmem:[%s23918_s6 + $0x184] ss:$8 sps:$4 sm:$0xff]  }
 0x433   : > { %v4295_v38 = vsel %vm21013_vm4, %v4293_v40, %v4294_v21  ;;  %v4296_v19 = vrot.slane %v4294_v21, 4  ;;  %v18359_v30 = vld [vmem:[%s23918_s6 + $0x194] ss:$8 sps:$4 sm:$0xff]   ;;  %6099 = vmatprep.subr.bf16.mxu0 %v18356_v56  ;;  %v18362_v40 = vld [vmem:[%s23918_s6 + $0x1a4] ss:$8 sps:$4 sm:$0xff]  }
 0x434   : > { %4317 = vst [vmem:[#allocation4 + $0x44] sm:$0xf] %v4295_v38  ;;  %v4211_v1 = vsel %vm20578_vm5, %v4206_v52, %v4210_v37  ;;  %v4215_v41 = vor.u32 %v4214_v35, %v4210_v37  ;;  %v18360_v21 = vld [vmem:[%s23918_s6 + $0x1a0] ss:$8 sps:$4 sm:$0xff]  }
 0x435   : > { %v4298_v42 = vsel %vm21013_vm4, %v4296_v19, %v4297_v47  ;;  %4251 = vst [vmem:[#allocation4 + $0x40] sm:$0xf] %v4211_v1  ;;  %v4326_v47 = vld [vmem:[#allocation4 + $0x20] sm:$0xf] }
 0x436   : > { %4318 = vst [vmem:[#allocation4 + $0x50] sm:$0xf] %v4298_v42  ;;  %v4216_v31 = vrot.slane %v4215_v41, 4  ;;  %v15371_v36 = vcombine.low %v4326_v47, %v4328_v55  ;;  %v18363_v42 = vld [vmem:[%s23918_s6 + $0x1b0] ss:$8 sps:$4 sm:$0xff]  }
 0x438   : > { %v4221_v14 = vsel %vm20578_vm5, %v4216_v31, %v21605_v46  ;;  %v4324_v46 = vld [vmem:[#allocation4 + $0x14] sm:$0xf]  ;;  %v18365_v31 = vld [vmem:[%s23918_s6 + $0x1b4] ss:$8 sps:$4 sm:$0xff]  }
 0x439   : > { %4252 = vst [vmem:[#allocation4 + $0x4c] sm:$0xf] %v4221_v14  ;;  %v15335_v43 = vcombine.low %v4324_v46, %v4326_v47  ;;  %v15368_v58 = vcombine.low %v4322_v50, %v4324_v46  ;;  %v18378_v50 = vld [vmem:[%s23918_s6 + $0x200] ss:$8 sps:$4 sm:$0xff]  }
 0x43b   : > { %v4332_v18 = vld [vmem:[#allocation4 + $0x44] sm:$0xf] }
 0x43c   : > { %v4331_v61 = vld [vmem:[#allocation4 + $0x3c] sm:$0xff]  ;;  %v15374_v23 = vcombine.low %v4330_v13, %v4332_v18  ;;  %v18352_v3 = vld [vmem:[#allocation4 + $0x38] ss:$12 sps:$4 sm:$0xff]  }
 0x43d   : > { %v15373_v53 = vcombine.high %v4329_v26, %v4331_v61  ;;  %v15372_v39 = vcombine.low %v4329_v26, %v4331_v61  ;;  %v4382_v59 = vld [vmem:[#allocation4 + $0x50] sm:$0xf]  ;;  %v18350_v26 = vld [vmem:[#allocation12 + $0x238] sm:$0xff]  }
 0x43e   : > { %v15341_v28 = vcombine.low %v4332_v18, %v4382_v59  ;;  %v18353_v12 = vld [vmem:[#allocation4 + $0x50] ss:$12 sps:$4 sm:$0xff]   ;;  %v18377_v18 = vld [vmem:[%s23918_s6 + $0x1f4] ss:$8 sps:$4 sm:$0xff]  }
 0x43f   : > { %4953 = vmatprep.mubr.bf16.mxu0 %v15373_v53  ;;  %v18375_v59 = vld [vmem:[%s23918_s6 + $0x1f0] ss:$8 sps:$4 sm:$0xff]  }
 0x440   : > { %4954 = vmatmul.mubr.bf16.gmra.mrb[156].mxu0 %v15372_v39  ;;  %v4381_v7 = vld [vmem:[#allocation4 + $0x48] sm:$0xff] }
 0x441   : > { %5304 = vmatprep.mubr.bf16.mxu0 %v21802_v54  ;;  %v15340_v5 = vcombine.high %v4331_v61, %v4381_v7  ;;  %v15339_v2 = vcombine.low %v4331_v61, %v4381_v7  ;;  %v15406_v29 = vcombine.high %v4381_v7, %v5029_v25  ;;  %v18336_v54 = vld [vmem:[#allocation12 + $0x90] sm:$0xff]   ;;  %v15405_v15 = vcombine.low %v4381_v7, %v5029_v25 }
 0x443   : > { %4672 = vmatprep.mubr.bf16.mxu1 %v15340_v5  ;;  %v18366_v5 = vld [vmem:[%s23918_s6 + $0x1c0] ss:$8 sps:$4 sm:$0xff]  }
 0x444   : > { %4673 = vmatmul.mubr.bf16.gmra.mrb[72].mxu1 %v15339_v2 }
 0x445   : > { %17621 = vmatprep.mubr.msk.bf16.mxu1 %vm24019_vm11, %v20163_v0 }
 0x448   : > { %5305 = vmatmul.mubr.bf16.vlgmr.msra.gmra.mrb[160].mxu0 %v21805_v11  ;;  %v15338_v11 = vcombine.low %v4328_v55, %v4330_v13  ;;  %v18369_v55 = vld [vmem:[%s23918_s6 + $0x1d0] ss:$8 sps:$4 sm:$0xff]  }
 0x449   : > { %5312 = vmatprep.mubr.bf16.mxu0 %v15373_v53  ;;  %6100 = vmatpush1.bf16.msra.mxu0 %v18354_v33 }
 0x44a   : > { %6101 = vmatprep.subr.bf16.mxu0 %v18359_v30 }
 0x44c   : > { %17622 = vmatmul.mubr.bf16.vlgmr.msra.gmra.mrb[76].mxu1 %v15335_v43 }
 0x44d   : > { %17634 = vmatpush3.bf16.msra.mxu1 %v18333_v62  ;;  %17625 = vmatprep.mubr.msk.bf16.mxu1 %vm24019_vm11, %v20163_v0 }
 0x44e   : > { %17635 = vmatprep.subr.bf16.mxu1 %v20163_v0 }
 0x450   : > { %5313 = vmatmul.mubr.bf16.gmra.mrb[164].mxu0 %v15372_v39  ;;  %v18368_v39 = vld [vmem:[%s23918_s6 + $0x1c4] ss:$8 sps:$4 sm:$0xff]  }
 0x451   : > { %17636 = vmatpush3.bf16.msra.mxu1 %v18334_v63  ;;  %5320 = vmatprep.mubr.bf16.mxu0 %v15406_v29 }
 0x452   : > { %17637 = vmatprep.subr.bf16.mxu1 %v20163_v0 }
 0x454   : > { %17626 = vmatmul.mubr.bf16.gmra.mrb[80].mxu1 %v15338_v11  ;;  %v18374_v11 = vld [vmem:[%s23918_s6 + $0x1e4] ss:$8 sps:$4 sm:$0xff]  }
 0x455   : > { %17638 = vmatpush3.bf16.msra.mxu1 %v18336_v54  ;;  %17629 = vmatprep.mubr.msk.bf16.mxu1 %vm24019_vm11, %v20163_v0  ;;  %v18371_v54 = vld [vmem:[%s23918_s6 + $0x1d4] ss:$8 sps:$4 sm:$0xff]  }
 0x456   : > { %17639 = vmatprep.subr.bf16.mxu1 %v20163_v0 }
 0x458   : > { %5321 = vmatmul.mubr.bf16.gmra.mrb[168].mxu0 %v15405_v15 }
 0x459   : > { %17640 = vmatpush3.bf16.msra.mxu1 %v18337_v48  ;;  %v18372_v48 = vld [vmem:[%s23918_s6 + $0x1e0] ss:$8 sps:$4 sm:$0xff]  }
 0x45a   : > { %17641 = vmatprep.subr.bf16.mxu1 %v20163_v0 }
 0x45c   : > { %17630 = vmatmul.mubr.bf16.gmra.mrb[84].mxu1 %v15341_v28  ;;  %v18380_v28 = vld [vmem:[%s23918_s6 + $0x204] ss:$8 sps:$4 sm:$0xff]  }
 0x45d   : > { %17642 = vmatpush3.bf16.msra.mxu1 %v18339_v6  ;;  %17649 = vmatprep.mubr.msk.bf16.mxu1 %vm24019_vm11, %v20163_v0 }
 0x45e   : > { %17643 = vmatprep.subr.bf16.mxu1 %v20163_v0 }
 0x461   : > { %17644 = vmatpush3.bf16.msra.mxu1 %v18340_v24 }
 0x462   : > { %17645 = vmatprep.subr.bf16.mxu1 %v20163_v0 }
 0x465   : > { %17646 = vmatpush3.bf16.msra.mxu1 %v18341_v44 }
 0x466   : > { %17647 = vmatprep.subr.bf16.mxu1 %v20163_v0 }
 0x469   : > { %17648 = vmatpush3.bf16.msra.mxu1 %v18342_v8 }
 0x46a   : > { %17661 = vmatprep.subr.bf16.mxu1 %v20163_v0 }
 0x46c   : > { %17650 = vmatmul.mubr.bf16.vlgmr.msra.gmra.mrb[76].mxu1 %v15368_v58 }
 0x46d   : > { %17662 = vmatpush3.bf16.msra.mxu1 %v18343_v57  ;;  %17653 = vmatprep.mubr.msk.bf16.mxu1 %vm24019_vm11, %v20163_v0 }
 0x46e   : > { %17663 = vmatprep.subr.bf16.mxu1 %v20163_v0 }
 0x471   : > { %17664 = vmatpush3.bf16.msra.mxu1 %v18344_v10  ;;  %v18383_v10 = vld [vmem:[%s23918_s6 + $0x214] ss:$8 sps:$4 sm:$0xff]  }
 0x472   : > { %17665 = vmatprep.subr.bf16.mxu1 %v20163_v0 }
 0x474   : > { %17654 = vmatmul.mubr.bf16.gmra.mrb[80].mxu1 %v15371_v36  ;;  %v18381_v36 = vld [vmem:[%s23918_s6 + $0x210] ss:$8 sps:$4 sm:$0xff]  }
 0x475   : > { %17666 = vmatpush3.bf16.msra.mxu1 %v18345_v49  ;;  %17657 = vmatprep.mubr.msk.bf16.mxu1 %vm24019_vm11, %v20163_v0 }
 0x476   : > { %17667 = vmatprep.subr.bf16.mxu1 %v20163_v0 }
 0x479   : > { %17668 = vmatpush3.bf16.msra.mxu1 %v18346_v22  ;;  %v18386_v22 = vld [vmem:[%s23918_s6 + $0x224] ss:$8 sps:$4 sm:$0xff]  }
 0x47a   : > { %17669 = vmatprep.subr.bf16.mxu1 %v20163_v0 }
 0x47c   : > { %17658 = vmatmul.mubr.bf16.gmra.mrb[84].mxu1 %v15374_v23  ;;  %v18389_v23 = vld [vmem:[%s23918_s6 + $0x234] ss:$8 sps:$4 sm:$0xff]  }
 0x47d   : > { %17670 = vmatpush3.bf16.msra.mxu1 %v18347_v4  ;;  %17677 = vmatprep.mubr.msk.bf16.mxu1 %vm24019_vm11, %v20163_v0  ;;  %v18384_v4 = vld [vmem:[%s23918_s6 + $0x220] ss:$8 sps:$4 sm:$0xff]  }
 0x47e   : > { %17671 = vmatprep.subr.bf16.mxu1 %v20163_v0 }
 0x481   : > { %17672 = vmatpush3.bf16.msra.mxu1 %v18348_v20 }
 0x482   : > { %17673 = vmatprep.subr.bf16.mxu1 %v20163_v0 }
 0x485   : > { %17674 = vmatpush3.bf16.msra.mxu1 %v18349_v9 }
 0x486   : > { %17675 = vmatprep.subr.bf16.mxu1 %v20163_v0 }
 0x489   : > { %17676 = vmatpush3.bf16.msra.mxu1 %v18350_v26  ;;  %v18387_v26 = vld [vmem:[%s23918_s6 + $0x230] ss:$8 sps:$4 sm:$0xff]  }
 0x48c   : > { %17678 = vmatmul.mubr.bf16.vlgmr.msra.gmra.mrb[76].mxu1 %v18351_v51 }
 0x48d   : > { %17681 = vmatprep.mubr.msk.bf16.mxu1 %vm24019_vm11, %v20163_v0 }
 0x494   : > { %17682 = vmatmul.mubr.bf16.gmra.mrb[80].mxu1 %v18352_v3 }
 0x495   : > { %17685 = vmatprep.mubr.msk.bf16.mxu1 %vm24019_vm11, %v20163_v0  ;;  %v18357_v0 = vld [vmem:[%s23918_s6 + $0x190] ss:$8 sps:$4 sm:$0xff]   ;;  %vm4254_vm11 = vcmask 1043456  }
 0x496   : > { %6102 = vmatpush1.bf16.msra.mxu0 %v18357_v0  ;;  %vm21974_vm10 = vmand %vm4254_vm11, %vm5455_vm0 }
 0x497   : > { %6103 = vmatprep.subr.bf16.mxu0 %v18362_v40  ;;  %v18390_v40 = vld [vmem:[%s23918_s6 + $0x240] ss:$8 sps:$4 sm:$0xff]   ;;  %vm22558_vm0 = vmand %vm7241_vm1, %vm7242_vm8 }
 0x49a   : > { %6104 = vmatpush1.bf16.msra.mxu0 %v18360_v21 }
 0x49b   : > { %6105 = vmatprep.subr.bf16.mxu0 %v18365_v31 }
 0x49c   : > { %17686 = vmatmul.mubr.bf16.gmra.mrb[84].mxu1 %v18353_v12  ;;  %v18392_v12 = vld [vmem:[%s23918_s6 + $0x244] ss:$8 sps:$4 sm:$0xff]  }
 0x49e   : > { %6106 = vmatpush1.bf16.msra.mxu0 %v18363_v42  ;;  %v18393_v42 = vld [vmem:[%s23918_s6 + $0x250] ss:$8 sps:$4 sm:$0xff]  }
 0x49f   : > { %6107 = vmatprep.subr.bf16.mxu0 %v18368_v39 }
 0x4a2   : > { %6108 = vmatpush1.bf16.msra.mxu0 %v18366_v5 }
 0x4a3   : > { %6109 = vmatprep.subr.bf16.mxu0 %v18371_v54 }
 0x4a6   : > { %6110 = vmatpush1.bf16.msra.mxu0 %v18369_v55  ;;  %v18405_v55 = vld [vmem:[%s23918_s6 + $0x284] ss:$8 sps:$4 sm:$0xff]  }
 0x4a7   : > { %6111 = vmatprep.subr.bf16.mxu0 %v18374_v11 }
 0x4aa   : > { %6112 = vmatpush1.bf16.msra.mxu0 %v18372_v48 }
 0x4ab   : > { %6113 = vmatprep.subr.bf16.mxu0 %v18377_v18 }
 0x4ae   : > { %6114 = vmatpush1.bf16.msra.mxu0 %v18375_v59 }
 0x4af   : > { %6115 = vmatprep.subr.bf16.mxu0 %v18380_v28 }
 0x4b2   : > { %6116 = vmatpush1.bf16.msra.mxu0 %v18378_v50 }
 0x4b3   : > { %6117 = vmatprep.subr.bf16.mxu0 %v18383_v10 }
 0x4b6   : > { %6118 = vmatpush1.bf16.msra.mxu0 %v18381_v36 }
 0x4b7   : > { %6119 = vmatprep.subr.bf16.mxu0 %v18386_v22 }
 0x4ba   : > { %6120 = vmatpush1.bf16.msra.mxu0 %v18384_v4 }
 0x4bb   : > { %6121 = vmatprep.subr.bf16.mxu0 %v18389_v23 }
 0x4be   : > { %6122 = vmatpush1.bf16.msra.mxu0 %v18387_v26 }
 0x4bf   : > { %6123 = vmatprep.subr.bf16.mxu0 %v18392_v12 }
 0x4c2   : > { %6124 = vmatpush1.bf16.msra.mxu0 %v18390_v40  ;;  %v5520_v40 = vld [vmem:[#allocation5] sm:$0xf] }
 0x4db   : > { %v17289_v52 = vpop.f32.mrb[148].mxu0 }
 0x4dc   : > { %v17290_v37 = vpop.f32.mrb[149].mxu0 }
 0x4dd   : > { %v17291_v35 = vadd.f32 %v17290_v37, %v17289_v52  ;;  %v17292_v38 = vpop.f32.mrb[150].mxu0  ;;  %v18395_v37 = vld [vmem:[%s23918_s6 + $0x254] ss:$8 sps:$4 sm:$0xff]  }
 0x4de   : > { %v17293_v19 = vpop.f32.mrb[151].mxu0  ;;  %6125 = vmatprep.subr.bf16.mxu0 %v18395_v37 }
 0x4df   : > { %v17294_v1 = vadd.f32 %v17293_v19, %v17292_v38  ;;  %6126 = vmatpush1.bf16.msra.mxu0 %v18393_v42 }
 0x4e6   : > { %v17244_v41 = vpop.f32.mrb[64].mxu1 }
 0x4e7   : > { %v17245_v14 = vpop.f32.mrb[65].mxu1 }
 0x4e8   : > { %v17246_v61 = vadd.f32 %v17245_v14, %v17244_v41  ;;  %v17247_v53 = vpop.f32.mrb[66].mxu1 }
 0x4e9   : > { %v17248_v7 = vpop.f32.mrb[67].mxu1 }
 0x4ea   : > { %v21898_v2 = vadd.f32 %v17291_v35, %v17246_v61  ;;  %v17249_v47 = vadd.f32 %v17248_v7, %v17247_v53  ;;  %v18398_v53 = vld [vmem:[%s23918_s6 + $0x264] ss:$8 sps:$4 sm:$0xff]  }
 0x4eb   : > { %6127 = vmatprep.subr.bf16.mxu0 %v18398_v53 }
 0x4ec   : > { %v21900_v46 = vadd.f32 %v17294_v1, %v17249_v47  ;;  %v18396_v47 = vld [vmem:[%s23918_s6 + $0x260] ss:$8 sps:$4 sm:$0xff]  }
 0x4ed   : > { %6128 = vmatpush1.bf16.msra.mxu0 %v18396_v47 }
 0x4f6   : > { %v17295_v62 = vpop.f32.mrb[152].mxu0 }
 0x4f7   : > { %v17296_v43 = vpop.f32.mrb[153].mxu0 }
 0x4f8   : > { %v17297_v25 = vadd.f32 %v17296_v43, %v17295_v62  ;;  %v17298_v63 = vpop.f32.mrb[154].mxu0  ;;  %v18401_v43 = vld [vmem:[%s23918_s6 + $0x274] ss:$8 sps:$4 sm:$0xff]  }
 0x4f9   : > { %v17299_v29 = vpop.f32.mrb[155].mxu0  ;;  %6129 = vmatprep.subr.bf16.mxu0 %v18401_v43 }
 0x4fa   : > { %v17300_v13 = vadd.f32 %v17299_v29, %v17298_v63  ;;  %v18399_v29 = vld [vmem:[%s23918_s6 + $0x270] ss:$8 sps:$4 sm:$0xff]  }
 0x4fb   : > { %6130 = vmatpush1.bf16.msra.mxu0 %v18399_v29  ;;  %v5469_v29 = vld [vmem:[#allocation5 + $0x18] sm:$0xf] }
 0x4fc   : > { %6162 = vmatprep.subr.bf16.mxu0 %v18405_v55 }
 0x504   : > { %v17250_v15 = vpop.f32.mrb[68].mxu1 }
 0x505   : > { %v17251_v6 = vpop.f32.mrb[69].mxu1 }
 0x506   : > { %v17252_v24 = vadd.f32 %v17251_v6, %v17250_v15  ;;  %v17253_v44 = vpop.f32.mrb[70].mxu1 }
 0x507   : > { %v17254_v8 = vpop.f32.mrb[71].mxu1 }
 0x508   : > { %v17774_v57 = vadd.f32 %v17297_v25, %v17252_v24  ;;  %v17255_v58 = vadd.f32 %v17254_v8, %v17253_v44 }
 0x50a   : > { %v17777_v49 = vadd.f32 %v17300_v13, %v17255_v58 }
 0x513   : > { %v17301_v20 = vpop.f32.mrb[156].mxu0 }
 0x514   : > { %v17302_v9 = vpop.f32.mrb[157].mxu0 }
 0x515   : > { %v17303_v51 = vadd.f32 %v17302_v9, %v17301_v20  ;;  %v17304_v3 = vpop.f32.mrb[158].mxu0 }
 0x516   : > { %v17305_v33 = vpop.f32.mrb[159].mxu0 }
 0x517   : > { %v17306_v56 = vadd.f32 %v17305_v33, %v17304_v3  ;;  %v17256_v30 = vpop.f32.mrb[72].mxu1 }
 0x518   : > { %v17257_v0 = vpop.f32.mrb[73].mxu1 }
 0x519   : > { %v17258_v21 = vadd.f32 %v17257_v0, %v17256_v30  ;;  %v17259_v52 = vpop.f32.mrb[74].mxu1 }
 0x51a   : > { %v17260_v35 = vpop.f32.mrb[75].mxu1 }
 0x51b   : > { %v17780_v38 = vadd.f32 %v17303_v51, %v17258_v21  ;;  %v17261_v19 = vadd.f32 %v17260_v35, %v17259_v52  ;;  %v17334_v1 = vpop.f32.mrb[160].mxu0 }
 0x51c   : > { %v17335_v41 = vpop.f32.mrb[161].mxu0 }
 0x51d   : > { %v17783_v31 = vadd.f32 %v17306_v56, %v17261_v19  ;;  %v17336_v14 = vadd.f32 %v17335_v41, %v17334_v1  ;;  %v17337_v61 = vpop.f32.mrb[162].mxu0  ;;  %v5530_v19 = vshrl.u32 %v5520_v40, 16  ;;  %v5533_v1 = vshll.u32 %v5520_v40, 16 }
 0x51e   : > { %v17338_v39 = vpop.f32.mrb[163].mxu0 }
 0x51f   : > { %v17339_v7 = vadd.f32 %v17338_v39, %v17337_v61  ;;  %v17769_v5 = vadd.f32 %v21898_v2, %v17336_v14 }
 0x521   : > { %v17772_v62 = vadd.f32 %v21900_v46, %v17339_v7  ;;  %v5457_v7 = vld [vmem:[#allocation5 + $0xc] sm:$0xf] }
 0x523   : > { %v17340_v25 = vpop.f32.mrb[164].mxu0 }
 0x524   : > { %v17341_v63 = vpop.f32.mrb[165].mxu0 }
 0x525   : > { %v17342_v2 = vadd.f32 %v17341_v63, %v17340_v25  ;;  %v17343_v13 = vpop.f32.mrb[166].mxu0 }
 0x526   : > { %v17344_v46 = vpop.f32.mrb[167].mxu0 }
 0x527   : > { %v17345_v54 = vadd.f32 %v17344_v46, %v17343_v13  ;;  %v17775_v11 = vadd.f32 %v17774_v57, %v17342_v2  ;;  %v5532_v2 = vrot.slane %v5530_v19, 4  ;;  %v5535_v13 = vrot.slane %v5533_v1, 5 }
 0x529   : > { %v17778_v48 = vadd.f32 %v17777_v49, %v17345_v54 }
 0x52b   : > { %v17346_v15 = vpop.f32.mrb[168].mxu0 }
 0x52c   : > { %v17347_v59 = vpop.f32.mrb[169].mxu0 }
 0x52d   : > { %v17348_v18 = vadd.f32 %v17347_v59, %v17346_v15  ;;  %v17349_v6 = vpop.f32.mrb[170].mxu0 }
 0x52e   : > { %v17350_v28 = vpop.f32.mrb[171].mxu0 }
 0x52f   : > { %v17351_v24 = vadd.f32 %v17350_v28, %v17349_v6  ;;  %v17781_v44 = vadd.f32 %v17780_v38, %v17348_v18 }
 0x531   : > { %v17784_v8 = vadd.f32 %v17783_v31, %v17351_v24 }
 0x55f   : > { %v5363_v50 = vpop.f32.mrb[76].mxu1 }
 0x560   : > { %v17770_v58 = vadd.f32 %v17769_v5, %v5363_v50  ;;  %v17679_v10 = vpop.f32.mrb[77].mxu1 }
 0x561   : > { %v5366_v36 = vpop.f32.mrb[78].mxu1  ;;  %v5481_v10 = vld [vmem:[#allocation5 + $0x24] sm:$0xf] }
 0x562   : > { %v5392_v22 = vmax.f32 %v17770_v58, 0.0  ;;  %v17773_v4 = vadd.f32 %v17772_v62, %v5366_v36  ;;  %v17680_v23 = vpop.f32.mrb[79].mxu1  ;;  %v5536_v58 = vor.u32 %v5535_v13, %v5532_v2 }
 0x563   : > { %v5638_v23 = vld [vmem:[#allocation5] sm:$0xe] }
 0x564   : > { %v16889_v20 = vpack.c.bf16 %v5392_v22, %v5392_v22  ;;  %v5393_v57 = vmax.f32 %v17773_v4, 0.0  ;;  %v15438_v40 = vrot.slane %v5638_v23, 9 }
 0x566   : > { %5422 = vst [vmem:[#allocation2] sm:$0xf] %v16889_v20  ;;  %v16890_v49 = vpack.c.bf16 %v5393_v57, %v5393_v57  ;;  %v5493_v20 = vld [vmem:[#allocation5 + $0x30] sm:$0xf] }
 0x567   : > { %v5371_v9 = vpop.f32.mrb[80].mxu1 }
 0x568   : > { %5423 = vst [vmem:[#allocation2 + $0x8] sm:$0xf] %v16890_v49  ;;  %v17776_v26 = vadd.f32 %v17775_v11, %v5371_v9  ;;  %v17683_v51 = vpop.f32.mrb[81].mxu1 }
 0x569   : > { %v5374_v3 = vpop.f32.mrb[82].mxu1 }
 0x56a   : > { %v5394_v12 = vmax.f32 %v17776_v26, 0.0  ;;  %v17779_v33 = vadd.f32 %v17778_v48, %v5374_v3  ;;  %v17684_v56 = vpop.f32.mrb[83].mxu1  ;;  %v21980_v48 = vld [vmem:[#allocation5 + $0x54] sm:$0xf] }
 0x56b   : > { %v5599_v24 = vshll.u32 %v21980_v48, 16  ;;  %v5603_v57 = vshrl.u32 %v21980_v48, 16  ;;  %v5528_v48 = vld [vmem:[#allocation5 + $0x60] sm:$0xf] }
 0x56c   : > { %v16891_v30 = vpack.c.bf16 %v5394_v12, %v5394_v12  ;;  %v5395_v0 = vmax.f32 %v17779_v33, 0.0  ;;  %v5537_v12 = vrot.slane %v5536_v58, 4  ;;  %v22002_v58 = vld [vmem:[#allocation5 + $0x54] sm:$0xf] }
 0x56d   : > { %v5446_v21 = vld [vmem:[#allocation2] sm:$0x7]  ;;  %v21988_v51 = vrot.slane %v5599_v24, 5  ;;  %v5605_v24 = vrot.slane %v5603_v57, 4 }
 0x56e   : > { %5424 = vst [vmem:[#allocation2 + $0x10] sm:$0xf] %v16891_v30  ;;  %v16892_v52 = vpack.c.bf16 %v5395_v0, %v5395_v0  ;;  %v5448_v37 = vshrl.u32 %v5446_v21, 16  ;;  %v5451_v14 = vshll.u32 %v5446_v21, 16 }
 0x56f   : > { %v5379_v35 = vpop.f32.mrb[84].mxu1  ;;  %v5460_v38 = vld [vmem:[#allocation2 + $0x8] sm:$0x7] }
 0x570   : > { %5425 = vst [vmem:[#allocation2 + $0x18] sm:$0xf] %v16892_v52  ;;  %v17782_v41 = vadd.f32 %v17781_v44, %v5379_v35  ;;  %v17687_v42 = vpop.f32.mrb[85].mxu1  ;;  %v5450_v31 = vrot.slane %v5448_v37, 7  ;;  %v5462_v61 = vshrl.u32 %v5460_v38, 16  ;;  %v5465_v5 = vshll.u32 %v5460_v38, 16 }
 0x571   : > { %v5382_v39 = vpop.f32.mrb[86].mxu1 }
 0x572   : > { %v5396_v47 = vmax.f32 %v17782_v41, 0.0  ;;  %v17785_v62 = vadd.f32 %v17784_v8, %v5382_v39  ;;  %v17688_v43 = vpop.f32.mrb[87].mxu1  ;;  %v5453_v25 = vor.u32 %v5451_v14, %v5450_v31  ;;  %v5464_v63 = vrot.slane %v5462_v61, 7 }
 0x574   : > { %v16893_v55 = vpack.c.bf16 %v5396_v47, %v5396_v47  ;;  %v5397_v46 = vmax.f32 %v17785_v62, 0.0  ;;  %v5458_v54 = vsel %vm21974_vm10, %v5453_v25, %v5457_v7  ;;  %v5467_v11 = vor.u32 %v5465_v5, %v5464_v63  ;;  %v5505_v5 = vld [vmem:[#allocation5 + $0x3c] sm:$0xf] }
 0x575   : > { %v5472_v15 = vld [vmem:[#allocation2 + $0x10] sm:$0x7]  ;;  %5459 = vst [vmem:[#allocation5 + $0xc] sm:$0xf] %v5458_v54  ;;  %v5517_v54 = vld [vmem:[#allocation5 + $0x48] sm:$0xf] }
 0x576   : > { %v5474_v59 = vshrl.u32 %v5472_v15, 16  ;;  %5426 = vst [vmem:[#allocation2 + $0x20] sm:$0xf] %v16893_v55  ;;  %v16894_v18 = vpack.c.bf16 %v5397_v46, %v5397_v46  ;;  %v5470_v6 = vsel %vm21974_vm10, %v5467_v11, %v5469_v29  ;;  %v5477_v8 = vshll.u32 %v5472_v15, 16 }
 0x577   : > { %v5484_v28 = vld [vmem:[#allocation2 + $0x18] sm:$0x7]  ;;  %5471 = vst [vmem:[#allocation5 + $0x18] sm:$0xf] %v5470_v6 }
 0x578   : > { %v5476_v44 = vrot.slane %v5474_v59, 7  ;;  %5427 = vst [vmem:[#allocation2 + $0x28] sm:$0xf] %v16894_v18  ;;  %v5486_v50 = vshrl.u32 %v5484_v28, 16  ;;  %v5489_v4 = vshll.u32 %v5484_v28, 16 }
 0x57a   : > { %v5479_v36 = vor.u32 %v5477_v8, %v5476_v44  ;;  %v5488_v22 = vrot.slane %v5486_v50, 7 }
 0x57c   : > { %v5482_v49 = vsel %vm21974_vm10, %v5479_v36, %v5481_v10  ;;  %v5521_v9 = vld [vmem:[#allocation5 + $0xc] sm:$0xf]  ;;  %v5491_v26 = vor.u32 %v5489_v4, %v5488_v22  ;;  %v5609_v10 = vshll.u32 %v5528_v48, 16 }
 0x57d   : > { %v5639_v3 = vld [vmem:[#allocation5 + $0xc] sm:$0xf]  ;;  %5483 = vst [vmem:[#allocation5 + $0x24] sm:$0xf] %v5482_v49  ;;  %v5496_v33 = vld [vmem:[#allocation2 + $0x20] sm:$0x7]  ;;  %v5606_v49 = vor.u32 %v5605_v24, %v21988_v51 }
 0x57e   : > { %v5539_v56 = vshll.u32 %v5521_v9, 16  ;;  %v5543_v30 = vshrl.u32 %v5521_v9, 16  ;;  %v5658_v0 = vrot.slane %v5639_v3, 5  ;;  %v5498_v21 = vshrl.u32 %v5496_v33, 16  ;;  %v5522_v37 = vld [vmem:[#allocation5 + $0x18] sm:$0xf] }
 0x57f   : > { %v5501_v52 = vshll.u32 %v5496_v33, 16  ;;  %v5494_v35 = vsel %vm21974_vm10, %v5491_v26, %v5493_v20  ;;  %v5640_v38 = vld [vmem:[#allocation5 + $0x18] sm:$0xf]  ;;  %v5508_v19 = vld [vmem:[#allocation2 + $0x28] sm:$0x7]  ;;  %v5549_v42 = vshll.u32 %v5522_v37, 16 }
 0x580   : > { %v5541_v1 = vrot.slane %v5539_v56, 5  ;;  %v5545_v41 = vrot.slane %v5543_v30, 4  ;;  %v5553_v31 = vshrl.u32 %v5522_v37, 16  ;;  %5495 = vst [vmem:[#allocation5 + $0x30] sm:$0xf] %v5494_v35  ;;  %v5500_v14 = vrot.slane %v5498_v21, 7 }
 0x581   : > { %v5510_v61 = vshrl.u32 %v5508_v19, 16  ;;  %v5513_v39 = vshll.u32 %v5508_v19, 16  ;;  %v5660_v7 = vrot.slane %v5658_v0, 4  ;;  %v5551_v62 = vrot.slane %v5549_v42, 5 }
 0x582   : > { %v5546_v47 = vor.u32 %v5545_v41, %v5541_v1  ;;  %v5555_v43 = vrot.slane %v5553_v31, 4  ;;  %v5661_v25 = vrot.slane %v5640_v38, 5  ;;  %v5503_v63 = vor.u32 %v5501_v52, %v5500_v14  ;;  %v5646_v52 = vld [vmem:[#allocation5 + $0x60] sm:$0xf] }
 0x583   : > { %v5512_v29 = vrot.slane %v5510_v61, 7  ;;  %v5542_v2 = vsel %vm20578_vm5, %v5537_v12, %v5541_v1  ;;  %v5659_v13 = vsel %vm21013_vm4, %v15438_v40, %v5658_v0  ;;  %v5676_v30 = vrot.slane %v22002_v58, 5 }
 0x584   : > { %v5547_v55 = vrot.slane %v5546_v47, 4  ;;  %v5556_v46 = vor.u32 %v5555_v43, %v5551_v62  ;;  %v5662_v11 = vsel %vm21013_vm4, %v5660_v7, %v5661_v25  ;;  %5627 = vst [vmem:[#allocation5 + $0x4] sm:$0xf] %v5542_v2  ;;  %5691 = vst [vmem:[#allocation5 + $0x8] sm:$0xf] %v5659_v13  ;;  %v5506_v15 = vsel %vm21974_vm10, %v5503_v63, %v5505_v5 }
 0x585   : > { %v5523_v59 = vld [vmem:[#allocation5 + $0x24] sm:$0xf]  ;;  %v5515_v18 = vor.u32 %v5513_v39, %v5512_v29  ;;  %v5663_v28 = vrot.slane %v5661_v25, 4  ;;  %5692 = vst [vmem:[#allocation5 + $0x14] sm:$0xf] %v5662_v11  ;;  %v22014_v35 = vrot.slane %v5609_v10, 5 }
 0x586   : > { %v5641_v6 = vld [vmem:[#allocation5 + $0x24] sm:$0xf]  ;;  %5507 = vst [vmem:[#allocation5 + $0x3c] sm:$0xf] %v5506_v15  ;;  %v5552_v44 = vsel %vm20578_vm5, %v5547_v55, %v5551_v62  ;;  %v5559_v8 = vshll.u32 %v5523_v59, 16  ;;  %v5563_v50 = vshrl.u32 %v5523_v59, 16 }
 0x587   : > { %v5557_v36 = vrot.slane %v5556_v46, 4  ;;  %5628 = vst [vmem:[#allocation5 + $0x10] sm:$0xf] %v5552_v44  ;;  %v5524_v22 = vld [vmem:[#allocation5 + $0x30] sm:$0xf]  ;;  %v5518_v4 = vsel %vm21974_vm10, %v5515_v18, %v5517_v54  ;;  %v5664_v23 = vrot.slane %v5641_v6, 5 }
 0x588   : > { %v5642_v20 = vld [vmem:[#allocation5 + $0x30] sm:$0xf]  ;;  %v5561_v57 = vrot.slane %v5559_v8, 5  ;;  %v5565_v9 = vrot.slane %v5563_v50, 4  ;;  %v5569_v26 = vshll.u32 %v5524_v22, 16  ;;  %v5573_v3 = vshrl.u32 %v5524_v22, 16 }
 0x589   : > { %5519 = vst [vmem:[#allocation5 + $0x48] sm:$0xf] %v5518_v4  ;;  %v5665_v12 = vsel %vm21013_vm4, %v5663_v28, %v5664_v23  ;;  %v5666_v33 = vrot.slane %v5664_v23, 4  ;;  %v5667_v56 = vrot.slane %v5642_v20, 5  ;;  %v5607_v1 = vrot.slane %v5606_v49, 4 }
 0x58a   : > { %v5562_v53 = vsel %vm20578_vm5, %v5557_v36, %v5561_v57  ;;  %v5566_v0 = vor.u32 %v5565_v9, %v5561_v57  ;;  %v5571_v40 = vrot.slane %v5569_v26, 5  ;;  %v5575_v21 = vrot.slane %v5573_v3, 4  ;;  %5693 = vst [vmem:[#allocation5 + $0x20] sm:$0xf] %v5665_v12  ;;  %v18403_v46 = vld [vmem:[%s23918_s6 + $0x280] ss:$8 sps:$4 sm:$0xff]  }
 0x58b   : > { %5629 = vst [vmem:[#allocation5 + $0x1c] sm:$0xf] %v5562_v53  ;;  %v5668_v37 = vsel %vm21013_vm4, %v5666_v33, %v5667_v56  ;;  %v5678_v31 = vrot.slane %v5676_v30, 4  ;;  %v5679_v14 = vrot.slane %v5646_v52, 5  ;;  %v5669_v5 = vrot.slane %v5667_v56, 4 }
 0x58c   : > { %v5567_v38 = vrot.slane %v5566_v0, 4  ;;  %v5576_v19 = vor.u32 %v5575_v21, %v5571_v40  ;;  %5694 = vst [vmem:[#allocation5 + $0x2c] sm:$0xf] %v5668_v37  ;;  %v5612_v63 = vsel %vm20578_vm5, %v5607_v1, %v22014_v35  ;;  %v18409_v4 = vld [vmem:[%s23918_s6 + $0x294] ss:$8 sps:$4 sm:$0xff]  }
 0x58d   : > { %v5525_v41 = vld [vmem:[#allocation5 + $0x3c] sm:$0xf]  ;;  %5634 = vst [vmem:[#allocation5 + $0x58] sm:$0xf] %v5612_v63  ;;  %v5680_v15 = vsel %vm21013_vm4, %v5678_v31, %v5679_v14  ;;  %v18407_v33 = vld [vmem:[%s23918_s6 + $0x290] ss:$8 sps:$4 sm:$0xff]  }
 0x58e   : > { %v5643_v42 = vld [vmem:[#allocation5 + $0x3c] sm:$0xf]  ;;  %v5572_v61 = vsel %vm20578_vm5, %v5567_v38, %v5571_v40  ;;  %v5579_v39 = vshll.u32 %v5525_v41, 16  ;;  %v5583_v7 = vshrl.u32 %v5525_v41, 16  ;;  %v5577_v47 = vrot.slane %v5576_v19, 4  ;;  %v22030_v59 = vld [vmem:[#allocation5 + $0xc] sm:$0xff] }
 0x58f   : > { %5630 = vst [vmem:[#allocation5 + $0x28] sm:$0xf] %v5572_v61  ;;  %v5670_v43 = vrot.slane %v5643_v42, 5  ;;  %5698 = vst [vmem:[#allocation5 + $0x5c] sm:$0xf] %v5680_v15 }
 0x590   : > { %v5526_v62 = vld [vmem:[#allocation5 + $0x48] sm:$0xf]  ;;  %v5581_v29 = vrot.slane %v5579_v39, 5  ;;  %v5585_v2 = vrot.slane %v5583_v7, 4  ;;  %v18413_v0 = vld [vmem:[%s23918_s6 + $0x2a4] ss:$8 sps:$4 sm:$0xff]  }
 0x591   : > { %v5644_v25 = vld [vmem:[#allocation5 + $0x48] sm:$0xf]  ;;  %v5589_v13 = vshll.u32 %v5526_v62, 16  ;;  %v5593_v55 = vshrl.u32 %v5526_v62, 16  ;;  %v5671_v54 = vsel %vm21013_vm4, %v5669_v5, %v5670_v43  ;;  %v5672_v11 = vrot.slane %v5670_v43, 4 }
 0x592   : > { %v5673_v48 = vrot.slane %v5644_v25, 5  ;;  %v5704_v18 = vld [vmem:[#allocation5 + $0x18] sm:$0xff]  ;;  %v5582_v6 = vsel %vm20578_vm5, %v5577_v47, %v5581_v29  ;;  %v5586_v28 = vor.u32 %v5585_v2, %v5581_v29  ;;  %5695 = vst [vmem:[#allocation5 + $0x38] sm:$0xf] %v5671_v54  ;;  %v22036_v10 = vld [vmem:[#allocation5 + $0x20] sm:$0xf] }
 0x593   : > { %v5591_v24 = vrot.slane %v5589_v13, 5  ;;  %v5595_v44 = vrot.slane %v5593_v55, 4  ;;  %v15488_v8 = vcombine.high %v22030_v59, %v5704_v18  ;;  %v15487_v50 = vcombine.low %v22030_v59, %v5704_v18  ;;  %5631 = vst [vmem:[#allocation5 + $0x34] sm:$0xf] %v5582_v6  ;;  %v22038_v36 = vld [vmem:[#allocation5 + $0x2c] sm:$0xf] }
 0x594   : > { %v5674_v22 = vsel %vm21013_vm4, %v5672_v11, %v5673_v48  ;;  %v5587_v23 = vrot.slane %v5586_v28, 4  ;;  %v5675_v49 = vrot.slane %v5673_v48, 4  ;;  %v15549_v57 = vcombine.low %v22036_v10, %v22038_v36  ;;  %v18417_v38 = vld [vmem:[%s23918_s6 + $0x2b4] ss:$8 sps:$4 sm:$0xff]   ;;  %v18415_v19 = vld [vmem:[%s23918_s6 + $0x2b0] ss:$8 sps:$4 sm:$0xff]  }
 0x595   : > { %v5596_v20 = vor.u32 %v5595_v44, %v5591_v24  ;;  %5696 = vst [vmem:[#allocation5 + $0x44] sm:$0xf] %v5674_v22  ;;  %6131 = vmatprep.mubr.bf16.mxu0 %v15488_v8  ;;  %v18421_v31 = vld [vmem:[%s23918_s6 + $0x2c4] ss:$8 sps:$4 sm:$0xff]   ;;  %v18419_v61 = vld [vmem:[%s23918_s6 + $0x2c0] ss:$8 sps:$4 sm:$0xff]  }
 0x596   : > { %6132 = vmatmul.mubr.bf16.vlgmr.msra.gmra.mrb[172].mxu0 %v15487_v50  ;;  %v5706_v9 = vld [vmem:[#allocation5 + $0x24] sm:$0xff]  ;;  %v5592_v26 = vsel %vm20578_vm5, %v5587_v23, %v5591_v24  ;;  %v5677_v12 = vsel %vm21013_vm4, %v5675_v49, %v5676_v30  ;;  %v18425_v7 = vld [vmem:[%s23918_s6 + $0x2d4] ss:$8 sps:$4 sm:$0xff]   ;;  %v18423_v5 = vld [vmem:[%s23918_s6 + $0x2d0] ss:$8 sps:$4 sm:$0xff]  }
 0x597   : > { %v5597_v3 = vrot.slane %v5596_v20, 4  ;;  %6163 = vmatpush1.bf16.msra.mxu0 %v18403_v46  ;;  %5632 = vst [vmem:[#allocation5 + $0x40] sm:$0xf] %v5592_v26  ;;  %5697 = vst [vmem:[#allocation5 + $0x50] sm:$0xf] %v5677_v12  ;;  %v22056_v56 = vcombine.high %v5704_v18, %v5706_v9  ;;  %v22058_v53 = vcombine.low %v5704_v18, %v5706_v9  ;;  %v22101_v47 = vld [vmem:[#allocation4 + $0x60] sm:$0xff] }
 0x598   : > { %6164 = vmatprep.subr.bf16.mxu0 %v18409_v4  ;;  %v18411_v30 = vld [vmem:[%s23918_s6 + $0x2a0] ss:$8 sps:$4 sm:$0xff]   ;;  %v18428_v62 = vld [vmem:[%s23918_s6 + $0x2e4] ss:$8 sps:$4 sm:$0xff]   ;;  %v18431_v25 = vld [vmem:[%s23918_s6 + $0x2f4] ss:$8 sps:$4 sm:$0xff]  }
 0x599   : > { %v5602_v16 = vsel %vm20578_vm5, %v5597_v3, %v21988_v51  ;;  %v22069_v52 = vld [vmem:[#allocation5 + $0x38] sm:$0xf]  ;;  %v18426_v43 = vld [vmem:[%s23918_s6 + $0x2e0] ss:$8 sps:$4 sm:$0xff]   ;;  %v18435_v29 = vld [vmem:[%s23918_s6 + $0x4] ss:$8 sps:$4 sm:$0xff]  }
 0x59a   : > { %5633 = vst [vmem:[#allocation5 + $0x4c] sm:$0xf] %v5602_v16  ;;  %v5708_v58 = vld [vmem:[#allocation5 + $0x30] sm:$0xff]  ;;  %v18433_v13 = vld [vmem:[%s23918_s6] ss:$8 sps:$4 sm:$0xff]   ;;  %v15492_v15 = vcombine.low %v22038_v36, %v22069_v52  ;;  %vm7216_vm5 = vcmask 1044484  }
 0x59b   : > { %6165 = vmatpush1.bf16.msra.mxu0 %v18407_v33  ;;  %v15491_v40 = vcombine.high %v5706_v9, %v5708_v58  ;;  %v15490_v21 = vcombine.low %v5706_v9, %v5708_v58  ;;  %v18429_v63 = vld [vmem:[%s23918_s6 + $0x2f0] ss:$8 sps:$4 sm:$0xff]   ;;  %v22119_v2 = vld [vmem:[#allocation5 + $0x14] sm:$0xf]  ;;  %v18442_v11 = vld [vmem:[%s23918_s6 + $0x24] ss:$8 sps:$4 sm:$0xff]  }
 0x59c   : > { %v22071_v37 = vld [vmem:[#allocation5 + $0x44] sm:$0xf]  ;;  %6166 = vmatprep.subr.bf16.mxu0 %v18413_v0  ;;  %v15489_v55 = vcombine.low %v22119_v2, %v22036_v10  ;;  %v18438_v46 = vld [vmem:[%s23918_s6 + $0x14] ss:$8 sps:$4 sm:$0xff]   ;;  %v18436_v54 = vld [vmem:[%s23918_s6 + $0x10] ss:$8 sps:$4 sm:$0xff]  }
 0x59d   : > { %v15552_v17 = vcombine.low %v22069_v52, %v22071_v37  ;;  %6141 = vmatprep.mubr.bf16.mxu0 %v15491_v40  ;;  %v18440_v48 = vld [vmem:[%s23918_s6 + $0x20] ss:$8 sps:$4 sm:$0xff]   ;;  %v18445_v18 = vld [vmem:[%s23918_s6 + $0x34] ss:$8 sps:$4 sm:$0xff]   ;;  %v18443_v6 = vld [vmem:[%s23918_s6 + $0x30] ss:$8 sps:$4 sm:$0xff]  }
 0x59e   : > { %6142 = vmatmul.mubr.bf16.gmra.mrb[176].mxu0 %v15490_v21  ;;  %v5710_v51 = vld [vmem:[#allocation5 + $0x3c] sm:$0xff]  ;;  %v18449_v28 = vld [vmem:[%s23918_s6 + $0x44] ss:$8 sps:$4 sm:$0xff]   ;;  %v5761_v24 = vld [vmem:[#allocation5 + $0x50] sm:$0xf] }
 0x59f   : > { %6167 = vmatpush1.bf16.msra.mxu0 %v18411_v30  ;;  %v22081_v1 = vcombine.high %v5708_v58, %v5710_v51  ;;  %v22083_v41 = vcombine.low %v5708_v58, %v5710_v51  ;;  %v18447_v44 = vld [vmem:[%s23918_s6 + $0x40] ss:$8 sps:$4 sm:$0xff]   ;;  %v15495_v8 = vcombine.low %v22071_v37, %v5761_v24  ;;  %v18452_v22 = vld [vmem:[%s23918_s6 + $0x54] ss:$8 sps:$4 sm:$0xff]   ;;  %v18450_v23 = vld [vmem:[%s23918_s6 + $0x50] ss:$8 sps:$4 sm:$0xff]  }
 0x5a0   : > { %6168 = vmatprep.subr.bf16.mxu0 %v18417_v38  ;;  %v5700_v50 = vld [vmem:[#allocation5] sm:$0xff]  ;;  %v18458_v9 = vld [vmem:[%s23918_s6 + $0x74] ss:$8 sps:$4 sm:$0xff]   ;;  %v18456_v26 = vld [vmem:[%s23918_s6 + $0x70] ss:$8 sps:$4 sm:$0xff]  }
 0x5a1   : > { %v22085_v42 = vld [vmem:[#allocation5 + $0x48] sm:$0xff]  ;;  %v15545_v4 = vcombine.high %v5700_v50, %v22030_v59  ;;  %v18464_v33 = vld [vmem:[%s23918_s6 + $0x94] ss:$8 sps:$4 sm:$0xff]   ;;  %v18462_v0 = vld [vmem:[%s23918_s6 + $0x90] ss:$8 sps:$4 sm:$0xff]  }
 0x5a2   : > { %v15494_v14 = vcombine.high %v5710_v51, %v22085_v42  ;;  %v15493_v39 = vcombine.low %v5710_v51, %v22085_v42  ;;  %v18455_v20 = vld [vmem:[%s23918_s6 + $0x64] ss:$8 sps:$4 sm:$0xff]   ;;  %v18453_v49 = vld [vmem:[%s23918_s6 + $0x60] ss:$8 sps:$4 sm:$0xff]   ;;  %v18470_v30 = vld [vmem:[%s23918_s6 + $0xb4] ss:$8 sps:$4 sm:$0xff]  }
 0x5a3   : > { %6169 = vmatpush1.bf16.msra.mxu0 %v18415_v19  ;;  %v18461_v3 = vld [vmem:[%s23918_s6 + $0x84] ss:$8 sps:$4 sm:$0xff]   ;;  %v18459_v12 = vld [vmem:[%s23918_s6 + $0x80] ss:$8 sps:$4 sm:$0xff]   ;;  %v18468_v40 = vld [vmem:[%s23918_s6 + $0xb0] ss:$8 sps:$4 sm:$0xff]  }
 0x5a4   : > { %6151 = vmatprep.mubr.bf16.mxu0 %v15494_v14  ;;  %6170 = vmatprep.subr.bf16.mxu0 %v18421_v31  ;;  %v18467_v16 = vld [vmem:[%s23918_s6 + $0xa4] ss:$8 sps:$4 sm:$0xff]   ;;  %v18465_v58 = vld [vmem:[%s23918_s6 + $0xa0] ss:$8 sps:$4 sm:$0xff]   ;;  %v18476_v51 = vld [vmem:[%s23918_s6 + $0xd4] ss:$8 sps:$4 sm:$0xff]  }
 0x5a5   : > { %v18473_v21 = vld [vmem:[%s23918_s6 + $0xc4] ss:$8 sps:$4 sm:$0xff]   ;;  %v18471_v38 = vld [vmem:[%s23918_s6 + $0xc0] ss:$8 sps:$4 sm:$0xff]   ;;  %v18474_v19 = vld [vmem:[%s23918_s6 + $0xd0] ss:$8 sps:$4 sm:$0xff]  }
 0x5a6   : > { %6152 = vmatmul.mubr.bf16.gmra.mrb[180].mxu0 %v15493_v39  ;;  %v18479_v31 = vld [vmem:[%s23918_s6 + $0xe4] ss:$8 sps:$4 sm:$0xff]   ;;  %v18477_v14 = vld [vmem:[%s23918_s6 + $0xe0] ss:$8 sps:$4 sm:$0xff]   ;;  %v18480_v39 = vld [vmem:[%s23918_s6 + $0xf0] ss:$8 sps:$4 sm:$0xff]  }
 0x5a7   : > { %6171 = vmatpush1.bf16.msra.mxu0 %v18419_v61  ;;  %6194 = vmatprep.mubr.bf16.mxu0 %v22101_v47  ;;  %v18482_v61 = vld [vmem:[%s23918_s6 + $0xf4] ss:$8 sps:$4 sm:$0xff]   ;;  %v18501_v24 = vld [vmem:[%s23918_s6 + $0x160] ss:$8 sps:$4 sm:$0xff]   ;;  %v18522_v36 = vld [vmem:[%s23918_s6 + $0x350] ss:$8 sps:$4 sm:$0xff]  }
 0x5a8   : > { %6172 = vmatprep.subr.bf16.mxu0 %v18425_v7  ;;  %v18485_v7 = vld [vmem:[%s23918_s6 + $0x104] ss:$8 sps:$4 sm:$0xff]   ;;  %v18524_v10 = vld [vmem:[%s23918_s6 + $0x354] ss:$8 sps:$4 sm:$0xff]   ;;  %vm7217_vm4 = vsmask.f32 4352 }
 0x5a9   : > { %v18530_v52 = vld [vmem:[%s23918_s6 + $0x374] ss:$8 sps:$4 sm:$0xff]   ;;  %v18533_v37 = vld [vmem:[%s23918_s6 + $0x384] ss:$8 sps:$4 sm:$0xff]   ;;  %vm22538_vm13 = vmand %vm7216_vm5, %vm7217_vm4  ;;  %vm7285_vm10 = vsmask.f32 7962 }
 0x5aa   : > { %vm24076_vm5 = vsmask.f32 256 }
 0x5ab   : > { %6173 = vmatpush1.bf16.msra.mxu0 %v18423_v5  ;;  %v18483_v5 = vld [vmem:[%s23918_s6 + $0x100] ss:$8 sps:$4 sm:$0xff]   ;;  %vm22572_vm1 = vmand %vm3858_vm15, %vm24076_vm5 }
 0x5ac   : > { %6174 = vmatprep.subr.bf16.mxu0 %v18428_v62  ;;  %v15544_v62 = vcombine.low %v5700_v50, %v22030_v59  ;;  %v18489_v59 = vld [vmem:[%s23918_s6 + $0x120] ss:$8 sps:$4 sm:$0xff]   ;;  %v18509_v50 = vld [vmem:[%s23918_s6 + $0x304] ss:$8 sps:$4 sm:$0xff]   ;;  %vm22582_vm15 = vmand %vm7260_vm2, %vm7285_vm10 }
 0x5af   : > { %6175 = vmatpush1.bf16.msra.mxu0 %v18426_v43  ;;  %v18488_v43 = vld [vmem:[%s23918_s6 + $0x114] ss:$8 sps:$4 sm:$0xff]  }
 0x5b0   : > { %6176 = vmatprep.subr.bf16.mxu0 %v18431_v25  ;;  %v18486_v25 = vld [vmem:[%s23918_s6 + $0x110] ss:$8 sps:$4 sm:$0xff]  }
 0x5b3   : > { %6177 = vmatpush1.bf16.msra.mxu0 %v18429_v63  ;;  %v18491_v63 = vld [vmem:[%s23918_s6 + $0x124] ss:$8 sps:$4 sm:$0xff]  }
 0x5b4   : > { %6488 = vmatprep.subr.bf16.mxu0 %v18435_v29  ;;  %v18494_v29 = vld [vmem:[%s23918_s6 + $0x134] ss:$8 sps:$4 sm:$0xff]  }
 0x5b6   : > { %6195 = vmatmul.mubr.bf16.vlgmr.msra.gmra.mrb[172].mxu0 %v15489_v55  ;;  %v18497_v55 = vld [vmem:[%s23918_s6 + $0x144] ss:$8 sps:$4 sm:$0xff]  }
 0x5b7   : > { %6489 = vmatpush1.bf16.msra.mxu0 %v18433_v13  ;;  %6204 = vmatprep.mubr.bf16.mxu0 %v22101_v47  ;;  %v18492_v13 = vld [vmem:[%s23918_s6 + $0x130] ss:$8 sps:$4 sm:$0xff]  }
 0x5b8   : > { %6490 = vmatprep.subr.bf16.mxu0 %v18438_v46  ;;  %v18495_v46 = vld [vmem:[%s23918_s6 + $0x140] ss:$8 sps:$4 sm:$0xff]  }
 0x5bb   : > { %6491 = vmatpush1.bf16.msra.mxu0 %v18436_v54  ;;  %v18500_v54 = vld [vmem:[%s23918_s6 + $0x154] ss:$8 sps:$4 sm:$0xff]  }
 0x5bc   : > { %6492 = vmatprep.subr.bf16.mxu0 %v18442_v11  ;;  %v18582_v11 = vld [vmem:[%s23919_s7 + $0x300] ss:$8 sps:$4 sm:$0xff]  }
 0x5be   : > { %6205 = vmatmul.mubr.bf16.gmra.mrb[176].mxu0 %v15492_v15  ;;  %v18498_v15 = vld [vmem:[%s23918_s6 + $0x150] ss:$8 sps:$4 sm:$0xff]  }
 0x5bf   : > { %6493 = vmatpush1.bf16.msra.mxu0 %v18440_v48  ;;  %6214 = vmatprep.mubr.bf16.mxu0 %v22101_v47  ;;  %v18584_v48 = vld [vmem:[%s23919_s7 + $0x304] ss:$8 sps:$4 sm:$0xff]  }
 0x5c0   : > { %6494 = vmatprep.subr.bf16.mxu0 %v18445_v18  ;;  %v18587_v18 = vld [vmem:[%s23919_s7 + $0x314] ss:$8 sps:$4 sm:$0xff]   ;;  %8218 = vmatprep.subr.bf16.mxu1 %v18584_v48  ;;  %v18570_v48 = vld [vmem:[%s23918_s6 + $0x450] ss:$8 sps:$4 sm:$0xff]  }
 0x5c1   : > { %8219 = vmatpush1.bf16.msra.mxu1 %v18582_v11 }
 0x5c2   : > { %8220 = vmatprep.subr.bf16.mxu1 %v18587_v18  ;;  %v18578_v18 = vld [vmem:[%s23918_s6 + $0x474] ss:$8 sps:$4 sm:$0xff]  }
 0x5c3   : > { %6495 = vmatpush1.bf16.msra.mxu0 %v18443_v6  ;;  %v18503_v6 = vld [vmem:[%s23918_s6 + $0x164] ss:$8 sps:$4 sm:$0xff]  }
 0x5c4   : > { %6496 = vmatprep.subr.bf16.mxu0 %v18449_v28  ;;  %v18585_v28 = vld [vmem:[%s23919_s7 + $0x310] ss:$8 sps:$4 sm:$0xff]  }
 0x5c5   : > { %8221 = vmatpush1.bf16.msra.mxu1 %v18585_v28  ;;  %v18579_v28 = vld [vmem:[#allocation5 + $0x20] ss:$12 sps:$4 sm:$0xff]  }
 0x5c6   : > { %6215 = vmatmul.mubr.bf16.gmra.mrb[180].mxu0 %v15495_v8  ;;  %v18504_v8 = vld [vmem:[%s23918_s6 + $0x170] ss:$8 sps:$4 sm:$0xff]  }
 0x5c7   : > { %6497 = vmatpush1.bf16.msra.mxu0 %v18447_v44  ;;  %6520 = vmatprep.mubr.bf16.mxu0 %v15545_v4  ;;  %v18506_v44 = vld [vmem:[%s23918_s6 + $0x174] ss:$8 sps:$4 sm:$0xff]   ;;  %v18507_v4 = vld [vmem:[%s23918_s6 + $0x300] ss:$8 sps:$4 sm:$0xff]  }
 0x5c8   : > { %6498 = vmatprep.subr.bf16.mxu0 %v18452_v22  ;;  %v5701_v22 = vld [vmem:[#allocation5 + $0x8] sm:$0xf] }
 0x5cb   : > { %6499 = vmatpush1.bf16.msra.mxu0 %v18450_v23  ;;  %v15546_v23 = vcombine.low %v5701_v22, %v22119_v2  ;;  %v18513_v2 = vld [vmem:[%s23918_s6 + $0x320] ss:$8 sps:$4 sm:$0xff]   ;;  %v18593_v22 = vld [vmem:[%s23919_s7 + $0x334] ss:$8 sps:$4 sm:$0xff]  }
 0x5cc   : > { %6500 = vmatprep.subr.bf16.mxu0 %v18455_v20  ;;  %v18512_v20 = vld [vmem:[%s23918_s6 + $0x314] ss:$8 sps:$4 sm:$0xff]  }
 0x5cf   : > { %6501 = vmatpush1.bf16.msra.mxu0 %v18453_v49  ;;  %v18510_v49 = vld [vmem:[%s23918_s6 + $0x310] ss:$8 sps:$4 sm:$0xff]  }
 0x5d0   : > { %6502 = vmatprep.subr.bf16.mxu0 %v18458_v9  ;;  %v18515_v9 = vld [vmem:[%s23918_s6 + $0x324] ss:$8 sps:$4 sm:$0xff]  }
 0x5d3   : > { %6503 = vmatpush1.bf16.msra.mxu0 %v18456_v26  ;;  %v18518_v26 = vld [vmem:[%s23918_s6 + $0x334] ss:$8 sps:$4 sm:$0xff]  }
 0x5d4   : > { %6504 = vmatprep.subr.bf16.mxu0 %v18461_v3  ;;  %v18516_v3 = vld [vmem:[%s23918_s6 + $0x330] ss:$8 sps:$4 sm:$0xff]  }
 0x5d7   : > { %6505 = vmatpush1.bf16.msra.mxu0 %v18459_v12  ;;  %v18521_v12 = vld [vmem:[%s23918_s6 + $0x344] ss:$8 sps:$4 sm:$0xff]  }
 0x5d8   : > { %6506 = vmatprep.subr.bf16.mxu0 %v18464_v33  ;;  %v18519_v33 = vld [vmem:[%s23918_s6 + $0x340] ss:$8 sps:$4 sm:$0xff]  }
 0x5db   : > { %6507 = vmatpush1.bf16.msra.mxu0 %v18462_v0  ;;  %v18525_v0 = vld [vmem:[%s23918_s6 + $0x360] ss:$8 sps:$4 sm:$0xff]  }
 0x5dc   : > { %6508 = vmatprep.subr.bf16.mxu0 %v18467_v16  ;;  %v18536_v16 = vld [vmem:[%s23918_s6 + $0x394] ss:$8 sps:$4 sm:$0xff]  }
 0x5df   : > { %6509 = vmatpush1.bf16.msra.mxu0 %v18465_v58  ;;  %v18534_v58 = vld [vmem:[%s23918_s6 + $0x390] ss:$8 sps:$4 sm:$0xff]  }
 0x5e0   : > { %6510 = vmatprep.subr.bf16.mxu0 %v18470_v30  ;;  %v18539_v30 = vld [vmem:[%s23918_s6 + $0x3a4] ss:$8 sps:$4 sm:$0xff]  }
 0x5e3   : > { %6511 = vmatpush1.bf16.msra.mxu0 %v18468_v40  ;;  %v18537_v40 = vld [vmem:[%s23918_s6 + $0x3a0] ss:$8 sps:$4 sm:$0xff]  }
 0x5e4   : > { %6512 = vmatprep.subr.bf16.mxu0 %v18473_v21  ;;  %v18542_v21 = vld [vmem:[%s23918_s6 + $0x3b4] ss:$8 sps:$4 sm:$0xff]  }
 0x5e7   : > { %6513 = vmatpush1.bf16.msra.mxu0 %v18471_v38  ;;  %v18540_v38 = vld [vmem:[%s23918_s6 + $0x3b0] ss:$8 sps:$4 sm:$0xff]  }
 0x5e8   : > { %6514 = vmatprep.subr.bf16.mxu0 %v18476_v51  ;;  %v18545_v51 = vld [vmem:[%s23918_s6 + $0x3c4] ss:$8 sps:$4 sm:$0xff]  }
 0x5eb   : > { %6515 = vmatpush1.bf16.msra.mxu0 %v18474_v19  ;;  %v18543_v19 = vld [vmem:[%s23918_s6 + $0x3c0] ss:$8 sps:$4 sm:$0xff]  }
 0x5ec   : > { %6516 = vmatprep.subr.bf16.mxu0 %v18479_v31  ;;  %v18548_v31 = vld [vmem:[%s23918_s6 + $0x3d4] ss:$8 sps:$4 sm:$0xff]  }
 0x5ef   : > { %6517 = vmatpush1.bf16.msra.mxu0 %v18477_v14  ;;  %v18546_v14 = vld [vmem:[%s23918_s6 + $0x3d0] ss:$8 sps:$4 sm:$0xff]  }
 0x5f0   : > { %6518 = vmatprep.subr.bf16.mxu0 %v18482_v61  ;;  %v18551_v61 = vld [vmem:[%s23918_s6 + $0x3e4] ss:$8 sps:$4 sm:$0xff]  }
 0x5f3   : > { %6519 = vmatpush1.bf16.msra.mxu0 %v18480_v39  ;;  %v18549_v39 = vld [vmem:[%s23918_s6 + $0x3e0] ss:$8 sps:$4 sm:$0xff]  }
 0x5f4   : > { %6551 = vmatprep.subr.bf16.mxu0 %v18485_v7  ;;  %v18554_v7 = vld [vmem:[%s23918_s6 + $0x3f4] ss:$8 sps:$4 sm:$0xff]  }
 0x5f6   : > { %6521 = vmatmul.mubr.bf16.vlgmr.msra.gmra.mrb[172].mxu0 %v15544_v62  ;;  %v18557_v62 = vld [vmem:[%s23918_s6 + $0x404] ss:$8 sps:$4 sm:$0xff]  }
 0x5f7   : > { %6530 = vmatprep.mubr.bf16.mxu0 %v22056_v56  ;;  %6552 = vmatpush1.bf16.msra.mxu0 %v18483_v5  ;;  %v18552_v5 = vld [vmem:[%s23918_s6 + $0x3f0] ss:$8 sps:$4 sm:$0xff]  }
 0x5f8   : > { %6553 = vmatprep.subr.bf16.mxu0 %v18488_v43  ;;  %v18555_v43 = vld [vmem:[%s23918_s6 + $0x400] ss:$8 sps:$4 sm:$0xff]  }
 0x5fb   : > { %6554 = vmatpush1.bf16.msra.mxu0 %v18486_v25  ;;  %v18560_v25 = vld [vmem:[%s23918_s6 + $0x414] ss:$8 sps:$4 sm:$0xff]  }
 0x5fc   : > { %6555 = vmatprep.subr.bf16.mxu0 %v18491_v63  ;;  %v18558_v63 = vld [vmem:[%s23918_s6 + $0x410] ss:$8 sps:$4 sm:$0xff]  }
 0x5fe   : > { %6531 = vmatmul.mubr.bf16.gmra.mrb[176].mxu0 %v22058_v53 }
 0x5ff   : > { %6540 = vmatprep.mubr.bf16.mxu0 %v22081_v1  ;;  %6556 = vmatpush1.bf16.msra.mxu0 %v18489_v59  ;;  %v18563_v59 = vld [vmem:[%s23918_s6 + $0x424] ss:$8 sps:$4 sm:$0xff]  }
 0x600   : > { %6557 = vmatprep.subr.bf16.mxu0 %v18494_v29  ;;  %v6624_v29 = vld [vmem:[#allocation5 + $0x54] sm:$0xff] }
 0x601   : > { %v15655_v11 = vcombine.low %v22085_v42, %v6624_v29 }
 0x603   : > { %6558 = vmatpush1.bf16.msra.mxu0 %v18492_v13  ;;  %v18561_v13 = vld [vmem:[%s23918_s6 + $0x420] ss:$8 sps:$4 sm:$0xff]  }
 0x604   : > { %6559 = vmatprep.subr.bf16.mxu0 %v18497_v55  ;;  %v18564_v55 = vld [vmem:[%s23918_s6 + $0x430] ss:$8 sps:$4 sm:$0xff]  }
 0x606   : > { %6541 = vmatmul.mubr.bf16.gmra.mrb[180].mxu0 %v22083_v41 }
 0x607   : > { %6560 = vmatpush1.bf16.msra.mxu0 %v18495_v46  ;;  %6583 = vmatprep.mubr.bf16.mxu0 %v22101_v47  ;;  %v18569_v46 = vld [vmem:[%s23918_s6 + $0x444] ss:$8 sps:$4 sm:$0xff]  }
 0x608   : > { %6561 = vmatprep.subr.bf16.mxu0 %v18500_v54  ;;  %v18567_v54 = vld [vmem:[%s23918_s6 + $0x440] ss:$8 sps:$4 sm:$0xff]  }
 0x60b   : > { %6562 = vmatpush1.bf16.msra.mxu0 %v18498_v15  ;;  %v18575_v15 = vld [vmem:[%s23918_s6 + $0x464] ss:$8 sps:$4 sm:$0xff]  }
 0x60c   : > { %6563 = vmatprep.subr.bf16.mxu0 %v18503_v6  ;;  %v18576_v6 = vld [vmem:[%s23918_s6 + $0x470] ss:$8 sps:$4 sm:$0xff]  }
 0x60f   : > { %6564 = vmatpush1.bf16.msra.mxu0 %v18501_v24  ;;  %v18580_v24 = vld [vmem:[#allocation5 + $0x38] ss:$12 sps:$4 sm:$0xff]  }
 0x610   : > { %6565 = vmatprep.subr.bf16.mxu0 %v18506_v44  ;;  %v18581_v44 = vld [vmem:[#allocation5 + $0x50] ss:$12 sps:$4 sm:$0xff]  }
 0x613   : > { %6566 = vmatpush1.bf16.msra.mxu0 %v18504_v8  ;;  %v18588_v8 = vld [vmem:[%s23919_s7 + $0x320] ss:$8 sps:$4 sm:$0xff]  }
 0x614   : > { %6963 = vmatprep.subr.bf16.mxu0 %v18509_v50  ;;  %v18590_v50 = vld [vmem:[%s23919_s7 + $0x324] ss:$8 sps:$4 sm:$0xff]  }
 0x615   : > { %8222 = vmatprep.subr.bf16.mxu1 %v18590_v50 }
 0x616   : > { %6584 = vmatmul.mubr.bf16.vlgmr.msra.gmra.mrb[172].mxu0 %v15546_v23  ;;  %8223 = vmatpush1.bf16.msra.mxu1 %v18588_v8  ;;  %v18602_v23 = vld [vmem:[%s23919_s7 + $0x344] ss:$8 sps:$4 sm:$0xff]  }
 0x617   : > { %6964 = vmatpush1.bf16.msra.mxu0 %v18507_v4  ;;  %6593 = vmatprep.mubr.bf16.mxu0 %v22101_v47  ;;  %v18600_v4 = vld [vmem:[%s23919_s7 + $0x340] ss:$8 sps:$4 sm:$0xff]   ;;  %v7177_v8 = vld [vmem:[#allocation6] sm:$0x8] }
 0x618   : > { %6965 = vmatprep.subr.bf16.mxu0 %v18512_v20  ;;  %8224 = vmatprep.subr.bf16.mxu1 %v18593_v22  ;;  %v18605_v20 = vld [vmem:[%s23919_s7 + $0x354] ss:$8 sps:$4 sm:$0xff]  }
 0x61b   : > { %6966 = vmatpush1.bf16.msra.mxu0 %v18510_v49  ;;  %v18603_v49 = vld [vmem:[%s23919_s7 + $0x350] ss:$8 sps:$4 sm:$0xff]  }
 0x61c   : > { %6967 = vmatprep.subr.bf16.mxu0 %v18515_v9  ;;  %v18608_v9 = vld [vmem:[%s23919_s7 + $0x364] ss:$8 sps:$4 sm:$0xff]  }
 0x61e   : > { %6594 = vmatmul.mubr.bf16.gmra.mrb[176].mxu0 %v15549_v57  ;;  %v18527_v57 = vld [vmem:[%s23918_s6 + $0x364] ss:$8 sps:$4 sm:$0xff]  }
 0x61f   : > { %6968 = vmatpush1.bf16.msra.mxu0 %v18513_v2  ;;  %6603 = vmatprep.mubr.bf16.mxu0 %v22101_v47  ;;  %v18606_v2 = vld [vmem:[%s23919_s7 + $0x360] ss:$8 sps:$4 sm:$0xff]  }
 0x620   : > { %6969 = vmatprep.subr.bf16.mxu0 %v18518_v26  ;;  %v18611_v26 = vld [vmem:[%s23919_s7 + $0x374] ss:$8 sps:$4 sm:$0xff]  }
 0x623   : > { %6970 = vmatpush1.bf16.msra.mxu0 %v18516_v3  ;;  %v18609_v3 = vld [vmem:[%s23919_s7 + $0x370] ss:$8 sps:$4 sm:$0xff]  }
 0x624   : > { %6971 = vmatprep.subr.bf16.mxu0 %v18521_v12  ;;  %v18614_v12 = vld [vmem:[%s23919_s7 + $0x384] ss:$8 sps:$4 sm:$0xff]  }
 0x626   : > { %6604 = vmatmul.mubr.bf16.gmra.mrb[180].mxu0 %v15552_v17  ;;  %v18531_v17 = vld [vmem:[%s23918_s6 + $0x380] ss:$8 sps:$4 sm:$0xff]  }
 0x627   : > { %6972 = vmatpush1.bf16.msra.mxu0 %v18519_v33  ;;  %6995 = vmatprep.mubr.bf16.mxu0 %v22056_v56  ;;  %v18528_v56 = vld [vmem:[%s23918_s6 + $0x370] ss:$8 sps:$4 sm:$0xff]   ;;  %v18612_v33 = vld [vmem:[%s23919_s7 + $0x380] ss:$8 sps:$4 sm:$0xff]  }
 0x628   : > { %6973 = vmatprep.subr.bf16.mxu0 %v18524_v10  ;;  %v18617_v10 = vld [vmem:[%s23919_s7 + $0x394] ss:$8 sps:$4 sm:$0xff]  }
 0x62b   : > { %6974 = vmatpush1.bf16.msra.mxu0 %v18522_v36  ;;  %v18615_v36 = vld [vmem:[%s23919_s7 + $0x390] ss:$8 sps:$4 sm:$0xff]  }
 0x62c   : > { %6975 = vmatprep.subr.bf16.mxu0 %v18527_v57  ;;  %v18620_v57 = vld [vmem:[%s23919_s7 + $0x3a4] ss:$8 sps:$4 sm:$0xff]  }
 0x62f   : > { %6976 = vmatpush1.bf16.msra.mxu0 %v18525_v0  ;;  %v18618_v0 = vld [vmem:[%s23919_s7 + $0x3a0] ss:$8 sps:$4 sm:$0xff]  }
 0x630   : > { %6977 = vmatprep.subr.bf16.mxu0 %v18530_v52  ;;  %v18623_v52 = vld [vmem:[%s23919_s7 + $0x3b4] ss:$8 sps:$4 sm:$0xff]  }
 0x633   : > { %6978 = vmatpush1.bf16.msra.mxu0 %v18528_v56  ;;  %v18621_v56 = vld [vmem:[%s23919_s7 + $0x3b0] ss:$8 sps:$4 sm:$0xff]  }
 0x634   : > { %6979 = vmatprep.subr.bf16.mxu0 %v18533_v37  ;;  %v18626_v37 = vld [vmem:[%s23919_s7 + $0x3c4] ss:$8 sps:$4 sm:$0xff]  }
 0x637   : > { %6980 = vmatpush1.bf16.msra.mxu0 %v18531_v17  ;;  %v18624_v17 = vld [vmem:[%s23919_s7 + $0x3c0] ss:$8 sps:$4 sm:$0xff]  }
 0x638   : > { %6981 = vmatprep.subr.bf16.mxu0 %v18536_v16  ;;  %v18629_v16 = vld [vmem:[%s23919_s7 + $0x3d4] ss:$8 sps:$4 sm:$0xff]  }
 0x63b   : > { %6982 = vmatpush1.bf16.msra.mxu0 %v18534_v58  ;;  %v18627_v58 = vld [vmem:[%s23919_s7 + $0x3d0] ss:$8 sps:$4 sm:$0xff]  }
 0x63c   : > { %6983 = vmatprep.subr.bf16.mxu0 %v18539_v30  ;;  %v18632_v30 = vld [vmem:[%s23919_s7 + $0x3e4] ss:$8 sps:$4 sm:$0xff]  }
 0x63f   : > { %6984 = vmatpush1.bf16.msra.mxu0 %v18537_v40  ;;  %v18630_v40 = vld [vmem:[%s23919_s7 + $0x3e0] ss:$8 sps:$4 sm:$0xff]  }
 0x640   : > { %6985 = vmatprep.subr.bf16.mxu0 %v18542_v21  ;;  %v18635_v21 = vld [vmem:[%s23919_s7 + $0x3f4] ss:$8 sps:$4 sm:$0xff]  }
 0x643   : > { %6986 = vmatpush1.bf16.msra.mxu0 %v18540_v38  ;;  %v18633_v38 = vld [vmem:[%s23919_s7 + $0x3f0] ss:$8 sps:$4 sm:$0xff]  }
 0x644   : > { %6987 = vmatprep.subr.bf16.mxu0 %v18545_v51  ;;  %v18647_v51 = vld [vmem:[%s23919_s7 + $0x404] ss:$8 sps:$4 sm:$0xff]  }
 0x647   : > { %6988 = vmatpush1.bf16.msra.mxu0 %v18543_v19 }
 0x648   : > { %6989 = vmatprep.subr.bf16.mxu0 %v18548_v31 }
 0x64b   : > { %6990 = vmatpush1.bf16.msra.mxu0 %v18546_v14 }
 0x64c   : > { %6991 = vmatprep.subr.bf16.mxu0 %v18551_v61 }
 0x64f   : > { %6992 = vmatpush1.bf16.msra.mxu0 %v18549_v39 }
 0x650   : > { %6993 = vmatprep.subr.bf16.mxu0 %v18554_v7 }
 0x653   : > { %6994 = vmatpush1.bf16.msra.mxu0 %v18552_v5 }
 0x654   : > { %7026 = vmatprep.subr.bf16.mxu0 %v18557_v62 }
 0x656   : > { %6996 = vmatmul.mubr.bf16.vlgmr.msra.gmra.mrb[172].mxu0 %v22058_v53  ;;  %v18566_v53 = vld [vmem:[%s23918_s6 + $0x434] ss:$8 sps:$4 sm:$0xff]  }
 0x657   : > { %7005 = vmatprep.mubr.bf16.mxu0 %v22081_v1  ;;  %7027 = vmatpush1.bf16.msra.mxu0 %v18555_v43  ;;  %v15656_v1 = vcombine.high %v22085_v42, %v6624_v29  ;;  %v18573_v42 = vld [vmem:[%s23918_s6 + $0x460] ss:$8 sps:$4 sm:$0xff]  }
 0x658   : > { %7028 = vmatprep.subr.bf16.mxu0 %v18560_v25 }
 0x65b   : > { %7029 = vmatpush1.bf16.msra.mxu0 %v18558_v63 }
 0x65c   : > { %7030 = vmatprep.subr.bf16.mxu0 %v18563_v59 }
 0x65e   : > { %7006 = vmatmul.mubr.bf16.gmra.mrb[176].mxu0 %v22083_v41  ;;  %v18572_v41 = vld [vmem:[%s23918_s6 + $0x454] ss:$8 sps:$4 sm:$0xff]  }
 0x65f   : > { %7015 = vmatprep.mubr.bf16.mxu0 %v15656_v1  ;;  %7031 = vmatpush1.bf16.msra.mxu0 %v18561_v13 }
 0x660   : > { %7032 = vmatprep.subr.bf16.mxu0 %v18566_v53 }
 0x663   : > { %7033 = vmatpush1.bf16.msra.mxu0 %v18564_v55 }
 0x664   : > { %7034 = vmatprep.subr.bf16.mxu0 %v18569_v46 }
 0x666   : > { %7016 = vmatmul.mubr.bf16.gmra.mrb[180].mxu0 %v15655_v11 }
 0x667   : > { %7035 = vmatpush1.bf16.msra.mxu0 %v18567_v54  ;;  %7058 = vmatprep.mubr.bf16.mxu0 %v22101_v47 }
 0x668   : > { %7036 = vmatprep.subr.bf16.mxu0 %v18572_v41 }
 0x66b   : > { %7037 = vmatpush1.bf16.msra.mxu0 %v18570_v48 }
 0x66c   : > { %7038 = vmatprep.subr.bf16.mxu0 %v18575_v15 }
 0x66f   : > { %7039 = vmatpush1.bf16.msra.mxu0 %v18573_v42 }
 0x670   : > { %7040 = vmatprep.subr.bf16.mxu0 %v18578_v18  ;;  %v7180_v18 = vld [vmem:[#allocation6 + $0x8] sm:$0x8] }
 0x673   : > { %7041 = vmatpush1.bf16.msra.mxu0 %v18576_v6 }
 0x676   : > { %7059 = vmatmul.mubr.bf16.vlgmr.msra.gmra.mrb[172].mxu0 %v18579_v28 }
 0x677   : > { %7068 = vmatprep.mubr.bf16.mxu0 %v22101_v47 }
 0x67e   : > { %7069 = vmatmul.mubr.bf16.gmra.mrb[176].mxu0 %v18580_v24  ;;  %v7222_v24 = vld [vmem:[#allocation6 + $0x8] sm:$0x10] }
 0x67f   : > { %7078 = vmatprep.mubr.bf16.mxu0 %v22101_v47  ;;  %v18591_v47 = vld [vmem:[%s23919_s7 + $0x330] ss:$8 sps:$4 sm:$0xff]  }
 0x680   : > { %8225 = vmatpush1.bf16.msra.mxu1 %v18591_v47 }
 0x681   : > { %8226 = vmatprep.subr.bf16.mxu1 %v18602_v23 }
 0x684   : > { %8227 = vmatpush1.bf16.msra.mxu1 %v18600_v4 }
 0x685   : > { %8228 = vmatprep.subr.bf16.mxu1 %v18605_v20 }
 0x686   : > { %7079 = vmatmul.mubr.bf16.gmra.mrb[180].mxu0 %v18581_v44 }
 0x688   : > { %8229 = vmatpush1.bf16.msra.mxu1 %v18603_v49  ;;  %v7219_v49 = vld [vmem:[#allocation6] sm:$0x10] }
 0x689   : > { %8230 = vmatprep.subr.bf16.mxu1 %v18608_v9 }
 0x68c   : > { %8231 = vmatpush1.bf16.msra.mxu1 %v18606_v2 }
 0x68d   : > { %8232 = vmatprep.subr.bf16.mxu1 %v18611_v26 }
 0x690   : > { %8233 = vmatpush1.bf16.msra.mxu1 %v18609_v3 }
 0x691   : > { %8234 = vmatprep.subr.bf16.mxu1 %v18614_v12 }
 0x694   : > { %8235 = vmatpush1.bf16.msra.mxu1 %v18612_v33 }
 0x695   : > { %8236 = vmatprep.subr.bf16.mxu1 %v18617_v10 }
 0x698   : > { %8237 = vmatpush1.bf16.msra.mxu1 %v18615_v36 }
 0x699   : > { %8238 = vmatprep.subr.bf16.mxu1 %v18620_v57 }
 0x69c   : > { %8239 = vmatpush1.bf16.msra.mxu1 %v18618_v0 }
 0x69d   : > { %8240 = vmatprep.subr.bf16.mxu1 %v18623_v52 }
 0x6a0   : > { %8241 = vmatpush1.bf16.msra.mxu1 %v18621_v56 }
 0x6a1   : > { %8242 = vmatprep.subr.bf16.mxu1 %v18626_v37 }
 0x6a4   : > { %8243 = vmatpush1.bf16.msra.mxu1 %v18624_v17 }
 0x6a5   : > { %8244 = vmatprep.subr.bf16.mxu1 %v18629_v16 }
 0x6a8   : > { %8245 = vmatpush1.bf16.msra.mxu1 %v18627_v58 }
 0x6a9   : > { %8246 = vmatprep.subr.bf16.mxu1 %v18632_v30 }
 0x6ac   : > { %8247 = vmatpush1.bf16.msra.mxu1 %v18630_v40 }
 0x6ad   : > { %8248 = vmatprep.subr.bf16.mxu1 %v18635_v21 }
 0x6b0   : > { %8249 = vmatpush1.bf16.msra.mxu1 %v18633_v38 }
 0x6b1   : > { %8261 = vmatprep.subr.bf16.mxu1 %v18647_v51 }
 0x749   : > { %v7060_v19 = vpop.f32.mrb[172].mxu0 }
 0x74a   : > { %v7101_v31 = vmax.f32 %v7060_v19, 0.0  ;;  %v7062_v14 = vpop.f32.mrb[173].mxu0 }
 0x74b   : > { %v7102_v61 = vmax.f32 %v7062_v14, 0.0  ;;  %v7064_v39 = vpop.f32.mrb[174].mxu0 }
 0x74c   : > { %v7103_v7 = vmax.f32 %v7064_v39, 0.0  ;;  %v7066_v5 = vpop.f32.mrb[175].mxu0 }
 0x74d   : > { %v16895_v62 = vpack.c.bf16 %v7102_v61, %v7101_v31  ;;  %v7104_v43 = vmax.f32 %v7066_v5, 0.0  ;;  %v7263_v5 = vld [vmem:[#allocation6] sm:$0x40] }
 0x74f   : > { %7149 = vst [vmem:[#allocation2] sm:$0xff] %v16895_v62  ;;  %v16896_v25 = vpack.c.bf16 %v7104_v43, %v7103_v7  ;;  %v7266_v7 = vld [vmem:[#allocation6 + $0x8] sm:$0x40] }
 0x751   : > { %7150 = vst [vmem:[#allocation2 + $0x8] sm:$0xff] %v16896_v25  ;;  %v7070_v63 = vpop.f32.mrb[176].mxu0 }
 0x752   : > { %v7105_v59 = vmax.f32 %v7070_v63, 0.0  ;;  %v7072_v29 = vpop.f32.mrb[177].mxu0 }
 0x753   : > { %v7106_v13 = vmax.f32 %v7072_v29, 0.0  ;;  %v7074_v53 = vpop.f32.mrb[178].mxu0 }
 0x754   : > { %v7107_v1 = vmax.f32 %v7074_v53, 0.0  ;;  %v7076_v55 = vpop.f32.mrb[179].mxu0 }
 0x755   : > { %v16897_v46 = vpack.c.bf16 %v7106_v13, %v7105_v59  ;;  %v7108_v54 = vmax.f32 %v7076_v55, 0.0  ;;  %v7247_v13 = vld [vmem:[#allocation6 + $0x8] sm:$0x20] }
 0x756   : > { %v7167_v11 = vld [vmem:[#allocation2] sm:$0x11]  ;;  %v7183_v41 = vld [vmem:[#allocation2] sm:$0x22]  ;;  %v7206_v48 = vld [vmem:[#allocation2] sm:$0x44] }
 0x757   : > { %7151 = vst [vmem:[#allocation2 + $0x10] sm:$0xff] %v16897_v46  ;;  %v16898_v15 = vpack.c.bf16 %v7108_v54, %v7107_v1  ;;  %v15713_v42 = vcombine.high %v7167_v11, %v7167_v11  ;;  %v15717_v6 = vcombine.high %v7206_v48, %v7206_v48  ;;  %v15712_v44 = vcombine.low %v7167_v11, %v7167_v11  ;;  %v7244_v1 = vld [vmem:[#allocation6] sm:$0x20] }
 0x758   : > { %v15716_v50 = vcombine.low %v7206_v48, %v7206_v48  ;;  %v15715_v4 = vcombine.high %v7183_v41, %v7183_v41  ;;  %v15714_v20 = vcombine.low %v7183_v41, %v7183_v41 }
 0x759   : > { %7152 = vst [vmem:[#allocation2 + $0x18] sm:$0xff] %v16898_v15  ;;  %v7080_v22 = vpop.f32.mrb[180].mxu0  ;;  %v7174_v47 = vrot.slane %v15713_v42, 5  ;;  %v7213_v23 = vrot.slane %v15717_v6, 6  ;;  %v7173_v26 = vrot.slane %v15712_v44, 5 }
 0x75a   : > { %v7109_v9 = vmax.f32 %v7080_v22, 0.0  ;;  %v7082_v2 = vpop.f32.mrb[181].mxu0  ;;  %v7212_v3 = vrot.slane %v15716_v50, 6  ;;  %v7194_v16 = vshll.u32 %v15715_v4, 16  ;;  %v7190_v58 = vshll.u32 %v15714_v20, 16 }
 0x75b   : > { %v7110_v12 = vmax.f32 %v7082_v2, 0.0  ;;  %v7084_v33 = vpop.f32.mrb[182].mxu0  ;;  %v7181_v10 = vsel %vm21631_vm12, %v7174_v47, %v7180_v18  ;;  %v7223_v36 = vsel %vm22538_vm13, %v7213_v23, %v7222_v24  ;;  %v7178_v52 = vsel %vm21631_vm12, %v7173_v26, %v7177_v8  ;;  %vm22552_vm12 = vmand %vm7260_vm2, %vm7261_vm3  ;;  %v7305_v44 = vld [vmem:[#allocation6 + $0x38] sm:$0x1]  ;;  %v7302_v22 = vld [vmem:[#allocation6 + $0x30] sm:$0x1] }
 0x75c   : > { %v7111_v57 = vmax.f32 %v7084_v33, 0.0  ;;  %v7086_v0 = vpop.f32.mrb[183].mxu0  ;;  %7182 = vst [vmem:[#allocation6 + $0x8] sm:$0x8] %v7181_v10  ;;  %7224 = vst [vmem:[#allocation6 + $0x8] sm:$0x10] %v7223_v36  ;;  %v7220_v56 = vsel %vm22538_vm13, %v7212_v3, %v7219_v49 }
 0x75d   : > { %v16899_v37 = vpack.c.bf16 %v7110_v12, %v7109_v9  ;;  %v7112_v17 = vmax.f32 %v7086_v0, 0.0  ;;  %7179 = vst [vmem:[#allocation6] sm:$0x8] %v7178_v52  ;;  %7221 = vst [vmem:[#allocation6] sm:$0x10] %v7220_v56  ;;  %v7196_v59 = vrot.slane %v7194_v16, 6 }
 0x75e   : > { %v7225_v30 = vld [vmem:[#allocation2 + $0x10] sm:$0x11]  ;;  %v7250_v40 = vld [vmem:[#allocation2 + $0x10] sm:$0x22]  ;;  %v7269_v21 = vld [vmem:[#allocation2 + $0x10] sm:$0x44] }
 0x75f   : > { %v15718_v38 = vcombine.low %v7225_v30, %v7225_v30  ;;  %v15719_v51 = vcombine.high %v7225_v30, %v7225_v30  ;;  %v15720_v19 = vcombine.low %v7250_v40, %v7250_v40  ;;  %v15721_v31 = vcombine.high %v7250_v40, %v7250_v40  ;;  %7153 = vst [vmem:[#allocation2 + $0x20] sm:$0xff] %v16899_v37  ;;  %v7343_v33 = vld [vmem:[#allocation6 + $0x38] sm:$0x2]  ;;  %v7340_v36 = vld [vmem:[#allocation6 + $0x30] sm:$0x2] }
 0x760   : > { %v15722_v14 = vcombine.low %v7269_v21, %v7269_v21  ;;  %v15723_v60 = vcombine.high %v7269_v21, %v7269_v21  ;;  %v16900_v61 = vpack.c.bf16 %v7112_v17, %v7111_v57  ;;  %v7192_v53 = vrot.slane %v7190_v58, 6 }
 0x761   : > { %v7232_v62 = vshll.u32 %v15718_v38, 16  ;;  %v7236_v43 = vshll.u32 %v15719_v51, 16  ;;  %v7256_v25 = vrot.slane %v15720_v19, 3  ;;  %v7257_v63 = vrot.slane %v15721_v31, 3 }
 0x762   : > { %7154 = vst [vmem:[#allocation2 + $0x28] sm:$0xff] %v16900_v61  ;;  %v7276_v48 = vshll.u32 %v15722_v14, 16  ;;  %v7280_v18 = vshll.u32 %v15723_v60, 16  ;;  %vm7403_vm2 = vcmask 1046528  }
 0x763   : > { %v7234_v55 = vrot.slane %v7232_v62, 3  ;;  %v7238_v46 = vrot.slane %v7236_v43, 3  ;;  %v7203_v54 = vld [vmem:[#allocation6 + $0x8] sm:$0x8]  ;;  %v7267_v11 = vsel %vm22552_vm12, %v7257_v63, %v7266_v7  ;;  %v7264_v41 = vsel %vm22552_vm12, %v7256_v25, %v7263_v5 }
 0x764   : > { %v7204_v15 = vsel %vm20561_vm6, %v7196_v59, %v7203_v54  ;;  %7268 = vst [vmem:[#allocation6 + $0x8] sm:$0x40] %v7267_v11  ;;  %v7200_v42 = vld [vmem:[#allocation6] sm:$0x8]  ;;  %7265 = vst [vmem:[#allocation6] sm:$0x40] %v7264_v41 }
 0x765   : > { %7205 = vst [vmem:[#allocation6 + $0x8] sm:$0x8] %v7204_v15  ;;  %v7248_v6 = vsel %vm22558_vm0, %v7238_v46, %v7247_v13  ;;  %v7201_v8 = vsel %vm20561_vm6, %v7192_v53, %v7200_v42  ;;  %v7245_v50 = vsel %vm22558_vm0, %v7234_v55, %v7244_v1  ;;  %v7278_v57 = vrot.slane %v7276_v48, 4 }
 0x766   : > { %7249 = vst [vmem:[#allocation6 + $0x8] sm:$0x20] %v7248_v6  ;;  %v7293_v47 = vld [vmem:[#allocation2 + $0x20] sm:$0x11]  ;;  %v7308_v4 = vld [vmem:[#allocation2 + $0x20] sm:$0x22] }
 0x767   : > { %v7330_v23 = vld [vmem:[#allocation2 + $0x20] sm:$0x44]  ;;  %7202 = vst [vmem:[#allocation6] sm:$0x8] %v7201_v8  ;;  %7246 = vst [vmem:[#allocation6] sm:$0x20] %v7245_v50  ;;  %v15724_v20 = vcombine.low %v7293_v47, %v7293_v47  ;;  %v15725_v49 = vcombine.high %v7293_v47, %v7293_v47  ;;  %v15726_v9 = vcombine.low %v7308_v4, %v7308_v4 }
 0x768   : > { %v15727_v2 = vcombine.high %v7308_v4, %v7308_v4  ;;  %v15728_v26 = vcombine.low %v7330_v23, %v7330_v23  ;;  %v15729_v3 = vcombine.high %v7330_v23, %v7330_v23  ;;  %v7282_v0 = vrot.slane %v7280_v18, 4 }
 0x769   : > { %v7306_v12 = vsel %vm22572_vm1, %v15725_v49, %v7305_v44  ;;  %v7303_v10 = vsel %vm22572_vm1, %v15724_v20, %v7302_v22  ;;  %v7315_v17 = vshll.u32 %v15726_v9, 16  ;;  %vm7629_vm6 = vsmask.f32 5376 }
 0x76a   : > { %7307 = vst [vmem:[#allocation6 + $0x38] sm:$0x1] %v7306_v12  ;;  %v7336_v52 = vrot.slane %v15728_v26, 1  ;;  %v7337_v56 = vrot.slane %v15729_v3, 1  ;;  %7304 = vst [vmem:[#allocation6 + $0x30] sm:$0x1] %v7303_v10 }
 0x76b   : > { %v7290_v37 = vld [vmem:[#allocation6 + $0x8] sm:$0x40]  ;;  %v7319_v16 = vshll.u32 %v15727_v2, 16  ;;  %v7287_v58 = vld [vmem:[#allocation6] sm:$0x40]  ;;  %v7317_v19 = vrot.slane %v7315_v17, 1 }
 0x76c   : > { %v7291_v30 = vsel %vm22582_vm15, %v7282_v0, %v7290_v37  ;;  %v7344_v40 = vsel %vm21610_vm9, %v7337_v56, %v7343_v33  ;;  %v7288_v21 = vsel %vm22582_vm15, %v7278_v57, %v7287_v58  ;;  %v7341_v38 = vsel %vm21610_vm9, %v7336_v52, %v7340_v36  ;;  %v18645_v58 = vld [vmem:[%s23919_s7 + $0x400] ss:$8 sps:$4 sm:$0xff]  }
 0x76d   : > { %7292 = vst [vmem:[#allocation6 + $0x8] sm:$0x40] %v7291_v30  ;;  %7345 = vst [vmem:[#allocation6 + $0x38] sm:$0x2] %v7344_v40  ;;  %v7321_v51 = vrot.slane %v7319_v16, 1  ;;  %vm9759_vm15 = vcmask 1044483  }
 0x76e   : > { %7289 = vst [vmem:[#allocation6] sm:$0x40] %v7288_v21  ;;  %7342 = vst [vmem:[#allocation6 + $0x30] sm:$0x2] %v7341_v38  ;;  %vm7350_vm9 = vsmask.f32 7424 }
 0x76f   : > { %vm24083_vm12 = vsmask.f32 3328  ;;  %v19100_v17 = vld [vmem:[#allocation14 + $0x444] ss:$8 sps:$4 sm:$0xff]  }
 0x770   : > { %vm23423_vm0 = vmand %vm4254_vm11, %vm24083_vm12  ;;  %vm9731_vm11 = vcmask 1047556  }
 0x771   : > { %v7327_v31 = vld [vmem:[#allocation6 + $0x38] sm:$0x1]  ;;  %v7324_v14 = vld [vmem:[#allocation6 + $0x30] sm:$0x1]  ;;  %vm23432_vm10 = vmand %vm9731_vm11, %vm7350_vm9 }
 0x772   : > { %v7328_v60 = vsel %vm21616_vm7, %v7321_v51, %v7327_v31  ;;  %v7325_v61 = vsel %vm21616_vm7, %v7317_v19, %v7324_v14  ;;  %vm7387_vm7 = vcmask 1047552   ;;  %v18653_v31 = vld [vmem:[%s23919_s7 + $0x414] ss:$8 sps:$4 sm:$0xff]   ;;  %vm23946_vm5 = vmor %vm23432_vm10, %vm23423_vm0 }
 0x773   : > { %7329 = vst [vmem:[#allocation6 + $0x38] sm:$0x1] %v7328_v60  ;;  %7326 = vst [vmem:[#allocation6 + $0x30] sm:$0x1] %v7325_v61  ;;  %v19963_v61 = vld [vmem:[#allocation4 + $0x60] sm:$0xff] }
 0x774   : > { %v7521_v39 = vld [vmem:[#allocation6 + $0x8] sm:$0xfc]  ;;  %vm22612_vm3 = vmand %vm7387_vm7, %vm7350_vm9  ;;  %vm9777_vm7 = vcmask 1046533  }
 0x775   : > { %v7520_v7 = vld [vmem:[#allocation6] sm:$0xfc]  ;;  %v22602_v34 = vld [vmem:[#allocation6 + $0x8] sm:$0xff]  ;;  %v7648_v5 = vshrl.u32 %v7521_v39, 16  ;;  %v7651_v62 = vshll.u32 %v7521_v39, 16  ;;  %vm23446_vm12 = vmand %vm9759_vm15, %vm7217_vm4 }
 0x776   : > { %v7631_v43 = vshrl.u32 %v7520_v7, 16  ;;  %v7634_v25 = vshll.u32 %v7520_v7, 16  ;;  %v22604_v63 = vld [vmem:[#allocation6] sm:$0xff]  ;;  %v7366_v59 = vshll.u32 %v22602_v34, 16  ;;  %v7396_v53 = vld [vmem:[#allocation6 + $0x8] sm:$0xfe]  ;;  %vm23451_vm11 = vmand %vm9777_vm7, %vm7242_vm8 }
 0x777   : > { %v7354_v29 = vshll.u32 %v22604_v63, 16  ;;  %v7650_v13 = vrot.slane %v7648_v5, 2  ;;  %v7653_v45 = vrot.slane %v7651_v62, 3  ;;  %v7364_v1 = vshrl.u32 %v22602_v34, 16  ;;  %v7395_v26 = vld [vmem:[#allocation6] sm:$0xfe] }
 0x778   : > { %v7368_v55 = vrot.slane %v7366_v59, 1  ;;  %v7352_v46 = vshrl.u32 %v22604_v63, 16  ;;  %v7633_v11 = vrot.slane %v7631_v43, 2  ;;  %v7636_v41 = vrot.slane %v7634_v25, 3  ;;  %v18651_v5 = vld [vmem:[%s23919_s7 + $0x410] ss:$8 sps:$4 sm:$0xff]  }
 0x779   : > { %v7356_v54 = vrot.slane %v7354_v29, 1  ;;  %v7654_v15 = vor.u32 %v7653_v45, %v7650_v13  ;;  %v7407_v8 = vrot.slane %v7396_v53, 1  ;;  %v7404_v16 = vrot.slane %v7395_v26, 1  ;;  %v18656_v62 = vld [vmem:[%s23919_s7 + $0x424] ss:$8 sps:$4 sm:$0xff]  }
 0x77a   : > { %v7527_v48 = vld [vmem:[#allocation6 + $0x38] sm:$0x3]  ;;  %v7526_v42 = vld [vmem:[#allocation6 + $0x30] sm:$0x3]  ;;  %v7369_v6 = vor.u32 %v7368_v55, %v7364_v1  ;;  %v7637_v56 = vor.u32 %v7636_v41, %v7633_v11  ;;  %v18654_v43 = vld [vmem:[%s23919_s7 + $0x420] ss:$8 sps:$4 sm:$0xff]  }
 0x77b   : > { %v7349_v18 = vld [vmem:[#allocation6 + $0x38] sm:$0xff]  ;;  %v7357_v44 = vor.u32 %v7356_v54, %v7352_v46  ;;  %v7656_v50 = vshrl.u32 %v7527_v48, 16  ;;  %v7659_v22 = vshll.u32 %v7527_v48, 16  ;;  %v7639_v47 = vshrl.u32 %v7526_v42, 16  ;;  %v7348_v23 = vld [vmem:[#allocation6 + $0x30] sm:$0xff] }
 0x77c   : > { %v7642_v4 = vshll.u32 %v7526_v42, 16  ;;  %v7371_v20 = vshll.u32 %v7349_v18, 16  ;;  %v7378_v49 = vshrl.u32 %v7349_v18, 16  ;;  %v7359_v9 = vshll.u32 %v7348_v23, 16  ;;  %v18659_v59 = vld [vmem:[%s23919_s7 + $0x434] ss:$8 sps:$4 sm:$0xff]  }
 0x77d   : > { %v7375_v2 = vshrl.u32 %v7348_v23, 16  ;;  %v7658_v3 = vrot.slane %v7656_v50, 2  ;;  %v7661_v27 = vrot.slane %v7659_v22, 3  ;;  %v7641_v12 = vrot.slane %v7639_v47, 2  ;;  %v18657_v54 = vld [vmem:[%s23919_s7 + $0x430] ss:$8 sps:$4 sm:$0xff]  }
 0x77e   : > { %v7644_v33 = vrot.slane %v7642_v4, 3  ;;  %v7373_v10 = vrot.slane %v7371_v20, 1  ;;  %v7361_v36 = vrot.slane %v7359_v9, 1  ;;  %v7408_v57 = vrot.slane %v7349_v18, 1  ;;  %v18662_v48 = vld [vmem:[%s23919_s7 + $0x444] ss:$8 sps:$4 sm:$0xff]  }
 0x77f   : > { %v7405_v0 = vrot.slane %v7348_v23, 1  ;;  %v7662_v52 = vor.u32 %v7661_v27, %v7658_v3  ;;  %v18660_v18 = vld [vmem:[%s23919_s7 + $0x440] ss:$8 sps:$4 sm:$0xff]   ;;  %v18668_v50 = vld [vmem:[%s23919_s7 + $0x464] ss:$8 sps:$4 sm:$0xff]  }
 0x780   : > { %v7645_v37 = vor.u32 %v7644_v33, %v7641_v12  ;;  %v22620_v30 = vsel %vm7350_vm9, %v7369_v6, %v7373_v10  ;;  %v7380_v40 = vor.u32 %v7378_v49, %v7373_v10  ;;  %v22623_v21 = vsel %vm7350_vm9, %v7357_v44, %v7361_v36  ;;  %7417 = vst [vmem:[#allocation6 + $0x58] sm:$0x7f] %v7408_v57  ;;  %v18665_v44 = vld [vmem:[%s23919_s7 + $0x454] ss:$8 sps:$4 sm:$0xff]   ;;  %v18666_v22 = vld [vmem:[%s23919_s7 + $0x460] ss:$8 sps:$4 sm:$0xff]  }
 0x781   : > { %v7377_v38 = vor.u32 %v7375_v2, %v7361_v36  ;;  %7416 = vst [vmem:[#allocation6 + $0x50] sm:$0x7f] %v7405_v0  ;;  %v7663_v51 = vsel %vm7629_vm6, %v7654_v15, %v7662_v52  ;;  %7386 = vst [vmem:[#allocation6 + $0x18] sm:$0xff] %v22620_v30  ;;  %v22633_v14 = vsel %vm7403_vm2, %v7407_v8, %v7408_v57  ;;  %v18663_v8 = vld [vmem:[%s23919_s7 + $0x450] ss:$8 sps:$4 sm:$0xff]  }
 0x782   : > { %v7646_v19 = vsel %vm7629_vm6, %v7637_v56, %v7645_v37  ;;  %7385 = vst [vmem:[#allocation6 + $0x10] sm:$0xff] %v22623_v21  ;;  %v22636_v60 = vsel %vm7403_vm2, %v7404_v16, %v7405_v0  ;;  %8250 = vmatprep.mubr.bf16.mxu1 %v7663_v51  ;;  %v7393_v39 = vsel %vm22612_vm3, %v7380_v40, %v19963_v61  ;;  %7415 = vst [vmem:[#allocation6 + $0x28] sm:$0xff] %v22633_v14  ;;  %v18671_v47 = vld [vmem:[%s23919_s7 + $0x474] ss:$8 sps:$4 sm:$0xff]   ;;  %v18669_v4 = vld [vmem:[%s23919_s7 + $0x470] ss:$8 sps:$4 sm:$0xff]  }
 0x783   : > { %v7390_v7 = vsel %vm22612_vm3, %v7377_v38, %v19963_v61  ;;  %7414 = vst [vmem:[#allocation6 + $0x20] sm:$0xff] %v22636_v60  ;;  %8251 = vmatmul.mubr.bf16.vlgmr.msra.gmra.mrb[88].mxu1 %v7646_v19  ;;  %7394 = vst [vmem:[#allocation6 + $0x48] sm:$0xff] %v7393_v39  ;;  %v18674_v23 = vld [vmem:[%s23919_s7 + $0x484] ss:$8 sps:$4 sm:$0xff]   ;;  %v18672_v20 = vld [vmem:[%s23919_s7 + $0x480] ss:$8 sps:$4 sm:$0xff]  }
 0x784   : > { %7391 = vst [vmem:[#allocation6 + $0x40] sm:$0xff] %v7390_v7  ;;  %8262 = vmatpush1.bf16.msra.mxu1 %v18645_v58  ;;  %v18677_v49 = vld [vmem:[%s23919_s7 + $0x494] ss:$8 sps:$4 sm:$0xff]   ;;  %v18675_v9 = vld [vmem:[%s23919_s7 + $0x490] ss:$8 sps:$4 sm:$0xff]  }
 0x785   : > { %8263 = vmatprep.subr.bf16.mxu1 %v18653_v31  ;;  %v18680_v2 = vld [vmem:[%s23919_s7 + $0x4a4] ss:$8 sps:$4 sm:$0xff]   ;;  %v18678_v26 = vld [vmem:[%s23919_s7 + $0x4a0] ss:$8 sps:$4 sm:$0xff]   ;;  %v18683_v3 = vld [vmem:[%s23919_s7 + $0x4b4] ss:$8 sps:$4 sm:$0xff]  }
 0x786   : > { %v18681_v27 = vld [vmem:[%s23919_s7 + $0x4b0] ss:$8 sps:$4 sm:$0xff]   ;;  %v18686_v12 = vld [vmem:[%s23919_s7 + $0x4c4] ss:$8 sps:$4 sm:$0xff]   ;;  %v18684_v33 = vld [vmem:[%s23919_s7 + $0x4c0] ss:$8 sps:$4 sm:$0xff]  }
 0x787   : > { %v18689_v10 = vld [vmem:[%s23919_s7 + $0x4d4] ss:$8 sps:$4 sm:$0xff]   ;;  %v18687_v57 = vld [vmem:[%s23919_s7 + $0x4d0] ss:$8 sps:$4 sm:$0xff]   ;;  %v7531_v52 = vld [vmem:[#allocation6 + $0x58] sm:$0x3] }
 0x788   : > { %8264 = vmatpush1.bf16.msra.mxu1 %v18651_v5  ;;  %v7523_v25 = vld [vmem:[#allocation6 + $0x18] sm:$0xfc]  ;;  %v7724_v51 = vshrl.u32 %v7531_v52, 16  ;;  %v7727_v19 = vshll.u32 %v7531_v52, 16  ;;  %v18695_v7 = vld [vmem:[%s23919_s7 + $0x4f4] ss:$8 sps:$4 sm:$0xff]  }
 0x789   : > { %8265 = vmatprep.subr.bf16.mxu1 %v18656_v62  ;;  %v7682_v29 = vshrl.u32 %v7523_v25, 16  ;;  %v7685_v13 = vshll.u32 %v7523_v25, 16  ;;  %v7525_v0 = vld [vmem:[#allocation6 + $0x28] sm:$0xfc]  ;;  %v18692_v56 = vld [vmem:[%s23919_s7 + $0x4e4] ss:$8 sps:$4 sm:$0xff]  }
 0x78a   : > { %v7529_v45 = vld [vmem:[#allocation6 + $0x48] sm:$0x3]  ;;  %v7522_v37 = vld [vmem:[#allocation6 + $0x10] sm:$0xfc]  ;;  %v7716_v40 = vshrl.u32 %v7525_v0, 16  ;;  %v7719_v38 = vshll.u32 %v7525_v0, 16 }
 0x78b   : > { %v7684_v53 = vrot.slane %v7682_v29, 2  ;;  %v7687_v1 = vrot.slane %v7685_v13, 3  ;;  %v7690_v55 = vshrl.u32 %v7529_v45, 16  ;;  %v7693_v46 = vshll.u32 %v7529_v45, 16  ;;  %v7528_v36 = vld [vmem:[#allocation6 + $0x40] sm:$0x3] }
 0x78c   : > { %8266 = vmatpush1.bf16.msra.mxu1 %v18654_v43  ;;  %v7673_v16 = vshrl.u32 %v7528_v36, 16  ;;  %v7676_v58 = vshll.u32 %v7528_v36, 16  ;;  %v18690_v31 = vld [vmem:[%s23919_s7 + $0x4e0] ss:$8 sps:$4 sm:$0xff]   ;;  %v7665_v61 = vshrl.u32 %v7522_v37, 16  ;;  %v7668_v39 = vshll.u32 %v7522_v37, 16 }
 0x78d   : > { %8267 = vmatprep.subr.bf16.mxu1 %v18659_v59  ;;  %v7692_v11 = vrot.slane %v7690_v55, 2  ;;  %v7695_v41 = vrot.slane %v7693_v46, 3  ;;  %v7688_v15 = vor.u32 %v7687_v1, %v7684_v53  ;;  %v7718_v43 = vrot.slane %v7716_v40, 2  ;;  %v18693_v13 = vld [vmem:[%s23919_s7 + $0x4f0] ss:$8 sps:$4 sm:$0xff]  }
 0x78e   : > { %v7675_v5 = vrot.slane %v7673_v16, 2  ;;  %v7678_v62 = vrot.slane %v7676_v58, 3  ;;  %v7721_v25 = vrot.slane %v7719_v38, 3  ;;  %v7726_v59 = vrot.slane %v7724_v51, 2  ;;  %v18698_v1 = vld [vmem:[%s23919_s7 + $0x504] ss:$8 sps:$4 sm:$0xff]  }
 0x78f   : > { %v7696_v42 = vor.u32 %v7695_v41, %v7692_v11  ;;  %v7729_v29 = vrot.slane %v7727_v19, 3  ;;  %v7667_v45 = vrot.slane %v7665_v61, 2  ;;  %v7670_v53 = vrot.slane %v7668_v39, 3  ;;  %v18696_v41 = vld [vmem:[%s23919_s7 + $0x500] ss:$8 sps:$4 sm:$0xff]  }
 0x790   : > { %8268 = vmatpush1.bf16.msra.mxu1 %v18657_v54  ;;  %v7679_v55 = vor.u32 %v7678_v62, %v7675_v5  ;;  %v7722_v46 = vor.u32 %v7721_v25, %v7718_v43  ;;  %v18731_v36 = vld [vmem:[%s23919_s7 + $0x5b4] ss:$8 sps:$4 sm:$0xff]   ;;  %v18734_v0 = vld [vmem:[%s23919_s7 + $0x5c4] ss:$8 sps:$4 sm:$0xff]   ;;  %v18732_v52 = vld [vmem:[%s23919_s7 + $0x5c0] ss:$8 sps:$4 sm:$0xff]  }
 0x791   : > { %v7697_v6 = vsel %vm7629_vm6, %v7688_v15, %v7696_v42  ;;  %8269 = vmatprep.subr.bf16.mxu1 %v18662_v48  ;;  %v7730_v54 = vor.u32 %v7729_v29, %v7726_v59  ;;  %v7671_v11 = vor.u32 %v7670_v53, %v7667_v45  ;;  %v18701_v48 = vld [vmem:[%s23919_s7 + $0x514] ss:$8 sps:$4 sm:$0xff]   ;;  %v7524_v37 = vld [vmem:[#allocation6 + $0x20] sm:$0xfc]  ;;  %v18738_v61 = vld [vmem:[%s23919_s7 + $0x5e0] ss:$8 sps:$4 sm:$0xff]  }
 0x792   : > { %8293 = vmatprep.mubr.bf16.mxu1 %v7697_v6  ;;  %v18704_v6 = vld [vmem:[%s23919_s7 + $0x524] ss:$8 sps:$4 sm:$0xff]   ;;  %v7530_v16 = vld [vmem:[#allocation6 + $0x50] sm:$0x3]  ;;  %v18735_v58 = vld [vmem:[%s23919_s7 + $0x5d0] ss:$8 sps:$4 sm:$0xff]  }
 0x793   : > { %v7680_v15 = vsel %vm7629_vm6, %v7671_v11, %v7679_v55  ;;  %v7731_v42 = vsel %vm7629_vm6, %v7722_v46, %v7730_v54  ;;  %v18740_v40 = vld [vmem:[%s23919_s7 + $0x5e4] ss:$8 sps:$4 sm:$0xff]   ;;  %v7699_v38 = vshrl.u32 %v7524_v37, 16  ;;  %v7702_v51 = vshll.u32 %v7524_v37, 16  ;;  %v18743_v39 = vld [vmem:[%s23919_s7 + $0x5f4] ss:$8 sps:$4 sm:$0xff]  }
 0x794   : > { %8270 = vmatpush1.bf16.msra.mxu1 %v18660_v18  ;;  %v18699_v18 = vld [vmem:[%s23919_s7 + $0x510] ss:$8 sps:$4 sm:$0xff]   ;;  %v7707_v19 = vshrl.u32 %v7530_v16, 16  ;;  %v18746_v59 = vld [vmem:[%s23919_s7 + $0x4] ss:$8 sps:$4 sm:$0xff]  }
 0x795   : > { %8271 = vmatprep.subr.bf16.mxu1 %v18665_v44  ;;  %v18702_v44 = vld [vmem:[%s23919_s7 + $0x520] ss:$8 sps:$4 sm:$0xff]   ;;  %v7704_v5 = vrot.slane %v7702_v51, 3  ;;  %v18741_v25 = vld [vmem:[%s23919_s7 + $0x5f0] ss:$8 sps:$4 sm:$0xff]  }
 0x796   : > { %v7709_v62 = vrot.slane %v7707_v19, 2  ;;  %v18744_v45 = vld [vmem:[%s23919_s7] ss:$8 sps:$4 sm:$0xff]   ;;  %v18749_v53 = vld [vmem:[%s23919_s7 + $0x14] ss:$8 sps:$4 sm:$0xff]  }
 0x797   : > { %v18747_v55 = vld [vmem:[%s23919_s7 + $0x10] ss:$8 sps:$4 sm:$0xff]   ;;  %v18752_v46 = vld [vmem:[%s23919_s7 + $0x24] ss:$8 sps:$4 sm:$0xff]   ;;  %v18750_v54 = vld [vmem:[%s23919_s7 + $0x20] ss:$8 sps:$4 sm:$0xff]  }
 0x798   : > { %8272 = vmatpush1.bf16.msra.mxu1 %v18663_v8  ;;  %v18707_v8 = vld [vmem:[%s23919_s7 + $0x534] ss:$8 sps:$4 sm:$0xff]   ;;  %v18800_v37 = vld [vmem:[%s23919_s7 + $0x124] ss:$8 sps:$4 sm:$0xff]   ;;  %v18807_v51 = vld [vmem:[%s23919_s7 + $0x150] ss:$8 sps:$4 sm:$0xff]  }
 0x799   : > { %8273 = vmatprep.subr.bf16.mxu1 %v18668_v50  ;;  %v18705_v50 = vld [vmem:[%s23919_s7 + $0x530] ss:$8 sps:$4 sm:$0xff]   ;;  %v18755_v11 = vld [vmem:[%s23919_s7 + $0x34] ss:$8 sps:$4 sm:$0xff]   ;;  %v18812_v19 = vld [vmem:[%s23919_s7 + $0x164] ss:$8 sps:$4 sm:$0xff]  }
 0x79a   : > { %vm24092_vm4 = vsmask.f32 1280 }
 0x79c   : > { %8274 = vmatpush1.bf16.msra.mxu1 %v18666_v22  ;;  %v18710_v22 = vld [vmem:[%s23919_s7 + $0x544] ss:$8 sps:$4 sm:$0xff]  }
 0x79d   : > { %8275 = vmatprep.subr.bf16.mxu1 %v18671_v47  ;;  %v18708_v47 = vld [vmem:[%s23919_s7 + $0x540] ss:$8 sps:$4 sm:$0xff]  }
 0x7a0   : > { %8276 = vmatpush1.bf16.msra.mxu1 %v18669_v4  ;;  %v18713_v4 = vld [vmem:[%s23919_s7 + $0x554] ss:$8 sps:$4 sm:$0xff]  }
 0x7a1   : > { %8277 = vmatprep.subr.bf16.mxu1 %v18674_v23  ;;  %v18711_v23 = vld [vmem:[%s23919_s7 + $0x550] ss:$8 sps:$4 sm:$0xff]  }
 0x7a4   : > { %8278 = vmatpush1.bf16.msra.mxu1 %v18672_v20  ;;  %v18716_v20 = vld [vmem:[%s23919_s7 + $0x564] ss:$8 sps:$4 sm:$0xff]  }
 0x7a5   : > { %8279 = vmatprep.subr.bf16.mxu1 %v18677_v49  ;;  %v18714_v49 = vld [vmem:[%s23919_s7 + $0x560] ss:$8 sps:$4 sm:$0xff]  }
 0x7a8   : > { %8280 = vmatpush1.bf16.msra.mxu1 %v18675_v9  ;;  %v18719_v9 = vld [vmem:[%s23919_s7 + $0x574] ss:$8 sps:$4 sm:$0xff]  }
 0x7a9   : > { %8281 = vmatprep.subr.bf16.mxu1 %v18680_v2  ;;  %v18717_v2 = vld [vmem:[%s23919_s7 + $0x570] ss:$8 sps:$4 sm:$0xff]  }
 0x7ac   : > { %8282 = vmatpush1.bf16.msra.mxu1 %v18678_v26  ;;  %v18722_v26 = vld [vmem:[%s23919_s7 + $0x584] ss:$8 sps:$4 sm:$0xff]  }
 0x7ad   : > { %8283 = vmatprep.subr.bf16.mxu1 %v18683_v3  ;;  %v18720_v3 = vld [vmem:[%s23919_s7 + $0x580] ss:$8 sps:$4 sm:$0xff]  }
 0x7b0   : > { %8284 = vmatpush1.bf16.msra.mxu1 %v18681_v27  ;;  %v18725_v27 = vld [vmem:[%s23919_s7 + $0x594] ss:$8 sps:$4 sm:$0xff]  }
 0x7b1   : > { %8285 = vmatprep.subr.bf16.mxu1 %v18686_v12  ;;  %v18723_v12 = vld [vmem:[%s23919_s7 + $0x590] ss:$8 sps:$4 sm:$0xff]  }
 0x7b4   : > { %8286 = vmatpush1.bf16.msra.mxu1 %v18684_v33  ;;  %v18728_v33 = vld [vmem:[%s23919_s7 + $0x5a4] ss:$8 sps:$4 sm:$0xff]  }
 0x7b5   : > { %8287 = vmatprep.subr.bf16.mxu1 %v18689_v10  ;;  %v18726_v10 = vld [vmem:[%s23919_s7 + $0x5a0] ss:$8 sps:$4 sm:$0xff]  }
 0x7b8   : > { %8288 = vmatpush1.bf16.msra.mxu1 %v18687_v57  ;;  %v18729_v57 = vld [vmem:[%s23919_s7 + $0x5b0] ss:$8 sps:$4 sm:$0xff]  }
 0x7b9   : > { %8289 = vmatprep.subr.bf16.mxu1 %v18692_v56  ;;  %v18737_v56 = vld [vmem:[%s23919_s7 + $0x5d4] ss:$8 sps:$4 sm:$0xff]  }
 0x7bc   : > { %8290 = vmatpush1.bf16.msra.mxu1 %v18690_v31  ;;  %v7710_v31 = vshll.u32 %v7530_v16, 16  ;;  %v18798_v16 = vld [vmem:[%s23919_s7 + $0x120] ss:$8 sps:$4 sm:$0xff]  }
 0x7bd   : > { %8291 = vmatprep.subr.bf16.mxu1 %v18695_v7  ;;  %v7701_v7 = vrot.slane %v7699_v38, 2  ;;  %v18809_v38 = vld [vmem:[%s23919_s7 + $0x154] ss:$8 sps:$4 sm:$0xff]  }
 0x7be   : > { %v7712_v43 = vrot.slane %v7710_v31, 3  ;;  %v18810_v31 = vld [vmem:[%s23919_s7 + $0x160] ss:$8 sps:$4 sm:$0xff]  }
 0x7bf   : > { %v7705_v29 = vor.u32 %v7704_v5, %v7701_v7  ;;  %v18818_v7 = vld [vmem:[%s23919_s7 + $0x184] ss:$8 sps:$4 sm:$0xff]   ;;  %v18816_v5 = vld [vmem:[%s23919_s7 + $0x180] ss:$8 sps:$4 sm:$0xff]  }
 0x7c0   : > { %8292 = vmatpush1.bf16.msra.mxu1 %v18693_v13  ;;  %v7713_v13 = vor.u32 %v7712_v43, %v7709_v62  ;;  %v18821_v62 = vld [vmem:[%s23919_s7 + $0x194] ss:$8 sps:$4 sm:$0xff]   ;;  %v18819_v43 = vld [vmem:[%s23919_s7 + $0x190] ss:$8 sps:$4 sm:$0xff]  }
 0x7c1   : > { %8304 = vmatprep.subr.bf16.mxu1 %v18698_v1 }
 0x7c2   : > { %v7714_v1 = vsel %vm7629_vm6, %v7705_v29, %v7713_v13  ;;  %v18827_v29 = vld [vmem:[%s23919_s7 + $0x1b4] ss:$8 sps:$4 sm:$0xff]   ;;  %v18825_v13 = vld [vmem:[%s23919_s7 + $0x1b0] ss:$8 sps:$4 sm:$0xff]  }
 0x7c3   : > { %8294 = vmatmul.mubr.bf16.vlgmr.msra.gmra.mrb[88].mxu1 %v7680_v15  ;;  %v18761_v15 = vld [vmem:[%s23919_s7 + $0x54] ss:$8 sps:$4 sm:$0xff]  }
 0x7c4   : > { %8305 = vmatpush1.bf16.msra.mxu1 %v18696_v41  ;;  %8336 = vmatprep.mubr.bf16.mxu1 %v7731_v42  ;;  %v18758_v41 = vld [vmem:[%s23919_s7 + $0x44] ss:$8 sps:$4 sm:$0xff]   ;;  %v18759_v42 = vld [vmem:[%s23919_s7 + $0x50] ss:$8 sps:$4 sm:$0xff]  }
 0x7c5   : > { %8306 = vmatprep.subr.bf16.mxu1 %v18701_v48  ;;  %v18756_v48 = vld [vmem:[%s23919_s7 + $0x40] ss:$8 sps:$4 sm:$0xff]  }
 0x7c8   : > { %8307 = vmatpush1.bf16.msra.mxu1 %v18699_v18  ;;  %v18764_v18 = vld [vmem:[%s23919_s7 + $0x64] ss:$8 sps:$4 sm:$0xff]  }
 0x7c9   : > { %8308 = vmatprep.subr.bf16.mxu1 %v18704_v6  ;;  %v18762_v6 = vld [vmem:[%s23919_s7 + $0x60] ss:$8 sps:$4 sm:$0xff]  }
 0x7cc   : > { %8309 = vmatpush1.bf16.msra.mxu1 %v18702_v44  ;;  %v18767_v44 = vld [vmem:[%s23919_s7 + $0x74] ss:$8 sps:$4 sm:$0xff]  }
 0x7cd   : > { %8310 = vmatprep.subr.bf16.mxu1 %v18707_v8  ;;  %v18765_v8 = vld [vmem:[%s23919_s7 + $0x70] ss:$8 sps:$4 sm:$0xff]  }
 0x7d0   : > { %8311 = vmatpush1.bf16.msra.mxu1 %v18705_v50  ;;  %v18770_v50 = vld [vmem:[%s23919_s7 + $0x84] ss:$8 sps:$4 sm:$0xff]  }
 0x7d1   : > { %8312 = vmatprep.subr.bf16.mxu1 %v18710_v22  ;;  %v18768_v22 = vld [vmem:[%s23919_s7 + $0x80] ss:$8 sps:$4 sm:$0xff]  }
 0x7d4   : > { %8313 = vmatpush1.bf16.msra.mxu1 %v18708_v47  ;;  %v18773_v47 = vld [vmem:[%s23919_s7 + $0x94] ss:$8 sps:$4 sm:$0xff]  }
 0x7d5   : > { %8314 = vmatprep.subr.bf16.mxu1 %v18713_v4  ;;  %v18771_v4 = vld [vmem:[%s23919_s7 + $0x90] ss:$8 sps:$4 sm:$0xff]  }
 0x7d8   : > { %8315 = vmatpush1.bf16.msra.mxu1 %v18711_v23  ;;  %v18776_v23 = vld [vmem:[%s23919_s7 + $0xa4] ss:$8 sps:$4 sm:$0xff]  }
 0x7d9   : > { %8316 = vmatprep.subr.bf16.mxu1 %v18716_v20  ;;  %v18774_v20 = vld [vmem:[%s23919_s7 + $0xa0] ss:$8 sps:$4 sm:$0xff]  }
 0x7dc   : > { %8317 = vmatpush1.bf16.msra.mxu1 %v18714_v49  ;;  %v18779_v49 = vld [vmem:[%s23919_s7 + $0xb4] ss:$8 sps:$4 sm:$0xff]  }
 0x7dd   : > { %8318 = vmatprep.subr.bf16.mxu1 %v18719_v9  ;;  %v18777_v9 = vld [vmem:[%s23919_s7 + $0xb0] ss:$8 sps:$4 sm:$0xff]  }
 0x7e0   : > { %8319 = vmatpush1.bf16.msra.mxu1 %v18717_v2  ;;  %v18782_v2 = vld [vmem:[%s23919_s7 + $0xc4] ss:$8 sps:$4 sm:$0xff]  }
 0x7e1   : > { %8320 = vmatprep.subr.bf16.mxu1 %v18722_v26  ;;  %v18780_v26 = vld [vmem:[%s23919_s7 + $0xc0] ss:$8 sps:$4 sm:$0xff]  }
 0x7e4   : > { %8321 = vmatpush1.bf16.msra.mxu1 %v18720_v3  ;;  %v18785_v3 = vld [vmem:[%s23919_s7 + $0xd4] ss:$8 sps:$4 sm:$0xff]  }
 0x7e5   : > { %8322 = vmatprep.subr.bf16.mxu1 %v18725_v27  ;;  %v18783_v27 = vld [vmem:[%s23919_s7 + $0xd0] ss:$8 sps:$4 sm:$0xff]  }
 0x7e8   : > { %8323 = vmatpush1.bf16.msra.mxu1 %v18723_v12  ;;  %v18788_v12 = vld [vmem:[%s23919_s7 + $0xe4] ss:$8 sps:$4 sm:$0xff]  }
 0x7e9   : > { %8324 = vmatprep.subr.bf16.mxu1 %v18728_v33  ;;  %v18786_v33 = vld [vmem:[%s23919_s7 + $0xe0] ss:$8 sps:$4 sm:$0xff]  }
 0x7ec   : > { %8325 = vmatpush1.bf16.msra.mxu1 %v18726_v10  ;;  %v18791_v10 = vld [vmem:[%s23919_s7 + $0xf4] ss:$8 sps:$4 sm:$0xff]  }
 0x7ed   : > { %8326 = vmatprep.subr.bf16.mxu1 %v18731_v36  ;;  %v18789_v36 = vld [vmem:[%s23919_s7 + $0xf0] ss:$8 sps:$4 sm:$0xff]  }
 0x7f0   : > { %8327 = vmatpush1.bf16.msra.mxu1 %v18729_v57  ;;  %v18794_v57 = vld [vmem:[%s23919_s7 + $0x104] ss:$8 sps:$4 sm:$0xff]  }
 0x7f1   : > { %8328 = vmatprep.subr.bf16.mxu1 %v18734_v0  ;;  %v18792_v0 = vld [vmem:[%s23919_s7 + $0x100] ss:$8 sps:$4 sm:$0xff]  }
 0x7f4   : > { %8329 = vmatpush1.bf16.msra.mxu1 %v18732_v52  ;;  %v18797_v52 = vld [vmem:[%s23919_s7 + $0x114] ss:$8 sps:$4 sm:$0xff]  }
 0x7f5   : > { %8330 = vmatprep.subr.bf16.mxu1 %v18737_v56  ;;  %v18795_v56 = vld [vmem:[%s23919_s7 + $0x110] ss:$8 sps:$4 sm:$0xff]  }
 0x7f8   : > { %8331 = vmatpush1.bf16.msra.mxu1 %v18735_v58  ;;  %v18806_v58 = vld [vmem:[%s23919_s7 + $0x144] ss:$8 sps:$4 sm:$0xff]  }
 0x7f9   : > { %8332 = vmatprep.subr.bf16.mxu1 %v18740_v40  ;;  %v18804_v40 = vld [vmem:[%s23919_s7 + $0x140] ss:$8 sps:$4 sm:$0xff]  }
 0x7fc   : > { %8333 = vmatpush1.bf16.msra.mxu1 %v18738_v61  ;;  %v18815_v61 = vld [vmem:[%s23919_s7 + $0x174] ss:$8 sps:$4 sm:$0xff]  }
 0x7fd   : > { %8334 = vmatprep.subr.bf16.mxu1 %v18743_v39  ;;  %v18813_v39 = vld [vmem:[%s23919_s7 + $0x170] ss:$8 sps:$4 sm:$0xff]  }
 0x800   : > { %8335 = vmatpush1.bf16.msra.mxu1 %v18741_v25  ;;  %v18824_v25 = vld [vmem:[%s23919_s7 + $0x1a4] ss:$8 sps:$4 sm:$0xff]  }
 0x801   : > { %8827 = vmatprep.subr.bf16.mxu1 %v18746_v59  ;;  %v18822_v59 = vld [vmem:[%s23919_s7 + $0x1a0] ss:$8 sps:$4 sm:$0xff]  }
 0x803   : > { %8337 = vmatmul.mubr.bf16.vlgmr.msra.gmra.mrb[88].mxu1 %v7714_v1  ;;  %v18833_v1 = vld [vmem:[%s23919_s7 + $0x1d4] ss:$8 sps:$4 sm:$0xff]  }
 0x804   : > { %8828 = vmatpush1.bf16.msra.mxu1 %v18744_v45  ;;  %8859 = vmatprep.mubr.bf16.mxu1 %v22602_v34  ;;  %v18753_v34 = vld [vmem:[%s23919_s7 + $0x30] ss:$8 sps:$4 sm:$0xff]   ;;  %v18830_v45 = vld [vmem:[%s23919_s7 + $0x1c4] ss:$8 sps:$4 sm:$0xff]  }
 0x805   : > { %8829 = vmatprep.subr.bf16.mxu1 %v18749_v53  ;;  %v18828_v53 = vld [vmem:[%s23919_s7 + $0x1c0] ss:$8 sps:$4 sm:$0xff]  }
 0x808   : > { %8830 = vmatpush1.bf16.msra.mxu1 %v18747_v55  ;;  %v18831_v55 = vld [vmem:[%s23919_s7 + $0x1d0] ss:$8 sps:$4 sm:$0xff]  }
 0x809   : > { %8831 = vmatprep.subr.bf16.mxu1 %v18752_v46  ;;  %v18836_v46 = vld [vmem:[%s23919_s7 + $0x1e4] ss:$8 sps:$4 sm:$0xff]  }
 0x80c   : > { %8832 = vmatpush1.bf16.msra.mxu1 %v18750_v54  ;;  %v18834_v54 = vld [vmem:[%s23919_s7 + $0x1e0] ss:$8 sps:$4 sm:$0xff]  }
 0x80d   : > { %8833 = vmatprep.subr.bf16.mxu1 %v18755_v11  ;;  %v18839_v11 = vld [vmem:[%s23919_s7 + $0x1f4] ss:$8 sps:$4 sm:$0xff]  }
 0x810   : > { %8834 = vmatpush1.bf16.msra.mxu1 %v18753_v34  ;;  %v18837_v34 = vld [vmem:[%s23919_s7 + $0x1f0] ss:$8 sps:$4 sm:$0xff]  }
 0x811   : > { %8835 = vmatprep.subr.bf16.mxu1 %v18758_v41  ;;  %v18842_v41 = vld [vmem:[%s23919_s7 + $0x204] ss:$8 sps:$4 sm:$0xff]  }
 0x814   : > { %8836 = vmatpush1.bf16.msra.mxu1 %v18756_v48  ;;  %v18840_v48 = vld [vmem:[%s23919_s7 + $0x200] ss:$8 sps:$4 sm:$0xff]  }
 0x815   : > { %8837 = vmatprep.subr.bf16.mxu1 %v18761_v15  ;;  %v18845_v15 = vld [vmem:[%s23919_s7 + $0x214] ss:$8 sps:$4 sm:$0xff]  }
 0x818   : > { %8838 = vmatpush1.bf16.msra.mxu1 %v18759_v42  ;;  %v18843_v42 = vld [vmem:[%s23919_s7 + $0x210] ss:$8 sps:$4 sm:$0xff]  }
 0x819   : > { %8839 = vmatprep.subr.bf16.mxu1 %v18764_v18  ;;  %v18848_v18 = vld [vmem:[%s23919_s7 + $0x224] ss:$8 sps:$4 sm:$0xff]  }
 0x81c   : > { %8840 = vmatpush1.bf16.msra.mxu1 %v18762_v6  ;;  %v18846_v6 = vld [vmem:[%s23919_s7 + $0x220] ss:$8 sps:$4 sm:$0xff]  }
 0x81d   : > { %8841 = vmatprep.subr.bf16.mxu1 %v18767_v44  ;;  %v18854_v44 = vld [vmem:[%s23919_s7 + $0x244] ss:$8 sps:$4 sm:$0xff]  }
 0x820   : > { %8842 = vmatpush1.bf16.msra.mxu1 %v18765_v8  ;;  %v18852_v8 = vld [vmem:[%s23919_s7 + $0x240] ss:$8 sps:$4 sm:$0xff]  }
 0x821   : > { %8843 = vmatprep.subr.bf16.mxu1 %v18770_v50  ;;  %v18857_v50 = vld [vmem:[%s23919_s7 + $0x254] ss:$8 sps:$4 sm:$0xff]  }
 0x824   : > { %8844 = vmatpush1.bf16.msra.mxu1 %v18768_v22  ;;  %v18855_v22 = vld [vmem:[%s23919_s7 + $0x250] ss:$8 sps:$4 sm:$0xff]  }
 0x825   : > { %8845 = vmatprep.subr.bf16.mxu1 %v18773_v47  ;;  %v18860_v47 = vld [vmem:[%s23919_s7 + $0x264] ss:$8 sps:$4 sm:$0xff]  }
 0x828   : > { %8846 = vmatpush1.bf16.msra.mxu1 %v18771_v4  ;;  %v18858_v4 = vld [vmem:[%s23919_s7 + $0x260] ss:$8 sps:$4 sm:$0xff]  }
 0x829   : > { %8847 = vmatprep.subr.bf16.mxu1 %v18776_v23  ;;  %v18863_v23 = vld [vmem:[%s23919_s7 + $0x274] ss:$8 sps:$4 sm:$0xff]  }
 0x82c   : > { %8848 = vmatpush1.bf16.msra.mxu1 %v18774_v20  ;;  %v18861_v20 = vld [vmem:[%s23919_s7 + $0x270] ss:$8 sps:$4 sm:$0xff]  }
 0x82d   : > { %8849 = vmatprep.subr.bf16.mxu1 %v18779_v49  ;;  %v18866_v49 = vld [vmem:[%s23919_s7 + $0x284] ss:$8 sps:$4 sm:$0xff]  }
 0x830   : > { %8850 = vmatpush1.bf16.msra.mxu1 %v18777_v9  ;;  %v18864_v9 = vld [vmem:[%s23919_s7 + $0x280] ss:$8 sps:$4 sm:$0xff]  }
 0x831   : > { %8851 = vmatprep.subr.bf16.mxu1 %v18782_v2  ;;  %v18869_v2 = vld [vmem:[%s23919_s7 + $0x294] ss:$8 sps:$4 sm:$0xff]  }
 0x834   : > { %8852 = vmatpush1.bf16.msra.mxu1 %v18780_v26  ;;  %v18867_v26 = vld [vmem:[%s23919_s7 + $0x290] ss:$8 sps:$4 sm:$0xff]  }
 0x835   : > { %8853 = vmatprep.subr.bf16.mxu1 %v18785_v3  ;;  %v18872_v3 = vld [vmem:[%s23919_s7 + $0x2a4] ss:$8 sps:$4 sm:$0xff]  }
 0x838   : > { %8854 = vmatpush1.bf16.msra.mxu1 %v18783_v27  ;;  %v18870_v27 = vld [vmem:[%s23919_s7 + $0x2a0] ss:$8 sps:$4 sm:$0xff]  }
 0x839   : > { %8855 = vmatprep.subr.bf16.mxu1 %v18788_v12  ;;  %v18875_v12 = vld [vmem:[%s23919_s7 + $0x2b4] ss:$8 sps:$4 sm:$0xff]  }
 0x83c   : > { %8856 = vmatpush1.bf16.msra.mxu1 %v18786_v33  ;;  %v18873_v33 = vld [vmem:[%s23919_s7 + $0x2b0] ss:$8 sps:$4 sm:$0xff]  }
 0x83d   : > { %8857 = vmatprep.subr.bf16.mxu1 %v18791_v10  ;;  %v18878_v10 = vld [vmem:[%s23919_s7 + $0x2c4] ss:$8 sps:$4 sm:$0xff]  }
 0x840   : > { %8858 = vmatpush1.bf16.msra.mxu1 %v18789_v36  ;;  %v18876_v36 = vld [vmem:[%s23919_s7 + $0x2c0] ss:$8 sps:$4 sm:$0xff]  }
 0x841   : > { %8870 = vmatprep.subr.bf16.mxu1 %v18794_v57  ;;  %v18881_v57 = vld [vmem:[%s23919_s7 + $0x2d4] ss:$8 sps:$4 sm:$0xff]  }
 0x843   : > { %8860 = vmatmul.mubr.bf16.vlgmr.msra.gmra.mrb[88].mxu1 %v22604_v63  ;;  %v18803_v63 = vld [vmem:[%s23919_s7 + $0x134] ss:$8 sps:$4 sm:$0xff]  }
 0x844   : > { %8871 = vmatpush1.bf16.msra.mxu1 %v18792_v0  ;;  %8902 = vmatprep.mubr.bf16.mxu1 %v22620_v30  ;;  %v18801_v30 = vld [vmem:[%s23919_s7 + $0x130] ss:$8 sps:$4 sm:$0xff]  }
 0x845   : > { %8872 = vmatprep.subr.bf16.mxu1 %v18797_v52  ;;  %v18879_v0 = vld [vmem:[%s23919_s7 + $0x2d0] ss:$8 sps:$4 sm:$0xff]   ;;  %v18884_v52 = vld [vmem:[%s23919_s7 + $0x2e4] ss:$8 sps:$4 sm:$0xff]  }
 0x848   : > { %8873 = vmatpush1.bf16.msra.mxu1 %v18795_v56  ;;  %v18882_v56 = vld [vmem:[%s23919_s7 + $0x2e0] ss:$8 sps:$4 sm:$0xff]  }
 0x849   : > { %8874 = vmatprep.subr.bf16.mxu1 %v18800_v37  ;;  %v18887_v37 = vld [vmem:[%s23919_s7 + $0x2f4] ss:$8 sps:$4 sm:$0xff]  }
 0x84c   : > { %8875 = vmatpush1.bf16.msra.mxu1 %v18798_v16  ;;  %v18885_v16 = vld [vmem:[%s23919_s7 + $0x2f0] ss:$8 sps:$4 sm:$0xff]  }
 0x84d   : > { %8876 = vmatprep.subr.bf16.mxu1 %v18803_v63  ;;  %v8963_v63 = vld [vmem:[#allocation6 + $0x38] sm:$0x1f] }
 0x850   : > { %8877 = vmatpush1.bf16.msra.mxu1 %v18801_v30  ;;  %v18890_v30 = vld [vmem:[%s23919_s7 + $0x604] ss:$8 sps:$4 sm:$0xff]  }
 0x851   : > { %8878 = vmatprep.subr.bf16.mxu1 %v18806_v58  ;;  %v8957_v58 = vld [vmem:[#allocation6 + $0x8] sm:$0xe0] }
 0x854   : > { %8879 = vmatpush1.bf16.msra.mxu1 %v18804_v40  ;;  %v9081_v40 = vrot.slane %v8963_v63, 5  ;;  %v19038_v63 = vld [vmem:[#allocation14 + $0x320] ss:$8 sps:$4 sm:$0xff]  }
 0x855   : > { %8880 = vmatprep.subr.bf16.mxu1 %v18809_v38  ;;  %v18888_v38 = vld [vmem:[%s23919_s7 + $0x600] ss:$8 sps:$4 sm:$0xff]  }
 0x858   : > { %8881 = vmatpush1.bf16.msra.mxu1 %v18807_v51  ;;  %v9080_v51 = vrot.slane %v8957_v58, 5  ;;  %v18945_v58 = vld [vmem:[%s23919_s7 + $0x730] ss:$8 sps:$4 sm:$0xff]  }
 0x859   : > { %8882 = vmatprep.subr.bf16.mxu1 %v18812_v19  ;;  %v18893_v19 = vld [vmem:[%s23919_s7 + $0x614] ss:$8 sps:$4 sm:$0xff]  }
 0x85c   : > { %8883 = vmatpush1.bf16.msra.mxu1 %v18810_v31  ;;  %v9082_v31 = vsel %vm1613_vm14, %v9080_v51, %v9081_v40  ;;  %v18950_v40 = vld [vmem:[%s23919_s7 + $0x744] ss:$8 sps:$4 sm:$0xff]   ;;  %v19046_v51 = vld [vmem:[#allocation14 + $0x344] ss:$8 sps:$4 sm:$0xff]  }
 0x85d   : > { %8884 = vmatprep.subr.bf16.mxu1 %v18815_v61  ;;  %v18891_v61 = vld [vmem:[%s23919_s7 + $0x610] ss:$8 sps:$4 sm:$0xff]  }
 0x860   : > { %8885 = vmatpush1.bf16.msra.mxu1 %v18813_v39  ;;  %v18896_v39 = vld [vmem:[%s23919_s7 + $0x624] ss:$8 sps:$4 sm:$0xff]  }
 0x861   : > { %8886 = vmatprep.subr.bf16.mxu1 %v18818_v7  ;;  %v18894_v7 = vld [vmem:[%s23919_s7 + $0x620] ss:$8 sps:$4 sm:$0xff]  }
 0x864   : > { %8887 = vmatpush1.bf16.msra.mxu1 %v18816_v5  ;;  %v18897_v5 = vld [vmem:[%s23919_s7 + $0x630] ss:$8 sps:$4 sm:$0xff]  }
 0x865   : > { %8888 = vmatprep.subr.bf16.mxu1 %v18821_v62  ;;  %v18902_v62 = vld [vmem:[%s23919_s7 + $0x644] ss:$8 sps:$4 sm:$0xff]  }
 0x868   : > { %8889 = vmatpush1.bf16.msra.mxu1 %v18819_v43  ;;  %v18900_v43 = vld [vmem:[%s23919_s7 + $0x640] ss:$8 sps:$4 sm:$0xff]  }
 0x869   : > { %8890 = vmatprep.subr.bf16.mxu1 %v18824_v25  ;;  %v18905_v25 = vld [vmem:[%s23919_s7 + $0x654] ss:$8 sps:$4 sm:$0xff]  }
 0x86c   : > { %8891 = vmatpush1.bf16.msra.mxu1 %v18822_v59  ;;  %v18903_v59 = vld [vmem:[%s23919_s7 + $0x650] ss:$8 sps:$4 sm:$0xff]  }
 0x86d   : > { %8892 = vmatprep.subr.bf16.mxu1 %v18827_v29  ;;  %v18908_v29 = vld [vmem:[%s23919_s7 + $0x664] ss:$8 sps:$4 sm:$0xff]  }
 0x870   : > { %8893 = vmatpush1.bf16.msra.mxu1 %v18825_v13  ;;  %v18906_v13 = vld [vmem:[%s23919_s7 + $0x660] ss:$8 sps:$4 sm:$0xff]  }
 0x871   : > { %8894 = vmatprep.subr.bf16.mxu1 %v18830_v45  ;;  %v18911_v45 = vld [vmem:[%s23919_s7 + $0x674] ss:$8 sps:$4 sm:$0xff]  }
 0x874   : > { %8895 = vmatpush1.bf16.msra.mxu1 %v18828_v53  ;;  %v18909_v53 = vld [vmem:[%s23919_s7 + $0x670] ss:$8 sps:$4 sm:$0xff]  }
 0x875   : > { %8896 = vmatprep.subr.bf16.mxu1 %v18833_v1  ;;  %v18914_v1 = vld [vmem:[%s23919_s7 + $0x684] ss:$8 sps:$4 sm:$0xff]  }
 0x878   : > { %8897 = vmatpush1.bf16.msra.mxu1 %v18831_v55  ;;  %v18912_v55 = vld [vmem:[%s23919_s7 + $0x680] ss:$8 sps:$4 sm:$0xff]  }
 0x879   : > { %8898 = vmatprep.subr.bf16.mxu1 %v18836_v46  ;;  %v18917_v46 = vld [vmem:[%s23919_s7 + $0x694] ss:$8 sps:$4 sm:$0xff]  }
 0x87c   : > { %8899 = vmatpush1.bf16.msra.mxu1 %v18834_v54  ;;  %v18915_v54 = vld [vmem:[%s23919_s7 + $0x690] ss:$8 sps:$4 sm:$0xff]  }
 0x87d   : > { %8900 = vmatprep.subr.bf16.mxu1 %v18839_v11  ;;  %v18920_v11 = vld [vmem:[%s23919_s7 + $0x6a4] ss:$8 sps:$4 sm:$0xff]  }
 0x880   : > { %8901 = vmatpush1.bf16.msra.mxu1 %v18837_v34  ;;  %v18918_v34 = vld [vmem:[%s23919_s7 + $0x6a0] ss:$8 sps:$4 sm:$0xff]  }
 0x881   : > { %8913 = vmatprep.subr.bf16.mxu1 %v18842_v41  ;;  %v18923_v41 = vld [vmem:[%s23919_s7 + $0x6b4] ss:$8 sps:$4 sm:$0xff]  }
 0x883   : > { %8903 = vmatmul.mubr.bf16.vlgmr.msra.gmra.mrb[88].mxu1 %v22623_v21  ;;  %v18851_v21 = vld [vmem:[%s23919_s7 + $0x234] ss:$8 sps:$4 sm:$0xff]  }
 0x884   : > { %8914 = vmatpush1.bf16.msra.mxu1 %v18840_v48  ;;  %8945 = vmatprep.mubr.bf16.mxu1 %v22633_v14  ;;  %v18849_v14 = vld [vmem:[%s23919_s7 + $0x230] ss:$8 sps:$4 sm:$0xff]  }
 0x885   : > { %8915 = vmatprep.subr.bf16.mxu1 %v18845_v15  ;;  %v18921_v48 = vld [vmem:[%s23919_s7 + $0x6b0] ss:$8 sps:$4 sm:$0xff]   ;;  %v18926_v15 = vld [vmem:[%s23919_s7 + $0x6c4] ss:$8 sps:$4 sm:$0xff]  }
 0x888   : > { %8916 = vmatpush1.bf16.msra.mxu1 %v18843_v42  ;;  %v18924_v42 = vld [vmem:[%s23919_s7 + $0x6c0] ss:$8 sps:$4 sm:$0xff]  }
 0x889   : > { %8917 = vmatprep.subr.bf16.mxu1 %v18848_v18  ;;  %v18929_v18 = vld [vmem:[%s23919_s7 + $0x6d4] ss:$8 sps:$4 sm:$0xff]  }
 0x88c   : > { %8918 = vmatpush1.bf16.msra.mxu1 %v18846_v6  ;;  %v18927_v6 = vld [vmem:[%s23919_s7 + $0x6d0] ss:$8 sps:$4 sm:$0xff]  }
 0x88d   : > { %8919 = vmatprep.subr.bf16.mxu1 %v18851_v21  ;;  %v18932_v21 = vld [vmem:[%s23919_s7 + $0x6e4] ss:$8 sps:$4 sm:$0xff]  }
 0x890   : > { %8920 = vmatpush1.bf16.msra.mxu1 %v18849_v14  ;;  %v18930_v14 = vld [vmem:[%s23919_s7 + $0x6e0] ss:$8 sps:$4 sm:$0xff]  }
 0x891   : > { %8921 = vmatprep.subr.bf16.mxu1 %v18854_v44  ;;  %v18935_v44 = vld [vmem:[%s23919_s7 + $0x6f4] ss:$8 sps:$4 sm:$0xff]  }
 0x894   : > { %8922 = vmatpush1.bf16.msra.mxu1 %v18852_v8  ;;  %v8962_v8 = vld [vmem:[#allocation6 + $0x30] sm:$0x1f] }
 0x895   : > { %8923 = vmatprep.subr.bf16.mxu1 %v18857_v50  ;;  %v18933_v50 = vld [vmem:[%s23919_s7 + $0x6f0] ss:$8 sps:$4 sm:$0xff]  }
 0x898   : > { %8924 = vmatpush1.bf16.msra.mxu1 %v18855_v22  ;;  %v8965_v22 = vld [vmem:[#allocation6 + $0x48] sm:$0x1f] }
 0x899   : > { %8925 = vmatprep.subr.bf16.mxu1 %v18860_v47  ;;  %v8956_v47 = vld [vmem:[#allocation6] sm:$0xe0] }
 0x89c   : > { %8926 = vmatpush1.bf16.msra.mxu1 %v18858_v4  ;;  %v18938_v4 = vld [vmem:[%s23919_s7 + $0x704] ss:$8 sps:$4 sm:$0xff]  }
 0x89d   : > { %8927 = vmatprep.subr.bf16.mxu1 %v18863_v23  ;;  %v9078_v23 = vrot.slane %v8962_v8, 5  ;;  %v8967_v8 = vld [vmem:[#allocation6 + $0x58] sm:$0x1f] }
 0x8a0   : > { %8928 = vmatpush1.bf16.msra.mxu1 %v18861_v20  ;;  %v8959_v20 = vld [vmem:[#allocation6 + $0x18] sm:$0xe0] }
 0x8a1   : > { %8929 = vmatprep.subr.bf16.mxu1 %v18866_v49  ;;  %v9087_v49 = vrot.slane %v8965_v22, 5  ;;  %v18986_v22 = vld [vmem:[%s23919_s7 + $0x804] ss:$8 sps:$4 sm:$0xff]  }
 0x8a4   : > { %8930 = vmatpush1.bf16.msra.mxu1 %v18864_v9  ;;  %v9077_v9 = vrot.slane %v8956_v47, 5 }
 0x8a5   : > { %8931 = vmatprep.subr.bf16.mxu1 %v18869_v2  ;;  %v18936_v2 = vld [vmem:[%s23919_s7 + $0x700] ss:$8 sps:$4 sm:$0xff]  }
 0x8a8   : > { %8932 = vmatpush1.bf16.msra.mxu1 %v18867_v26  ;;  %v9086_v26 = vrot.slane %v8959_v20, 5 }
 0x8a9   : > { %8933 = vmatprep.subr.bf16.mxu1 %v18872_v3  ;;  %v18941_v3 = vld [vmem:[%s23919_s7 + $0x714] ss:$8 sps:$4 sm:$0xff]  }
 0x8ac   : > { %8934 = vmatpush1.bf16.msra.mxu1 %v18870_v27  ;;  %v9079_v27 = vsel %vm1613_vm14, %v9077_v9, %v9078_v23  ;;  %v9093_v23 = vrot.slane %v8967_v8, 5  ;;  %v18989_v9 = vld [vmem:[%s23919_s7 + $0x814] ss:$8 sps:$4 sm:$0xff]  }
 0x8ad   : > { %8935 = vmatprep.subr.bf16.mxu1 %v18875_v12  ;;  %v9088_v12 = vsel %vm1613_vm14, %v9086_v26, %v9087_v49  ;;  %v18984_v49 = vld [vmem:[%s23919_s7 + $0x800] ss:$8 sps:$4 sm:$0xff]  }
 0x8b0   : > { %8936 = vmatpush1.bf16.msra.mxu1 %v18873_v33  ;;  %v19032_v33 = vld [vmem:[#allocation14 + $0x300] ss:$8 sps:$4 sm:$0xff]  }
 0x8b1   : > { %8937 = vmatprep.subr.bf16.mxu1 %v18878_v10  ;;  %v19034_v10 = vld [vmem:[#allocation14 + $0x304] ss:$8 sps:$4 sm:$0xff]  }
 0x8b2   : > { %10670 = vmatprep.subr.bf16.mxu0 %v19034_v10  ;;  %v18993_v10 = vld [vmem:[%s23919_s7 + $0x830] ss:$8 sps:$4 sm:$0xff]  }
 0x8b3   : > { %10671 = vmatpush1.bf16.msra.mxu0 %v19032_v33  ;;  %v18995_v33 = vld [vmem:[%s23919_s7 + $0x834] ss:$8 sps:$4 sm:$0xff]  }
 0x8b4   : > { %8938 = vmatpush1.bf16.msra.mxu1 %v18876_v36  ;;  %v18939_v36 = vld [vmem:[%s23919_s7 + $0x710] ss:$8 sps:$4 sm:$0xff]  }
 0x8b5   : > { %8939 = vmatprep.subr.bf16.mxu1 %v18881_v57  ;;  %v19037_v57 = vld [vmem:[#allocation14 + $0x314] ss:$8 sps:$4 sm:$0xff]  }
 0x8b6   : > { %10672 = vmatprep.subr.bf16.mxu0 %v19037_v57  ;;  %v18996_v57 = vld [vmem:[%s23919_s7 + $0x840] ss:$8 sps:$4 sm:$0xff]  }
 0x8b8   : > { %8940 = vmatpush1.bf16.msra.mxu1 %v18879_v0  ;;  %v18944_v0 = vld [vmem:[%s23919_s7 + $0x724] ss:$8 sps:$4 sm:$0xff]  }
 0x8b9   : > { %8941 = vmatprep.subr.bf16.mxu1 %v18884_v52  ;;  %v19035_v52 = vld [vmem:[#allocation14 + $0x310] ss:$8 sps:$4 sm:$0xff]  }
 0x8ba   : > { %10673 = vmatpush1.bf16.msra.mxu0 %v19035_v52  ;;  %v18999_v52 = vld [vmem:[%s23919_s7 + $0x850] ss:$8 sps:$4 sm:$0xff]  }
 0x8bc   : > { %8942 = vmatpush1.bf16.msra.mxu1 %v18882_v56  ;;  %v19040_v56 = vld [vmem:[#allocation14 + $0x324] ss:$8 sps:$4 sm:$0xff]  }
 0x8bd   : > { %8943 = vmatprep.subr.bf16.mxu1 %v18887_v37  ;;  %v18942_v37 = vld [vmem:[%s23919_s7 + $0x720] ss:$8 sps:$4 sm:$0xff]   ;;  %10674 = vmatprep.subr.bf16.mxu0 %v19040_v56  ;;  %v19004_v56 = vld [vmem:[%s23919_s7 + $0x864] ss:$8 sps:$4 sm:$0xff]  }
 0x8be   : > { %10675 = vmatpush1.bf16.msra.mxu0 %v19038_v63  ;;  %v19005_v63 = vld [vmem:[%s23919_s7 + $0x870] ss:$8 sps:$4 sm:$0xff]  }
 0x8c0   : > { %8944 = vmatpush1.bf16.msra.mxu1 %v18885_v16  ;;  %v18947_v16 = vld [vmem:[%s23919_s7 + $0x734] ss:$8 sps:$4 sm:$0xff]  }
 0x8c1   : > { %9581 = vmatprep.subr.bf16.mxu1 %v18890_v30  ;;  %v19043_v30 = vld [vmem:[#allocation14 + $0x334] ss:$8 sps:$4 sm:$0xff]  }
 0x8c2   : > { %10676 = vmatprep.subr.bf16.mxu0 %v19043_v30  ;;  %v19010_v30 = vld [vmem:[%s23919_s7 + $0x884] ss:$8 sps:$4 sm:$0xff]  }
 0x8c3   : > { %8946 = vmatmul.mubr.bf16.vlgmr.msra.gmra.mrb[88].mxu1 %v22636_v60  ;;  %v18899_v60 = vld [vmem:[%s23919_s7 + $0x634] ss:$8 sps:$4 sm:$0xff]  }
 0x8c4   : > { %9582 = vmatpush1.bf16.msra.mxu1 %v18888_v38  ;;  %9613 = vmatprep.mubr.bf16.mxu1 %v9082_v31  ;;  %v19041_v38 = vld [vmem:[#allocation14 + $0x330] ss:$8 sps:$4 sm:$0xff]   ;;  %v18953_v31 = vld [vmem:[%s23919_s7 + $0x754] ss:$8 sps:$4 sm:$0xff]  }
 0x8c5   : > { %9583 = vmatprep.subr.bf16.mxu1 %v18893_v19  ;;  %v18948_v19 = vld [vmem:[%s23919_s7 + $0x740] ss:$8 sps:$4 sm:$0xff]   ;;  %10677 = vmatpush1.bf16.msra.mxu0 %v19041_v38  ;;  %v19011_v38 = vld [vmem:[%s23919_s7 + $0x890] ss:$8 sps:$4 sm:$0xff]  }
 0x8c6   : > { %10678 = vmatprep.subr.bf16.mxu0 %v19046_v51  ;;  %v19016_v51 = vld [vmem:[%s23919_s7 + $0x8a4] ss:$8 sps:$4 sm:$0xff]  }
 0x8c8   : > { %9584 = vmatpush1.bf16.msra.mxu1 %v18891_v61  ;;  %v19044_v61 = vld [vmem:[#allocation14 + $0x340] ss:$8 sps:$4 sm:$0xff]  }
 0x8c9   : > { %9585 = vmatprep.subr.bf16.mxu1 %v18896_v39  ;;  %v19049_v39 = vld [vmem:[#allocation14 + $0x354] ss:$8 sps:$4 sm:$0xff]   ;;  %10679 = vmatpush1.bf16.msra.mxu0 %v19044_v61 }
 0x8ca   : > { %10680 = vmatprep.subr.bf16.mxu0 %v19049_v39  ;;  %v19017_v61 = vld [vmem:[%s23919_s7 + $0x8b0] ss:$8 sps:$4 sm:$0xff]   ;;  %v19022_v39 = vld [vmem:[%s23919_s7 + $0x8c4] ss:$8 sps:$4 sm:$0xff]  }
 0x8cc   : > { %9586 = vmatpush1.bf16.msra.mxu1 %v18894_v7  ;;  %v18951_v7 = vld [vmem:[%s23919_s7 + $0x750] ss:$8 sps:$4 sm:$0xff]  }
 0x8cd   : > { %9587 = vmatprep.subr.bf16.mxu1 %v18899_v60  ;;  %v18956_v60 = vld [vmem:[%s23919_s7 + $0x764] ss:$8 sps:$4 sm:$0xff]  }
 0x8d0   : > { %9588 = vmatpush1.bf16.msra.mxu1 %v18897_v5  ;;  %v19047_v5 = vld [vmem:[#allocation14 + $0x350] ss:$8 sps:$4 sm:$0xff]  }
 0x8d1   : > { %9589 = vmatprep.subr.bf16.mxu1 %v18902_v62  ;;  %v19052_v62 = vld [vmem:[#allocation14 + $0x364] ss:$8 sps:$4 sm:$0xff]   ;;  %10681 = vmatpush1.bf16.msra.mxu0 %v19047_v5 }
 0x8d2   : > { %10682 = vmatprep.subr.bf16.mxu0 %v19052_v62  ;;  %v19023_v5 = vld [vmem:[%s23919_s7 + $0x8d0] ss:$8 sps:$4 sm:$0xff]   ;;  %v19028_v62 = vld [vmem:[%s23919_s7 + $0x8e4] ss:$8 sps:$4 sm:$0xff]  }
 0x8d4   : > { %9590 = vmatpush1.bf16.msra.mxu1 %v18900_v43  ;;  %v18954_v43 = vld [vmem:[%s23919_s7 + $0x760] ss:$8 sps:$4 sm:$0xff]  }
 0x8d5   : > { %9591 = vmatprep.subr.bf16.mxu1 %v18905_v25  ;;  %v18959_v25 = vld [vmem:[%s23919_s7 + $0x774] ss:$8 sps:$4 sm:$0xff]  }
 0x8d8   : > { %9592 = vmatpush1.bf16.msra.mxu1 %v18903_v59  ;;  %v19050_v59 = vld [vmem:[#allocation14 + $0x360] ss:$8 sps:$4 sm:$0xff]  }
 0x8d9   : > { %9593 = vmatprep.subr.bf16.mxu1 %v18908_v29  ;;  %v18957_v29 = vld [vmem:[%s23919_s7 + $0x770] ss:$8 sps:$4 sm:$0xff]   ;;  %10683 = vmatpush1.bf16.msra.mxu0 %v19050_v59 }
 0x8da   : > { %v8960_v59 = vld [vmem:[#allocation6 + $0x20] sm:$0xe0] }
 0x8dc   : > { %9594 = vmatpush1.bf16.msra.mxu1 %v18906_v13  ;;  %v18962_v13 = vld [vmem:[%s23919_s7 + $0x784] ss:$8 sps:$4 sm:$0xff]  }
 0x8dd   : > { %9595 = vmatprep.subr.bf16.mxu1 %v18911_v45  ;;  %v18960_v45 = vld [vmem:[%s23919_s7 + $0x780] ss:$8 sps:$4 sm:$0xff]  }
 0x8e0   : > { %9596 = vmatpush1.bf16.msra.mxu1 %v18909_v53  ;;  %v18965_v53 = vld [vmem:[%s23919_s7 + $0x794] ss:$8 sps:$4 sm:$0xff]  }
 0x8e1   : > { %9597 = vmatprep.subr.bf16.mxu1 %v18914_v1  ;;  %v18963_v1 = vld [vmem:[%s23919_s7 + $0x790] ss:$8 sps:$4 sm:$0xff]  }
 0x8e4   : > { %9598 = vmatpush1.bf16.msra.mxu1 %v18912_v55  ;;  %v18968_v55 = vld [vmem:[%s23919_s7 + $0x7a4] ss:$8 sps:$4 sm:$0xff]  }
 0x8e5   : > { %9599 = vmatprep.subr.bf16.mxu1 %v18917_v46  ;;  %v18966_v46 = vld [vmem:[%s23919_s7 + $0x7a0] ss:$8 sps:$4 sm:$0xff]  }
 0x8e8   : > { %9600 = vmatpush1.bf16.msra.mxu1 %v18915_v54  ;;  %v18971_v54 = vld [vmem:[%s23919_s7 + $0x7b4] ss:$8 sps:$4 sm:$0xff]  }
 0x8e9   : > { %9601 = vmatprep.subr.bf16.mxu1 %v18920_v11  ;;  %v18969_v11 = vld [vmem:[%s23919_s7 + $0x7b0] ss:$8 sps:$4 sm:$0xff]  }
 0x8ec   : > { %9602 = vmatpush1.bf16.msra.mxu1 %v18918_v34  ;;  %v18974_v34 = vld [vmem:[%s23919_s7 + $0x7c4] ss:$8 sps:$4 sm:$0xff]  }
 0x8ed   : > { %9603 = vmatprep.subr.bf16.mxu1 %v18923_v41  ;;  %v18972_v41 = vld [vmem:[%s23919_s7 + $0x7c0] ss:$8 sps:$4 sm:$0xff]  }
 0x8f0   : > { %9604 = vmatpush1.bf16.msra.mxu1 %v18921_v48  ;;  %v18977_v48 = vld [vmem:[%s23919_s7 + $0x7d4] ss:$8 sps:$4 sm:$0xff]  }
 0x8f1   : > { %9605 = vmatprep.subr.bf16.mxu1 %v18926_v15  ;;  %v18975_v15 = vld [vmem:[%s23919_s7 + $0x7d0] ss:$8 sps:$4 sm:$0xff]  }
 0x8f4   : > { %9606 = vmatpush1.bf16.msra.mxu1 %v18924_v42  ;;  %v18980_v42 = vld [vmem:[%s23919_s7 + $0x7e4] ss:$8 sps:$4 sm:$0xff]  }
 0x8f5   : > { %9607 = vmatprep.subr.bf16.mxu1 %v18929_v18  ;;  %v18978_v18 = vld [vmem:[%s23919_s7 + $0x7e0] ss:$8 sps:$4 sm:$0xff]  }
 0x8f8   : > { %9608 = vmatpush1.bf16.msra.mxu1 %v18927_v6  ;;  %v18983_v6 = vld [vmem:[%s23919_s7 + $0x7f4] ss:$8 sps:$4 sm:$0xff]  }
 0x8f9   : > { %9609 = vmatprep.subr.bf16.mxu1 %v18932_v21  ;;  %v8964_v21 = vld [vmem:[#allocation6 + $0x40] sm:$0x1f] }
 0x8fa   : > { %v9084_v47 = vrot.slane %v8964_v21, 5  ;;  %v5635_v21 = vld [vmem:[#allocation5 + $0x64] sm:$0xf] }
 0x8fc   : > { %9610 = vmatpush1.bf16.msra.mxu1 %v18930_v14  ;;  %v18981_v14 = vld [vmem:[%s23919_s7 + $0x7f0] ss:$8 sps:$4 sm:$0xff]  }
 0x8fd   : > { %9611 = vmatprep.subr.bf16.mxu1 %v18935_v44  ;;  %v8961_v44 = vld [vmem:[#allocation6 + $0x28] sm:$0xe0] }
 0x900   : > { %9612 = vmatpush1.bf16.msra.mxu1 %v18933_v50  ;;  %v8958_v50 = vld [vmem:[#allocation6 + $0x10] sm:$0xe0] }
 0x901   : > { %9624 = vmatprep.subr.bf16.mxu1 %v18938_v4  ;;  %v9092_v4 = vrot.slane %v8961_v44, 5  ;;  %v9083_v20 = vrot.slane %v8958_v50, 5 }
 0x903   : > { %9614 = vmatmul.mubr.bf16.vlgmr.msra.gmra.mrb[88].mxu1 %v9079_v27  ;;  %v9094_v26 = vsel %vm1613_vm14, %v9092_v4, %v9093_v23  ;;  %v18992_v27 = vld [vmem:[%s23919_s7 + $0x824] ss:$8 sps:$4 sm:$0xff]   ;;  %v19066_v23 = vld [vmem:[#allocation14 + $0x3a4] ss:$8 sps:$4 sm:$0xff]  }
 0x904   : > { %9625 = vmatpush1.bf16.msra.mxu1 %v18936_v2  ;;  %9656 = vmatprep.mubr.bf16.mxu1 %v9088_v12  ;;  %v9085_v2 = vsel %vm1613_vm14, %v9083_v20, %v9084_v47  ;;  %v18990_v12 = vld [vmem:[%s23919_s7 + $0x820] ss:$8 sps:$4 sm:$0xff]   ;;  %v19061_v4 = vld [vmem:[#allocation14 + $0x390] ss:$8 sps:$4 sm:$0xff]   ;;  %v19064_v20 = vld [vmem:[#allocation14 + $0x3a0] ss:$8 sps:$4 sm:$0xff]  }
 0x905   : > { %9626 = vmatprep.subr.bf16.mxu1 %v18941_v3  ;;  %v18987_v3 = vld [vmem:[%s23919_s7 + $0x810] ss:$8 sps:$4 sm:$0xff]  }
 0x906   : > { %v19063_v47 = vld [vmem:[#allocation14 + $0x394] ss:$8 sps:$4 sm:$0xff]  }
 0x908   : > { %9627 = vmatpush1.bf16.msra.mxu1 %v18939_v36  ;;  %v18998_v36 = vld [vmem:[%s23919_s7 + $0x844] ss:$8 sps:$4 sm:$0xff]  }
 0x909   : > { %9628 = vmatprep.subr.bf16.mxu1 %v18944_v0  ;;  %v19001_v0 = vld [vmem:[%s23919_s7 + $0x854] ss:$8 sps:$4 sm:$0xff]  }
 0x90c   : > { %9629 = vmatpush1.bf16.msra.mxu1 %v18942_v37  ;;  %v19002_v37 = vld [vmem:[%s23919_s7 + $0x860] ss:$8 sps:$4 sm:$0xff]  }
 0x90d   : > { %9630 = vmatprep.subr.bf16.mxu1 %v18947_v16  ;;  %v19007_v16 = vld [vmem:[%s23919_s7 + $0x874] ss:$8 sps:$4 sm:$0xff]  }
 0x910   : > { %9631 = vmatpush1.bf16.msra.mxu1 %v18945_v58  ;;  %v19008_v58 = vld [vmem:[%s23919_s7 + $0x880] ss:$8 sps:$4 sm:$0xff]  }
 0x911   : > { %9632 = vmatprep.subr.bf16.mxu1 %v18950_v40  ;;  %v19013_v40 = vld [vmem:[%s23919_s7 + $0x894] ss:$8 sps:$4 sm:$0xff]  }
 0x914   : > { %9633 = vmatpush1.bf16.msra.mxu1 %v18948_v19  ;;  %v19014_v19 = vld [vmem:[%s23919_s7 + $0x8a0] ss:$8 sps:$4 sm:$0xff]  }
 0x915   : > { %9634 = vmatprep.subr.bf16.mxu1 %v18953_v31  ;;  %v19019_v31 = vld [vmem:[%s23919_s7 + $0x8b4] ss:$8 sps:$4 sm:$0xff]  }
 0x918   : > { %9635 = vmatpush1.bf16.msra.mxu1 %v18951_v7  ;;  %v19020_v7 = vld [vmem:[%s23919_s7 + $0x8c0] ss:$8 sps:$4 sm:$0xff]  }
 0x919   : > { %9636 = vmatprep.subr.bf16.mxu1 %v18956_v60  ;;  %v19025_v60 = vld [vmem:[%s23919_s7 + $0x8d4] ss:$8 sps:$4 sm:$0xff]  }
 0x91c   : > { %9637 = vmatpush1.bf16.msra.mxu1 %v18954_v43  ;;  %v19026_v43 = vld [vmem:[%s23919_s7 + $0x8e0] ss:$8 sps:$4 sm:$0xff]  }
 0x91d   : > { %9638 = vmatprep.subr.bf16.mxu1 %v18959_v25  ;;  %v19031_v25 = vld [vmem:[%s23919_s7 + $0x8f4] ss:$8 sps:$4 sm:$0xff]  }
 0x920   : > { %9639 = vmatpush1.bf16.msra.mxu1 %v18957_v29  ;;  %v8966_v29 = vld [vmem:[#allocation6 + $0x50] sm:$0x1f] }
 0x921   : > { %9640 = vmatprep.subr.bf16.mxu1 %v18962_v13  ;;  %v19029_v13 = vld [vmem:[%s23919_s7 + $0x8f0] ss:$8 sps:$4 sm:$0xff]  }
 0x924   : > { %9641 = vmatpush1.bf16.msra.mxu1 %v18960_v45  ;;  %v9089_v45 = vrot.slane %v8960_v59, 5 }
 0x925   : > { %9642 = vmatprep.subr.bf16.mxu1 %v18965_v53  ;;  %v9090_v53 = vrot.slane %v8966_v29, 5 }
 0x928   : > { %9643 = vmatpush1.bf16.msra.mxu1 %v18963_v1  ;;  %v9091_v1 = vsel %vm1613_vm14, %v9089_v45, %v9090_v53  ;;  %v9779_v45 = vld [vmem:[#allocation7] sm:$0x60] }
 0x929   : > { %9644 = vmatprep.subr.bf16.mxu1 %v18968_v55  ;;  %v19053_v55 = vld [vmem:[#allocation14 + $0x370] ss:$8 sps:$4 sm:$0xff]  }
 0x92c   : > { %9645 = vmatpush1.bf16.msra.mxu1 %v18966_v46  ;;  %v19055_v46 = vld [vmem:[#allocation14 + $0x374] ss:$8 sps:$4 sm:$0xff]  }
 0x92d   : > { %9646 = vmatprep.subr.bf16.mxu1 %v18971_v54  ;;  %v19964_v54 = vld [vmem:[#allocation4 + $0x60] sm:$0xf]  ;;  %10684 = vmatprep.subr.bf16.mxu0 %v19055_v46 }
 0x92e   : > { %10685 = vmatpush1.bf16.msra.mxu0 %v19053_v55 }
 0x930   : > { %9647 = vmatpush1.bf16.msra.mxu1 %v18969_v11  ;;  %v4232_v11 = vshrl.u32 %v19964_v54, 16 }
 0x931   : > { %9648 = vmatprep.subr.bf16.mxu1 %v18974_v34  ;;  %v19965_v34 = vld [vmem:[#allocation5 + $0x60] sm:$0xf] }
 0x934   : > { %9649 = vmatpush1.bf16.msra.mxu1 %v18972_v41  ;;  %v5613_v41 = vshrl.u32 %v19965_v34, 16 }
 0x935   : > { %9650 = vmatprep.subr.bf16.mxu1 %v18977_v48  ;;  %v4234_v48 = vrot.slane %v4232_v11, 4 }
 0x938   : > { %9651 = vmatpush1.bf16.msra.mxu1 %v18975_v15  ;;  %v5615_v15 = vrot.slane %v5613_v41, 4 }
 0x939   : > { %9652 = vmatprep.subr.bf16.mxu1 %v18980_v42  ;;  %v4235_v42 = vor.u32 %v4234_v48, %v21640_v32  ;;  %v19058_v32 = vld [vmem:[#allocation14 + $0x380] ss:$8 sps:$4 sm:$0xff]  }
 0x93c   : > { %9653 = vmatpush1.bf16.msra.mxu1 %v18978_v18  ;;  %v5616_v18 = vor.u32 %v5615_v15, %v22014_v35  ;;  %v19060_v35 = vld [vmem:[#allocation14 + $0x384] ss:$8 sps:$4 sm:$0xff]   ;;  %v9800_v15 = vld [vmem:[#allocation7 + $0x38] sm:$0x3] }
 0x93d   : > { %9654 = vmatprep.subr.bf16.mxu1 %v18983_v6  ;;  %v4256_v6 = vld [vmem:[#allocation4 + $0x64] sm:$0xf]  ;;  %10686 = vmatprep.subr.bf16.mxu0 %v19060_v35 }
 0x93e   : > { %v5617_v44 = vrot.slane %v5616_v18, 4  ;;  %10687 = vmatpush1.bf16.msra.mxu0 %v19058_v32 }
 0x93f   : > { %10688 = vmatprep.subr.bf16.mxu0 %v19063_v47 }
 0x940   : > { %9655 = vmatpush1.bf16.msra.mxu1 %v18981_v14  ;;  %v4236_v14 = vrot.slane %v4235_v42, 4 }
 0x941   : > { %9667 = vmatprep.subr.bf16.mxu1 %v18986_v22  ;;  %v5636_v22 = vsel %vm23423_vm0, %v5617_v44, %v5635_v21 }
 0x942   : > { %v4257_v50 = vsel %vm23423_vm0, %v4236_v14, %v4256_v6  ;;  %5637 = vst [vmem:[#allocation5 + $0x64] sm:$0xf] %v5636_v22  ;;  %10689 = vmatpush1.bf16.msra.mxu0 %v19061_v4  ;;  %v9797_v6 = vld [vmem:[#allocation7 + $0x30] sm:$0x3] }
 0x943   : > { %9657 = vmatmul.mubr.bf16.vlgmr.msra.gmra.mrb[88].mxu1 %v9085_v2  ;;  %4258 = vst [vmem:[#allocation4 + $0x64] sm:$0xf] %v4257_v50  ;;  %10690 = vmatprep.subr.bf16.mxu0 %v19066_v23  ;;  %v19072_v2 = vld [vmem:[#allocation14 + $0x3c4] ss:$8 sps:$4 sm:$0xff]  }
 0x944   : > { %9668 = vmatpush1.bf16.msra.mxu1 %v18984_v49  ;;  %9699 = vmatprep.mubr.bf16.mxu1 %v9094_v26  ;;  %v19069_v49 = vld [vmem:[#allocation14 + $0x3b4] ss:$8 sps:$4 sm:$0xff]   ;;  %v19070_v26 = vld [vmem:[#allocation14 + $0x3c0] ss:$8 sps:$4 sm:$0xff]  }
 0x945   : > { %9669 = vmatprep.subr.bf16.mxu1 %v18989_v9  ;;  %v19067_v9 = vld [vmem:[#allocation14 + $0x3b0] ss:$8 sps:$4 sm:$0xff]  }
 0x946   : > { %10691 = vmatpush1.bf16.msra.mxu0 %v19064_v20 }
 0x947   : > { %10692 = vmatprep.subr.bf16.mxu0 %v19069_v49 }
 0x948   : > { %9670 = vmatpush1.bf16.msra.mxu1 %v18987_v3  ;;  %v19075_v3 = vld [vmem:[#allocation14 + $0x3d4] ss:$8 sps:$4 sm:$0xff]  }
 0x949   : > { %9671 = vmatprep.subr.bf16.mxu1 %v18992_v27  ;;  %v19073_v27 = vld [vmem:[#allocation14 + $0x3d0] ss:$8 sps:$4 sm:$0xff]  }
 0x94a   : > { %10693 = vmatpush1.bf16.msra.mxu0 %v19067_v9 }
 0x94b   : > { %10694 = vmatprep.subr.bf16.mxu0 %v19072_v2 }
 0x94c   : > { %9672 = vmatpush1.bf16.msra.mxu1 %v18990_v12  ;;  %v19078_v12 = vld [vmem:[#allocation14 + $0x3e4] ss:$8 sps:$4 sm:$0xff]  }
 0x94d   : > { %9673 = vmatprep.subr.bf16.mxu1 %v18995_v33  ;;  %v19076_v33 = vld [vmem:[#allocation14 + $0x3e0] ss:$8 sps:$4 sm:$0xff]  }
 0x94e   : > { %10695 = vmatpush1.bf16.msra.mxu0 %v19070_v26 }
 0x94f   : > { %10696 = vmatprep.subr.bf16.mxu0 %v19075_v3 }
 0x950   : > { %9674 = vmatpush1.bf16.msra.mxu1 %v18993_v10  ;;  %v19081_v10 = vld [vmem:[#allocation14 + $0x3f4] ss:$8 sps:$4 sm:$0xff]  }
 0x951   : > { %9675 = vmatprep.subr.bf16.mxu1 %v18998_v36  ;;  %v19079_v36 = vld [vmem:[#allocation14 + $0x3f0] ss:$8 sps:$4 sm:$0xff]  }
 0x952   : > { %10697 = vmatpush1.bf16.msra.mxu0 %v19073_v27 }
 0x953   : > { %10698 = vmatprep.subr.bf16.mxu0 %v19078_v12 }
 0x954   : > { %9676 = vmatpush1.bf16.msra.mxu1 %v18996_v57  ;;  %v19086_v57 = vld [vmem:[#allocation14 + $0x404] ss:$8 sps:$4 sm:$0xff]  }
 0x955   : > { %9677 = vmatprep.subr.bf16.mxu1 %v19001_v0 }
 0x956   : > { %10699 = vmatpush1.bf16.msra.mxu0 %v19076_v33 }
 0x957   : > { %10700 = vmatprep.subr.bf16.mxu0 %v19081_v10 }
 0x958   : > { %9678 = vmatpush1.bf16.msra.mxu1 %v18999_v52 }
 0x959   : > { %9679 = vmatprep.subr.bf16.mxu1 %v19004_v56 }
 0x95a   : > { %10701 = vmatpush1.bf16.msra.mxu0 %v19079_v36 }
 0x95b   : > { %10713 = vmatprep.subr.bf16.mxu0 %v19086_v57 }
 0x95c   : > { %9680 = vmatpush1.bf16.msra.mxu1 %v19002_v37 }
 0x95d   : > { %9681 = vmatprep.subr.bf16.mxu1 %v19007_v16 }
 0x960   : > { %9682 = vmatpush1.bf16.msra.mxu1 %v19005_v63 }
 0x961   : > { %9683 = vmatprep.subr.bf16.mxu1 %v19010_v30 }
 0x964   : > { %9684 = vmatpush1.bf16.msra.mxu1 %v19008_v58 }
 0x965   : > { %9685 = vmatprep.subr.bf16.mxu1 %v19013_v40 }
 0x968   : > { %9686 = vmatpush1.bf16.msra.mxu1 %v19011_v38 }
 0x969   : > { %9687 = vmatprep.subr.bf16.mxu1 %v19016_v51 }
 0x96c   : > { %9688 = vmatpush1.bf16.msra.mxu1 %v19014_v19  ;;  %v9734_v19 = vld [vmem:[#allocation2 + $0x8] sm:$0xff] }
 0x96d   : > { %9689 = vmatprep.subr.bf16.mxu1 %v19019_v31 }
 0x970   : > { %9690 = vmatpush1.bf16.msra.mxu1 %v19017_v61 }
 0x971   : > { %9691 = vmatprep.subr.bf16.mxu1 %v19022_v39 }
 0x974   : > { %9692 = vmatpush1.bf16.msra.mxu1 %v19020_v7 }
 0x975   : > { %9693 = vmatprep.subr.bf16.mxu1 %v19025_v60 }
 0x978   : > { %9694 = vmatpush1.bf16.msra.mxu1 %v19023_v5  ;;  %v9764_v5 = vld [vmem:[#allocation7 + $0x8] sm:$0x18] }
 0x979   : > { %9695 = vmatprep.subr.bf16.mxu1 %v19028_v62 }
 0x97c   : > { %9696 = vmatpush1.bf16.msra.mxu1 %v19026_v43  ;;  %v9782_v43 = vld [vmem:[#allocation7 + $0x8] sm:$0x60] }
 0x97d   : > { %9697 = vmatprep.subr.bf16.mxu1 %v19031_v25 }
 0x980   : > { %9698 = vmatpush1.bf16.msra.mxu1 %v19029_v13  ;;  %v9761_v13 = vld [vmem:[#allocation7] sm:$0x18] }
 0x983   : > { %9700 = vmatmul.mubr.bf16.vlgmr.msra.gmra.mrb[88].mxu1 %v9091_v1 }
 0xa56   : > { %v9701_v0 = vpop.f32.mrb[88].mxu1 }
 0xa57   : > { %v9714_v52 = vmax.f32 %v9701_v0, 0.0  ;;  %v9703_v56 = vpop.f32.mrb[89].mxu1 }
 0xa58   : > { %v9715_v37 = vmax.f32 %v9703_v56, 0.0  ;;  %v9705_v16 = vpop.f32.mrb[90].mxu1 }
 0xa59   : > { %v9716_v30 = vmax.f32 %v9705_v16, 0.0  ;;  %v9707_v58 = vpop.f32.mrb[91].mxu1 }
 0xa5a   : > { %v16901_v40 = vpack.c.bf16 %v9715_v37, %v9714_v52  ;;  %v9717_v38 = vmax.f32 %v9707_v58, 0.0 }
 0xa5c   : > { %9730 = vst [vmem:[#allocation2] sm:$0xff] %v16901_v40  ;;  %v16902_v51 = vpack.c.bf16 %v9717_v38, %v9716_v30 }
 0xa5e   : > { %v9735_v31 = vsel %vm23946_vm5, %v16902_v51, %v9734_v19  ;;  %vm9795_vm5 = vcmask 1041408  }
 0xa5f   : > { %9736 = vst [vmem:[#allocation2 + $0x8] sm:$0xff] %v9735_v31  ;;  %vm9796_vm8 = vmand %vm9795_vm5, %vm24092_vm4 }
 0xa63   : > { %v9749_v61 = vld [vmem:[#allocation2] sm:$0x33]  ;;  %v9767_v39 = vld [vmem:[#allocation2] sm:$0xcc] }
 0xa64   : > { %v16213_v7 = vcombine.high %v9749_v61, %v9749_v61  ;;  %v16215_v62 = vcombine.high %v9767_v39, %v9767_v39  ;;  %v16212_v25 = vcombine.low %v9749_v61, %v9749_v61  ;;  %v16214_v59 = vcombine.low %v9767_v39, %v9767_v39 }
 0xa66   : > { %v9785_v53 = vld [vmem:[#allocation2 + $0x8] sm:$0x66]  ;;  %v9756_v1 = vrot.slane %v16213_v7, 5  ;;  %v9774_v55 = vrot.slane %v16215_v62, 5  ;;  %v9755_v46 = vrot.slane %v16212_v25, 5  ;;  %v9773_v54 = vrot.slane %v16214_v59, 5 }
 0xa67   : > { %v16216_v11 = vcombine.low %v9785_v53, %v9785_v53  ;;  %v16217_v34 = vcombine.high %v9785_v53, %v9785_v53  ;;  %v19084_v59 = vld [vmem:[#allocation14 + $0x400] ss:$8 sps:$4 sm:$0xff]  }
 0xa68   : > { %v9765_v41 = vsel %vm23446_vm12, %v9756_v1, %v9764_v5  ;;  %v9783_v48 = vsel %vm23451_vm11, %v9774_v55, %v9782_v43  ;;  %v9762_v42 = vsel %vm23446_vm12, %v9755_v46, %v9761_v13  ;;  %v9780_v18 = vsel %vm23451_vm11, %v9773_v54, %v9779_v45  ;;  %v19091_v46 = vld [vmem:[#allocation14 + $0x414] ss:$8 sps:$4 sm:$0xff]  }
 0xa69   : > { %v9791_v21 = vrot.slane %v16216_v11, 1  ;;  %9766 = vst [vmem:[#allocation7 + $0x8] sm:$0x18] %v9765_v41  ;;  %9784 = vst [vmem:[#allocation7 + $0x8] sm:$0x60] %v9783_v48  ;;  %v9792_v14 = vrot.slane %v16217_v34, 1 }
 0xa6a   : > { %9763 = vst [vmem:[#allocation7] sm:$0x18] %v9762_v42  ;;  %9781 = vst [vmem:[#allocation7] sm:$0x60] %v9780_v18  ;;  %v19966_v18 = vld [vmem:[#allocation7 + $0x50] sm:$0xff] }
 0xa6b   : > { %v9801_v44 = vsel %vm9796_vm8, %v9792_v14, %v9800_v15  ;;  %v9798_v50 = vsel %vm9796_vm8, %v9791_v21, %v9797_v6 }
 0xa6c   : > { %9802 = vst [vmem:[#allocation7 + $0x38] sm:$0x3] %v9801_v44  ;;  %9799 = vst [vmem:[#allocation7 + $0x30] sm:$0x3] %v9798_v50  ;;  %v19089_v44 = vld [vmem:[#allocation14 + $0x410] ss:$8 sps:$4 sm:$0xff]  }
 0xa70   : > { %v9974_v22 = vld [vmem:[#allocation7 + $0x8] sm:$0xfc] }
 0xa71   : > { %v9973_v32 = vld [vmem:[#allocation7] sm:$0xfc]  ;;  %v23464_v35 = vld [vmem:[#allocation7 + $0x8] sm:$0xff]  ;;  %v10100_v47 = vshrl.u32 %v9974_v22, 16  ;;  %v10103_v4 = vshll.u32 %v9974_v22, 16 }
 0xa72   : > { %v10083_v23 = vshrl.u32 %v9973_v32, 16  ;;  %v10086_v20 = vshll.u32 %v9973_v32, 16  ;;  %v23466_v49 = vld [vmem:[#allocation7] sm:$0xff]  ;;  %v9820_v9 = vshrl.u32 %v23464_v35, 16  ;;  %v9822_v2 = vshll.u32 %v23464_v35, 16 }
 0xa73   : > { %v9808_v26 = vshrl.u32 %v23466_v49, 16  ;;  %v9980_v3 = vld [vmem:[#allocation7 + $0x38] sm:$0x3]  ;;  %v10102_v27 = vrot.slane %v10100_v47, 2  ;;  %v10105_v12 = vrot.slane %v10103_v4, 3  ;;  %v9810_v52 = vshll.u32 %v23466_v49, 16 }
 0xa74   : > { %v9979_v33 = vld [vmem:[#allocation7 + $0x30] sm:$0x3]  ;;  %v10108_v10 = vshrl.u32 %v9980_v3, 16  ;;  %v10111_v36 = vshll.u32 %v9980_v3, 16  ;;  %v10085_v57 = vrot.slane %v10083_v23, 2  ;;  %v9806_v0 = vld [vmem:[#allocation7 + $0x38] sm:$0xff] }
 0xa75   : > { %v10088_v56 = vrot.slane %v10086_v20, 3  ;;  %v10091_v37 = vshrl.u32 %v9979_v33, 16  ;;  %v10094_v16 = vshll.u32 %v9979_v33, 16  ;;  %v9824_v30 = vrot.slane %v9822_v2, 1  ;;  %v9805_v58 = vld [vmem:[#allocation7 + $0x30] sm:$0xff] }
 0xa76   : > { %v10106_v40 = vor.u32 %v10105_v12, %v10102_v27  ;;  %v10110_v38 = vrot.slane %v10108_v10, 2  ;;  %v10113_v51 = vrot.slane %v10111_v36, 3  ;;  %v9827_v19 = vshll.u32 %v9806_v0, 16  ;;  %v9850_v31 = vld [vmem:[#allocation7 + $0x8] sm:$0xfe] }
 0xa77   : > { %v10093_v61 = vrot.slane %v10091_v37, 2  ;;  %v10096_v39 = vrot.slane %v10094_v16, 3  ;;  %v9825_v7 = vor.u32 %v9824_v30, %v9820_v9  ;;  %v9834_v60 = vshrl.u32 %v9806_v0, 16  ;;  %v9849_v1 = vld [vmem:[#allocation7] sm:$0xfe] }
 0xa78   : > { %v10114_v5 = vor.u32 %v10113_v51, %v10110_v38  ;;  %v9829_v62 = vrot.slane %v9827_v19, 1  ;;  %v9812_v43 = vrot.slane %v9810_v52, 1  ;;  %v9815_v25 = vshll.u32 %v9805_v58, 16  ;;  %v19094_v32 = vld [vmem:[#allocation14 + $0x424] ss:$8 sps:$4 sm:$0xff]  }
 0xa79   : > { %v10089_v29 = vor.u32 %v10088_v56, %v10085_v57  ;;  %v10097_v13 = vor.u32 %v10096_v39, %v10093_v61  ;;  %v9860_v45 = vrot.slane %v9850_v31, 1  ;;  %v9861_v53 = vrot.slane %v9806_v0, 1  ;;  %v19092_v23 = vld [vmem:[#allocation14 + $0x420] ss:$8 sps:$4 sm:$0xff]   ;;  %v19097_v20 = vld [vmem:[#allocation14 + $0x434] ss:$8 sps:$4 sm:$0xff]  }
 0xa7a   : > { %v10115_v55 = vsel %vm7629_vm6, %v10106_v40, %v10114_v5  ;;  %v23474_v54 = vsel %vm7350_vm9, %v9825_v7, %v9829_v62  ;;  %v9836_v11 = vor.u32 %v9834_v60, %v9829_v62  ;;  %v9813_v34 = vor.u32 %v9812_v43, %v9808_v26  ;;  %v19095_v27 = vld [vmem:[#allocation14 + $0x430] ss:$8 sps:$4 sm:$0xff]   ;;  %v19098_v37 = vld [vmem:[#allocation14 + $0x440] ss:$8 sps:$4 sm:$0xff]   ;;  %v19103_v16 = vld [vmem:[#allocation14 + $0x454] ss:$8 sps:$4 sm:$0xff]  }
 0xa7b   : > { %10702 = vmatprep.mubr.bf16.mxu0 %v10115_v55  ;;  %v10098_v41 = vsel %vm7629_vm6, %v10089_v29, %v10097_v13  ;;  %9842 = vst [vmem:[#allocation7 + $0x18] sm:$0xff] %v23474_v54  ;;  %v9817_v48 = vrot.slane %v9815_v25, 1  ;;  %v9831_v15 = vshrl.u32 %v9805_v58, 16  ;;  %v23479_v42 = vsel %vm7403_vm2, %v9860_v45, %v9861_v53  ;;  %9870 = vst [vmem:[#allocation7 + $0x58] sm:$0x7f] %v9861_v53 }
 0xa7c   : > { %10703 = vmatmul.mubr.bf16.vlgmr.msra.gmra.mrb[184].mxu0 %v10098_v41  ;;  %v9847_v6 = vsel %vm22612_vm3, %v9836_v11, %v19966_v18  ;;  %9868 = vst [vmem:[#allocation7 + $0x28] sm:$0xff] %v23479_v42  ;;  %v9857_v21 = vrot.slane %v9849_v1, 1  ;;  %v9858_v14 = vrot.slane %v9805_v58, 1  ;;  %v19101_v58 = vld [vmem:[#allocation14 + $0x450] ss:$8 sps:$4 sm:$0xff]  }
 0xa7d   : > { %10714 = vmatpush1.bf16.msra.mxu0 %v19084_v59  ;;  %9848 = vst [vmem:[#allocation7 + $0x48] sm:$0xff] %v9847_v6  ;;  %v23485_v50 = vsel %vm7350_vm9, %v9813_v34, %v9817_v48  ;;  %v9833_v22 = vor.u32 %v9831_v15, %v9817_v48  ;;  %v19106_v40 = vld [vmem:[#allocation14 + $0x464] ss:$8 sps:$4 sm:$0xff]   ;;  %v19104_v38 = vld [vmem:[#allocation14 + $0x460] ss:$8 sps:$4 sm:$0xff]  }
 0xa7e   : > { %10715 = vmatprep.subr.bf16.mxu0 %v19091_v46  ;;  %9841 = vst [vmem:[#allocation7 + $0x10] sm:$0xff] %v23485_v50  ;;  %v23489_v47 = vsel %vm7403_vm2, %v9857_v21, %v9858_v14  ;;  %9869 = vst [vmem:[#allocation7 + $0x50] sm:$0x7f] %v9858_v14  ;;  %v19109_v51 = vld [vmem:[#allocation14 + $0x474] ss:$8 sps:$4 sm:$0xff]  }
 0xa7f   : > { %v9844_v4 = vsel %vm22612_vm3, %v9833_v22, %v19966_v18  ;;  %9867 = vst [vmem:[#allocation7 + $0x20] sm:$0xff] %v23489_v47  ;;  %v19107_v19 = vld [vmem:[#allocation14 + $0x470] ss:$8 sps:$4 sm:$0xff]   ;;  %v19112_v31 = vld [vmem:[#allocation14 + $0x484] ss:$8 sps:$4 sm:$0xff]  }
 0xa80   : > { %9845 = vst [vmem:[#allocation7 + $0x40] sm:$0xff] %v9844_v4  ;;  %v19110_v61 = vld [vmem:[#allocation14 + $0x480] ss:$8 sps:$4 sm:$0xff]   ;;  %v19115_v39 = vld [vmem:[#allocation14 + $0x494] ss:$8 sps:$4 sm:$0xff]  }
 0xa81   : > { %10716 = vmatpush1.bf16.msra.mxu0 %v19089_v44  ;;  %v19113_v7 = vld [vmem:[#allocation14 + $0x490] ss:$8 sps:$4 sm:$0xff]   ;;  %v19118_v60 = vld [vmem:[#allocation14 + $0x4a4] ss:$8 sps:$4 sm:$0xff]   ;;  %v19116_v5 = vld [vmem:[#allocation14 + $0x4a0] ss:$8 sps:$4 sm:$0xff]  }
 0xa82   : > { %10717 = vmatprep.subr.bf16.mxu0 %v19094_v32  ;;  %v9976_v9 = vld [vmem:[#allocation7 + $0x18] sm:$0xfc]  ;;  %v19124_v25 = vld [vmem:[#allocation14 + $0x4c4] ss:$8 sps:$4 sm:$0xff]   ;;  %v19122_v59 = vld [vmem:[#allocation14 + $0x4c0] ss:$8 sps:$4 sm:$0xff]  }
 0xa83   : > { %v10134_v2 = vshrl.u32 %v9976_v9, 16  ;;  %v10137_v26 = vshll.u32 %v9976_v9, 16  ;;  %v19121_v62 = vld [vmem:[#allocation14 + $0x4b4] ss:$8 sps:$4 sm:$0xff]   ;;  %v19119_v43 = vld [vmem:[#allocation14 + $0x4b0] ss:$8 sps:$4 sm:$0xff]  }
 0xa84   : > { %v9982_v3 = vld [vmem:[#allocation7 + $0x48] sm:$0x3]  ;;  %v19127_v29 = vld [vmem:[#allocation14 + $0x4d4] ss:$8 sps:$4 sm:$0xff]   ;;  %v19125_v45 = vld [vmem:[#allocation14 + $0x4d0] ss:$8 sps:$4 sm:$0xff]  }
 0xa85   : > { %10718 = vmatpush1.bf16.msra.mxu0 %v19092_v23  ;;  %v10136_v12 = vrot.slane %v10134_v2, 2  ;;  %v10139_v33 = vrot.slane %v10137_v26, 3  ;;  %v10142_v10 = vshrl.u32 %v9982_v3, 16  ;;  %v10145_v36 = vshll.u32 %v9982_v3, 16  ;;  %v9978_v53 = vld [vmem:[#allocation7 + $0x28] sm:$0xfc] }
 0xa86   : > { %10719 = vmatprep.subr.bf16.mxu0 %v19097_v20  ;;  %v9984_v1 = vld [vmem:[#allocation7 + $0x58] sm:$0x3]  ;;  %v19130_v55 = vld [vmem:[#allocation14 + $0x4e4] ss:$8 sps:$4 sm:$0xff]   ;;  %v10168_v41 = vshrl.u32 %v9978_v53, 16  ;;  %v10171_v48 = vshll.u32 %v9978_v53, 16 }
 0xa87   : > { %v10144_v57 = vrot.slane %v10142_v10, 2  ;;  %v10147_v0 = vrot.slane %v10145_v36, 3  ;;  %v10140_v52 = vor.u32 %v10139_v33, %v10136_v12  ;;  %v9981_v13 = vld [vmem:[#allocation7 + $0x40] sm:$0x3]  ;;  %v9975_v46 = vld [vmem:[#allocation7 + $0x10] sm:$0xfc] }
 0xa88   : > { %v10125_v11 = vshrl.u32 %v9981_v13, 16  ;;  %v10128_v34 = vshll.u32 %v9981_v13, 16  ;;  %v10176_v15 = vshrl.u32 %v9984_v1, 16  ;;  %v10179_v18 = vshll.u32 %v9984_v1, 16  ;;  %v19128_v6 = vld [vmem:[#allocation14 + $0x4e0] ss:$8 sps:$4 sm:$0xff]  }
 0xa89   : > { %10720 = vmatpush1.bf16.msra.mxu0 %v19095_v27  ;;  %v10148_v56 = vor.u32 %v10147_v0, %v10144_v57  ;;  %v10117_v21 = vshrl.u32 %v9975_v46, 16  ;;  %v10120_v14 = vshll.u32 %v9975_v46, 16  ;;  %v19133_v44 = vld [vmem:[#allocation14 + $0x4f4] ss:$8 sps:$4 sm:$0xff]   ;;  %v10170_v4 = vrot.slane %v10168_v41, 2 }
 0xa8a   : > { %10721 = vmatprep.subr.bf16.mxu0 %v19100_v17  ;;  %v10127_v22 = vrot.slane %v10125_v11, 2  ;;  %v10130_v32 = vrot.slane %v10128_v34, 3  ;;  %v10173_v23 = vrot.slane %v10171_v48, 3  ;;  %v10178_v20 = vrot.slane %v10176_v15, 2  ;;  %v19131_v2 = vld [vmem:[#allocation14 + $0x4f0] ss:$8 sps:$4 sm:$0xff]  }
 0xa8b   : > { %v10149_v30 = vsel %vm7629_vm6, %v10140_v52, %v10148_v56  ;;  %v10181_v9 = vrot.slane %v10179_v18, 3  ;;  %v10119_v26 = vrot.slane %v10117_v21, 2  ;;  %v10122_v3 = vrot.slane %v10120_v14, 3  ;;  %v19136_v27 = vld [vmem:[#allocation14 + $0x504] ss:$8 sps:$4 sm:$0xff]  }
 0xa8c   : > { %10745 = vmatprep.mubr.bf16.mxu0 %v10149_v30  ;;  %v10131_v12 = vor.u32 %v10130_v32, %v10127_v22  ;;  %v10174_v33 = vor.u32 %v10173_v23, %v10170_v4  ;;  %v19134_v17 = vld [vmem:[#allocation14 + $0x500] ss:$8 sps:$4 sm:$0xff]   ;;  %v19139_v57 = vld [vmem:[#allocation14 + $0x514] ss:$8 sps:$4 sm:$0xff]   ;;  %v19137_v56 = vld [vmem:[#allocation14 + $0x510] ss:$8 sps:$4 sm:$0xff]  }
 0xa8d   : > { %10722 = vmatpush1.bf16.msra.mxu0 %v19098_v37  ;;  %v10182_v10 = vor.u32 %v10181_v9, %v10178_v20  ;;  %v10123_v36 = vor.u32 %v10122_v3, %v10119_v26  ;;  %v19142_v37 = vld [vmem:[#allocation14 + $0x524] ss:$8 sps:$4 sm:$0xff]   ;;  %v19145_v30 = vld [vmem:[#allocation14 + $0x534] ss:$8 sps:$4 sm:$0xff]   ;;  %v19167_v13 = vld [vmem:[#allocation14 + $0x5b0] ss:$8 sps:$4 sm:$0xff]  }
 0xa8e   : > { %10723 = vmatprep.subr.bf16.mxu0 %v19103_v16  ;;  %v19140_v16 = vld [vmem:[#allocation14 + $0x520] ss:$8 sps:$4 sm:$0xff]   ;;  %v19175_v1 = vld [vmem:[#allocation14 + $0x5d4] ss:$8 sps:$4 sm:$0xff]   ;;  %v19173_v11 = vld [vmem:[#allocation14 + $0x5d0] ss:$8 sps:$4 sm:$0xff]  }
 0xa8f   : > { %v10132_v0 = vsel %vm7629_vm6, %v10123_v36, %v10131_v12  ;;  %v10183_v52 = vsel %vm7629_vm6, %v10174_v33, %v10182_v10  ;;  %v19170_v53 = vld [vmem:[#allocation14 + $0x5c0] ss:$8 sps:$4 sm:$0xff]   ;;  %v19178_v34 = vld [vmem:[#allocation14 + $0x5e4] ss:$8 sps:$4 sm:$0xff]   ;;  %v19181_v21 = vld [vmem:[#allocation14 + $0x5f4] ss:$8 sps:$4 sm:$0xff]  }
 0xa90   : > { %v9983_v46 = vld [vmem:[#allocation7 + $0x50] sm:$0x3]  ;;  %v19179_v4 = vld [vmem:[#allocation14 + $0x5f0] ss:$8 sps:$4 sm:$0xff]   ;;  %v19184_v23 = vld [vmem:[#allocation14 + $0x4] ss:$8 sps:$4 sm:$0xff]  }
 0xa91   : > { %10724 = vmatpush1.bf16.msra.mxu0 %v19101_v58  ;;  %v19143_v58 = vld [vmem:[#allocation14 + $0x530] ss:$8 sps:$4 sm:$0xff]   ;;  %v10159_v15 = vshrl.u32 %v9983_v46, 16  ;;  %v10162_v18 = vshll.u32 %v9983_v46, 16  ;;  %v19187_v26 = vld [vmem:[#allocation14 + $0x14] ss:$8 sps:$4 sm:$0xff]  }
 0xa92   : > { %10725 = vmatprep.subr.bf16.mxu0 %v19106_v40  ;;  %v19148_v40 = vld [vmem:[#allocation14 + $0x544] ss:$8 sps:$4 sm:$0xff]   ;;  %v19188_v33 = vld [vmem:[#allocation14 + $0x20] ss:$8 sps:$4 sm:$0xff]   ;;  %v19193_v10 = vld [vmem:[#allocation14 + $0x34] ss:$8 sps:$4 sm:$0xff]  }
 0xa93   : > { %v10161_v22 = vrot.slane %v10159_v15, 2  ;;  %v10164_v32 = vrot.slane %v10162_v18, 3  ;;  %v19190_v12 = vld [vmem:[#allocation14 + $0x24] ss:$8 sps:$4 sm:$0xff]   ;;  %v19191_v36 = vld [vmem:[#allocation14 + $0x30] ss:$8 sps:$4 sm:$0xff]  }
 0xa94   : > { %v19241_v46 = vld [vmem:[#allocation14 + $0x134] ss:$8 sps:$4 sm:$0xff]   ;;  %v19250_v15 = vld [vmem:[#allocation14 + $0x164] ss:$8 sps:$4 sm:$0xff]  }
 0xa95   : > { %10726 = vmatpush1.bf16.msra.mxu0 %v19104_v38  ;;  %v19146_v38 = vld [vmem:[#allocation14 + $0x540] ss:$8 sps:$4 sm:$0xff]   ;;  %v10165_v9 = vor.u32 %v10164_v32, %v10161_v22  ;;  %v19253_v18 = vld [vmem:[#allocation14 + $0x174] ss:$8 sps:$4 sm:$0xff]   ;;  %v19257_v22 = vld [vmem:[#allocation14 + $0x190] ss:$8 sps:$4 sm:$0xff]  }
 0xa96   : > { %10727 = vmatprep.subr.bf16.mxu0 %v19109_v51  ;;  %v19151_v51 = vld [vmem:[#allocation14 + $0x554] ss:$8 sps:$4 sm:$0xff]   ;;  %v19262_v32 = vld [vmem:[#allocation14 + $0x1a4] ss:$8 sps:$4 sm:$0xff]  }
 0xa99   : > { %10728 = vmatpush1.bf16.msra.mxu0 %v19107_v19  ;;  %v19149_v19 = vld [vmem:[#allocation14 + $0x550] ss:$8 sps:$4 sm:$0xff]  }
 0xa9a   : > { %10729 = vmatprep.subr.bf16.mxu0 %v19112_v31  ;;  %v19154_v31 = vld [vmem:[#allocation14 + $0x564] ss:$8 sps:$4 sm:$0xff]  }
 0xa9d   : > { %10730 = vmatpush1.bf16.msra.mxu0 %v19110_v61  ;;  %v19152_v61 = vld [vmem:[#allocation14 + $0x560] ss:$8 sps:$4 sm:$0xff]  }
 0xa9e   : > { %10731 = vmatprep.subr.bf16.mxu0 %v19115_v39  ;;  %v19157_v39 = vld [vmem:[#allocation14 + $0x574] ss:$8 sps:$4 sm:$0xff]  }
 0xaa1   : > { %10732 = vmatpush1.bf16.msra.mxu0 %v19113_v7  ;;  %v19155_v7 = vld [vmem:[#allocation14 + $0x570] ss:$8 sps:$4 sm:$0xff]  }
 0xaa2   : > { %10733 = vmatprep.subr.bf16.mxu0 %v19118_v60  ;;  %v19160_v60 = vld [vmem:[#allocation14 + $0x584] ss:$8 sps:$4 sm:$0xff]  }
 0xaa5   : > { %10734 = vmatpush1.bf16.msra.mxu0 %v19116_v5  ;;  %v19158_v5 = vld [vmem:[#allocation14 + $0x580] ss:$8 sps:$4 sm:$0xff]  }
 0xaa6   : > { %10735 = vmatprep.subr.bf16.mxu0 %v19121_v62  ;;  %v19163_v62 = vld [vmem:[#allocation14 + $0x594] ss:$8 sps:$4 sm:$0xff]  }
 0xaa9   : > { %10736 = vmatpush1.bf16.msra.mxu0 %v19119_v43  ;;  %v19161_v43 = vld [vmem:[#allocation14 + $0x590] ss:$8 sps:$4 sm:$0xff]  }
 0xaaa   : > { %10737 = vmatprep.subr.bf16.mxu0 %v19124_v25  ;;  %v19166_v25 = vld [vmem:[#allocation14 + $0x5a4] ss:$8 sps:$4 sm:$0xff]  }
 0xaad   : > { %10738 = vmatpush1.bf16.msra.mxu0 %v19122_v59  ;;  %v19164_v59 = vld [vmem:[#allocation14 + $0x5a0] ss:$8 sps:$4 sm:$0xff]  }
 0xaae   : > { %10739 = vmatprep.subr.bf16.mxu0 %v19127_v29  ;;  %v19169_v29 = vld [vmem:[#allocation14 + $0x5b4] ss:$8 sps:$4 sm:$0xff]  }
 0xab1   : > { %10740 = vmatpush1.bf16.msra.mxu0 %v19125_v45  ;;  %v19172_v45 = vld [vmem:[#allocation14 + $0x5c4] ss:$8 sps:$4 sm:$0xff]  }
 0xab2   : > { %10741 = vmatprep.subr.bf16.mxu0 %v19130_v55  ;;  %v9977_v55 = vld [vmem:[#allocation7 + $0x20] sm:$0xfc] }
 0xab3   : > { %v10151_v41 = vshrl.u32 %v9977_v55, 16  ;;  %v10154_v48 = vshll.u32 %v9977_v55, 16  ;;  %v19236_v55 = vld [vmem:[#allocation14 + $0x120] ss:$8 sps:$4 sm:$0xff]  }
 0xab5   : > { %10742 = vmatpush1.bf16.msra.mxu0 %v19128_v6  ;;  %v19176_v6 = vld [vmem:[#allocation14 + $0x5e0] ss:$8 sps:$4 sm:$0xff]   ;;  %v10153_v14 = vrot.slane %v10151_v41, 2 }
 0xab6   : > { %10743 = vmatprep.subr.bf16.mxu0 %v19133_v44  ;;  %v10156_v44 = vrot.slane %v10154_v48, 3  ;;  %v19242_v41 = vld [vmem:[#allocation14 + $0x140] ss:$8 sps:$4 sm:$0xff]   ;;  %v19247_v48 = vld [vmem:[#allocation14 + $0x154] ss:$8 sps:$4 sm:$0xff]  }
 0xab8   : > { %v10157_v20 = vor.u32 %v10156_v44, %v10153_v14  ;;  %v19254_v14 = vld [vmem:[#allocation14 + $0x180] ss:$8 sps:$4 sm:$0xff]   ;;  %v19259_v44 = vld [vmem:[#allocation14 + $0x194] ss:$8 sps:$4 sm:$0xff]  }
 0xab9   : > { %10744 = vmatpush1.bf16.msra.mxu0 %v19131_v2  ;;  %v19182_v2 = vld [vmem:[#allocation14] ss:$8 sps:$4 sm:$0xff]  }
 0xaba   : > { %10756 = vmatprep.subr.bf16.mxu0 %v19136_v27  ;;  %v10166_v3 = vsel %vm7629_vm6, %v10157_v20, %v10165_v9  ;;  %v19185_v27 = vld [vmem:[#allocation14 + $0x10] ss:$8 sps:$4 sm:$0xff]   ;;  %v19268_v9 = vld [vmem:[#allocation14 + $0x1c4] ss:$8 sps:$4 sm:$0xff]   ;;  %vm23679_vm6 = vmor %vm22538_vm13, %vm22572_vm1  ;;  %vm14941_vm13 = vcmask 73728  }
 0xabb   : > { %v19263_v20 = vld [vmem:[#allocation14 + $0x1b0] ss:$8 sps:$4 sm:$0xff]  }
 0xabc   : > { %10746 = vmatmul.mubr.bf16.vlgmr.msra.gmra.mrb[184].mxu0 %v10132_v0  ;;  %v19199_v0 = vld [vmem:[#allocation14 + $0x54] ss:$8 sps:$4 sm:$0xff]  }
 0xabd   : > { %10757 = vmatpush1.bf16.msra.mxu0 %v19134_v17  ;;  %10788 = vmatprep.mubr.bf16.mxu0 %v10183_v52  ;;  %v19196_v17 = vld [vmem:[#allocation14 + $0x44] ss:$8 sps:$4 sm:$0xff]   ;;  %v19197_v52 = vld [vmem:[#allocation14 + $0x50] ss:$8 sps:$4 sm:$0xff]  }
 0xabe   : > { %10758 = vmatprep.subr.bf16.mxu0 %v19139_v57  ;;  %v19194_v57 = vld [vmem:[#allocation14 + $0x40] ss:$8 sps:$4 sm:$0xff]  }
 0xac1   : > { %10759 = vmatpush1.bf16.msra.mxu0 %v19137_v56  ;;  %v19202_v56 = vld [vmem:[#allocation14 + $0x64] ss:$8 sps:$4 sm:$0xff]  }
 0xac2   : > { %10760 = vmatprep.subr.bf16.mxu0 %v19142_v37  ;;  %v19205_v37 = vld [vmem:[#allocation14 + $0x74] ss:$8 sps:$4 sm:$0xff]  }
 0xac5   : > { %10761 = vmatpush1.bf16.msra.mxu0 %v19140_v16  ;;  %v19203_v16 = vld [vmem:[#allocation14 + $0x70] ss:$8 sps:$4 sm:$0xff]  }
 0xac6   : > { %10762 = vmatprep.subr.bf16.mxu0 %v19145_v30  ;;  %v19208_v30 = vld [vmem:[#allocation14 + $0x84] ss:$8 sps:$4 sm:$0xff]  }
 0xac9   : > { %10763 = vmatpush1.bf16.msra.mxu0 %v19143_v58  ;;  %v19206_v58 = vld [vmem:[#allocation14 + $0x80] ss:$8 sps:$4 sm:$0xff]  }
 0xaca   : > { %10764 = vmatprep.subr.bf16.mxu0 %v19148_v40  ;;  %v19211_v40 = vld [vmem:[#allocation14 + $0x94] ss:$8 sps:$4 sm:$0xff]  }
 0xacd   : > { %10765 = vmatpush1.bf16.msra.mxu0 %v19146_v38  ;;  %v19209_v38 = vld [vmem:[#allocation14 + $0x90] ss:$8 sps:$4 sm:$0xff]  }
 0xace   : > { %10766 = vmatprep.subr.bf16.mxu0 %v19151_v51  ;;  %v19214_v51 = vld [vmem:[#allocation14 + $0xa4] ss:$8 sps:$4 sm:$0xff]  }
 0xad1   : > { %10767 = vmatpush1.bf16.msra.mxu0 %v19149_v19  ;;  %v19212_v19 = vld [vmem:[#allocation14 + $0xa0] ss:$8 sps:$4 sm:$0xff]  }
 0xad2   : > { %10768 = vmatprep.subr.bf16.mxu0 %v19154_v31  ;;  %v19217_v31 = vld [vmem:[#allocation14 + $0xb4] ss:$8 sps:$4 sm:$0xff]  }
 0xad5   : > { %10769 = vmatpush1.bf16.msra.mxu0 %v19152_v61  ;;  %v19215_v61 = vld [vmem:[#allocation14 + $0xb0] ss:$8 sps:$4 sm:$0xff]  }
 0xad6   : > { %10770 = vmatprep.subr.bf16.mxu0 %v19157_v39  ;;  %v19220_v39 = vld [vmem:[#allocation14 + $0xc4] ss:$8 sps:$4 sm:$0xff]  }
 0xad9   : > { %10771 = vmatpush1.bf16.msra.mxu0 %v19155_v7  ;;  %v19218_v7 = vld [vmem:[#allocation14 + $0xc0] ss:$8 sps:$4 sm:$0xff]  }
 0xada   : > { %10772 = vmatprep.subr.bf16.mxu0 %v19160_v60  ;;  %v19223_v60 = vld [vmem:[#allocation14 + $0xd4] ss:$8 sps:$4 sm:$0xff]  }
 0xadd   : > { %10773 = vmatpush1.bf16.msra.mxu0 %v19158_v5  ;;  %v19221_v5 = vld [vmem:[#allocation14 + $0xd0] ss:$8 sps:$4 sm:$0xff]  }
 0xade   : > { %10774 = vmatprep.subr.bf16.mxu0 %v19163_v62  ;;  %v19226_v62 = vld [vmem:[#allocation14 + $0xe4] ss:$8 sps:$4 sm:$0xff]  }
 0xae1   : > { %10775 = vmatpush1.bf16.msra.mxu0 %v19161_v43  ;;  %v19224_v43 = vld [vmem:[#allocation14 + $0xe0] ss:$8 sps:$4 sm:$0xff]  }
 0xae2   : > { %10776 = vmatprep.subr.bf16.mxu0 %v19166_v25  ;;  %v19229_v25 = vld [vmem:[#allocation14 + $0xf4] ss:$8 sps:$4 sm:$0xff]  }
 0xae5   : > { %10777 = vmatpush1.bf16.msra.mxu0 %v19164_v59  ;;  %v19227_v59 = vld [vmem:[#allocation14 + $0xf0] ss:$8 sps:$4 sm:$0xff]  }
 0xae6   : > { %10778 = vmatprep.subr.bf16.mxu0 %v19169_v29  ;;  %v19232_v29 = vld [vmem:[#allocation14 + $0x104] ss:$8 sps:$4 sm:$0xff]  }
 0xae9   : > { %10779 = vmatpush1.bf16.msra.mxu0 %v19167_v13  ;;  %v19230_v13 = vld [vmem:[#allocation14 + $0x100] ss:$8 sps:$4 sm:$0xff]  }
 0xaea   : > { %10780 = vmatprep.subr.bf16.mxu0 %v19172_v45  ;;  %v19235_v45 = vld [vmem:[#allocation14 + $0x114] ss:$8 sps:$4 sm:$0xff]  }
 0xaed   : > { %10781 = vmatpush1.bf16.msra.mxu0 %v19170_v53  ;;  %v19233_v53 = vld [vmem:[#allocation14 + $0x110] ss:$8 sps:$4 sm:$0xff]  }
 0xaee   : > { %10782 = vmatprep.subr.bf16.mxu0 %v19175_v1  ;;  %v19238_v1 = vld [vmem:[#allocation14 + $0x124] ss:$8 sps:$4 sm:$0xff]  }
 0xaf1   : > { %10783 = vmatpush1.bf16.msra.mxu0 %v19173_v11  ;;  %v19239_v11 = vld [vmem:[#allocation14 + $0x130] ss:$8 sps:$4 sm:$0xff]  }
 0xaf2   : > { %10784 = vmatprep.subr.bf16.mxu0 %v19178_v34  ;;  %v19244_v34 = vld [vmem:[#allocation14 + $0x144] ss:$8 sps:$4 sm:$0xff]  }
 0xaf5   : > { %10785 = vmatpush1.bf16.msra.mxu0 %v19176_v6  ;;  %v19251_v6 = vld [vmem:[#allocation14 + $0x170] ss:$8 sps:$4 sm:$0xff]  }
 0xaf6   : > { %10786 = vmatprep.subr.bf16.mxu0 %v19181_v21  ;;  %v19256_v21 = vld [vmem:[#allocation14 + $0x184] ss:$8 sps:$4 sm:$0xff]  }
 0xaf9   : > { %10787 = vmatpush1.bf16.msra.mxu0 %v19179_v4  ;;  %v19260_v4 = vld [vmem:[#allocation14 + $0x1a0] ss:$8 sps:$4 sm:$0xff]  }
 0xafa   : > { %11279 = vmatprep.subr.bf16.mxu0 %v19184_v23  ;;  %v19265_v23 = vld [vmem:[#allocation14 + $0x1b4] ss:$8 sps:$4 sm:$0xff]  }
 0xafc   : > { %10789 = vmatmul.mubr.bf16.vlgmr.msra.gmra.mrb[184].mxu0 %v10166_v3  ;;  %v19269_v3 = vld [vmem:[#allocation14 + $0x1d0] ss:$8 sps:$4 sm:$0xff]  }
 0xafd   : > { %11280 = vmatpush1.bf16.msra.mxu0 %v19182_v2  ;;  %11311 = vmatprep.mubr.bf16.mxu0 %v23464_v35  ;;  %v19200_v35 = vld [vmem:[#allocation14 + $0x60] ss:$8 sps:$4 sm:$0xff]  }
 0xafe   : > { %11281 = vmatprep.subr.bf16.mxu0 %v19187_v26  ;;  %v19266_v2 = vld [vmem:[#allocation14 + $0x1c0] ss:$8 sps:$4 sm:$0xff]   ;;  %v19271_v26 = vld [vmem:[#allocation14 + $0x1d4] ss:$8 sps:$4 sm:$0xff]  }
 0xb01   : > { %11282 = vmatpush1.bf16.msra.mxu0 %v19185_v27  ;;  %v19274_v27 = vld [vmem:[#allocation14 + $0x1e4] ss:$8 sps:$4 sm:$0xff]  }
 0xb02   : > { %11283 = vmatprep.subr.bf16.mxu0 %v19190_v12  ;;  %v19272_v12 = vld [vmem:[#allocation14 + $0x1e0] ss:$8 sps:$4 sm:$0xff]  }
 0xb05   : > { %11284 = vmatpush1.bf16.msra.mxu0 %v19188_v33  ;;  %v19277_v33 = vld [vmem:[#allocation14 + $0x1f4] ss:$8 sps:$4 sm:$0xff]  }
 0xb06   : > { %11285 = vmatprep.subr.bf16.mxu0 %v19193_v10  ;;  %v19275_v10 = vld [vmem:[#allocation14 + $0x1f0] ss:$8 sps:$4 sm:$0xff]  }
 0xb09   : > { %11286 = vmatpush1.bf16.msra.mxu0 %v19191_v36  ;;  %v19280_v36 = vld [vmem:[#allocation14 + $0x204] ss:$8 sps:$4 sm:$0xff]  }
 0xb0a   : > { %11287 = vmatprep.subr.bf16.mxu0 %v19196_v17  ;;  %v19278_v17 = vld [vmem:[#allocation14 + $0x200] ss:$8 sps:$4 sm:$0xff]  }
 0xb0d   : > { %11288 = vmatpush1.bf16.msra.mxu0 %v19194_v57  ;;  %v19283_v57 = vld [vmem:[#allocation14 + $0x214] ss:$8 sps:$4 sm:$0xff]  }
 0xb0e   : > { %11289 = vmatprep.subr.bf16.mxu0 %v19199_v0  ;;  %v19281_v0 = vld [vmem:[#allocation14 + $0x210] ss:$8 sps:$4 sm:$0xff]  }
 0xb11   : > { %11290 = vmatpush1.bf16.msra.mxu0 %v19197_v52  ;;  %v19286_v52 = vld [vmem:[#allocation14 + $0x224] ss:$8 sps:$4 sm:$0xff]  }
 0xb12   : > { %11291 = vmatprep.subr.bf16.mxu0 %v19202_v56  ;;  %v19284_v56 = vld [vmem:[#allocation14 + $0x220] ss:$8 sps:$4 sm:$0xff]  }
 0xb15   : > { %11292 = vmatpush1.bf16.msra.mxu0 %v19200_v35  ;;  %v19289_v35 = vld [vmem:[#allocation14 + $0x234] ss:$8 sps:$4 sm:$0xff]  }
 0xb16   : > { %11293 = vmatprep.subr.bf16.mxu0 %v19205_v37  ;;  %v19287_v37 = vld [vmem:[#allocation14 + $0x230] ss:$8 sps:$4 sm:$0xff]  }
 0xb19   : > { %11294 = vmatpush1.bf16.msra.mxu0 %v19203_v16  ;;  %v19292_v16 = vld [vmem:[#allocation14 + $0x244] ss:$8 sps:$4 sm:$0xff]  }
 0xb1a   : > { %11295 = vmatprep.subr.bf16.mxu0 %v19208_v30  ;;  %v19290_v30 = vld [vmem:[#allocation14 + $0x240] ss:$8 sps:$4 sm:$0xff]  }
 0xb1d   : > { %11296 = vmatpush1.bf16.msra.mxu0 %v19206_v58  ;;  %v19295_v58 = vld [vmem:[#allocation14 + $0x254] ss:$8 sps:$4 sm:$0xff]  }
 0xb1e   : > { %11297 = vmatprep.subr.bf16.mxu0 %v19211_v40  ;;  %v19298_v40 = vld [vmem:[#allocation14 + $0x264] ss:$8 sps:$4 sm:$0xff]  }
 0xb21   : > { %11298 = vmatpush1.bf16.msra.mxu0 %v19209_v38  ;;  %v19301_v38 = vld [vmem:[#allocation14 + $0x274] ss:$8 sps:$4 sm:$0xff]  }
 0xb22   : > { %11299 = vmatprep.subr.bf16.mxu0 %v19214_v51  ;;  %v19299_v51 = vld [vmem:[#allocation14 + $0x270] ss:$8 sps:$4 sm:$0xff]  }
 0xb25   : > { %11300 = vmatpush1.bf16.msra.mxu0 %v19212_v19  ;;  %v19304_v19 = vld [vmem:[#allocation14 + $0x284] ss:$8 sps:$4 sm:$0xff]  }
 0xb26   : > { %11301 = vmatprep.subr.bf16.mxu0 %v19217_v31  ;;  %v19302_v31 = vld [vmem:[#allocation14 + $0x280] ss:$8 sps:$4 sm:$0xff]  }
 0xb29   : > { %11302 = vmatpush1.bf16.msra.mxu0 %v19215_v61  ;;  %v19307_v61 = vld [vmem:[#allocation14 + $0x294] ss:$8 sps:$4 sm:$0xff]  }
 0xb2a   : > { %11303 = vmatprep.subr.bf16.mxu0 %v19220_v39  ;;  %v19305_v39 = vld [vmem:[#allocation14 + $0x290] ss:$8 sps:$4 sm:$0xff]  }
 0xb2d   : > { %11304 = vmatpush1.bf16.msra.mxu0 %v19218_v7  ;;  %v19310_v7 = vld [vmem:[#allocation14 + $0x2a4] ss:$8 sps:$4 sm:$0xff]  }
 0xb2e   : > { %11305 = vmatprep.subr.bf16.mxu0 %v19223_v60  ;;  %v19308_v60 = vld [vmem:[#allocation14 + $0x2a0] ss:$8 sps:$4 sm:$0xff]  }
 0xb31   : > { %11306 = vmatpush1.bf16.msra.mxu0 %v19221_v5  ;;  %v19313_v5 = vld [vmem:[#allocation14 + $0x2b4] ss:$8 sps:$4 sm:$0xff]  }
 0xb32   : > { %11307 = vmatprep.subr.bf16.mxu0 %v19226_v62  ;;  %v19311_v62 = vld [vmem:[#allocation14 + $0x2b0] ss:$8 sps:$4 sm:$0xff]  }
 0xb35   : > { %11308 = vmatpush1.bf16.msra.mxu0 %v19224_v43  ;;  %v19316_v43 = vld [vmem:[#allocation14 + $0x2c4] ss:$8 sps:$4 sm:$0xff]  }
 0xb36   : > { %11309 = vmatprep.subr.bf16.mxu0 %v19229_v25  ;;  %v19314_v25 = vld [vmem:[#allocation14 + $0x2c0] ss:$8 sps:$4 sm:$0xff]  }
 0xb39   : > { %11310 = vmatpush1.bf16.msra.mxu0 %v19227_v59  ;;  %v19319_v59 = vld [vmem:[#allocation14 + $0x2d4] ss:$8 sps:$4 sm:$0xff]  }
 0xb3a   : > { %11322 = vmatprep.subr.bf16.mxu0 %v19232_v29  ;;  %v19317_v29 = vld [vmem:[#allocation14 + $0x2d0] ss:$8 sps:$4 sm:$0xff]  }
 0xb3c   : > { %11312 = vmatmul.mubr.bf16.vlgmr.msra.gmra.mrb[184].mxu0 %v23466_v49  ;;  %v19245_v49 = vld [vmem:[#allocation14 + $0x150] ss:$8 sps:$4 sm:$0xff]  }
 0xb3d   : > { %11323 = vmatpush1.bf16.msra.mxu0 %v19230_v13  ;;  %11354 = vmatprep.mubr.bf16.mxu0 %v23474_v54  ;;  %v19248_v54 = vld [vmem:[#allocation14 + $0x160] ss:$8 sps:$4 sm:$0xff]   ;;  %v19322_v13 = vld [vmem:[#allocation14 + $0x2e4] ss:$8 sps:$4 sm:$0xff]  }
 0xb3e   : > { %11324 = vmatprep.subr.bf16.mxu0 %v19235_v45  ;;  %v19320_v45 = vld [vmem:[#allocation14 + $0x2e0] ss:$8 sps:$4 sm:$0xff]  }
 0xb41   : > { %11325 = vmatpush1.bf16.msra.mxu0 %v19233_v53  ;;  %v19325_v53 = vld [vmem:[#allocation14 + $0x2f4] ss:$8 sps:$4 sm:$0xff]  }
 0xb42   : > { %11326 = vmatprep.subr.bf16.mxu0 %v19238_v1  ;;  %v19323_v1 = vld [vmem:[#allocation14 + $0x2f0] ss:$8 sps:$4 sm:$0xff]  }
 0xb45   : > { %11327 = vmatpush1.bf16.msra.mxu0 %v19236_v55  ;;  %v11415_v55 = vld [vmem:[#allocation7 + $0x38] sm:$0x1f] }
 0xb46   : > { %11328 = vmatprep.subr.bf16.mxu0 %v19241_v46  ;;  %v19328_v46 = vld [vmem:[#allocation14 + $0x604] ss:$8 sps:$4 sm:$0xff]  }
 0xb49   : > { %11329 = vmatpush1.bf16.msra.mxu0 %v19239_v11  ;;  %v11409_v11 = vld [vmem:[#allocation7 + $0x8] sm:$0xe0] }
 0xb4a   : > { %11330 = vmatprep.subr.bf16.mxu0 %v19244_v34  ;;  %v11533_v34 = vrot.slane %v11415_v55, 5  ;;  %v19481_v55 = vld [vmem:[#allocation15 + $0x34] ss:$8 sps:$4 sm:$0xff]  }
 0xb4d   : > { %11331 = vmatpush1.bf16.msra.mxu0 %v19242_v41  ;;  %v19326_v41 = vld [vmem:[#allocation14 + $0x600] ss:$8 sps:$4 sm:$0xff]  }
 0xb4e   : > { %11332 = vmatprep.subr.bf16.mxu0 %v19247_v48  ;;  %v11532_v48 = vrot.slane %v11409_v11, 5  ;;  %v19388_v11 = vld [vmem:[#allocation14 + $0x744] ss:$8 sps:$4 sm:$0xff]  }
 0xb51   : > { %11333 = vmatpush1.bf16.msra.mxu0 %v19245_v49  ;;  %v19331_v49 = vld [vmem:[#allocation14 + $0x614] ss:$8 sps:$4 sm:$0xff]  }
 0xb52   : > { %11334 = vmatprep.subr.bf16.mxu0 %v19250_v15  ;;  %v11534_v15 = vsel %vm1613_vm14, %v11532_v48, %v11533_v34  ;;  %v19479_v34 = vld [vmem:[#allocation15 + $0x30] ss:$8 sps:$4 sm:$0xff]   ;;  %v19386_v48 = vld [vmem:[#allocation14 + $0x740] ss:$8 sps:$4 sm:$0xff]  }
 0xb55   : > { %11335 = vmatpush1.bf16.msra.mxu0 %v19248_v54  ;;  %v19329_v54 = vld [vmem:[#allocation14 + $0x610] ss:$8 sps:$4 sm:$0xff]  }
 0xb56   : > { %11336 = vmatprep.subr.bf16.mxu0 %v19253_v18  ;;  %v19334_v18 = vld [vmem:[#allocation14 + $0x624] ss:$8 sps:$4 sm:$0xff]  }
 0xb59   : > { %11337 = vmatpush1.bf16.msra.mxu0 %v19251_v6  ;;  %v19332_v6 = vld [vmem:[#allocation14 + $0x620] ss:$8 sps:$4 sm:$0xff]  }
 0xb5a   : > { %11338 = vmatprep.subr.bf16.mxu0 %v19256_v21  ;;  %v19337_v21 = vld [vmem:[#allocation14 + $0x634] ss:$8 sps:$4 sm:$0xff]  }
 0xb5d   : > { %11339 = vmatpush1.bf16.msra.mxu0 %v19254_v14  ;;  %v19335_v14 = vld [vmem:[#allocation14 + $0x630] ss:$8 sps:$4 sm:$0xff]  }
 0xb5e   : > { %11340 = vmatprep.subr.bf16.mxu0 %v19259_v44  ;;  %v19340_v44 = vld [vmem:[#allocation14 + $0x644] ss:$8 sps:$4 sm:$0xff]  }
 0xb61   : > { %11341 = vmatpush1.bf16.msra.mxu0 %v19257_v22  ;;  %v19338_v22 = vld [vmem:[#allocation14 + $0x640] ss:$8 sps:$4 sm:$0xff]  }
 0xb62   : > { %11342 = vmatprep.subr.bf16.mxu0 %v19262_v32  ;;  %v19343_v32 = vld [vmem:[#allocation14 + $0x654] ss:$8 sps:$4 sm:$0xff]  }
 0xb65   : > { %11343 = vmatpush1.bf16.msra.mxu0 %v19260_v4  ;;  %v19346_v4 = vld [vmem:[#allocation14 + $0x664] ss:$8 sps:$4 sm:$0xff]  }
 0xb66   : > { %11344 = vmatprep.subr.bf16.mxu0 %v19265_v23  ;;  %v19344_v23 = vld [vmem:[#allocation14 + $0x660] ss:$8 sps:$4 sm:$0xff]  }
 0xb69   : > { %11345 = vmatpush1.bf16.msra.mxu0 %v19263_v20  ;;  %v19349_v20 = vld [vmem:[#allocation14 + $0x674] ss:$8 sps:$4 sm:$0xff]  }
 0xb6a   : > { %11346 = vmatprep.subr.bf16.mxu0 %v19268_v9  ;;  %v19347_v9 = vld [vmem:[#allocation14 + $0x670] ss:$8 sps:$4 sm:$0xff]  }
 0xb6d   : > { %11347 = vmatpush1.bf16.msra.mxu0 %v19266_v2  ;;  %v19352_v2 = vld [vmem:[#allocation14 + $0x684] ss:$8 sps:$4 sm:$0xff]  }
 0xb6e   : > { %11348 = vmatprep.subr.bf16.mxu0 %v19271_v26  ;;  %v19350_v26 = vld [vmem:[#allocation14 + $0x680] ss:$8 sps:$4 sm:$0xff]  }
 0xb71   : > { %11349 = vmatpush1.bf16.msra.mxu0 %v19269_v3  ;;  %v19355_v3 = vld [vmem:[#allocation14 + $0x694] ss:$8 sps:$4 sm:$0xff]  }
 0xb72   : > { %11350 = vmatprep.subr.bf16.mxu0 %v19274_v27  ;;  %v19353_v27 = vld [vmem:[#allocation14 + $0x690] ss:$8 sps:$4 sm:$0xff]  }
 0xb75   : > { %11351 = vmatpush1.bf16.msra.mxu0 %v19272_v12  ;;  %v19358_v12 = vld [vmem:[#allocation14 + $0x6a4] ss:$8 sps:$4 sm:$0xff]  }
 0xb76   : > { %11352 = vmatprep.subr.bf16.mxu0 %v19277_v33  ;;  %v19356_v33 = vld [vmem:[#allocation14 + $0x6a0] ss:$8 sps:$4 sm:$0xff]  }
 0xb79   : > { %11353 = vmatpush1.bf16.msra.mxu0 %v19275_v10  ;;  %v19361_v10 = vld [vmem:[#allocation14 + $0x6b4] ss:$8 sps:$4 sm:$0xff]  }
 0xb7a   : > { %11365 = vmatprep.subr.bf16.mxu0 %v19280_v36  ;;  %v19359_v36 = vld [vmem:[#allocation14 + $0x6b0] ss:$8 sps:$4 sm:$0xff]  }
 0xb7c   : > { %11355 = vmatmul.mubr.bf16.vlgmr.msra.gmra.mrb[184].mxu0 %v23485_v50  ;;  %v19293_v50 = vld [vmem:[#allocation14 + $0x250] ss:$8 sps:$4 sm:$0xff]  }
 0xb7d   : > { %11366 = vmatpush1.bf16.msra.mxu0 %v19278_v17  ;;  %11397 = vmatprep.mubr.bf16.mxu0 %v23479_v42  ;;  %v19296_v42 = vld [vmem:[#allocation14 + $0x260] ss:$8 sps:$4 sm:$0xff]   ;;  %v19364_v17 = vld [vmem:[#allocation14 + $0x6c4] ss:$8 sps:$4 sm:$0xff]  }
 0xb7e   : > { %11367 = vmatprep.subr.bf16.mxu0 %v19283_v57  ;;  %v19362_v57 = vld [vmem:[#allocation14 + $0x6c0] ss:$8 sps:$4 sm:$0xff]  }
 0xb81   : > { %11368 = vmatpush1.bf16.msra.mxu0 %v19281_v0  ;;  %v19367_v0 = vld [vmem:[#allocation14 + $0x6d4] ss:$8 sps:$4 sm:$0xff]  }
 0xb82   : > { %11369 = vmatprep.subr.bf16.mxu0 %v19286_v52  ;;  %v19365_v52 = vld [vmem:[#allocation14 + $0x6d0] ss:$8 sps:$4 sm:$0xff]  }
 0xb85   : > { %11370 = vmatpush1.bf16.msra.mxu0 %v19284_v56  ;;  %v19370_v56 = vld [vmem:[#allocation14 + $0x6e4] ss:$8 sps:$4 sm:$0xff]  }
 0xb86   : > { %11371 = vmatprep.subr.bf16.mxu0 %v19289_v35  ;;  %v19368_v35 = vld [vmem:[#allocation14 + $0x6e0] ss:$8 sps:$4 sm:$0xff]  }
 0xb89   : > { %11372 = vmatpush1.bf16.msra.mxu0 %v19287_v37  ;;  %v19373_v37 = vld [vmem:[#allocation14 + $0x6f4] ss:$8 sps:$4 sm:$0xff]  }
 0xb8a   : > { %11373 = vmatprep.subr.bf16.mxu0 %v19292_v16  ;;  %v11414_v16 = vld [vmem:[#allocation7 + $0x30] sm:$0x1f] }
 0xb8d   : > { %11374 = vmatpush1.bf16.msra.mxu0 %v19290_v30  ;;  %v19371_v30 = vld [vmem:[#allocation14 + $0x6f0] ss:$8 sps:$4 sm:$0xff]  }
 0xb8e   : > { %11375 = vmatprep.subr.bf16.mxu0 %v19295_v58  ;;  %v11417_v58 = vld [vmem:[#allocation7 + $0x48] sm:$0x1f] }
 0xb91   : > { %11376 = vmatpush1.bf16.msra.mxu0 %v19293_v50  ;;  %v11408_v50 = vld [vmem:[#allocation7] sm:$0xe0] }
 0xb92   : > { %11377 = vmatprep.subr.bf16.mxu0 %v19298_v40  ;;  %v19376_v40 = vld [vmem:[#allocation14 + $0x704] ss:$8 sps:$4 sm:$0xff]  }
 0xb95   : > { %11378 = vmatpush1.bf16.msra.mxu0 %v19296_v42  ;;  %v11530_v42 = vrot.slane %v11414_v16, 5  ;;  %v11413_v16 = vld [vmem:[#allocation7 + $0x28] sm:$0xe0] }
 0xb96   : > { %11379 = vmatprep.subr.bf16.mxu0 %v19301_v38  ;;  %v11411_v38 = vld [vmem:[#allocation7 + $0x18] sm:$0xe0] }
 0xb99   : > { %11380 = vmatpush1.bf16.msra.mxu0 %v19299_v51  ;;  %v11539_v51 = vrot.slane %v11417_v58, 5  ;;  %v11410_v58 = vld [vmem:[#allocation7 + $0x10] sm:$0xe0] }
 0xb9a   : > { %11381 = vmatprep.subr.bf16.mxu0 %v19304_v19  ;;  %v11529_v19 = vrot.slane %v11408_v50, 5  ;;  %v19424_v50 = vld [vmem:[#allocation14 + $0x804] ss:$8 sps:$4 sm:$0xff]  }
 0xb9d   : > { %11382 = vmatpush1.bf16.msra.mxu0 %v19302_v31  ;;  %v19374_v31 = vld [vmem:[#allocation14 + $0x700] ss:$8 sps:$4 sm:$0xff]  }
 0xb9e   : > { %11383 = vmatprep.subr.bf16.mxu0 %v19307_v61  ;;  %v11538_v61 = vrot.slane %v11411_v38, 5 }
 0xba1   : > { %11384 = vmatpush1.bf16.msra.mxu0 %v19305_v39  ;;  %v19379_v39 = vld [vmem:[#allocation14 + $0x714] ss:$8 sps:$4 sm:$0xff]  }
 0xba2   : > { %11385 = vmatprep.subr.bf16.mxu0 %v19310_v7  ;;  %v11531_v7 = vsel %vm1613_vm14, %v11529_v19, %v11530_v42  ;;  %v11544_v42 = vrot.slane %v11413_v16, 5  ;;  %v19422_v19 = vld [vmem:[#allocation14 + $0x800] ss:$8 sps:$4 sm:$0xff]   ;;  %v19517_v16 = vld [vmem:[#allocation15 + $0xf4] ss:$8 sps:$4 sm:$0xff]  }
 0xba5   : > { %11386 = vmatpush1.bf16.msra.mxu0 %v19308_v60  ;;  %v11540_v60 = vsel %vm1613_vm14, %v11538_v61, %v11539_v51  ;;  %v11535_v51 = vrot.slane %v11410_v58, 5  ;;  %v19522_v58 = vld [vmem:[#allocation15 + $0x104] ss:$8 sps:$4 sm:$0xff]  }
 0xba6   : > { %11387 = vmatprep.subr.bf16.mxu0 %v19313_v5  ;;  %v19470_v5 = vld [vmem:[#allocation15] ss:$8 sps:$4 sm:$0xff]  }
 0xba9   : > { %11388 = vmatpush1.bf16.msra.mxu0 %v19311_v62  ;;  %v19472_v62 = vld [vmem:[#allocation15 + $0x4] ss:$8 sps:$4 sm:$0xff]  }
 0xbaa   : > { %11389 = vmatprep.subr.bf16.mxu0 %v19316_v43  ;;  %v19377_v43 = vld [vmem:[#allocation14 + $0x710] ss:$8 sps:$4 sm:$0xff]   ;;  %14402 = vmatprep.subr.bf16.mxu1 %v19472_v62  ;;  %v19433_v62 = vld [vmem:[#allocation14 + $0x834] ss:$8 sps:$4 sm:$0xff]  }
 0xbab   : > { %14403 = vmatpush1.bf16.msra.mxu1 %v19470_v5  ;;  %v19428_v5 = vld [vmem:[#allocation14 + $0x820] ss:$8 sps:$4 sm:$0xff]  }
 0xbad   : > { %11390 = vmatpush1.bf16.msra.mxu0 %v19314_v25  ;;  %v19475_v25 = vld [vmem:[#allocation15 + $0x14] ss:$8 sps:$4 sm:$0xff]  }
 0xbae   : > { %11391 = vmatprep.subr.bf16.mxu0 %v19319_v59  ;;  %v19382_v59 = vld [vmem:[#allocation14 + $0x724] ss:$8 sps:$4 sm:$0xff]   ;;  %14404 = vmatprep.subr.bf16.mxu1 %v19475_v25 }
 0xbaf   : > { %v19436_v25 = vld [vmem:[#allocation14 + $0x844] ss:$8 sps:$4 sm:$0xff]  }
 0xbb1   : > { %11392 = vmatpush1.bf16.msra.mxu0 %v19317_v29  ;;  %v19473_v29 = vld [vmem:[#allocation15 + $0x10] ss:$8 sps:$4 sm:$0xff]  }
 0xbb2   : > { %11393 = vmatprep.subr.bf16.mxu0 %v19322_v13  ;;  %v19478_v13 = vld [vmem:[#allocation15 + $0x24] ss:$8 sps:$4 sm:$0xff]   ;;  %14405 = vmatpush1.bf16.msra.mxu1 %v19473_v29  ;;  %v19439_v29 = vld [vmem:[#allocation14 + $0x854] ss:$8 sps:$4 sm:$0xff]  }
 0xbb3   : > { %14406 = vmatprep.subr.bf16.mxu1 %v19478_v13  ;;  %v19437_v13 = vld [vmem:[#allocation14 + $0x850] ss:$8 sps:$4 sm:$0xff]  }
 0xbb5   : > { %11394 = vmatpush1.bf16.msra.mxu0 %v19320_v45  ;;  %v19380_v45 = vld [vmem:[#allocation14 + $0x720] ss:$8 sps:$4 sm:$0xff]  }
 0xbb6   : > { %11395 = vmatprep.subr.bf16.mxu0 %v19325_v53  ;;  %v19385_v53 = vld [vmem:[#allocation14 + $0x734] ss:$8 sps:$4 sm:$0xff]  }
 0xbb9   : > { %11396 = vmatpush1.bf16.msra.mxu0 %v19323_v1  ;;  %v19476_v1 = vld [vmem:[#allocation15 + $0x20] ss:$8 sps:$4 sm:$0xff]  }
 0xbba   : > { %12033 = vmatprep.subr.bf16.mxu0 %v19328_v46  ;;  %v19383_v46 = vld [vmem:[#allocation14 + $0x730] ss:$8 sps:$4 sm:$0xff]   ;;  %14407 = vmatpush1.bf16.msra.mxu1 %v19476_v1  ;;  %v19445_v1 = vld [vmem:[#allocation14 + $0x874] ss:$8 sps:$4 sm:$0xff]  }
 0xbbb   : > { %14408 = vmatprep.subr.bf16.mxu1 %v19481_v55  ;;  %v19443_v55 = vld [vmem:[#allocation14 + $0x870] ss:$8 sps:$4 sm:$0xff]  }
 0xbbc   : > { %11398 = vmatmul.mubr.bf16.vlgmr.msra.gmra.mrb[184].mxu0 %v23489_v47  ;;  %v19341_v47 = vld [vmem:[#allocation14 + $0x650] ss:$8 sps:$4 sm:$0xff]  }
 0xbbd   : > { %12034 = vmatpush1.bf16.msra.mxu0 %v19326_v41  ;;  %12065 = vmatprep.mubr.bf16.mxu0 %v11534_v15  ;;  %v19484_v41 = vld [vmem:[#allocation15 + $0x44] ss:$8 sps:$4 sm:$0xff]   ;;  %v19482_v15 = vld [vmem:[#allocation15 + $0x40] ss:$8 sps:$4 sm:$0xff]  }
 0xbbe   : > { %12035 = vmatprep.subr.bf16.mxu0 %v19331_v49  ;;  %v19391_v49 = vld [vmem:[#allocation14 + $0x754] ss:$8 sps:$4 sm:$0xff]   ;;  %14409 = vmatpush1.bf16.msra.mxu1 %v19479_v34 }
 0xbbf   : > { %14410 = vmatprep.subr.bf16.mxu1 %v19484_v41  ;;  %v19451_v34 = vld [vmem:[#allocation14 + $0x894] ss:$8 sps:$4 sm:$0xff]   ;;  %v19449_v41 = vld [vmem:[#allocation14 + $0x890] ss:$8 sps:$4 sm:$0xff]  }
 0xbc1   : > { %12036 = vmatpush1.bf16.msra.mxu0 %v19329_v54  ;;  %v19487_v54 = vld [vmem:[#allocation15 + $0x54] ss:$8 sps:$4 sm:$0xff]  }
 0xbc2   : > { %12037 = vmatprep.subr.bf16.mxu0 %v19334_v18  ;;  %v19389_v18 = vld [vmem:[#allocation14 + $0x750] ss:$8 sps:$4 sm:$0xff]   ;;  %14411 = vmatpush1.bf16.msra.mxu1 %v19482_v15  ;;  %v19457_v15 = vld [vmem:[#allocation14 + $0x8b4] ss:$8 sps:$4 sm:$0xff]  }
 0xbc3   : > { %14412 = vmatprep.subr.bf16.mxu1 %v19487_v54  ;;  %v19455_v54 = vld [vmem:[#allocation14 + $0x8b0] ss:$8 sps:$4 sm:$0xff]  }
 0xbc5   : > { %12038 = vmatpush1.bf16.msra.mxu0 %v19332_v6  ;;  %v19394_v6 = vld [vmem:[#allocation14 + $0x764] ss:$8 sps:$4 sm:$0xff]  }
 0xbc6   : > { %12039 = vmatprep.subr.bf16.mxu0 %v19337_v21  ;;  %v19485_v21 = vld [vmem:[#allocation15 + $0x50] ss:$8 sps:$4 sm:$0xff]  }
 0xbc7   : > { %14413 = vmatpush1.bf16.msra.mxu1 %v19485_v21  ;;  %v19463_v21 = vld [vmem:[#allocation14 + $0x8d4] ss:$8 sps:$4 sm:$0xff]  }
 0xbc9   : > { %12040 = vmatpush1.bf16.msra.mxu0 %v19335_v14  ;;  %v19490_v14 = vld [vmem:[#allocation15 + $0x64] ss:$8 sps:$4 sm:$0xff]  }
 0xbca   : > { %12041 = vmatprep.subr.bf16.mxu0 %v19340_v44  ;;  %v19392_v44 = vld [vmem:[#allocation14 + $0x760] ss:$8 sps:$4 sm:$0xff]   ;;  %14414 = vmatprep.subr.bf16.mxu1 %v19490_v14  ;;  %v19461_v14 = vld [vmem:[#allocation14 + $0x8d0] ss:$8 sps:$4 sm:$0xff]  }
 0xbcd   : > { %12042 = vmatpush1.bf16.msra.mxu0 %v19338_v22  ;;  %v19397_v22 = vld [vmem:[#allocation14 + $0x774] ss:$8 sps:$4 sm:$0xff]  }
 0xbce   : > { %12043 = vmatprep.subr.bf16.mxu0 %v19343_v32  ;;  %v19488_v32 = vld [vmem:[#allocation15 + $0x60] ss:$8 sps:$4 sm:$0xff]  }
 0xbcf   : > { %14415 = vmatpush1.bf16.msra.mxu1 %v19488_v32  ;;  %v19469_v32 = vld [vmem:[#allocation14 + $0x8f4] ss:$8 sps:$4 sm:$0xff]  }
 0xbd1   : > { %12044 = vmatpush1.bf16.msra.mxu0 %v19341_v47  ;;  %v19493_v47 = vld [vmem:[#allocation15 + $0x74] ss:$8 sps:$4 sm:$0xff]  }
 0xbd2   : > { %12045 = vmatprep.subr.bf16.mxu0 %v19346_v4  ;;  %v19395_v4 = vld [vmem:[#allocation14 + $0x770] ss:$8 sps:$4 sm:$0xff]   ;;  %14416 = vmatprep.subr.bf16.mxu1 %v19493_v47  ;;  %v11412_v47 = vld [vmem:[#allocation7 + $0x20] sm:$0xe0] }
 0xbd5   : > { %12046 = vmatpush1.bf16.msra.mxu0 %v19344_v23  ;;  %v19400_v23 = vld [vmem:[#allocation14 + $0x784] ss:$8 sps:$4 sm:$0xff]  }
 0xbd6   : > { %12047 = vmatprep.subr.bf16.mxu0 %v19349_v20  ;;  %v19491_v20 = vld [vmem:[#allocation15 + $0x70] ss:$8 sps:$4 sm:$0xff]  }
 0xbd7   : > { %14417 = vmatpush1.bf16.msra.mxu1 %v19491_v20  ;;  %v11541_v20 = vrot.slane %v11412_v47, 5  ;;  %v23580_v47 = vld [vmem:[%s23519_s26 + $0x8] sm:$0x3] }
 0xbd9   : > { %12048 = vmatpush1.bf16.msra.mxu0 %v19347_v9  ;;  %v19398_v9 = vld [vmem:[#allocation14 + $0x780] ss:$8 sps:$4 sm:$0xff]  }
 0xbda   : > { %12049 = vmatprep.subr.bf16.mxu0 %v19352_v2  ;;  %v19403_v2 = vld [vmem:[#allocation14 + $0x794] ss:$8 sps:$4 sm:$0xff]  }
 0xbdd   : > { %12050 = vmatpush1.bf16.msra.mxu0 %v19350_v26  ;;  %v19401_v26 = vld [vmem:[#allocation14 + $0x790] ss:$8 sps:$4 sm:$0xff]  }
 0xbde   : > { %12051 = vmatprep.subr.bf16.mxu0 %v19355_v3  ;;  %v19406_v3 = vld [vmem:[#allocation14 + $0x7a4] ss:$8 sps:$4 sm:$0xff]  }
 0xbe1   : > { %12052 = vmatpush1.bf16.msra.mxu0 %v19353_v27  ;;  %v19404_v27 = vld [vmem:[#allocation14 + $0x7a0] ss:$8 sps:$4 sm:$0xff]  }
 0xbe2   : > { %12053 = vmatprep.subr.bf16.mxu0 %v19358_v12  ;;  %v19409_v12 = vld [vmem:[#allocation14 + $0x7b4] ss:$8 sps:$4 sm:$0xff]  }
 0xbe5   : > { %12054 = vmatpush1.bf16.msra.mxu0 %v19356_v33  ;;  %v19407_v33 = vld [vmem:[#allocation14 + $0x7b0] ss:$8 sps:$4 sm:$0xff]  }
 0xbe6   : > { %12055 = vmatprep.subr.bf16.mxu0 %v19361_v10  ;;  %v19412_v10 = vld [vmem:[#allocation14 + $0x7c4] ss:$8 sps:$4 sm:$0xff]  }
 0xbe9   : > { %12056 = vmatpush1.bf16.msra.mxu0 %v19359_v36  ;;  %v19410_v36 = vld [vmem:[#allocation14 + $0x7c0] ss:$8 sps:$4 sm:$0xff]  }
 0xbea   : > { %12057 = vmatprep.subr.bf16.mxu0 %v19364_v17  ;;  %v19415_v17 = vld [vmem:[#allocation14 + $0x7d4] ss:$8 sps:$4 sm:$0xff]  }
 0xbed   : > { %12058 = vmatpush1.bf16.msra.mxu0 %v19362_v57  ;;  %v19413_v57 = vld [vmem:[#allocation14 + $0x7d0] ss:$8 sps:$4 sm:$0xff]  }
 0xbee   : > { %12059 = vmatprep.subr.bf16.mxu0 %v19367_v0  ;;  %v19418_v0 = vld [vmem:[#allocation14 + $0x7e4] ss:$8 sps:$4 sm:$0xff]  }
 0xbf1   : > { %12060 = vmatpush1.bf16.msra.mxu0 %v19365_v52  ;;  %v19416_v52 = vld [vmem:[#allocation14 + $0x7e0] ss:$8 sps:$4 sm:$0xff]  }
 0xbf2   : > { %12061 = vmatprep.subr.bf16.mxu0 %v19370_v56  ;;  %v19421_v56 = vld [vmem:[#allocation14 + $0x7f4] ss:$8 sps:$4 sm:$0xff]  }
 0xbf5   : > { %12062 = vmatpush1.bf16.msra.mxu0 %v19368_v35  ;;  %v11416_v35 = vld [vmem:[#allocation7 + $0x40] sm:$0x1f] }
 0xbf6   : > { %12063 = vmatprep.subr.bf16.mxu0 %v19373_v37  ;;  %v19419_v37 = vld [vmem:[#allocation14 + $0x7f0] ss:$8 sps:$4 sm:$0xff]  }
 0xbf9   : > { %12064 = vmatpush1.bf16.msra.mxu0 %v19371_v30  ;;  %v11419_v30 = vld [vmem:[#allocation7 + $0x58] sm:$0x1f] }
 0xbfa   : > { %12076 = vmatprep.subr.bf16.mxu0 %v19376_v40  ;;  %v11536_v40 = vrot.slane %v11416_v35, 5  ;;  %v11545_v38 = vrot.slane %v11419_v30, 5  ;;  %v19514_v35 = vld [vmem:[#allocation15 + $0xe4] ss:$8 sps:$4 sm:$0xff]   ;;  %v19515_v30 = vld [vmem:[#allocation15 + $0xf0] ss:$8 sps:$4 sm:$0xff]  }
 0xbfc   : > { %12066 = vmatmul.mubr.bf16.vlgmr.msra.gmra.mrb[184].mxu0 %v11531_v7  ;;  %v11537_v61 = vsel %vm1613_vm14, %v11535_v51, %v11536_v40  ;;  %v19425_v7 = vld [vmem:[#allocation14 + $0x810] ss:$8 sps:$4 sm:$0xff]  }
 0xbfd   : > { %12077 = vmatpush1.bf16.msra.mxu0 %v19374_v31  ;;  %12108 = vmatprep.mubr.bf16.mxu0 %v11540_v60  ;;  %v19427_v31 = vld [vmem:[#allocation14 + $0x814] ss:$8 sps:$4 sm:$0xff]   ;;  %v19430_v60 = vld [vmem:[#allocation14 + $0x824] ss:$8 sps:$4 sm:$0xff]  }
 0xbfe   : > { %12078 = vmatprep.subr.bf16.mxu0 %v19379_v39  ;;  %v11546_v39 = vsel %vm1613_vm14, %v11544_v42, %v11545_v38 }
 0xc01   : > { %12079 = vmatpush1.bf16.msra.mxu0 %v19377_v43  ;;  %v19431_v43 = vld [vmem:[#allocation14 + $0x830] ss:$8 sps:$4 sm:$0xff]  }
 0xc02   : > { %12080 = vmatprep.subr.bf16.mxu0 %v19382_v59  ;;  %v19434_v59 = vld [vmem:[#allocation14 + $0x840] ss:$8 sps:$4 sm:$0xff]  }
 0xc05   : > { %12081 = vmatpush1.bf16.msra.mxu0 %v19380_v45  ;;  %v19442_v45 = vld [vmem:[#allocation14 + $0x864] ss:$8 sps:$4 sm:$0xff]  }
 0xc06   : > { %12082 = vmatprep.subr.bf16.mxu0 %v19385_v53  ;;  %v19440_v53 = vld [vmem:[#allocation14 + $0x860] ss:$8 sps:$4 sm:$0xff]  }
 0xc09   : > { %12083 = vmatpush1.bf16.msra.mxu0 %v19383_v46  ;;  %v19448_v46 = vld [vmem:[#allocation14 + $0x884] ss:$8 sps:$4 sm:$0xff]  }
 0xc0a   : > { %12084 = vmatprep.subr.bf16.mxu0 %v19388_v11  ;;  %v19446_v11 = vld [vmem:[#allocation14 + $0x880] ss:$8 sps:$4 sm:$0xff]  }
 0xc0d   : > { %12085 = vmatpush1.bf16.msra.mxu0 %v19386_v48  ;;  %v19454_v48 = vld [vmem:[#allocation14 + $0x8a4] ss:$8 sps:$4 sm:$0xff]  }
 0xc0e   : > { %12086 = vmatprep.subr.bf16.mxu0 %v19391_v49  ;;  %v19452_v49 = vld [vmem:[#allocation14 + $0x8a0] ss:$8 sps:$4 sm:$0xff]  }
 0xc11   : > { %12087 = vmatpush1.bf16.msra.mxu0 %v19389_v18  ;;  %v19460_v18 = vld [vmem:[#allocation14 + $0x8c4] ss:$8 sps:$4 sm:$0xff]  }
 0xc12   : > { %12088 = vmatprep.subr.bf16.mxu0 %v19394_v6  ;;  %v19458_v6 = vld [vmem:[#allocation14 + $0x8c0] ss:$8 sps:$4 sm:$0xff]  }
 0xc15   : > { %12089 = vmatpush1.bf16.msra.mxu0 %v19392_v44  ;;  %v19466_v44 = vld [vmem:[#allocation14 + $0x8e4] ss:$8 sps:$4 sm:$0xff]  }
 0xc16   : > { %12090 = vmatprep.subr.bf16.mxu0 %v19397_v22  ;;  %v19464_v22 = vld [vmem:[#allocation14 + $0x8e0] ss:$8 sps:$4 sm:$0xff]  }
 0xc19   : > { %12091 = vmatpush1.bf16.msra.mxu0 %v19395_v4  ;;  %v11418_v4 = vld [vmem:[#allocation7 + $0x50] sm:$0x1f] }
 0xc1a   : > { %12092 = vmatprep.subr.bf16.mxu0 %v19400_v23  ;;  %v19467_v23 = vld [vmem:[#allocation14 + $0x8f0] ss:$8 sps:$4 sm:$0xff]  }
 0xc1d   : > { %12093 = vmatpush1.bf16.msra.mxu0 %v19398_v9  ;;  %v11542_v9 = vrot.slane %v11418_v4, 5  ;;  %v23583_v4 = vld [vmem:[%s23519_s26 + $0xa] sm:$0x3] }
 0xc1e   : > { %12094 = vmatprep.subr.bf16.mxu0 %v19403_v2 }
 0xc1f   : > { %v11543_v2 = vsel %vm1613_vm14, %v11541_v20, %v11542_v9  ;;  %vm24093_vm14 = vmor %vm23432_vm10, %vm23423_vm0 }
 0xc21   : > { %12095 = vmatpush1.bf16.msra.mxu0 %v19401_v26  ;;  %v19494_v26 = vld [vmem:[#allocation15 + $0x80] ss:$8 sps:$4 sm:$0xff]  }
 0xc22   : > { %12096 = vmatprep.subr.bf16.mxu0 %v19406_v3  ;;  %v19496_v3 = vld [vmem:[#allocation15 + $0x84] ss:$8 sps:$4 sm:$0xff]  }
 0xc23   : > { %14418 = vmatprep.subr.bf16.mxu1 %v19496_v3  ;;  %v23600_v3 = vld [vmem:[%s23514_s19 + $0xe] sm:$0x3] }
 0xc24   : > { %14419 = vmatpush1.bf16.msra.mxu1 %v19494_v26  ;;  %v23597_v26 = vld [vmem:[%s23514_s19 + $0xc] sm:$0x3] }
 0xc25   : > { %12097 = vmatpush1.bf16.msra.mxu0 %v19404_v27  ;;  %v19497_v27 = vld [vmem:[#allocation15 + $0x90] ss:$8 sps:$4 sm:$0xff]  }
 0xc26   : > { %12098 = vmatprep.subr.bf16.mxu0 %v19409_v12  ;;  %v19499_v12 = vld [vmem:[#allocation15 + $0x94] ss:$8 sps:$4 sm:$0xff]  }
 0xc27   : > { %14420 = vmatprep.subr.bf16.mxu1 %v19499_v12 }
 0xc28   : > { %14421 = vmatpush1.bf16.msra.mxu1 %v19497_v27 }
 0xc29   : > { %12099 = vmatpush1.bf16.msra.mxu0 %v19407_v33  ;;  %v19502_v33 = vld [vmem:[#allocation15 + $0xa4] ss:$8 sps:$4 sm:$0xff]  }
 0xc2a   : > { %12100 = vmatprep.subr.bf16.mxu0 %v19412_v10  ;;  %v19500_v10 = vld [vmem:[#allocation15 + $0xa0] ss:$8 sps:$4 sm:$0xff]   ;;  %14422 = vmatprep.subr.bf16.mxu1 %v19502_v33  ;;  %v23611_v33 = vld [vmem:[%s23519_s26 + $0xc] sm:$0x3] }
 0xc2c   : > { %14423 = vmatpush1.bf16.msra.mxu1 %v19500_v10  ;;  %v23614_v10 = vld [vmem:[%s23519_s26 + $0xe] sm:$0x3] }
 0xc2d   : > { %12101 = vmatpush1.bf16.msra.mxu0 %v19410_v36  ;;  %v19505_v36 = vld [vmem:[#allocation15 + $0xb4] ss:$8 sps:$4 sm:$0xff]  }
 0xc2e   : > { %12102 = vmatprep.subr.bf16.mxu0 %v19415_v17  ;;  %v19503_v17 = vld [vmem:[#allocation15 + $0xb0] ss:$8 sps:$4 sm:$0xff]   ;;  %14424 = vmatprep.subr.bf16.mxu1 %v19505_v36 }
 0xc30   : > { %14425 = vmatpush1.bf16.msra.mxu1 %v19503_v17 }
 0xc31   : > { %12103 = vmatpush1.bf16.msra.mxu0 %v19413_v57  ;;  %v19508_v57 = vld [vmem:[#allocation15 + $0xc4] ss:$8 sps:$4 sm:$0xff]  }
 0xc32   : > { %12104 = vmatprep.subr.bf16.mxu0 %v19418_v0  ;;  %v19506_v0 = vld [vmem:[#allocation15 + $0xc0] ss:$8 sps:$4 sm:$0xff]   ;;  %14426 = vmatprep.subr.bf16.mxu1 %v19508_v57 }
 0xc34   : > { %14427 = vmatpush1.bf16.msra.mxu1 %v19506_v0 }
 0xc35   : > { %12105 = vmatpush1.bf16.msra.mxu0 %v19416_v52  ;;  %v19511_v52 = vld [vmem:[#allocation15 + $0xd4] ss:$8 sps:$4 sm:$0xff]  }
 0xc36   : > { %12106 = vmatprep.subr.bf16.mxu0 %v19421_v56  ;;  %v19509_v56 = vld [vmem:[#allocation15 + $0xd0] ss:$8 sps:$4 sm:$0xff]   ;;  %14428 = vmatprep.subr.bf16.mxu1 %v19511_v52  ;;  %v23625_v52 = vld [vmem:[%s23514_s19 + $0x10] sm:$0x3] }
 0xc38   : > { %14429 = vmatpush1.bf16.msra.mxu1 %v19509_v56  ;;  %v23628_v56 = vld [vmem:[%s23519_s26 + $0x10] sm:$0x3] }
 0xc39   : > { %12107 = vmatpush1.bf16.msra.mxu0 %v19419_v37  ;;  %v19512_v37 = vld [vmem:[#allocation15 + $0xe0] ss:$8 sps:$4 sm:$0xff]   ;;  %14430 = vmatprep.subr.bf16.mxu1 %v19514_v35 }
 0xc3a   : > { %12119 = vmatprep.subr.bf16.mxu0 %v19424_v50  ;;  %v12200_v50 = vlaneseq }
 0xc3c   : > { %12109 = vmatmul.mubr.bf16.vlgmr.msra.gmra.mrb[184].mxu0 %v11537_v61  ;;  %14431 = vmatpush1.bf16.msra.mxu1 %v19512_v37  ;;  %v12201_v40 = vshrl.u32 %v12200_v50, 7 }
 0xc3d   : > { %12120 = vmatpush1.bf16.msra.mxu0 %v19422_v19  ;;  %12151 = vmatprep.mubr.bf16.mxu0 %v11546_v39 }
 0xc3e   : > { %12121 = vmatprep.subr.bf16.mxu0 %v19427_v31  ;;  %14432 = vmatprep.subr.bf16.mxu1 %v19517_v16  ;;  %v23521_v38 = vsub.s32 0, %v12201_v40  ;;  %v23524_v31 = vld [vmem:[%s23514_s19] sm:$0x3]  ;;  %v23526_v61 = vsub.s32 1, %v12201_v40 }
 0xc40   : > { %14433 = vmatpush1.bf16.msra.mxu1 %v19515_v30  ;;  %v12398_v17 = vrot.slane %v23580_v47, %v23521_v38  ;;  %v12402_v57 = vrot.slane %v23580_v47, %v23526_v61  ;;  %v12442_v0 = vrot.slane %v23583_v4, %v23521_v38  ;;  %v12475_v37 = vrot.slane %v23597_v26, %v23521_v38 }
 0xc41   : > { %12122 = vmatpush1.bf16.msra.mxu0 %v19425_v7  ;;  %14443 = vmatprep.subr.bf16.mxu1 %v19522_v58  ;;  %v12519_v30 = vrot.slane %v23600_v3, %v23521_v38 }
 0xc42   : > { %12123 = vmatprep.subr.bf16.mxu0 %v19430_v60  ;;  %v23529_v60 = vld [vmem:[%s23519_s26] sm:$0x3] }
 0xc45   : > { %12124 = vmatpush1.bf16.msra.mxu0 %v19428_v5  ;;  %v23532_v5 = vld [vmem:[%s23514_s19 + $0x2] sm:$0x3] }
 0xc46   : > { %12125 = vmatprep.subr.bf16.mxu0 %v19433_v62 }
 0xc49   : > { %12126 = vmatpush1.bf16.msra.mxu0 %v19431_v43 }
 0xc4a   : > { %12127 = vmatprep.subr.bf16.mxu0 %v19436_v25  ;;  %v23535_v25 = vld [vmem:[%s23519_s26 + $0x2] sm:$0x3] }
 0xc4d   : > { %12128 = vmatpush1.bf16.msra.mxu0 %v19434_v59 }
 0xc4e   : > { %12129 = vmatprep.subr.bf16.mxu0 %v19439_v29 }
 0xc51   : > { %12130 = vmatpush1.bf16.msra.mxu0 %v19437_v13  ;;  %v12203_v13 = vrot.slane %v23524_v31, %v23521_v38 }
 0xc52   : > { %12131 = vmatprep.subr.bf16.mxu0 %v19442_v45  ;;  %v23540_v45 = vld [vmem:[%s23514_s19 + $0x4] sm:$0x3] }
 0xc55   : > { %12132 = vmatpush1.bf16.msra.mxu0 %v19440_v53  ;;  %v23543_v53 = vld [vmem:[%s23519_s26 + $0x4] sm:$0x3] }
 0xc56   : > { %12133 = vmatprep.subr.bf16.mxu0 %v19445_v1  ;;  %v12207_v1 = vrot.slane %v23524_v31, %v23526_v61 }
 0xc59   : > { %12134 = vmatpush1.bf16.msra.mxu0 %v19443_v55  ;;  %v12217_v55 = vrot.slane %v23529_v60, %v23521_v38 }
 0xc5a   : > { %12135 = vmatprep.subr.bf16.mxu0 %v19448_v46  ;;  %v12221_v46 = vrot.slane %v23529_v60, %v23526_v61 }
 0xc5d   : > { %12136 = vmatpush1.bf16.msra.mxu0 %v19446_v11  ;;  %v12246_v11 = vrot.slane %v23532_v5, %v23521_v38 }
 0xc5e   : > { %12137 = vmatprep.subr.bf16.mxu0 %v19451_v34  ;;  %v23554_v34 = vld [vmem:[%s23514_s19 + $0x6] sm:$0x3] }
 0xc5f   : > { %v12337_v20 = vrot.slane %v23554_v34, %v23521_v38  ;;  %v12341_v9 = vrot.slane %v23554_v34, %v23526_v61 }
 0xc61   : > { %12138 = vmatpush1.bf16.msra.mxu0 %v19449_v41  ;;  %v23557_v41 = vld [vmem:[%s23514_s19 + $0x8] sm:$0x3] }
 0xc62   : > { %12139 = vmatprep.subr.bf16.mxu0 %v19454_v48  ;;  %v12388_v63 = vrot.slane %v23557_v41, %v23526_v61 }
 0xc65   : > { %12140 = vmatpush1.bf16.msra.mxu0 %v19452_v49  ;;  %v12250_v49 = vrot.slane %v23532_v5, %v23526_v61 }
 0xc66   : > { %12141 = vmatprep.subr.bf16.mxu0 %v19457_v15  ;;  %v12260_v15 = vrot.slane %v23535_v25, %v23521_v38 }
 0xc69   : > { %12142 = vmatpush1.bf16.msra.mxu0 %v19455_v54  ;;  %v12264_v54 = vrot.slane %v23535_v25, %v23526_v61 }
 0xc6a   : > { %12143 = vmatprep.subr.bf16.mxu0 %v19460_v18  ;;  %v23566_v18 = vld [vmem:[%s23519_s26 + $0x6] sm:$0x3]  ;;  %s16847_s26 = sshll.u32 %s20249_s21, 4  ;;  %s14944_s21 = scalar_lea.sflag [#allocation11], %s462_s22 }
 0xc6b   : > { %v12351_v8 = vrot.slane %v23566_v18, %v23521_v38  ;;  %v12355_v36 = vrot.slane %v23566_v18, %v23526_v61  ;;  %s23870_s24 = scalar_lea.hbm %s24106_s15, %s16847_s26 }
 0xc6d   : > { %12144 = vmatpush1.bf16.msra.mxu0 %v19458_v6  ;;  %v23569_v6 = vld [vmem:[%s23514_s19 + $0xa] sm:$0x3] }
 0xc6e   : > { %12145 = vmatprep.subr.bf16.mxu0 %v19463_v21  ;;  %v12183_v21 = vld [vmem:[#allocation2 + $0x8] sm:$0xff]  ;;  %v12428_v27 = vrot.slane %v23569_v6, %v23521_v38  ;;  %v12432_v12 = vrot.slane %v23569_v6, %v23526_v61  ;;  %v24096_v6 = vrot.slane %v23583_v4, %v23526_v61 }
 0xc71   : > { %12146 = vmatpush1.bf16.msra.mxu0 %v19461_v14  ;;  %v12293_v14 = vrot.slane %v23540_v45, %v23521_v38 }
 0xc72   : > { %12147 = vmatprep.subr.bf16.mxu0 %v19466_v44  ;;  %v12297_v44 = vrot.slane %v23540_v45, %v23526_v61 }
 0xc75   : > { %12148 = vmatpush1.bf16.msra.mxu0 %v19464_v22  ;;  %v12307_v22 = vrot.slane %v23543_v53, %v23521_v38 }
 0xc76   : > { %12149 = vmatprep.subr.bf16.mxu0 %v19469_v32  ;;  %v12311_v32 = vrot.slane %v23543_v53, %v23526_v61 }
 0xc79   : > { %12150 = vmatpush1.bf16.msra.mxu0 %v19467_v23 }
 0xc7c   : > { %12152 = vmatmul.mubr.bf16.vlgmr.msra.gmra.mrb[184].mxu0 %v11543_v2  ;;  %v12384_v2 = vrot.slane %v23557_v41, %v23521_v38 }
 0xd4f   : > { %v12153_v42 = vpop.f32.mrb[184].mxu0 }
 0xd50   : > { %v12166_v51 = vmax.f32 %v12153_v42, 0.0  ;;  %v12155_v19 = vpop.f32.mrb[185].mxu0 }
 0xd51   : > { %v12167_v39 = vmax.f32 %v12155_v19, 0.0  ;;  %v12157_v7 = vpop.f32.mrb[186].mxu0 }
 0xd52   : > { %v12168_v62 = vmax.f32 %v12157_v7, 0.0  ;;  %v12159_v43 = vpop.f32.mrb[187].mxu0 }
 0xd53   : > { %v16903_v59 = vpack.c.bf16 %v12167_v39, %v12166_v51  ;;  %v12169_v29 = vmax.f32 %v12159_v43, 0.0 }
 0xd55   : > { %12182 = vst [vmem:[#allocation2] sm:$0xff] %v16903_v59  ;;  %v16904_v48 = vpack.c.bf16 %v12169_v29, %v12168_v62 }
 0xd57   : > { %v12184_v23 = vsel %vm24093_vm14, %v16904_v48, %v12183_v21 }
 0xd58   : > { %12185 = vst [vmem:[#allocation2 + $0x8] sm:$0xff] %v12184_v23 }
 0xd5c   : > { %v12195_v51 = vld [vmem:[#allocation2] sm:$0x11]  ;;  %v12285_v39 = vld [vmem:[#allocation2] sm:$0x22]  ;;  %v12329_v21 = vld [vmem:[#allocation2] sm:$0x44] }
 0xd5d   : > { %v12238_v19 = vld [vmem:[#allocation2] sm:$0x11]  ;;  %v12196_v29 = vunpack.c.l.bf16 %v12195_v51  ;;  %v12197_v45 = vunpack.c.h.bf16 %v12195_v51  ;;  %v12286_v23 = vunpack.c.l.bf16 %v12285_v39  ;;  %v12287_v50 = vunpack.c.h.bf16 %v12285_v39  ;;  %v12376_v35 = vld [vmem:[#allocation2] sm:$0x88] }
 0xd5e   : > { %v12239_v34 = vunpack.c.l.bf16 %v12238_v19  ;;  %v12240_v48 = vunpack.c.h.bf16 %v12238_v19  ;;  %v12330_v42 = vunpack.c.l.bf16 %v12329_v21  ;;  %v12331_v58 = vunpack.c.h.bf16 %v12329_v21 }
 0xd5f   : > { %v12511_v16 = vld [vmem:[#allocation2 + $0x8] sm:$0x22]  ;;  %v12210_v62 = vadd.f32 %v12203_v13, %v12196_v29  ;;  %v12211_v43 = vadd.f32 %v12207_v1, %v12197_v45  ;;  %v12300_v40 = vadd.f32 %v12293_v14, %v12286_v23  ;;  %v12301_v39 = vadd.f32 %v12297_v44, %v12287_v50  ;;  %v12420_v1 = vld [vmem:[#allocation2] sm:$0x88]  ;;  %v12282_v44 = vld [vmem:[#allocation8 + $0x8] sm:$0x11] }
 0xd60   : > { %v12253_v51 = vadd.f32 %v12246_v11, %v12239_v34  ;;  %v12254_v59 = vadd.f32 %v12250_v49, %v12240_v48  ;;  %v12512_v19 = vunpack.c.l.bf16 %v12511_v16  ;;  %v12513_v7 = vunpack.c.h.bf16 %v12511_v16  ;;  %v12467_v28 = vld [vmem:[#allocation2 + $0x8] sm:$0x22]  ;;  %v12417_v23 = vld [vmem:[#allocation8 + $0x20] sm:$0x11] }
 0xd61   : > { %v12224_v21 = vmul.f32 %v12217_v55, %v12210_v62  ;;  %v12225_v13 = vmul.f32 %v12221_v46, %v12211_v43  ;;  %v12235_v55 = vld [vmem:[#allocation8] sm:$0x11]  ;;  %v12314_v60 = vmul.f32 %v12307_v22, %v12300_v40  ;;  %v12315_v46 = vmul.f32 %v12311_v32, %v12301_v39  ;;  %v12326_v32 = vld [vmem:[#allocation8 + $0x10] sm:$0x11] }
 0xd62   : > { %v12267_v31 = vmul.f32 %v12260_v15, %v12253_v51  ;;  %v12268_v5 = vmul.f32 %v12264_v54, %v12254_v59  ;;  %v12344_v25 = vadd.f32 %v12337_v20, %v12330_v42  ;;  %v12345_v49 = vadd.f32 %v12341_v9, %v12331_v58  ;;  %v19543_v11 = vld [vmem:[#allocation15 + $0x170] ss:$8 sps:$4 sm:$0xff]  }
 0xd63   : > { %v16905_v15 = vpack.c.bf16 %v12225_v13, %v12224_v21  ;;  %v12377_v24 = vunpack.c.l.bf16 %v12376_v35  ;;  %v12378_v14 = vunpack.c.h.bf16 %v12376_v35  ;;  %v16907_v16 = vpack.c.bf16 %v12315_v46, %v12314_v60 }
 0xd64   : > { %v16906_v54 = vpack.c.bf16 %v12268_v5, %v12267_v31  ;;  %v12358_v50 = vmul.f32 %v12351_v8, %v12344_v25  ;;  %v12359_v62 = vmul.f32 %v12355_v36, %v12345_v49  ;;  %v12421_v43 = vunpack.c.l.bf16 %v12420_v1  ;;  %v12558_v36 = vld [vmem:[#allocation2 + $0x8] sm:$0x44] }
 0xd65   : > { %v12236_v22 = vsel %vm23679_vm6, %v16905_v15, %v12235_v55  ;;  %v12391_v20 = vadd.f32 %v12384_v2, %v12377_v24  ;;  %v12392_v9 = vadd.f32 %v12388_v63, %v12378_v14  ;;  %v16512_v35 = vrot.slane %v16907_v16, 9  ;;  %v19520_v14 = vld [vmem:[#allocation15 + $0x100] ss:$8 sps:$4 sm:$0xff]  }
 0xd66   : > { %v12277_v53 = vshrl.u32 %v16906_v54, 16  ;;  %12237 = vst [vmem:[#allocation8] sm:$0x11] %v12236_v22  ;;  %v16908_v58 = vpack.c.bf16 %v12359_v62, %v12358_v50  ;;  %v12422_v18 = vunpack.c.h.bf16 %v12420_v1  ;;  %v12435_v8 = vadd.f32 %v12428_v27, %v12421_v43  ;;  %v19527_v50 = vld [vmem:[#allocation15 + $0x114] ss:$8 sps:$4 sm:$0xff]  }
 0xd67   : > { %v12405_v2 = vmul.f32 %v12398_v17, %v12391_v20  ;;  %v12406_v41 = vmul.f32 %v12402_v57, %v12392_v9  ;;  %v12468_v63 = vunpack.c.l.bf16 %v12467_v28  ;;  %v12327_v42 = vsel %vm23679_vm6, %v16512_v35, %v12326_v32  ;;  %v12373_v17 = vld [vmem:[#allocation8 + $0x18] sm:$0x11]  ;;  %v12464_v62 = vld [vmem:[#allocation8 + $0x28] sm:$0x11]  ;;  %v12508_v35 = vld [vmem:[#allocation8 + $0x30] sm:$0x11] }
 0xd68   : > { %v12283_v40 = vsel %vm23679_vm6, %v12277_v53, %v12282_v44  ;;  %v12368_v59 = vshrl.u32 %v16908_v58, 16  ;;  %v12436_v27 = vadd.f32 %v12432_v12, %v12422_v18  ;;  %v12449_v29 = vmul.f32 %v12442_v0, %v12435_v8  ;;  %12328 = vst [vmem:[#allocation8 + $0x10] sm:$0x11] %v12327_v42  ;;  %v12555_v8 = vld [vmem:[#allocation8 + $0x38] sm:$0x11] }
 0xd69   : > { %12284 = vst [vmem:[#allocation8 + $0x8] sm:$0x11] %v12283_v40  ;;  %v16909_v45 = vpack.c.bf16 %v12406_v41, %v12405_v2  ;;  %v12469_v34 = vunpack.c.h.bf16 %v12467_v28  ;;  %v12482_v47 = vadd.f32 %v12475_v37, %v12468_v63  ;;  %v12526_v57 = vadd.f32 %v12519_v30, %v12512_v19  ;;  %v19525_v40 = vld [vmem:[#allocation15 + $0x110] ss:$8 sps:$4 sm:$0xff]  }
 0xd6a   : > { %v16514_v48 = vrot.slane %v12368_v59, 10  ;;  %v12450_v12 = vmul.f32 %v24096_v6, %v12436_v27  ;;  %v24097_v0 = vrot.slane %v23600_v3, %v23526_v61  ;;  %v12559_v39 = vunpack.c.l.bf16 %v12558_v36  ;;  %v12599_v63 = vld [vmem:[#allocation8 + $0x40] sm:$0x11]  ;;  %v19528_v59 = vld [vmem:[#allocation15 + $0x120] ss:$8 sps:$4 sm:$0xff]  }
 0xd6b   : > { %v16516_v21 = vrot.slane %v16909_v45, 11  ;;  %v24098_v13 = vrot.slane %v23597_v26, %v23526_v61  ;;  %v24099_v31 = vrot.slane %v23611_v33, %v23521_v38  ;;  %v24100_v19 = vrot.slane %v23614_v10, %v23521_v38  ;;  %v19533_v27 = vld [vmem:[#allocation15 + $0x134] ss:$8 sps:$4 sm:$0xff]   ;;  %v19536_v45 = vld [vmem:[#allocation15 + $0x144] ss:$8 sps:$4 sm:$0xff]  }
 0xd6c   : > { %v12527_v51 = vadd.f32 %v24097_v0, %v12513_v7  ;;  %v12374_v4 = vsel %vm23679_vm6, %v16514_v48, %v12373_v17  ;;  %v16910_v1 = vpack.c.bf16 %v12450_v12, %v12449_v29  ;;  %v24101_v3 = vrot.slane %v23614_v10, %v23526_v61  ;;  %v19531_v17 = vld [vmem:[#allocation15 + $0x130] ss:$8 sps:$4 sm:$0xff]   ;;  %v19542_v48 = vld [vmem:[#allocation15 + $0x164] ss:$8 sps:$4 sm:$0xff]   ;;  %v19545_v6 = vld [vmem:[#allocation15 + $0x174] ss:$8 sps:$4 sm:$0xff]  }
 0xd6d   : > { %v12483_v37 = vadd.f32 %v24098_v13, %v12469_v34  ;;  %v12496_v30 = vmul.f32 %v24099_v31, %v12482_v47  ;;  %v12540_v5 = vmul.f32 %v24100_v19, %v12526_v57  ;;  %v12560_v55 = vunpack.c.h.bf16 %v12558_v36  ;;  %v12602_v60 = vld [vmem:[#allocation8] sm:$0xff]  ;;  %12375 = vst [vmem:[#allocation8 + $0x18] sm:$0x11] %v12374_v4  ;;  %v19534_v34 = vld [vmem:[#allocation15 + $0x140] ss:$8 sps:$4 sm:$0xff]  }
 0xd6e   : > { %v12541_v7 = vmul.f32 %v24101_v3, %v12527_v51  ;;  %v12418_v26 = vsel %vm23679_vm6, %v16516_v21, %v12417_v23  ;;  %v24102_v46 = vrot.slane %v23611_v33, %v23526_v61  ;;  %v24103_v49 = vrot.slane %v23625_v52, %v23521_v38  ;;  %v19539_v47 = vld [vmem:[#allocation15 + $0x154] ss:$8 sps:$4 sm:$0xff]   ;;  %v19537_v57 = vld [vmem:[#allocation15 + $0x150] ss:$8 sps:$4 sm:$0xff]   ;;  %v19540_v23 = vld [vmem:[#allocation15 + $0x160] ss:$8 sps:$4 sm:$0xff]  }
 0xd6f   : > { %v12584_v54 = vrot.slane %v23628_v56, %v23526_v61  ;;  %v16525_v24 = vcombine.low %v12602_v60, %v12602_v60  ;;  %v16526_v10 = vcombine.high %v12602_v60, %v12602_v60  ;;  %12419 = vst [vmem:[#allocation8 + $0x20] sm:$0x11] %v12418_v26  ;;  %v12459_v28 = vshrl.u32 %v16910_v1, 16  ;;  %v19548_v12 = vld [vmem:[#allocation15 + $0x184] ss:$8 sps:$4 sm:$0xff]  }
 0xd70   : > { %v12497_v25 = vmul.f32 %v24102_v46, %v12483_v37  ;;  %v12573_v15 = vadd.f32 %v24103_v49, %v12559_v39  ;;  %v16912_v44 = vpack.c.bf16 %v12541_v7, %v12540_v5  ;;  %v23755_v16 = vld [vmem:[#allocation8 + $0x8] sm:$0xff]  ;;  %v24104_v33 = vrot.slane %v23625_v52, %v23526_v61  ;;  %v19551_v51 = vld [vmem:[#allocation15 + $0x194] ss:$8 sps:$4 sm:$0xff]   ;;  %v19549_v39 = vld [vmem:[#allocation15 + $0x190] ss:$8 sps:$4 sm:$0xff]  }
 0xd71   : > { %v24105_v53 = vrot.slane %v23628_v56, %v23521_v38  ;;  %14434 = vmatprep.mubr.bf16.mxu1 %v16526_v10  ;;  %v16528_v20 = vcombine.high %v23755_v16, %v23755_v16  ;;  %v16518_v9 = vrot.slane %v12459_v28, 11  ;;  %v19530_v38 = vld [vmem:[#allocation15 + $0x124] ss:$8 sps:$4 sm:$0xff]   ;;  %v19546_v0 = vld [vmem:[#allocation15 + $0x180] ss:$8 sps:$4 sm:$0xff]  }
 0xd72   : > { %v16911_v43 = vpack.c.bf16 %v12497_v25, %v12496_v30  ;;  %v12574_v22 = vadd.f32 %v24104_v33, %v12560_v55  ;;  %v12550_v58 = vshrl.u32 %v16912_v44, 16  ;;  %14435 = vmatmul.mubr.bf16.vlgmr.msra.gmra.mrb[92].mxu1 %v16525_v24  ;;  %v19554_v21 = vld [vmem:[#allocation15 + $0x1a4] ss:$8 sps:$4 sm:$0xff]   ;;  %v19552_v13 = vld [vmem:[#allocation15 + $0x1a0] ss:$8 sps:$4 sm:$0xff]   ;;  %v16527_v25 = vcombine.low %v23755_v16, %v23755_v16 }
 0xd73   : > { %v12587_v32 = vmul.f32 %v24105_v53, %v12573_v15  ;;  %14444 = vmatpush1.bf16.msra.mxu1 %v19520_v14  ;;  %14475 = vmatprep.mubr.bf16.mxu1 %v16528_v20  ;;  %v12465_v61 = vsel %vm23679_vm6, %v16518_v9, %v12464_v62  ;;  %v19557_v37 = vld [vmem:[#allocation15 + $0x1b4] ss:$8 sps:$4 sm:$0xff]   ;;  %v19555_v31 = vld [vmem:[#allocation15 + $0x1b0] ss:$8 sps:$4 sm:$0xff]   ;;  %v19560_v30 = vld [vmem:[#allocation15 + $0x1c4] ss:$8 sps:$4 sm:$0xff]  }
 0xd74   : > { %v16520_v18 = vrot.slane %v16911_v43, 9  ;;  %v12588_v36 = vmul.f32 %v12584_v54, %v12574_v22  ;;  %v16522_v52 = vrot.slane %v12550_v58, 9  ;;  %14445 = vmatprep.subr.bf16.mxu1 %v19527_v50  ;;  %12466 = vst [vmem:[#allocation8 + $0x28] sm:$0x11] %v12465_v61  ;;  %v19558_v19 = vld [vmem:[#allocation15 + $0x1c0] ss:$8 sps:$4 sm:$0xff]  }
 0xd75   : > { %v19563_v5 = vld [vmem:[#allocation15 + $0x1d4] ss:$8 sps:$4 sm:$0xff]   ;;  %v19561_v4 = vld [vmem:[#allocation15 + $0x1d0] ss:$8 sps:$4 sm:$0xff]   ;;  %v19566_v1 = vld [vmem:[#allocation15 + $0x1e4] ss:$8 sps:$4 sm:$0xff]  }
 0xd76   : > { %v12509_v56 = vsel %vm23679_vm6, %v16520_v18, %v12508_v35  ;;  %v16913_v2 = vpack.c.bf16 %v12588_v36, %v12587_v32  ;;  %v12556_v41 = vsel %vm23679_vm6, %v16522_v52, %v12555_v8  ;;  %v19564_v3 = vld [vmem:[#allocation15 + $0x1e0] ss:$8 sps:$4 sm:$0xff]   ;;  %v19569_v7 = vld [vmem:[#allocation15 + $0x1f4] ss:$8 sps:$4 sm:$0xff]   ;;  %v19567_v55 = vld [vmem:[#allocation15 + $0x1f0] ss:$8 sps:$4 sm:$0xff]  }
 0xd77   : > { %12510 = vst [vmem:[#allocation8 + $0x30] sm:$0x11] %v12509_v56  ;;  %12557 = vst [vmem:[#allocation8 + $0x38] sm:$0x11] %v12556_v41  ;;  %14446 = vmatpush1.bf16.msra.mxu1 %v19525_v40  ;;  %v19572_v60 = vld [vmem:[#allocation15 + $0x204] ss:$8 sps:$4 sm:$0xff]  }
 0xd78   : > { %v16524_v42 = vrot.slane %v16913_v2, 10  ;;  %14447 = vmatprep.subr.bf16.mxu1 %v19530_v38  ;;  %v23773_v26 = vld [vmem:[#allocation8 + $0x10] sm:$0xff]  ;;  %v19577_v49 = vld [vmem:[#allocation15 + $0x214] ss:$8 sps:$4 sm:$0xff]   ;;  %v19575_v54 = vld [vmem:[#allocation15 + $0x210] ss:$8 sps:$4 sm:$0xff]  }
 0xd79   : > { %v19570_v46 = vld [vmem:[#allocation15 + $0x200] ss:$8 sps:$4 sm:$0xff]   ;;  %v16530_v15 = vcombine.high %v23773_v26, %v23773_v26  ;;  %v19580_v24 = vld [vmem:[#allocation15 + $0x224] ss:$8 sps:$4 sm:$0xff]   ;;  %v19583_v14 = vld [vmem:[#allocation15 + $0x234] ss:$8 sps:$4 sm:$0xff]  }
 0xd7a   : > { %v12600_v29 = vsel %vm23679_vm6, %v16524_v42, %v12599_v63  ;;  %v19578_v10 = vld [vmem:[#allocation15 + $0x220] ss:$8 sps:$4 sm:$0xff]   ;;  %v19581_v28 = vld [vmem:[#allocation15 + $0x230] ss:$8 sps:$4 sm:$0xff]   ;;  %v19586_v44 = vld [vmem:[#allocation15 + $0x244] ss:$8 sps:$4 sm:$0xff]  }
 0xd7b   : > { %12601 = vst [vmem:[#allocation8 + $0x40] sm:$0x11] %v12600_v29  ;;  %14448 = vmatpush1.bf16.msra.mxu1 %v19528_v59  ;;  %v19584_v16 = vld [vmem:[#allocation15 + $0x240] ss:$8 sps:$4 sm:$0xff]   ;;  %v19589_v50 = vld [vmem:[#allocation15 + $0x254] ss:$8 sps:$4 sm:$0xff]   ;;  %v16529_v29 = vcombine.low %v23773_v26, %v23773_v26 }
 0xd7c   : > { %14449 = vmatprep.subr.bf16.mxu1 %v19533_v27  ;;  %v19587_v62 = vld [vmem:[#allocation15 + $0x250] ss:$8 sps:$4 sm:$0xff]   ;;  %v19592_v43 = vld [vmem:[#allocation15 + $0x264] ss:$8 sps:$4 sm:$0xff]   ;;  %v19590_v33 = vld [vmem:[#allocation15 + $0x260] ss:$8 sps:$4 sm:$0xff]  }
 0xd7d   : > { %v19595_v22 = vld [vmem:[#allocation15 + $0x274] ss:$8 sps:$4 sm:$0xff]   ;;  %v19593_v53 = vld [vmem:[#allocation15 + $0x270] ss:$8 sps:$4 sm:$0xff]   ;;  %v19598_v32 = vld [vmem:[#allocation15 + $0x284] ss:$8 sps:$4 sm:$0xff]  }
 0xd7e   : > { %v19596_v20 = vld [vmem:[#allocation15 + $0x280] ss:$8 sps:$4 sm:$0xff]   ;;  %v19601_v9 = vld [vmem:[#allocation15 + $0x294] ss:$8 sps:$4 sm:$0xff]   ;;  %v19599_v35 = vld [vmem:[#allocation15 + $0x290] ss:$8 sps:$4 sm:$0xff]  }
 0xd7f   : > { %14450 = vmatpush1.bf16.msra.mxu1 %v19531_v17  ;;  %v19604_v58 = vld [vmem:[#allocation15 + $0x2a4] ss:$8 sps:$4 sm:$0xff]   ;;  %v19602_v18 = vld [vmem:[#allocation15 + $0x2a0] ss:$8 sps:$4 sm:$0xff]   ;;  %v19607_v8 = vld [vmem:[#allocation15 + $0x2b4] ss:$8 sps:$4 sm:$0xff]  }
 0xd80   : > { %14451 = vmatprep.subr.bf16.mxu1 %v19536_v45  ;;  %v19605_v36 = vld [vmem:[#allocation15 + $0x2b0] ss:$8 sps:$4 sm:$0xff]   ;;  %v19610_v40 = vld [vmem:[#allocation15 + $0x2c4] ss:$8 sps:$4 sm:$0xff]   ;;  %v19608_v61 = vld [vmem:[#allocation15 + $0x2c0] ss:$8 sps:$4 sm:$0xff]  }
 0xd81   : > { %v19613_v52 = vld [vmem:[#allocation15 + $0x2d4] ss:$8 sps:$4 sm:$0xff]   ;;  %v19611_v38 = vld [vmem:[#allocation15 + $0x2d0] ss:$8 sps:$4 sm:$0xff]   ;;  %v19616_v56 = vld [vmem:[#allocation15 + $0x2e4] ss:$8 sps:$4 sm:$0xff]  }
 0xd82   : > { %v19614_v2 = vld [vmem:[#allocation15 + $0x2e0] ss:$8 sps:$4 sm:$0xff]   ;;  %v19619_v41 = vld [vmem:[#allocation15 + $0x2f4] ss:$8 sps:$4 sm:$0xff]   ;;  %v19617_v63 = vld [vmem:[#allocation15 + $0x2f0] ss:$8 sps:$4 sm:$0xff]  }
 0xd83   : > { %14452 = vmatpush1.bf16.msra.mxu1 %v19534_v34  ;;  %v19622_v42 = vld [vmem:[#allocation15 + $0x304] ss:$8 sps:$4 sm:$0xff]   ;;  %v23779_v59 = vld [vmem:[#allocation8 + $0x18] sm:$0xff]  ;;  %v19620_v27 = vld [vmem:[#allocation15 + $0x300] ss:$8 sps:$4 sm:$0xff]  }
 0xd84   : > { %14453 = vmatprep.subr.bf16.mxu1 %v19539_v47  ;;  %v19627_v17 = vld [vmem:[#allocation15 + $0x314] ss:$8 sps:$4 sm:$0xff]   ;;  %v16532_v45 = vcombine.high %v23779_v59, %v23779_v59  ;;  %v19625_v34 = vld [vmem:[#allocation15 + $0x310] ss:$8 sps:$4 sm:$0xff]   ;;  %v19630_v47 = vld [vmem:[#allocation15 + $0x324] ss:$8 sps:$4 sm:$0xff]  }
 0xd85   : > { %v19661_v26 = vld [vmem:[#allocation15 + $0x3d0] ss:$8 sps:$4 sm:$0xff]  }
 0xd87   : > { %14454 = vmatpush1.bf16.msra.mxu1 %v19537_v57  ;;  %v19628_v57 = vld [vmem:[#allocation15 + $0x320] ss:$8 sps:$4 sm:$0xff]  }
 0xd88   : > { %14455 = vmatprep.subr.bf16.mxu1 %v19542_v48  ;;  %v19633_v48 = vld [vmem:[#allocation15 + $0x334] ss:$8 sps:$4 sm:$0xff]  }
 0xd8b   : > { %14456 = vmatpush1.bf16.msra.mxu1 %v19540_v23  ;;  %v19631_v23 = vld [vmem:[#allocation15 + $0x330] ss:$8 sps:$4 sm:$0xff]  }
 0xd8c   : > { %14457 = vmatprep.subr.bf16.mxu1 %v19545_v6  ;;  %v19636_v6 = vld [vmem:[#allocation15 + $0x344] ss:$8 sps:$4 sm:$0xff]  }
 0xd8f   : > { %14458 = vmatpush1.bf16.msra.mxu1 %v19543_v11  ;;  %v19634_v11 = vld [vmem:[#allocation15 + $0x340] ss:$8 sps:$4 sm:$0xff]  }
 0xd90   : > { %14459 = vmatprep.subr.bf16.mxu1 %v19548_v12  ;;  %v19639_v12 = vld [vmem:[#allocation15 + $0x354] ss:$8 sps:$4 sm:$0xff]  }
 0xd93   : > { %14460 = vmatpush1.bf16.msra.mxu1 %v19546_v0  ;;  %v19637_v0 = vld [vmem:[#allocation15 + $0x350] ss:$8 sps:$4 sm:$0xff]  }
 0xd94   : > { %14461 = vmatprep.subr.bf16.mxu1 %v19551_v51  ;;  %v19642_v51 = vld [vmem:[#allocation15 + $0x364] ss:$8 sps:$4 sm:$0xff]  }
 0xd97   : > { %14462 = vmatpush1.bf16.msra.mxu1 %v19549_v39  ;;  %v19640_v39 = vld [vmem:[#allocation15 + $0x360] ss:$8 sps:$4 sm:$0xff]  }
 0xd98   : > { %14463 = vmatprep.subr.bf16.mxu1 %v19554_v21  ;;  %v19645_v21 = vld [vmem:[#allocation15 + $0x374] ss:$8 sps:$4 sm:$0xff]  }
 0xd9b   : > { %14464 = vmatpush1.bf16.msra.mxu1 %v19552_v13  ;;  %v19643_v13 = vld [vmem:[#allocation15 + $0x370] ss:$8 sps:$4 sm:$0xff]  }
 0xd9c   : > { %14465 = vmatprep.subr.bf16.mxu1 %v19557_v37  ;;  %v19648_v37 = vld [vmem:[#allocation15 + $0x384] ss:$8 sps:$4 sm:$0xff]  }
 0xd9f   : > { %14466 = vmatpush1.bf16.msra.mxu1 %v19555_v31  ;;  %v19646_v31 = vld [vmem:[#allocation15 + $0x380] ss:$8 sps:$4 sm:$0xff]  }
 0xda0   : > { %14467 = vmatprep.subr.bf16.mxu1 %v19560_v30  ;;  %v19651_v30 = vld [vmem:[#allocation15 + $0x394] ss:$8 sps:$4 sm:$0xff]  }
 0xda3   : > { %14468 = vmatpush1.bf16.msra.mxu1 %v19558_v19  ;;  %v19649_v19 = vld [vmem:[#allocation15 + $0x390] ss:$8 sps:$4 sm:$0xff]  }
 0xda4   : > { %14469 = vmatprep.subr.bf16.mxu1 %v19563_v5  ;;  %v19654_v5 = vld [vmem:[#allocation15 + $0x3a4] ss:$8 sps:$4 sm:$0xff]  }
 0xda7   : > { %14470 = vmatpush1.bf16.msra.mxu1 %v19561_v4  ;;  %v19652_v4 = vld [vmem:[#allocation15 + $0x3a0] ss:$8 sps:$4 sm:$0xff]  }
 0xda8   : > { %14471 = vmatprep.subr.bf16.mxu1 %v19566_v1  ;;  %v19657_v1 = vld [vmem:[#allocation15 + $0x3b4] ss:$8 sps:$4 sm:$0xff]  }
 0xdab   : > { %14472 = vmatpush1.bf16.msra.mxu1 %v19564_v3  ;;  %v19655_v3 = vld [vmem:[#allocation15 + $0x3b0] ss:$8 sps:$4 sm:$0xff]  }
 0xdac   : > { %14473 = vmatprep.subr.bf16.mxu1 %v19569_v7  ;;  %v19660_v7 = vld [vmem:[#allocation15 + $0x3c4] ss:$8 sps:$4 sm:$0xff]  }
 0xdaf   : > { %14474 = vmatpush1.bf16.msra.mxu1 %v19567_v55  ;;  %v19658_v55 = vld [vmem:[#allocation15 + $0x3c0] ss:$8 sps:$4 sm:$0xff]  }
 0xdb0   : > { %14484 = vmatprep.subr.bf16.mxu1 %v19572_v60  ;;  %v19663_v60 = vld [vmem:[#allocation15 + $0x3d4] ss:$8 sps:$4 sm:$0xff]  }
 0xdb2   : > { %14476 = vmatmul.mubr.bf16.vlgmr.msra.gmra.mrb[92].mxu1 %v16527_v25  ;;  %v19664_v25 = vld [vmem:[#allocation15 + $0x3e0] ss:$8 sps:$4 sm:$0xff]  }
 0xdb3   : > { %14485 = vmatpush1.bf16.msra.mxu1 %v19570_v46  ;;  %14516 = vmatprep.mubr.bf16.mxu1 %v16530_v15  ;;  %v19666_v46 = vld [vmem:[#allocation15 + $0x3e4] ss:$8 sps:$4 sm:$0xff]   ;;  %v19667_v15 = vld [vmem:[#allocation15 + $0x3f0] ss:$8 sps:$4 sm:$0xff]  }
 0xdb4   : > { %14486 = vmatprep.subr.bf16.mxu1 %v19577_v49  ;;  %v19669_v49 = vld [vmem:[#allocation15 + $0x3f4] ss:$8 sps:$4 sm:$0xff]  }
 0xdb7   : > { %14487 = vmatpush1.bf16.msra.mxu1 %v19575_v54  ;;  %v19672_v54 = vld [vmem:[#allocation15 + $0x404] ss:$8 sps:$4 sm:$0xff]  }
 0xdb8   : > { %14488 = vmatprep.subr.bf16.mxu1 %v19580_v24  ;;  %v23785_v24 = vld [vmem:[#allocation8 + $0x20] sm:$0xff] }
 0xdbb   : > { %14489 = vmatpush1.bf16.msra.mxu1 %v19578_v10  ;;  %v19670_v10 = vld [vmem:[#allocation15 + $0x400] ss:$8 sps:$4 sm:$0xff]  }
 0xdbc   : > { %14490 = vmatprep.subr.bf16.mxu1 %v19583_v14  ;;  %v16531_v14 = vcombine.low %v23779_v59, %v23779_v59  ;;  %v19711_v59 = vld [vmem:[#allocation15 + $0x4d0] ss:$8 sps:$4 sm:$0xff]  }
 0xdbf   : > { %14491 = vmatpush1.bf16.msra.mxu1 %v19581_v28  ;;  %v19677_v28 = vld [vmem:[#allocation15 + $0x414] ss:$8 sps:$4 sm:$0xff]  }
 0xdc0   : > { %14492 = vmatprep.subr.bf16.mxu1 %v19586_v44  ;;  %v16534_v44 = vcombine.high %v23785_v24, %v23785_v24 }
 0xdc3   : > { %14493 = vmatpush1.bf16.msra.mxu1 %v19584_v16  ;;  %v19675_v16 = vld [vmem:[#allocation15 + $0x410] ss:$8 sps:$4 sm:$0xff]  }
 0xdc4   : > { %14494 = vmatprep.subr.bf16.mxu1 %v19589_v50  ;;  %v19680_v50 = vld [vmem:[#allocation15 + $0x424] ss:$8 sps:$4 sm:$0xff]  }
 0xdc7   : > { %14495 = vmatpush1.bf16.msra.mxu1 %v19587_v62  ;;  %v19678_v62 = vld [vmem:[#allocation15 + $0x420] ss:$8 sps:$4 sm:$0xff]  }
 0xdc8   : > { %14496 = vmatprep.subr.bf16.mxu1 %v19592_v43  ;;  %v19683_v43 = vld [vmem:[#allocation15 + $0x434] ss:$8 sps:$4 sm:$0xff]  }
 0xdcb   : > { %14497 = vmatpush1.bf16.msra.mxu1 %v19590_v33  ;;  %v19681_v33 = vld [vmem:[#allocation15 + $0x430] ss:$8 sps:$4 sm:$0xff]  }
 0xdcc   : > { %14498 = vmatprep.subr.bf16.mxu1 %v19595_v22  ;;  %v19686_v22 = vld [vmem:[#allocation15 + $0x444] ss:$8 sps:$4 sm:$0xff]  }
 0xdcf   : > { %14499 = vmatpush1.bf16.msra.mxu1 %v19593_v53  ;;  %v19684_v53 = vld [vmem:[#allocation15 + $0x440] ss:$8 sps:$4 sm:$0xff]  }
 0xdd0   : > { %14500 = vmatprep.subr.bf16.mxu1 %v19598_v32  ;;  %v19689_v32 = vld [vmem:[#allocation15 + $0x454] ss:$8 sps:$4 sm:$0xff]  }
 0xdd3   : > { %14501 = vmatpush1.bf16.msra.mxu1 %v19596_v20  ;;  %v19687_v20 = vld [vmem:[#allocation15 + $0x450] ss:$8 sps:$4 sm:$0xff]  }
 0xdd4   : > { %14502 = vmatprep.subr.bf16.mxu1 %v19601_v9  ;;  %v19692_v9 = vld [vmem:[#allocation15 + $0x464] ss:$8 sps:$4 sm:$0xff]  }
 0xdd7   : > { %14503 = vmatpush1.bf16.msra.mxu1 %v19599_v35  ;;  %v19690_v35 = vld [vmem:[#allocation15 + $0x460] ss:$8 sps:$4 sm:$0xff]  }
 0xdd8   : > { %14504 = vmatprep.subr.bf16.mxu1 %v19604_v58  ;;  %v19695_v58 = vld [vmem:[#allocation15 + $0x474] ss:$8 sps:$4 sm:$0xff]  }
 0xddb   : > { %14505 = vmatpush1.bf16.msra.mxu1 %v19602_v18  ;;  %v19693_v18 = vld [vmem:[#allocation15 + $0x470] ss:$8 sps:$4 sm:$0xff]  }
 0xddc   : > { %14506 = vmatprep.subr.bf16.mxu1 %v19607_v8  ;;  %v19698_v8 = vld [vmem:[#allocation15 + $0x484] ss:$8 sps:$4 sm:$0xff]  }
 0xddf   : > { %14507 = vmatpush1.bf16.msra.mxu1 %v19605_v36  ;;  %v19696_v36 = vld [vmem:[#allocation15 + $0x480] ss:$8 sps:$4 sm:$0xff]  }
 0xde0   : > { %14508 = vmatprep.subr.bf16.mxu1 %v19610_v40  ;;  %v19701_v40 = vld [vmem:[#allocation15 + $0x494] ss:$8 sps:$4 sm:$0xff]  }
 0xde3   : > { %14509 = vmatpush1.bf16.msra.mxu1 %v19608_v61  ;;  %v19699_v61 = vld [vmem:[#allocation15 + $0x490] ss:$8 sps:$4 sm:$0xff]  }
 0xde4   : > { %14510 = vmatprep.subr.bf16.mxu1 %v19613_v52  ;;  %v19704_v52 = vld [vmem:[#allocation15 + $0x4a4] ss:$8 sps:$4 sm:$0xff]  }
 0xde7   : > { %14511 = vmatpush1.bf16.msra.mxu1 %v19611_v38  ;;  %v19702_v38 = vld [vmem:[#allocation15 + $0x4a0] ss:$8 sps:$4 sm:$0xff]  }
 0xde8   : > { %14512 = vmatprep.subr.bf16.mxu1 %v19616_v56  ;;  %v19707_v56 = vld [vmem:[#allocation15 + $0x4b4] ss:$8 sps:$4 sm:$0xff]  }
 0xdeb   : > { %14513 = vmatpush1.bf16.msra.mxu1 %v19614_v2  ;;  %v19705_v2 = vld [vmem:[#allocation15 + $0x4b0] ss:$8 sps:$4 sm:$0xff]  }
 0xdec   : > { %14514 = vmatprep.subr.bf16.mxu1 %v19619_v41  ;;  %v19710_v41 = vld [vmem:[#allocation15 + $0x4c4] ss:$8 sps:$4 sm:$0xff]  }
 0xdef   : > { %14515 = vmatpush1.bf16.msra.mxu1 %v19617_v63  ;;  %v19708_v63 = vld [vmem:[#allocation15 + $0x4c0] ss:$8 sps:$4 sm:$0xff]  }
 0xdf0   : > { %14525 = vmatprep.subr.bf16.mxu1 %v19622_v42  ;;  %v19713_v42 = vld [vmem:[#allocation15 + $0x4d4] ss:$8 sps:$4 sm:$0xff]  }
 0xdf2   : > { %14517 = vmatmul.mubr.bf16.vlgmr.msra.gmra.mrb[92].mxu1 %v16529_v29  ;;  %v19714_v29 = vld [vmem:[#allocation15 + $0x4e0] ss:$8 sps:$4 sm:$0xff]  }
 0xdf3   : > { %14526 = vmatpush1.bf16.msra.mxu1 %v19620_v27  ;;  %14557 = vmatprep.mubr.bf16.mxu1 %v16532_v45  ;;  %v19716_v27 = vld [vmem:[#allocation15 + $0x4e4] ss:$8 sps:$4 sm:$0xff]   ;;  %v19717_v45 = vld [vmem:[#allocation15 + $0x4f0] ss:$8 sps:$4 sm:$0xff]  }
 0xdf4   : > { %14527 = vmatprep.subr.bf16.mxu1 %v19627_v17  ;;  %v19719_v17 = vld [vmem:[#allocation15 + $0x4f4] ss:$8 sps:$4 sm:$0xff]  }
 0xdf7   : > { %14528 = vmatpush1.bf16.msra.mxu1 %v19625_v34  ;;  %v19722_v34 = vld [vmem:[#allocation15 + $0x504] ss:$8 sps:$4 sm:$0xff]  }
 0xdf8   : > { %14529 = vmatprep.subr.bf16.mxu1 %v19630_v47  ;;  %v23791_v47 = vld [vmem:[#allocation8 + $0x28] sm:$0xff] }
 0xdfb   : > { %14530 = vmatpush1.bf16.msra.mxu1 %v19628_v57  ;;  %v19720_v57 = vld [vmem:[#allocation15 + $0x500] ss:$8 sps:$4 sm:$0xff]  }
 0xdfc   : > { %14531 = vmatprep.subr.bf16.mxu1 %v19633_v48  ;;  %v16533_v48 = vcombine.low %v23785_v24, %v23785_v24  ;;  %v19761_v24 = vld [vmem:[#allocation15 + $0x5d0] ss:$8 sps:$4 sm:$0xff]  }
 0xdff   : > { %14532 = vmatpush1.bf16.msra.mxu1 %v19631_v23  ;;  %v19727_v23 = vld [vmem:[#allocation15 + $0x514] ss:$8 sps:$4 sm:$0xff]  }
 0xe00   : > { %14533 = vmatprep.subr.bf16.mxu1 %v19636_v6  ;;  %v16536_v6 = vcombine.high %v23791_v47, %v23791_v47 }
 0xe03   : > { %14534 = vmatpush1.bf16.msra.mxu1 %v19634_v11  ;;  %v19725_v11 = vld [vmem:[#allocation15 + $0x510] ss:$8 sps:$4 sm:$0xff]  }
 0xe04   : > { %14535 = vmatprep.subr.bf16.mxu1 %v19639_v12  ;;  %v19730_v12 = vld [vmem:[#allocation15 + $0x524] ss:$8 sps:$4 sm:$0xff]  }
 0xe07   : > { %14536 = vmatpush1.bf16.msra.mxu1 %v19637_v0  ;;  %v19728_v0 = vld [vmem:[#allocation15 + $0x520] ss:$8 sps:$4 sm:$0xff]  }
 0xe08   : > { %14537 = vmatprep.subr.bf16.mxu1 %v19642_v51  ;;  %v19733_v51 = vld [vmem:[#allocation15 + $0x534] ss:$8 sps:$4 sm:$0xff]  }
 0xe0b   : > { %14538 = vmatpush1.bf16.msra.mxu1 %v19640_v39  ;;  %v19731_v39 = vld [vmem:[#allocation15 + $0x530] ss:$8 sps:$4 sm:$0xff]  }
 0xe0c   : > { %14539 = vmatprep.subr.bf16.mxu1 %v19645_v21  ;;  %v19736_v21 = vld [vmem:[#allocation15 + $0x544] ss:$8 sps:$4 sm:$0xff]  }
 0xe0f   : > { %14540 = vmatpush1.bf16.msra.mxu1 %v19643_v13  ;;  %v19734_v13 = vld [vmem:[#allocation15 + $0x540] ss:$8 sps:$4 sm:$0xff]  }
 0xe10   : > { %14541 = vmatprep.subr.bf16.mxu1 %v19648_v37  ;;  %v19739_v37 = vld [vmem:[#allocation15 + $0x554] ss:$8 sps:$4 sm:$0xff]  }
 0xe13   : > { %14542 = vmatpush1.bf16.msra.mxu1 %v19646_v31  ;;  %v19737_v31 = vld [vmem:[#allocation15 + $0x550] ss:$8 sps:$4 sm:$0xff]  }
 0xe14   : > { %14543 = vmatprep.subr.bf16.mxu1 %v19651_v30  ;;  %v19742_v30 = vld [vmem:[#allocation15 + $0x564] ss:$8 sps:$4 sm:$0xff]  }
 0xe17   : > { %14544 = vmatpush1.bf16.msra.mxu1 %v19649_v19  ;;  %v19740_v19 = vld [vmem:[#allocation15 + $0x560] ss:$8 sps:$4 sm:$0xff]  }
 0xe18   : > { %14545 = vmatprep.subr.bf16.mxu1 %v19654_v5  ;;  %v19745_v5 = vld [vmem:[#allocation15 + $0x574] ss:$8 sps:$4 sm:$0xff]  }
 0xe1b   : > { %14546 = vmatpush1.bf16.msra.mxu1 %v19652_v4  ;;  %v19743_v4 = vld [vmem:[#allocation15 + $0x570] ss:$8 sps:$4 sm:$0xff]  }
 0xe1c   : > { %14547 = vmatprep.subr.bf16.mxu1 %v19657_v1  ;;  %v19748_v1 = vld [vmem:[#allocation15 + $0x584] ss:$8 sps:$4 sm:$0xff]  }
 0xe1f   : > { %14548 = vmatpush1.bf16.msra.mxu1 %v19655_v3  ;;  %v19746_v3 = vld [vmem:[#allocation15 + $0x580] ss:$8 sps:$4 sm:$0xff]  }
 0xe20   : > { %14549 = vmatprep.subr.bf16.mxu1 %v19660_v7  ;;  %v19751_v7 = vld [vmem:[#allocation15 + $0x594] ss:$8 sps:$4 sm:$0xff]  }
 0xe23   : > { %14550 = vmatpush1.bf16.msra.mxu1 %v19658_v55  ;;  %v19749_v55 = vld [vmem:[#allocation15 + $0x590] ss:$8 sps:$4 sm:$0xff]  }
 0xe24   : > { %14551 = vmatprep.subr.bf16.mxu1 %v19663_v60  ;;  %v19754_v60 = vld [vmem:[#allocation15 + $0x5a4] ss:$8 sps:$4 sm:$0xff]  }
 0xe27   : > { %14552 = vmatpush1.bf16.msra.mxu1 %v19661_v26  ;;  %v19752_v26 = vld [vmem:[#allocation15 + $0x5a0] ss:$8 sps:$4 sm:$0xff]  }
 0xe28   : > { %14553 = vmatprep.subr.bf16.mxu1 %v19666_v46  ;;  %v19757_v46 = vld [vmem:[#allocation15 + $0x5b4] ss:$8 sps:$4 sm:$0xff]  }
 0xe2b   : > { %14554 = vmatpush1.bf16.msra.mxu1 %v19664_v25  ;;  %v19755_v25 = vld [vmem:[#allocation15 + $0x5b0] ss:$8 sps:$4 sm:$0xff]  }
 0xe2c   : > { %14555 = vmatprep.subr.bf16.mxu1 %v19669_v49  ;;  %v19760_v49 = vld [vmem:[#allocation15 + $0x5c4] ss:$8 sps:$4 sm:$0xff]  }
 0xe2f   : > { %14556 = vmatpush1.bf16.msra.mxu1 %v19667_v15  ;;  %v19758_v15 = vld [vmem:[#allocation15 + $0x5c0] ss:$8 sps:$4 sm:$0xff]  }
 0xe30   : > { %14566 = vmatprep.subr.bf16.mxu1 %v19672_v54  ;;  %v19763_v54 = vld [vmem:[#allocation15 + $0x5d4] ss:$8 sps:$4 sm:$0xff]  }
 0xe32   : > { %14558 = vmatmul.mubr.bf16.vlgmr.msra.gmra.mrb[92].mxu1 %v16531_v14  ;;  %v19764_v14 = vld [vmem:[#allocation15 + $0x5e0] ss:$8 sps:$4 sm:$0xff]  }
 0xe33   : > { %14567 = vmatpush1.bf16.msra.mxu1 %v19670_v10  ;;  %14598 = vmatprep.mubr.bf16.mxu1 %v16534_v44  ;;  %v19766_v10 = vld [vmem:[#allocation15 + $0x5e4] ss:$8 sps:$4 sm:$0xff]   ;;  %v19767_v44 = vld [vmem:[#allocation15 + $0x5f0] ss:$8 sps:$4 sm:$0xff]  }
 0xe34   : > { %14568 = vmatprep.subr.bf16.mxu1 %v19677_v28  ;;  %v19769_v28 = vld [vmem:[#allocation15 + $0x5f4] ss:$8 sps:$4 sm:$0xff]  }
 0xe37   : > { %14569 = vmatpush1.bf16.msra.mxu1 %v19675_v16  ;;  %v19772_v16 = vld [vmem:[#allocation15 + $0x604] ss:$8 sps:$4 sm:$0xff]  }
 0xe38   : > { %14570 = vmatprep.subr.bf16.mxu1 %v19680_v50  ;;  %v23797_v50 = vld [vmem:[#allocation8 + $0x30] sm:$0xff] }
 0xe3b   : > { %14571 = vmatpush1.bf16.msra.mxu1 %v19678_v62  ;;  %v19770_v62 = vld [vmem:[#allocation15 + $0x600] ss:$8 sps:$4 sm:$0xff]  }
 0xe3c   : > { %14572 = vmatprep.subr.bf16.mxu1 %v19683_v43  ;;  %v16535_v43 = vcombine.low %v23791_v47, %v23791_v47  ;;  %v19811_v47 = vld [vmem:[#allocation15 + $0x6d0] ss:$8 sps:$4 sm:$0xff]  }
 0xe3f   : > { %14573 = vmatpush1.bf16.msra.mxu1 %v19681_v33  ;;  %v19777_v33 = vld [vmem:[#allocation15 + $0x614] ss:$8 sps:$4 sm:$0xff]  }
 0xe40   : > { %14574 = vmatprep.subr.bf16.mxu1 %v19686_v22  ;;  %v16538_v22 = vcombine.high %v23797_v50, %v23797_v50 }
 0xe43   : > { %14575 = vmatpush1.bf16.msra.mxu1 %v19684_v53  ;;  %v19775_v53 = vld [vmem:[#allocation15 + $0x610] ss:$8 sps:$4 sm:$0xff]  }
 0xe44   : > { %14576 = vmatprep.subr.bf16.mxu1 %v19689_v32  ;;  %v19780_v32 = vld [vmem:[#allocation15 + $0x624] ss:$8 sps:$4 sm:$0xff]  }
 0xe47   : > { %14577 = vmatpush1.bf16.msra.mxu1 %v19687_v20  ;;  %v19778_v20 = vld [vmem:[#allocation15 + $0x620] ss:$8 sps:$4 sm:$0xff]  }
 0xe48   : > { %14578 = vmatprep.subr.bf16.mxu1 %v19692_v9  ;;  %v19783_v9 = vld [vmem:[#allocation15 + $0x634] ss:$8 sps:$4 sm:$0xff]  }
 0xe4b   : > { %14579 = vmatpush1.bf16.msra.mxu1 %v19690_v35  ;;  %v19781_v35 = vld [vmem:[#allocation15 + $0x630] ss:$8 sps:$4 sm:$0xff]  }
 0xe4c   : > { %14580 = vmatprep.subr.bf16.mxu1 %v19695_v58  ;;  %v19786_v58 = vld [vmem:[#allocation15 + $0x644] ss:$8 sps:$4 sm:$0xff]  }
 0xe4f   : > { %14581 = vmatpush1.bf16.msra.mxu1 %v19693_v18  ;;  %v19784_v18 = vld [vmem:[#allocation15 + $0x640] ss:$8 sps:$4 sm:$0xff]  }
 0xe50   : > { %14582 = vmatprep.subr.bf16.mxu1 %v19698_v8  ;;  %v19789_v8 = vld [vmem:[#allocation15 + $0x654] ss:$8 sps:$4 sm:$0xff]  }
 0xe53   : > { %14583 = vmatpush1.bf16.msra.mxu1 %v19696_v36  ;;  %v19787_v36 = vld [vmem:[#allocation15 + $0x650] ss:$8 sps:$4 sm:$0xff]  }
 0xe54   : > { %14584 = vmatprep.subr.bf16.mxu1 %v19701_v40  ;;  %v19792_v40 = vld [vmem:[#allocation15 + $0x664] ss:$8 sps:$4 sm:$0xff]  }
 0xe57   : > { %14585 = vmatpush1.bf16.msra.mxu1 %v19699_v61  ;;  %v19790_v61 = vld [vmem:[#allocation15 + $0x660] ss:$8 sps:$4 sm:$0xff]  }
 0xe58   : > { %14586 = vmatprep.subr.bf16.mxu1 %v19704_v52  ;;  %v19795_v52 = vld [vmem:[#allocation15 + $0x674] ss:$8 sps:$4 sm:$0xff]  }
 0xe5b   : > { %14587 = vmatpush1.bf16.msra.mxu1 %v19702_v38  ;;  %v19793_v38 = vld [vmem:[#allocation15 + $0x670] ss:$8 sps:$4 sm:$0xff]  }
 0xe5c   : > { %14588 = vmatprep.subr.bf16.mxu1 %v19707_v56  ;;  %v19798_v56 = vld [vmem:[#allocation15 + $0x684] ss:$8 sps:$4 sm:$0xff]  }
 0xe5f   : > { %14589 = vmatpush1.bf16.msra.mxu1 %v19705_v2  ;;  %v19796_v2 = vld [vmem:[#allocation15 + $0x680] ss:$8 sps:$4 sm:$0xff]  }
 0xe60   : > { %14590 = vmatprep.subr.bf16.mxu1 %v19710_v41  ;;  %v19801_v41 = vld [vmem:[#allocation15 + $0x694] ss:$8 sps:$4 sm:$0xff]  }
 0xe63   : > { %14591 = vmatpush1.bf16.msra.mxu1 %v19708_v63  ;;  %v19799_v63 = vld [vmem:[#allocation15 + $0x690] ss:$8 sps:$4 sm:$0xff]  }
 0xe64   : > { %14592 = vmatprep.subr.bf16.mxu1 %v19713_v42  ;;  %v19804_v42 = vld [vmem:[#allocation15 + $0x6a4] ss:$8 sps:$4 sm:$0xff]  }
 0xe67   : > { %14593 = vmatpush1.bf16.msra.mxu1 %v19711_v59  ;;  %v19802_v59 = vld [vmem:[#allocation15 + $0x6a0] ss:$8 sps:$4 sm:$0xff]  }
 0xe68   : > { %14594 = vmatprep.subr.bf16.mxu1 %v19716_v27  ;;  %v19807_v27 = vld [vmem:[#allocation15 + $0x6b4] ss:$8 sps:$4 sm:$0xff]  }
 0xe6b   : > { %14595 = vmatpush1.bf16.msra.mxu1 %v19714_v29  ;;  %v19805_v29 = vld [vmem:[#allocation15 + $0x6b0] ss:$8 sps:$4 sm:$0xff]  }
 0xe6c   : > { %14596 = vmatprep.subr.bf16.mxu1 %v19719_v17  ;;  %v19810_v17 = vld [vmem:[#allocation15 + $0x6c4] ss:$8 sps:$4 sm:$0xff]  }
 0xe6f   : > { %14597 = vmatpush1.bf16.msra.mxu1 %v19717_v45  ;;  %v19808_v45 = vld [vmem:[#allocation15 + $0x6c0] ss:$8 sps:$4 sm:$0xff]  }
 0xe70   : > { %14607 = vmatprep.subr.bf16.mxu1 %v19722_v34  ;;  %v19813_v34 = vld [vmem:[#allocation15 + $0x6d4] ss:$8 sps:$4 sm:$0xff]  }
 0xe72   : > { %14599 = vmatmul.mubr.bf16.vlgmr.msra.gmra.mrb[92].mxu1 %v16533_v48  ;;  %v19814_v48 = vld [vmem:[#allocation15 + $0x6e0] ss:$8 sps:$4 sm:$0xff]  }
 0xe73   : > { %14608 = vmatpush1.bf16.msra.mxu1 %v19720_v57  ;;  %14639 = vmatprep.mubr.bf16.mxu1 %v16536_v6  ;;  %v19816_v57 = vld [vmem:[#allocation15 + $0x6e4] ss:$8 sps:$4 sm:$0xff]   ;;  %v19817_v6 = vld [vmem:[#allocation15 + $0x6f0] ss:$8 sps:$4 sm:$0xff]  }
 0xe74   : > { %14609 = vmatprep.subr.bf16.mxu1 %v19727_v23  ;;  %v19819_v23 = vld [vmem:[#allocation15 + $0x6f4] ss:$8 sps:$4 sm:$0xff]  }
 0xe77   : > { %14610 = vmatpush1.bf16.msra.mxu1 %v19725_v11  ;;  %v19822_v11 = vld [vmem:[#allocation15 + $0x704] ss:$8 sps:$4 sm:$0xff]  }
 0xe78   : > { %14611 = vmatprep.subr.bf16.mxu1 %v19730_v12  ;;  %v23803_v12 = vld [vmem:[#allocation8 + $0x38] sm:$0xff] }
 0xe7b   : > { %14612 = vmatpush1.bf16.msra.mxu1 %v19728_v0  ;;  %v19820_v0 = vld [vmem:[#allocation15 + $0x700] ss:$8 sps:$4 sm:$0xff]  }
 0xe7c   : > { %14613 = vmatprep.subr.bf16.mxu1 %v19733_v51  ;;  %v16537_v51 = vcombine.low %v23797_v50, %v23797_v50  ;;  %v19845_v50 = vld [vmem:[#allocation15 + $0x774] ss:$8 sps:$4 sm:$0xff]  }
 0xe7f   : > { %14614 = vmatpush1.bf16.msra.mxu1 %v19731_v39  ;;  %v19827_v39 = vld [vmem:[#allocation15 + $0x714] ss:$8 sps:$4 sm:$0xff]  }
 0xe80   : > { %14615 = vmatprep.subr.bf16.mxu1 %v19736_v21  ;;  %v16540_v21 = vcombine.high %v23803_v12, %v23803_v12 }
 0xe83   : > { %14616 = vmatpush1.bf16.msra.mxu1 %v19734_v13  ;;  %v19920_v13 = vld [vmem:[%s23922_s10 + $0x40] sm:$0xff]  }
 0xe84   : > { %14617 = vmatprep.subr.bf16.mxu1 %v19739_v37  ;;  %v19921_v37 = vld [vmem:[%s23922_s10] sm:$0xff]   ;;  %17363 = vmatprep.subr.bf16.mxu0 %v19920_v13  ;;  %v19901_v13 = vld [vmem:[#allocation15 + $0x894] ss:$8 sps:$4 sm:$0xff]  }
 0xe85   : > { %17364 = vmatpush3.bf16.msra.mxu0 %v19921_v37  ;;  %v19899_v37 = vld [vmem:[#allocation15 + $0x890] ss:$8 sps:$4 sm:$0xff]  }
 0xe87   : > { %14618 = vmatpush1.bf16.msra.mxu1 %v19737_v31  ;;  %v19922_v31 = vld [vmem:[%s23922_s10 + $0x48] sm:$0xff]  }
 0xe88   : > { %14619 = vmatprep.subr.bf16.mxu1 %v19742_v30  ;;  %v19825_v30 = vld [vmem:[#allocation15 + $0x710] ss:$8 sps:$4 sm:$0xff]   ;;  %17365 = vmatprep.subr.bf16.mxu0 %v19922_v31  ;;  %v19904_v31 = vld [vmem:[#allocation15 + $0x8a4] ss:$8 sps:$4 sm:$0xff]  }
 0xe8b   : > { %14620 = vmatpush1.bf16.msra.mxu1 %v19740_v19  ;;  %v19830_v19 = vld [vmem:[#allocation15 + $0x724] ss:$8 sps:$4 sm:$0xff]  }
 0xe8c   : > { %14621 = vmatprep.subr.bf16.mxu1 %v19745_v5  ;;  %v19923_v5 = vld [vmem:[%s23922_s10 + $0x8] sm:$0xff]  }
 0xe8d   : > { %17366 = vmatpush3.bf16.msra.mxu0 %v19923_v5  ;;  %v19905_v5 = vld [vmem:[#allocation15 + $0x8b0] ss:$8 sps:$4 sm:$0xff]  }
 0xe8f   : > { %14622 = vmatpush1.bf16.msra.mxu1 %v19743_v4  ;;  %v19924_v4 = vld [vmem:[%s23922_s10 + $0x50] sm:$0xff]  }
 0xe90   : > { %14623 = vmatprep.subr.bf16.mxu1 %v19748_v1  ;;  %v19828_v1 = vld [vmem:[#allocation15 + $0x720] ss:$8 sps:$4 sm:$0xff]   ;;  %17367 = vmatprep.subr.bf16.mxu0 %v19924_v4  ;;  %v19910_v4 = vld [vmem:[#allocation15 + $0x8c4] ss:$8 sps:$4 sm:$0xff]  }
 0xe93   : > { %14624 = vmatpush1.bf16.msra.mxu1 %v19746_v3  ;;  %v19833_v3 = vld [vmem:[#allocation15 + $0x734] ss:$8 sps:$4 sm:$0xff]  }
 0xe94   : > { %14625 = vmatprep.subr.bf16.mxu1 %v19751_v7  ;;  %v19925_v7 = vld [vmem:[%s23922_s10 + $0x10] sm:$0xff]  }
 0xe95   : > { %17368 = vmatpush3.bf16.msra.mxu0 %v19925_v7  ;;  %v19911_v7 = vld [vmem:[#allocation15 + $0x8d0] ss:$8 sps:$4 sm:$0xff]  }
 0xe97   : > { %14626 = vmatpush1.bf16.msra.mxu1 %v19749_v55  ;;  %v19926_v55 = vld [vmem:[%s23922_s10 + $0x58] sm:$0xff]  }
 0xe98   : > { %14627 = vmatprep.subr.bf16.mxu1 %v19754_v60  ;;  %v19831_v60 = vld [vmem:[#allocation15 + $0x730] ss:$8 sps:$4 sm:$0xff]   ;;  %17369 = vmatprep.subr.bf16.mxu0 %v19926_v55  ;;  %v19916_v55 = vld [vmem:[#allocation15 + $0x8e4] ss:$8 sps:$4 sm:$0xff]  }
 0xe9b   : > { %14628 = vmatpush1.bf16.msra.mxu1 %v19752_v26  ;;  %v19836_v26 = vld [vmem:[#allocation15 + $0x744] ss:$8 sps:$4 sm:$0xff]  }
 0xe9c   : > { %14629 = vmatprep.subr.bf16.mxu1 %v19757_v46  ;;  %v19927_v46 = vld [vmem:[%s23922_s10 + $0x18] sm:$0xff]  }
 0xe9d   : > { %17370 = vmatpush3.bf16.msra.mxu0 %v19927_v46  ;;  %v19917_v46 = vld [vmem:[#allocation15 + $0x8f0] ss:$8 sps:$4 sm:$0xff]  }
 0xe9f   : > { %14630 = vmatpush1.bf16.msra.mxu1 %v19755_v25  ;;  %v19928_v25 = vld [vmem:[%s23922_s10 + $0x60] sm:$0xff]  }
 0xea0   : > { %14631 = vmatprep.subr.bf16.mxu1 %v19760_v49  ;;  %v19834_v49 = vld [vmem:[#allocation15 + $0x740] ss:$8 sps:$4 sm:$0xff]   ;;  %17371 = vmatprep.subr.bf16.mxu0 %v19928_v25 }
 0xea3   : > { %14632 = vmatpush1.bf16.msra.mxu1 %v19758_v15  ;;  %v19839_v15 = vld [vmem:[#allocation15 + $0x754] ss:$8 sps:$4 sm:$0xff]  }
 0xea4   : > { %14633 = vmatprep.subr.bf16.mxu1 %v19763_v54  ;;  %v19929_v54 = vld [vmem:[%s23922_s10 + $0x20] sm:$0xff]  }
 0xea5   : > { %17372 = vmatpush3.bf16.msra.mxu0 %v19929_v54 }
 0xea7   : > { %14634 = vmatpush1.bf16.msra.mxu1 %v19761_v24  ;;  %v19930_v24 = vld [vmem:[%s23922_s10 + $0x68] sm:$0xff]  }
 0xea8   : > { %14635 = vmatprep.subr.bf16.mxu1 %v19766_v10  ;;  %v19837_v10 = vld [vmem:[#allocation15 + $0x750] ss:$8 sps:$4 sm:$0xff]   ;;  %17373 = vmatprep.subr.bf16.mxu0 %v19930_v24 }
 0xeab   : > { %14636 = vmatpush1.bf16.msra.mxu1 %v19764_v14  ;;  %v19842_v14 = vld [vmem:[#allocation15 + $0x764] ss:$8 sps:$4 sm:$0xff]  }
 0xeac   : > { %14637 = vmatprep.subr.bf16.mxu1 %v19769_v28  ;;  %v19931_v28 = vld [vmem:[%s23922_s10 + $0x28] sm:$0xff]  }
 0xead   : > { %17374 = vmatpush3.bf16.msra.mxu0 %v19931_v28 }
 0xeaf   : > { %14638 = vmatpush1.bf16.msra.mxu1 %v19767_v44  ;;  %v19932_v44 = vld [vmem:[%s23922_s10 + $0x70] sm:$0xff]  }
 0xeb0   : > { %14648 = vmatprep.subr.bf16.mxu1 %v19772_v16  ;;  %v19840_v16 = vld [vmem:[#allocation15 + $0x760] ss:$8 sps:$4 sm:$0xff]   ;;  %17375 = vmatprep.subr.bf16.mxu0 %v19932_v44 }
 0xeb2   : > { %14640 = vmatmul.mubr.bf16.vlgmr.msra.gmra.mrb[92].mxu1 %v16535_v43  ;;  %v19843_v43 = vld [vmem:[#allocation15 + $0x770] ss:$8 sps:$4 sm:$0xff]  }
 0xeb3   : > { %14649 = vmatpush1.bf16.msra.mxu1 %v19770_v62  ;;  %14680 = vmatprep.mubr.bf16.mxu1 %v16538_v22  ;;  %v19933_v62 = vld [vmem:[%s23922_s10 + $0x30] sm:$0xff]  }
 0xeb4   : > { %14650 = vmatprep.subr.bf16.mxu1 %v19777_v33  ;;  %v19848_v33 = vld [vmem:[#allocation15 + $0x784] ss:$8 sps:$4 sm:$0xff]   ;;  %17376 = vmatpush3.bf16.msra.mxu0 %v19933_v62  ;;  %v19846_v22 = vld [vmem:[#allocation15 + $0x780] ss:$8 sps:$4 sm:$0xff]  }
 0xeb7   : > { %14651 = vmatpush1.bf16.msra.mxu1 %v19775_v53  ;;  %v19851_v53 = vld [vmem:[#allocation15 + $0x794] ss:$8 sps:$4 sm:$0xff]  }
 0xeb8   : > { %14652 = vmatprep.subr.bf16.mxu1 %v19780_v32  ;;  %v19849_v32 = vld [vmem:[#allocation15 + $0x790] ss:$8 sps:$4 sm:$0xff]  }
 0xebb   : > { %14653 = vmatpush1.bf16.msra.mxu1 %v19778_v20  ;;  %v19854_v20 = vld [vmem:[#allocation15 + $0x7a4] ss:$8 sps:$4 sm:$0xff]  }
 0xebc   : > { %14654 = vmatprep.subr.bf16.mxu1 %v19783_v9  ;;  %v19852_v9 = vld [vmem:[#allocation15 + $0x7a0] ss:$8 sps:$4 sm:$0xff]  }
 0xebf   : > { %14655 = vmatpush1.bf16.msra.mxu1 %v19781_v35  ;;  %v19857_v35 = vld [vmem:[#allocation15 + $0x7b4] ss:$8 sps:$4 sm:$0xff]  }
 0xec0   : > { %14656 = vmatprep.subr.bf16.mxu1 %v19786_v58  ;;  %v19855_v58 = vld [vmem:[#allocation15 + $0x7b0] ss:$8 sps:$4 sm:$0xff]  }
 0xec3   : > { %14657 = vmatpush1.bf16.msra.mxu1 %v19784_v18  ;;  %v19860_v18 = vld [vmem:[#allocation15 + $0x7c4] ss:$8 sps:$4 sm:$0xff]  }
 0xec4   : > { %14658 = vmatprep.subr.bf16.mxu1 %v19789_v8  ;;  %v19858_v8 = vld [vmem:[#allocation15 + $0x7c0] ss:$8 sps:$4 sm:$0xff]  }
 0xec7   : > { %14659 = vmatpush1.bf16.msra.mxu1 %v19787_v36  ;;  %v19863_v36 = vld [vmem:[#allocation15 + $0x7d4] ss:$8 sps:$4 sm:$0xff]  }
 0xec8   : > { %14660 = vmatprep.subr.bf16.mxu1 %v19792_v40  ;;  %v19861_v40 = vld [vmem:[#allocation15 + $0x7d0] ss:$8 sps:$4 sm:$0xff]  }
 0xecb   : > { %14661 = vmatpush1.bf16.msra.mxu1 %v19790_v61  ;;  %v19866_v61 = vld [vmem:[#allocation15 + $0x7e4] ss:$8 sps:$4 sm:$0xff]  }
 0xecc   : > { %14662 = vmatprep.subr.bf16.mxu1 %v19795_v52  ;;  %v19864_v52 = vld [vmem:[#allocation15 + $0x7e0] ss:$8 sps:$4 sm:$0xff]  }
 0xecf   : > { %14663 = vmatpush1.bf16.msra.mxu1 %v19793_v38  ;;  %v19869_v38 = vld [vmem:[#allocation15 + $0x7f4] ss:$8 sps:$4 sm:$0xff]  }
 0xed0   : > { %14664 = vmatprep.subr.bf16.mxu1 %v19798_v56  ;;  %v19867_v56 = vld [vmem:[#allocation15 + $0x7f0] ss:$8 sps:$4 sm:$0xff]  }
 0xed3   : > { %14665 = vmatpush1.bf16.msra.mxu1 %v19796_v2  ;;  %v19872_v2 = vld [vmem:[#allocation15 + $0x804] ss:$8 sps:$4 sm:$0xff]  }
 0xed4   : > { %14666 = vmatprep.subr.bf16.mxu1 %v19801_v41  ;;  %v23851_v41 = vld [vmem:[#allocation8 + $0x40] sm:$0xff] }
 0xed5   : > { %v16541_v25 = vcombine.low %v23851_v41, %v23851_v41 }
 0xed7   : > { %14667 = vmatpush1.bf16.msra.mxu1 %v19799_v63  ;;  %v19870_v63 = vld [vmem:[#allocation15 + $0x800] ss:$8 sps:$4 sm:$0xff]  }
 0xed8   : > { %14668 = vmatprep.subr.bf16.mxu1 %v19804_v42  ;;  %v16539_v42 = vcombine.low %v23803_v12, %v23803_v12  ;;  %v19890_v12 = vld [vmem:[#allocation15 + $0x860] ss:$8 sps:$4 sm:$0xff]  }
 0xedb   : > { %14669 = vmatpush1.bf16.msra.mxu1 %v19802_v59  ;;  %v19877_v59 = vld [vmem:[#allocation15 + $0x814] ss:$8 sps:$4 sm:$0xff]  }
 0xedc   : > { %14670 = vmatprep.subr.bf16.mxu1 %v19807_v27  ;;  %v16542_v27 = vcombine.high %v23851_v41, %v23851_v41 }
 0xedf   : > { %14671 = vmatpush1.bf16.msra.mxu1 %v19805_v29  ;;  %v19875_v29 = vld [vmem:[#allocation15 + $0x810] ss:$8 sps:$4 sm:$0xff]  }
 0xee0   : > { %14672 = vmatprep.subr.bf16.mxu1 %v19810_v17  ;;  %v19880_v17 = vld [vmem:[#allocation15 + $0x824] ss:$8 sps:$4 sm:$0xff]  }
 0xee3   : > { %14673 = vmatpush1.bf16.msra.mxu1 %v19808_v45  ;;  %v19878_v45 = vld [vmem:[#allocation15 + $0x820] ss:$8 sps:$4 sm:$0xff]  }
 0xee4   : > { %14674 = vmatprep.subr.bf16.mxu1 %v19813_v34  ;;  %v19883_v34 = vld [vmem:[#allocation15 + $0x834] ss:$8 sps:$4 sm:$0xff]  }
 0xee7   : > { %14675 = vmatpush1.bf16.msra.mxu1 %v19811_v47  ;;  %v19881_v47 = vld [vmem:[#allocation15 + $0x830] ss:$8 sps:$4 sm:$0xff]  }
 0xee8   : > { %14676 = vmatprep.subr.bf16.mxu1 %v19816_v57  ;;  %v19886_v57 = vld [vmem:[#allocation15 + $0x844] ss:$8 sps:$4 sm:$0xff]  }
 0xeeb   : > { %14677 = vmatpush1.bf16.msra.mxu1 %v19814_v48  ;;  %v19884_v48 = vld [vmem:[#allocation15 + $0x840] ss:$8 sps:$4 sm:$0xff]  }
 0xeec   : > { %14678 = vmatprep.subr.bf16.mxu1 %v19819_v23  ;;  %v19889_v23 = vld [vmem:[#allocation15 + $0x854] ss:$8 sps:$4 sm:$0xff]  }
 0xeef   : > { %14679 = vmatpush1.bf16.msra.mxu1 %v19817_v6  ;;  %v19887_v6 = vld [vmem:[#allocation15 + $0x850] ss:$8 sps:$4 sm:$0xff]  }
 0xef0   : > { %14689 = vmatprep.subr.bf16.mxu1 %v19822_v11  ;;  %v19892_v11 = vld [vmem:[#allocation15 + $0x864] ss:$8 sps:$4 sm:$0xff]  }
 0xef2   : > { %14681 = vmatmul.mubr.bf16.vlgmr.msra.gmra.mrb[92].mxu1 %v16537_v51  ;;  %v19893_v51 = vld [vmem:[#allocation15 + $0x870] ss:$8 sps:$4 sm:$0xff]  }
 0xef3   : > { %14690 = vmatpush1.bf16.msra.mxu1 %v19820_v0  ;;  %14721 = vmatprep.mubr.bf16.mxu1 %v16540_v21  ;;  %v19895_v0 = vld [vmem:[#allocation15 + $0x874] ss:$8 sps:$4 sm:$0xff]   ;;  %v19896_v21 = vld [vmem:[#allocation15 + $0x880] ss:$8 sps:$4 sm:$0xff]  }
 0xef4   : > { %14691 = vmatprep.subr.bf16.mxu1 %v19827_v39  ;;  %v19898_v39 = vld [vmem:[#allocation15 + $0x884] ss:$8 sps:$4 sm:$0xff]  }
 0xef7   : > { %14692 = vmatpush1.bf16.msra.mxu1 %v19825_v30  ;;  %v19902_v30 = vld [vmem:[#allocation15 + $0x8a0] ss:$8 sps:$4 sm:$0xff]  }
 0xef8   : > { %14693 = vmatprep.subr.bf16.mxu1 %v19830_v19  ;;  %v19907_v19 = vld [vmem:[#allocation15 + $0x8b4] ss:$8 sps:$4 sm:$0xff]  }
 0xefb   : > { %14694 = vmatpush1.bf16.msra.mxu1 %v19828_v1  ;;  %v19908_v1 = vld [vmem:[#allocation15 + $0x8c0] ss:$8 sps:$4 sm:$0xff]  }
 0xefc   : > { %14695 = vmatprep.subr.bf16.mxu1 %v19833_v3  ;;  %v19913_v3 = vld [vmem:[#allocation15 + $0x8d4] ss:$8 sps:$4 sm:$0xff]  }
 0xeff   : > { %14696 = vmatpush1.bf16.msra.mxu1 %v19831_v60  ;;  %v19914_v60 = vld [vmem:[#allocation15 + $0x8e0] ss:$8 sps:$4 sm:$0xff]  }
 0xf00   : > { %14697 = vmatprep.subr.bf16.mxu1 %v19836_v26  ;;  %v19919_v26 = vld [vmem:[#allocation15 + $0x8f4] ss:$8 sps:$4 sm:$0xff]  }
 0xf03   : > { %14698 = vmatpush1.bf16.msra.mxu1 %v19834_v49  ;;  %v19934_v49 = vld [vmem:[%s23922_s10 + $0x78] sm:$0xff]  }
 0xf04   : > { %14699 = vmatprep.subr.bf16.mxu1 %v19839_v15  ;;  %v19935_v15 = vld [vmem:[%s23922_s10 + $0x38] sm:$0xff]   ;;  %17377 = vmatprep.subr.bf16.mxu0 %v19934_v49 }
 0xf05   : > { %17378 = vmatpush3.bf16.msra.mxu0 %v19935_v15 }
 0xf07   : > { %14700 = vmatpush1.bf16.msra.mxu1 %v19837_v10 }
 0xf08   : > { %14701 = vmatprep.subr.bf16.mxu1 %v19842_v14 }
 0xf0b   : > { %14702 = vmatpush1.bf16.msra.mxu1 %v19840_v16 }
 0xf0c   : > { %14703 = vmatprep.subr.bf16.mxu1 %v19845_v50 }
 0xf0f   : > { %14704 = vmatpush1.bf16.msra.mxu1 %v19843_v43 }
 0xf10   : > { %14705 = vmatprep.subr.bf16.mxu1 %v19848_v33 }
 0xf13   : > { %14706 = vmatpush1.bf16.msra.mxu1 %v19846_v22 }
 0xf14   : > { %14707 = vmatprep.subr.bf16.mxu1 %v19851_v53 }
 0xf17   : > { %14708 = vmatpush1.bf16.msra.mxu1 %v19849_v32 }
 0xf18   : > { %14709 = vmatprep.subr.bf16.mxu1 %v19854_v20 }
 0xf1b   : > { %14710 = vmatpush1.bf16.msra.mxu1 %v19852_v9 }
 0xf1c   : > { %14711 = vmatprep.subr.bf16.mxu1 %v19857_v35 }
 0xf1f   : > { %14712 = vmatpush1.bf16.msra.mxu1 %v19855_v58 }
 0xf20   : > { %14713 = vmatprep.subr.bf16.mxu1 %v19860_v18 }
 0xf23   : > { %14714 = vmatpush1.bf16.msra.mxu1 %v19858_v8 }
 0xf24   : > { %14715 = vmatprep.subr.bf16.mxu1 %v19863_v36 }
 0xf27   : > { %14716 = vmatpush1.bf16.msra.mxu1 %v19861_v40 }
 0xf28   : > { %14717 = vmatprep.subr.bf16.mxu1 %v19866_v61 }
 0xf2b   : > { %14718 = vmatpush1.bf16.msra.mxu1 %v19864_v52 }
 0xf2c   : > { %14719 = vmatprep.subr.bf16.mxu1 %v19869_v38 }
 0xf2f   : > { %14720 = vmatpush1.bf16.msra.mxu1 %v19867_v56 }
 0xf30   : > { %14730 = vmatprep.subr.bf16.mxu1 %v19872_v2 }
 0xf32   : > { %14722 = vmatmul.mubr.bf16.vlgmr.msra.gmra.mrb[92].mxu1 %v16539_v42 }
 0xf33   : > { %14731 = vmatpush1.bf16.msra.mxu1 %v19870_v63  ;;  %14762 = vmatprep.mubr.bf16.mxu1 %v16542_v27 }
 0xf34   : > { %14732 = vmatprep.subr.bf16.mxu1 %v19877_v59 }
 0xf37   : > { %14733 = vmatpush1.bf16.msra.mxu1 %v19875_v29 }
 0xf38   : > { %14734 = vmatprep.subr.bf16.mxu1 %v19880_v17 }
 0xf3b   : > { %14735 = vmatpush1.bf16.msra.mxu1 %v19878_v45 }
 0xf3c   : > { %14736 = vmatprep.subr.bf16.mxu1 %v19883_v34 }
 0xf3f   : > { %14737 = vmatpush1.bf16.msra.mxu1 %v19881_v47 }
 0xf40   : > { %14738 = vmatprep.subr.bf16.mxu1 %v19886_v57 }
 0xf43   : > { %14739 = vmatpush1.bf16.msra.mxu1 %v19884_v48 }
 0xf44   : > { %14740 = vmatprep.subr.bf16.mxu1 %v19889_v23 }
 0xf47   : > { %14741 = vmatpush1.bf16.msra.mxu1 %v19887_v6 }
 0xf48   : > { %14742 = vmatprep.subr.bf16.mxu1 %v19892_v11 }
 0xf4b   : > { %14743 = vmatpush1.bf16.msra.mxu1 %v19890_v12 }
 0xf4c   : > { %14744 = vmatprep.subr.bf16.mxu1 %v19895_v0 }
 0xf4f   : > { %14745 = vmatpush1.bf16.msra.mxu1 %v19893_v51 }
 0xf50   : > { %14746 = vmatprep.subr.bf16.mxu1 %v19898_v39 }
 0xf53   : > { %14747 = vmatpush1.bf16.msra.mxu1 %v19896_v21 }
 0xf54   : > { %14748 = vmatprep.subr.bf16.mxu1 %v19901_v13 }
 0xf57   : > { %14749 = vmatpush1.bf16.msra.mxu1 %v19899_v37 }
 0xf58   : > { %14750 = vmatprep.subr.bf16.mxu1 %v19904_v31 }
 0xf5b   : > { %14751 = vmatpush1.bf16.msra.mxu1 %v19902_v30 }
 0xf5c   : > { %14752 = vmatprep.subr.bf16.mxu1 %v19907_v19 }
 0xf5f   : > { %14753 = vmatpush1.bf16.msra.mxu1 %v19905_v5 }
 0xf60   : > { %14754 = vmatprep.subr.bf16.mxu1 %v19910_v4 }
 0xf63   : > { %14755 = vmatpush1.bf16.msra.mxu1 %v19908_v1 }
 0xf64   : > { %14756 = vmatprep.subr.bf16.mxu1 %v19913_v3 }
 0xf67   : > { %14757 = vmatpush1.bf16.msra.mxu1 %v19911_v7 }
 0xf68   : > { %14758 = vmatprep.subr.bf16.mxu1 %v19916_v55 }
 0xf6b   : > { %14759 = vmatpush1.bf16.msra.mxu1 %v19914_v60 }
 0xf6c   : > { %14760 = vmatprep.subr.bf16.mxu1 %v19919_v26 }
 0xf6f   : > { %14761 = vmatpush1.bf16.msra.mxu1 %v19917_v46 }
 0xf72   : > { %14763 = vmatmul.mubr.bf16.vlgmr.msra.gmra.mrb[92].mxu1 %v16541_v25 }
0x1045   : > { %v14764_v54 = vpop.f32.mrb[92].mxu1 }
0x1046   : > { %v14766_v24 = vpop.f32.mrb[93].mxu1  ;;  %v14771_v28 = vpack.c.bf16 %v14764_v54, %v14764_v54 }
0x1047   : > { %v14772_v10 = vpack.c.bf16 %v14766_v24, %v14766_v24  ;;  %v14768_v14 = vpop.f32.mrb[94].mxu1 }
0x1048   : > { %v14769_v44 = vpop.f32.mrb[95].mxu1 }
0x1049   : > { %14933 = vmatprep.mubr.bf16.mxu0 %v14772_v10 }
0x104a   : > { %14934 = vmatmul.mubr.bf16.vlgmr.msra.gmra.mrb[188].mxu0 %v14771_v28 }
0x111d   : > { %v17379_v16 = vpop.f32.mrb[188].mxu0 }
0x111e   : > { %v17380_v50 = vpop.f32.mrb[189].mxu0 }
0x111f   : > { %v17381_v62 = vadd.f32 %v17380_v50, %v17379_v16  ;;  %v17382_v43 = vpop.f32.mrb[190].mxu0 }
0x1120   : > { %v17383_v33 = vpop.f32.mrb[191].mxu0 }
0x1121   : > { %14942 = vst.msk [vmem:[%s463_s23] sm:$0x1] %vm14941_vm13, %v17381_v62 }
0x1122   : > { %20092 = shalt.err (!%p20089_p10)
}
0x1123   : > { %s20093_s30 = scalar_lea.hbm %s23870_s24, 16  ;;  %s20097_s19 = scalar_lea.hbm %s24106_s15, 32 }
0x1124   : > { %p20094_p0 = scmp.ne.s32.totalorder %s23870_s24, %s20093_s30  ;;  %p20098_p4 = scmp.lt.u32.totalorder %s23870_s24, %s24106_s15 }
0x1125   : > { %p20099_p12 = scmp.lt.u32.totalorder %s20097_s19, %s20093_s30  ;;  %p20101_p8 = scmp.lt.u32.totalorder %s20093_s30, %s23870_s24 }
0x1126   : > { %p20095_p2 = pnand %p20094_p0, %p24107_p11 }
0x1127   : > { %p20100_p7 = por %p20099_p12, %p20098_p4 }
0x1128   : > { %p20096_p3 = pneg %p20095_p2 }
0x1129   : > { %p20102_p13 = por %p20101_p8, %p20100_p7 }
0x112b   : > { %p20103_p1 = pnand %p20102_p13, %p20096_p3 }
0x112d   : > { %20106 = shalt.err (!%p20103_p1)
}
0x112e   : > { %18072 = dma.vmem_to_hbm [thread:$0]  (%p24107_p11), %s23872_s11, 16, %s23870_s24, %s14944_s21  }
0x112f PF: > { %s24108_s26 = sld [smem:[#allocation24_spill]]  ;;  %s24109_s23 = sld [smem:[#allocation22_spill]] }
0x1130   : > { %s24110_s29 = sld [smem:[#allocation27_spill]] }
0x1135   : > { %p18099_p6 = scmp.ge.s32.totalorder %s24108_s26, 2  ;;  %s14968_s13 = sand.u32 1, %s24109_s23  }
0x1136   : > { %p24111_p9 = scmp.ne.s32.totalorder %s24110_s29, 0  ;;  %s14969_s17 = scalar_lea.sflag [#allocation11], %s14968_s13 }
0x1138   : > { %p18088_p5 = pnand %p18099_p6, %p24111_p9 }
0x113a   : > { %20136 = dma.done.wait (!%p18088_p5), %s14969_s17, 16  }
0x113b   : > { %20138 = vsyncadd (!%p18088_p5), %s14969_s17, 4294967280  ;;  %s24112_s20 = sld [smem:[#allocation25_spill]]  ;;  %s24113_s28 = sld [smem:[#allocation23_spill]] }
0x113c   : > { %s24114_s19 = sld [smem:[#allocation26_spill]]  ;;  %s24115_s17 = smov %s20145_s18 }
0x1141   : > { %p24_p10 = scmp.ge.s32.totalorder %s24112_s20, 4   ;;  %s24116_s18 = smov %s24113_s28 }
0x1143   :  { %26 = sbr.rel (!%p24_p10) target bundleno = 8 (0x8), region = 132 }
0x114a   :  { %14973 = vsyncpa [#allocation10], 1 }
0x114b   :  { %14975 = vsyncpa [#allocation10 + $0x1], 1 }
0x114c   :  { %14976 = vsyncpa [#allocation13], 1 }
0x114d   :  { %14977 = vsyncpa [#allocation16], 1 }
0x114e   :  { %14978 = vsyncpa [#allocation11], 1 }
0x114f   :  { %14980 = vsyncpa [#allocation11 + $0x1], 1 }

</bundles_post_ra>
